<compile_context>
chip_gen: v7x
topology: tpu7x:2x2x1
jax: 0.10.0
libtpu: 0.0.40
codegen_flags: <defaults>
</compile_context>

<pallas_src>
import jax
import jax.numpy as jnp
from jax.experimental import pallas as pl
from jax.experimental.pallas import tpu as pltpu


HIDDEN_DIMS = (2048, 1024, 512, 256)          # fc1..fc4 output widths
_OFFSETS = (0, 2048, 3072, 3584)              # column offsets into packed (1,3840) aux
_TOTAL_HIDDEN = 3840
BN_EPS = 1e-5


# ----------------------------- fused Pallas kernel -----------------------------

def fused_mlp_kernel(x_ref,
                     w1_hbm, w2_hbm, w3_hbm, w4_hbm,      # int8 weights, HBM (pl.ANY)
                     w5_ref, scales_ref, shifts_ref, b5_ref,
                     o_ref,
                     w1_v, w2_v, w3_v, w4_v, dma_sems):
    """Entire CNNModel forward (eval mode) in one kernel body.

      h_i = leaky_relu( (h_{i-1} @ Wq_i) * qscale_i + shift_i , slope=0.01 )  i=1..4
      out = sigmoid( sum(h_4 * w5_row, axis=-1) + b5 )

    Wq_i is int8 with eval-mode BatchNorm scale folded in before quantization;
    qscale_i is the per-output-column dequant scale; shift_i folds the linear
    bias, BN running mean/var, gamma and beta. Dropout is identity at
    inference. All 4 weight DMAs are issued up front so layer-i compute
    overlaps layer-(i+1..4) streaming.
    """
    w_hbm = (w1_hbm, w2_hbm, w3_hbm, w4_hbm)
    w_vmem = (w1_v, w2_v, w3_v, w4_v)

    # Issue all weight DMAs immediately; compute is hidden under them.
    copies = []
    for i in range(4):
        cp = pltpu.make_async_copy(w_hbm[i], w_vmem[i], dma_sems.at[i])
        cp.start()
        copies.append(cp)

    h = x_ref[...]                                        # (B, in_dim) f32
    for i in range(4):
        copies[i].wait()
        w_bf16 = w_vmem[i][...].astype(jnp.bfloat16)      # int8 -> bf16 widen (exact)
        y = jnp.dot(h.astype(jnp.bfloat16), w_bf16,
                    preferred_element_type=jnp.float32)   # MXU, f32 accumulation
        lo, width = _OFFSETS[i], HIDDEN_DIMS[i]
        sc = scales_ref[:, lo:lo + width]                 # (1, width) dequant scale
        sh = shifts_ref[:, lo:lo + width]                 # (1, width) BN+bias shift
        y = y * sc + sh
        h = jnp.where(y > 0, y, 0.01 * y)                 # LeakyReLU(0.01)

    # fc5 (256 -> 1): VPU multiply + lane reduction (avoid N=1 MXU matmul).
    y5 = jnp.sum(h * w5_ref[...], axis=-1, keepdims=True) + b5_ref[...]
    o_ref[...] = jax.nn.sigmoid(y5).astype(o_ref.dtype)


# ----------------------------- wrapper -----------------------------

@jax.jit
def cnn_model_forward(flat_params, x):
    """Single fused pallas_call for the whole network (manual weight pipelining)."""
    (w1q, w2q, w3q, w4q, w5row, scales, shifts, b5) = flat_params
    B = x.shape[0]
    out_dim = b5.shape[1]

    def vmem_full(a):  # whole-array VMEM block
        return pl.BlockSpec(a.shape, lambda i, _a=a: (0,) * len(_a.shape))

    hbm = pl.BlockSpec(memory_space=pl.ANY)   # raw HBM ref, DMA'd manually

    return pl.pallas_call(
        fused_mlp_kernel,
        out_shape=jax.ShapeDtypeStruct((B, out_dim), jnp.float32),
        grid=(1,),
        in_specs=[vmem_full(x),
                  hbm, hbm, hbm, hbm,
                  vmem_full(w5row), vmem_full(scales), vmem_full(shifts),
                  vmem_full(b5)],
        out_specs=pl.BlockSpec((B, out_dim), lambda i: (0, 0)),
        scratch_shapes=[
            pltpu.VMEM(w1q.shape, jnp.int8),
            pltpu.VMEM(w2q.shape, jnp.int8),
            pltpu.VMEM(w3q.shape, jnp.int8),
            pltpu.VMEM(w4q.shape, jnp.int8),
            pltpu.SemaphoreType.DMA((4,)),
        ],
        compiler_params=pltpu.CompilerParams(
            dimension_semantics=("arbitrary",),
            vmem_limit_bytes=24 << 20,   # peak need ~8 MiB; fits every generation
        ),
    )(x, w1q, w2q, w3q, w4q, w5row, scales, shifts, b5)


# ----------------------------- parameter setup -----------------------------

def init_params(key, input_dim, output_dim=1):
    """Deterministic synthetic parameters matching CNNModel.__init__ shapes."""
    dims = [input_dim, *HIDDEN_DIMS, output_dim]
    params = []
    for li in range(5):
        fan_in, fan_out = dims[li], dims[li + 1]
        key, kw, kb = jax.random.split(key, 3)
        bound = 1.0 / jnp.sqrt(jnp.float32(fan_in))
        # weight stored as [in, out] (transposed vs torch's [out, in])
        w = jax.random.uniform(kw, (fan_in, fan_out), jnp.float32, -bound, bound)
        b = jax.random.uniform(kb, (fan_out,), jnp.float32, -bound, bound)
        layer = {"w": w, "b": b}
        if li < 4:  # bn1..bn4 (eval-mode: gamma, beta, running_mean, running_var)
            key, kg, kbt, km, kv = jax.random.split(key, 5)
            layer["gamma"] = 1.0 + 0.1 * jax.random.normal(kg, (fan_out,), jnp.float32)
            layer["beta"] = 0.1 * jax.random.normal(kbt, (fan_out,), jnp.float32)
            layer["mean"] = 0.1 * jax.random.normal(km, (fan_out,), jnp.float32)
            layer["var"] = jnp.abs(jax.random.normal(kv, (fan_out,), jnp.float32)) + 0.5
        params.append(layer)
    return params


def prepare_inference_params(params, eps=BN_EPS):
    """Fold eval-mode BN + bias, then int8-quantize weights per output column.

      y = ((x@W + b) - mean) * gamma/sqrt(var+eps) + beta
        = (x @ Wq) * qscale + shift
      where W' = W * bn_scale, qscale_j = max|W'[:,j]| / 127, Wq = round(W'/qscale),
            shift = beta + (b - mean) * bn_scale,  bn_scale = gamma/sqrt(var+eps).
    """
    qweights, scale_parts, shift_parts = [], [], []
    for li in range(4):
        p = params[li]
        inv_std = 1.0 / jnp.sqrt(p["var"] + eps)
        bn_scale = p["gamma"] * inv_std                               # [N]
        w_folded = p["w"] * bn_scale[None, :]                         # [K, N] f32
        shift = p["beta"] + (p["b"] - p["mean"]) * bn_scale           # [N]
        col_max = jnp.maximum(jnp.max(jnp.abs(w_folded), axis=0), 1e-8)
        q_scale = col_max / 127.0                                     # [N] dequant scale
        w_q = jnp.clip(jnp.round(w_folded / q_scale[None, :]),
                       -127, 127).astype(jnp.int8)                    # [K, N] int8
        qweights.append(w_q)
        scale_parts.append(q_scale.astype(jnp.float32))
        shift_parts.append(shift.astype(jnp.float32))

    scales = jnp.concatenate(scale_parts)[None, :]                    # (1, 3840)
    shifts = jnp.concatenate(shift_parts)[None, :]                    # (1, 3840)

    p5 = params[4]
    assert p5["w"].shape[1] == 1, "VPU lane-reduce output layer assumes output_dim == 1"
    w5row = p5["w"].T.astype(jnp.float32)                             # (1, 256) f32
    b5 = p5["b"][None, :].astype(jnp.float32)                         # (1, 1)  f32
    return (qweights[0], qweights[1], qweights[2], qweights[3],
            w5row, scales, shifts, b5)


# ----------------------------- reference -----------------------------

def reference_forward(flat_params, x):
    """Plain-JAX reference using the same deployed (BN-folded, int8) weights."""
    (w1q, w2q, w3q, w4q, w5row, scales, shifts, b5) = flat_params
    qw = (w1q, w2q, w3q, w4q)
    h = x
    for i in range(4):
        lo, width = _OFFSETS[i], HIDDEN_DIMS[i]
        h_bf = h.astype(jnp.bfloat16).astype(jnp.float32)   # match kernel's bf16 act
        y = jnp.dot(h_bf, qw[i].astype(jnp.float32),
                    preferred_element_type=jnp.float32)
        y = y * scales[:, lo:lo + width] + shifts[:, lo:lo + width]
        h = jnp.where(y > 0, y, 0.01 * y)
    y5 = jnp.sum(h * w5row, axis=-1, keepdims=True) + b5
    return jax.nn.sigmoid(y5)


# ----------------------------- main -----------------------------

if __name__ == "__main__":
    key = jax.random.PRNGKey(0)
    batch, input_dim, output_dim = 8, 512, 1

    key, kx, kp = jax.random.split(key, 3)
    x = jax.random.normal(kx, (batch, input_dim), jnp.float32)
    params = init_params(kp, input_dim, output_dim)
    flat = prepare_inference_params(params)

    out = cnn_model_forward(flat, x)
    out = jax.block_until_ready(out)

    ref = reference_forward(flat, x)
    assert out.shape == (batch, output_dim), out.shape
    max_err = float(jnp.max(jnp.abs(out - ref)))
    assert jnp.allclose(out, ref, atol=1e-3, rtol=1e-3), max_err

    print("KERNEL_OK")
</pallas_src>

<mosaic_0001>
module attributes {stable_mosaic.version = 11 : i64} {
  func.func @fused_mlp_kernel(%arg0: i32, %arg1: memref<8x512xf32, #tpu.memory_space<vmem>>, %arg2: memref<512x2048xi8, #tpu.memory_space<any>>, %arg3: memref<2048x1024xi8, #tpu.memory_space<any>>, %arg4: memref<1024x512xi8, #tpu.memory_space<any>>, %arg5: memref<512x256xi8, #tpu.memory_space<any>>, %arg6: memref<1x256xf32, #tpu.memory_space<vmem>>, %arg7: memref<1x3840xf32, #tpu.memory_space<vmem>>, %arg8: memref<1x3840xf32, #tpu.memory_space<vmem>>, %arg9: memref<1x1xf32, #tpu.memory_space<vmem>>, %arg10: memref<8x1xf32, #tpu.memory_space<vmem>>, %arg11: memref<512x2048xi8, #tpu.memory_space<vmem>>, %arg12: memref<2048x1024xi8, #tpu.memory_space<vmem>>, %arg13: memref<1024x512xi8, #tpu.memory_space<vmem>>, %arg14: memref<512x256xi8, #tpu.memory_space<vmem>>, %arg15: memref<4x!tpu.dma_semaphore, #tpu.memory_space<semaphore_mem>>) attributes {dimension_semantics = [#tpu.dimension_semantics<arbitrary>], iteration_bounds = array<i64: 1>, scalar_prefetch = 0 : i64, scratch_operands = 5 : i64, tpu.core_type = #tpu.core_type<tc>, window_params = [{pipeline_mode = #tpu.pipeline_mode<synchronous>, transform_indices = @transform_0, window_bounds = array<i64: 8, 512>}, {}, {}, {}, {}, {pipeline_mode = #tpu.pipeline_mode<synchronous>, transform_indices = @transform_5, window_bounds = array<i64: 1, 256>}, {pipeline_mode = #tpu.pipeline_mode<synchronous>, transform_indices = @transform_6, window_bounds = array<i64: 1, 3840>}, {pipeline_mode = #tpu.pipeline_mode<synchronous>, transform_indices = @transform_7, window_bounds = array<i64: 1, 3840>}, {pipeline_mode = #tpu.pipeline_mode<synchronous>, transform_indices = @transform_8, window_bounds = array<i64: 1, 1>}, {pipeline_mode = #tpu.pipeline_mode<synchronous>, transform_indices = @transform_9, window_bounds = array<i64: 8, 1>}]} {
    %c0_i32 = arith.constant 0 : i32
    %0 = tpu.memref_slice %arg15[%c0_i32] : memref<4x!tpu.dma_semaphore, #tpu.memory_space<semaphore_mem>> -> memref<1x!tpu.dma_semaphore, #tpu.memory_space<semaphore_mem>>
    %1 = tpu.memref_squeeze %0 : memref<1x!tpu.dma_semaphore, #tpu.memory_space<semaphore_mem>> -> memref<!tpu.dma_semaphore, #tpu.memory_space<semaphore_mem>>
    tpu.enqueue_dma source(%arg2 : memref<512x2048xi8, #tpu.memory_space<any>>) target(%arg11 : memref<512x2048xi8, #tpu.memory_space<vmem>>) target_semaphore(%1 : memref<!tpu.dma_semaphore, #tpu.memory_space<semaphore_mem>>)
    %c1_i32 = arith.constant 1 : i32
    %2 = tpu.memref_slice %arg15[%c1_i32] : memref<4x!tpu.dma_semaphore, #tpu.memory_space<semaphore_mem>> -> memref<1x!tpu.dma_semaphore, #tpu.memory_space<semaphore_mem>>
    %3 = tpu.memref_squeeze %2 : memref<1x!tpu.dma_semaphore, #tpu.memory_space<semaphore_mem>> -> memref<!tpu.dma_semaphore, #tpu.memory_space<semaphore_mem>>
    tpu.enqueue_dma source(%arg3 : memref<2048x1024xi8, #tpu.memory_space<any>>) target(%arg12 : memref<2048x1024xi8, #tpu.memory_space<vmem>>) target_semaphore(%3 : memref<!tpu.dma_semaphore, #tpu.memory_space<semaphore_mem>>)
    %c2_i32 = arith.constant 2 : i32
    %4 = tpu.memref_slice %arg15[%c2_i32] : memref<4x!tpu.dma_semaphore, #tpu.memory_space<semaphore_mem>> -> memref<1x!tpu.dma_semaphore, #tpu.memory_space<semaphore_mem>>
    %5 = tpu.memref_squeeze %4 : memref<1x!tpu.dma_semaphore, #tpu.memory_space<semaphore_mem>> -> memref<!tpu.dma_semaphore, #tpu.memory_space<semaphore_mem>>
    tpu.enqueue_dma source(%arg4 : memref<1024x512xi8, #tpu.memory_space<any>>) target(%arg13 : memref<1024x512xi8, #tpu.memory_space<vmem>>) target_semaphore(%5 : memref<!tpu.dma_semaphore, #tpu.memory_space<semaphore_mem>>)
    %c3_i32 = arith.constant 3 : i32
    %6 = tpu.memref_slice %arg15[%c3_i32] : memref<4x!tpu.dma_semaphore, #tpu.memory_space<semaphore_mem>> -> memref<1x!tpu.dma_semaphore, #tpu.memory_space<semaphore_mem>>
    %7 = tpu.memref_squeeze %6 : memref<1x!tpu.dma_semaphore, #tpu.memory_space<semaphore_mem>> -> memref<!tpu.dma_semaphore, #tpu.memory_space<semaphore_mem>>
    tpu.enqueue_dma source(%arg5 : memref<512x256xi8, #tpu.memory_space<any>>) target(%arg14 : memref<512x256xi8, #tpu.memory_space<vmem>>) target_semaphore(%7 : memref<!tpu.dma_semaphore, #tpu.memory_space<semaphore_mem>>)
    %c0 = arith.constant 0 : index
    %c0_0 = arith.constant 0 : index
    %8 = vector.load %arg1[%c0, %c0_0] : memref<8x512xf32, #tpu.memory_space<vmem>>, vector<8x512xf32>
    %c0_i32_1 = arith.constant 0 : i32
    %9 = tpu.memref_slice %arg15[%c0_i32_1] : memref<4x!tpu.dma_semaphore, #tpu.memory_space<semaphore_mem>> -> memref<1x!tpu.dma_semaphore, #tpu.memory_space<semaphore_mem>>
    %10 = tpu.memref_squeeze %9 : memref<1x!tpu.dma_semaphore, #tpu.memory_space<semaphore_mem>> -> memref<!tpu.dma_semaphore, #tpu.memory_space<semaphore_mem>>
    tpu.wait_dma2 semaphore(%10 : memref<!tpu.dma_semaphore, #tpu.memory_space<semaphore_mem>>) src(%arg2 : memref<512x2048xi8, #tpu.memory_space<any>>) dst(%arg11 : memref<512x2048xi8, #tpu.memory_space<vmem>>)
    %c0_2 = arith.constant 0 : index
    %c0_3 = arith.constant 0 : index
    %11 = vector.load %arg11[%c0_2, %c0_3] : memref<512x2048xi8, #tpu.memory_space<vmem>>, vector<512x2048xi8>
    %12 = arith.sitofp %11 : vector<512x2048xi8> to vector<512x2048xbf16>
    %13 = arith.truncf %8 : vector<8x512xf32> to vector<8x512xbf16>
    %cst = arith.constant dense<0.000000e+00> : vector<8x2048xf32>
    %14 = tpu.matmul %13, %12, %cst {dimension_numbers = #tpu.dot_dimension_numbers<[1], [0], [0], [1], [0, 0, 1, 1], [], []>} : vector<8x512xbf16>, vector<512x2048xbf16>, vector<8x2048xf32> -> vector<8x2048xf32>
    %c0_4 = arith.constant 0 : index
    %c0_5 = arith.constant 0 : index
    %15 = vector.load %arg7[%c0_4, %c0_5] : memref<1x3840xf32, #tpu.memory_space<vmem>>, vector<1x2048xf32>
    %c0_6 = arith.constant 0 : index
    %c0_7 = arith.constant 0 : index
    %16 = vector.load %arg8[%c0_6, %c0_7] : memref<1x3840xf32, #tpu.memory_space<vmem>>, vector<1x2048xf32>
    %17 = vector.broadcast %15 : vector<1x2048xf32> to vector<8x2048xf32>
    %18 = arith.mulf %14, %17 : vector<8x2048xf32>
    %19 = vector.broadcast %16 : vector<1x2048xf32> to vector<8x2048xf32>
    %20 = arith.addf %18, %19 : vector<8x2048xf32>
    %cst_8 = arith.constant 0.000000e+00 : f32
    %21 = vector.broadcast %cst_8 : f32 to vector<8x2048xf32>
    %22 = arith.cmpf ogt, %20, %21 : vector<8x2048xf32>
    %cst_9 = arith.constant 0.00999999977 : f32
    %23 = vector.broadcast %cst_9 : f32 to vector<8x2048xf32>
    %24 = arith.mulf %23, %20 : vector<8x2048xf32>
    %25 = arith.select %22, %20, %24 : vector<8x2048xi1>, vector<8x2048xf32>
    %c1_i32_10 = arith.constant 1 : i32
    %26 = tpu.memref_slice %arg15[%c1_i32_10] : memref<4x!tpu.dma_semaphore, #tpu.memory_space<semaphore_mem>> -> memref<1x!tpu.dma_semaphore, #tpu.memory_space<semaphore_mem>>
    %27 = tpu.memref_squeeze %26 : memref<1x!tpu.dma_semaphore, #tpu.memory_space<semaphore_mem>> -> memref<!tpu.dma_semaphore, #tpu.memory_space<semaphore_mem>>
    tpu.wait_dma2 semaphore(%27 : memref<!tpu.dma_semaphore, #tpu.memory_space<semaphore_mem>>) src(%arg3 : memref<2048x1024xi8, #tpu.memory_space<any>>) dst(%arg12 : memref<2048x1024xi8, #tpu.memory_space<vmem>>)
    %c0_11 = arith.constant 0 : index
    %c0_12 = arith.constant 0 : index
    %28 = vector.load %arg12[%c0_11, %c0_12] : memref<2048x1024xi8, #tpu.memory_space<vmem>>, vector<2048x1024xi8>
    %29 = arith.sitofp %28 : vector<2048x1024xi8> to vector<2048x1024xbf16>
    %30 = arith.truncf %25 : vector<8x2048xf32> to vector<8x2048xbf16>
    %cst_13 = arith.constant dense<0.000000e+00> : vector<8x1024xf32>
    %31 = tpu.matmul %30, %29, %cst_13 {dimension_numbers = #tpu.dot_dimension_numbers<[1], [0], [0], [1], [0, 0, 1, 1], [], []>} : vector<8x2048xbf16>, vector<2048x1024xbf16>, vector<8x1024xf32> -> vector<8x1024xf32>
    %c0_14 = arith.constant 0 : index
    %c2048 = arith.constant 2048 : index
    %32 = vector.load %arg7[%c0_14, %c2048] : memref<1x3840xf32, #tpu.memory_space<vmem>>, vector<1x1024xf32>
    %c0_15 = arith.constant 0 : index
    %c2048_16 = arith.constant 2048 : index
    %33 = vector.load %arg8[%c0_15, %c2048_16] : memref<1x3840xf32, #tpu.memory_space<vmem>>, vector<1x1024xf32>
    %34 = vector.broadcast %32 : vector<1x1024xf32> to vector<8x1024xf32>
    %35 = arith.mulf %31, %34 : vector<8x1024xf32>
    %36 = vector.broadcast %33 : vector<1x1024xf32> to vector<8x1024xf32>
    %37 = arith.addf %35, %36 : vector<8x1024xf32>
    %cst_17 = arith.constant 0.000000e+00 : f32
    %38 = vector.broadcast %cst_17 : f32 to vector<8x1024xf32>
    %39 = arith.cmpf ogt, %37, %38 : vector<8x1024xf32>
    %cst_18 = arith.constant 0.00999999977 : f32
    %40 = vector.broadcast %cst_18 : f32 to vector<8x1024xf32>
    %41 = arith.mulf %40, %37 : vector<8x1024xf32>
    %42 = arith.select %39, %37, %41 : vector<8x1024xi1>, vector<8x1024xf32>
    %c2_i32_19 = arith.constant 2 : i32
    %43 = tpu.memref_slice %arg15[%c2_i32_19] : memref<4x!tpu.dma_semaphore, #tpu.memory_space<semaphore_mem>> -> memref<1x!tpu.dma_semaphore, #tpu.memory_space<semaphore_mem>>
    %44 = tpu.memref_squeeze %43 : memref<1x!tpu.dma_semaphore, #tpu.memory_space<semaphore_mem>> -> memref<!tpu.dma_semaphore, #tpu.memory_space<semaphore_mem>>
    tpu.wait_dma2 semaphore(%44 : memref<!tpu.dma_semaphore, #tpu.memory_space<semaphore_mem>>) src(%arg4 : memref<1024x512xi8, #tpu.memory_space<any>>) dst(%arg13 : memref<1024x512xi8, #tpu.memory_space<vmem>>)
    %c0_20 = arith.constant 0 : index
    %c0_21 = arith.constant 0 : index
    %45 = vector.load %arg13[%c0_20, %c0_21] : memref<1024x512xi8, #tpu.memory_space<vmem>>, vector<1024x512xi8>
    %46 = arith.sitofp %45 : vector<1024x512xi8> to vector<1024x512xbf16>
    %47 = arith.truncf %42 : vector<8x1024xf32> to vector<8x1024xbf16>
    %cst_22 = arith.constant dense<0.000000e+00> : vector<8x512xf32>
    %48 = tpu.matmul %47, %46, %cst_22 {dimension_numbers = #tpu.dot_dimension_numbers<[1], [0], [0], [1], [0, 0, 1, 1], [], []>} : vector<8x1024xbf16>, vector<1024x512xbf16>, vector<8x512xf32> -> vector<8x512xf32>
    %c0_23 = arith.constant 0 : index
    %c3072 = arith.constant 3072 : index
    %49 = vector.load %arg7[%c0_23, %c3072] : memref<1x3840xf32, #tpu.memory_space<vmem>>, vector<1x512xf32>
    %c0_24 = arith.constant 0 : index
    %c3072_25 = arith.constant 3072 : index
    %50 = vector.load %arg8[%c0_24, %c3072_25] : memref<1x3840xf32, #tpu.memory_space<vmem>>, vector<1x512xf32>
    %51 = vector.broadcast %49 : vector<1x512xf32> to vector<8x512xf32>
    %52 = arith.mulf %48, %51 : vector<8x512xf32>
    %53 = vector.broadcast %50 : vector<1x512xf32> to vector<8x512xf32>
    %54 = arith.addf %52, %53 : vector<8x512xf32>
    %cst_26 = arith.constant 0.000000e+00 : f32
    %55 = vector.broadcast %cst_26 : f32 to vector<8x512xf32>
    %56 = arith.cmpf ogt, %54, %55 : vector<8x512xf32>
    %cst_27 = arith.constant 0.00999999977 : f32
    %57 = vector.broadcast %cst_27 : f32 to vector<8x512xf32>
    %58 = arith.mulf %57, %54 : vector<8x512xf32>
    %59 = arith.select %56, %54, %58 : vector<8x512xi1>, vector<8x512xf32>
    %c3_i32_28 = arith.constant 3 : i32
    %60 = tpu.memref_slice %arg15[%c3_i32_28] : memref<4x!tpu.dma_semaphore, #tpu.memory_space<semaphore_mem>> -> memref<1x!tpu.dma_semaphore, #tpu.memory_space<semaphore_mem>>
    %61 = tpu.memref_squeeze %60 : memref<1x!tpu.dma_semaphore, #tpu.memory_space<semaphore_mem>> -> memref<!tpu.dma_semaphore, #tpu.memory_space<semaphore_mem>>
    tpu.wait_dma2 semaphore(%61 : memref<!tpu.dma_semaphore, #tpu.memory_space<semaphore_mem>>) src(%arg5 : memref<512x256xi8, #tpu.memory_space<any>>) dst(%arg14 : memref<512x256xi8, #tpu.memory_space<vmem>>)
    %c0_29 = arith.constant 0 : index
    %c0_30 = arith.constant 0 : index
    %62 = vector.load %arg14[%c0_29, %c0_30] : memref<512x256xi8, #tpu.memory_space<vmem>>, vector<512x256xi8>
    %63 = arith.sitofp %62 : vector<512x256xi8> to vector<512x256xbf16>
    %64 = arith.truncf %59 : vector<8x512xf32> to vector<8x512xbf16>
    %cst_31 = arith.constant dense<0.000000e+00> : vector<8x256xf32>
    %65 = tpu.matmul %64, %63, %cst_31 {dimension_numbers = #tpu.dot_dimension_numbers<[1], [0], [0], [1], [0, 0, 1, 1], [], []>} : vector<8x512xbf16>, vector<512x256xbf16>, vector<8x256xf32> -> vector<8x256xf32>
    %c0_32 = arith.constant 0 : index
    %c3584 = arith.constant 3584 : index
    %66 = vector.load %arg7[%c0_32, %c3584] : memref<1x3840xf32, #tpu.memory_space<vmem>>, vector<1x256xf32>
    %c0_33 = arith.constant 0 : index
    %c3584_34 = arith.constant 3584 : index
    %67 = vector.load %arg8[%c0_33, %c3584_34] : memref<1x3840xf32, #tpu.memory_space<vmem>>, vector<1x256xf32>
    %68 = vector.broadcast %66 : vector<1x256xf32> to vector<8x256xf32>
    %69 = arith.mulf %65, %68 : vector<8x256xf32>
    %70 = vector.broadcast %67 : vector<1x256xf32> to vector<8x256xf32>
    %71 = arith.addf %69, %70 : vector<8x256xf32>
    %cst_35 = arith.constant 0.000000e+00 : f32
    %72 = vector.broadcast %cst_35 : f32 to vector<8x256xf32>
    %73 = arith.cmpf ogt, %71, %72 : vector<8x256xf32>
    %cst_36 = arith.constant 0.00999999977 : f32
    %74 = vector.broadcast %cst_36 : f32 to vector<8x256xf32>
    %75 = arith.mulf %74, %71 : vector<8x256xf32>
    %76 = arith.select %73, %71, %75 : vector<8x256xi1>, vector<8x256xf32>
    %c0_37 = arith.constant 0 : index
    %c0_38 = arith.constant 0 : index
    %77 = vector.load %arg6[%c0_37, %c0_38] : memref<1x256xf32, #tpu.memory_space<vmem>>, vector<1x256xf32>
    %78 = vector.broadcast %77 : vector<1x256xf32> to vector<8x256xf32>
    %79 = arith.mulf %76, %78 : vector<8x256xf32>
    %cst_39 = arith.constant dense<0.000000e+00> : vector<8xf32>
    %80 = vector.multi_reduction <add>, %79, %cst_39 [1] : vector<8x256xf32> to vector<8xf32>
    %81 = vector.shape_cast %80 : vector<8xf32> to vector<8x1xf32>
    %c0_40 = arith.constant 0 : index
    %c0_41 = arith.constant 0 : index
    %82 = vector.load %arg9[%c0_40, %c0_41] : memref<1x1xf32, #tpu.memory_space<vmem>>, vector<1x1xf32>
    %83 = vector.broadcast %82 : vector<1x1xf32> to vector<8x1xf32>
    %84 = arith.addf %81, %83 : vector<8x1xf32>
    %85 = arith.negf %84 : vector<8x1xf32>
    %86 = math.exp %85 : vector<8x1xf32>
    %cst_42 = arith.constant 1.000000e+00 : f32
    %87 = vector.broadcast %cst_42 : f32 to vector<8x1xf32>
    %88 = arith.addf %87, %86 : vector<8x1xf32>
    %89 = arith.divf %87, %88 : vector<8x1xf32>
    %c0_43 = arith.constant 0 : index
    %c0_44 = arith.constant 0 : index
    %90 = vector.load %arg10[%c0_43, %c0_44] : memref<8x1xf32, #tpu.memory_space<vmem>>, vector<8x1xf32>
    tpu.vector_store %arg10[%c0_43, %c0_44], %89 {strides = array<i32>} : memref<8x1xf32, #tpu.memory_space<vmem>>, vector<8x1xf32>,
    return
  }
  func.func @transform_0(%arg0: i32) -> (i32, i32) {
    %c0_i32 = arith.constant 0 : i32
    %c0_i32_0 = arith.constant 0 : i32
    %c0_i32_1 = arith.constant 0 : i32
    return %c0_i32, %c0_i32_0 : i32, i32
  }
  func.func @transform_5(%arg0: i32) -> (i32, i32) {
    %c0_i32 = arith.constant 0 : i32
    %c0_i32_0 = arith.constant 0 : i32
    %c0_i32_1 = arith.constant 0 : i32
    return %c0_i32, %c0_i32_0 : i32, i32
  }
  func.func @transform_6(%arg0: i32) -> (i32, i32) {
    %c0_i32 = arith.constant 0 : i32
    %c0_i32_0 = arith.constant 0 : i32
    %c0_i32_1 = arith.constant 0 : i32
    return %c0_i32, %c0_i32_0 : i32, i32
  }
  func.func @transform_7(%arg0: i32) -> (i32, i32) {
    %c0_i32 = arith.constant 0 : i32
    %c0_i32_0 = arith.constant 0 : i32
    %c0_i32_1 = arith.constant 0 : i32
    return %c0_i32, %c0_i32_0 : i32, i32
  }
  func.func @transform_8(%arg0: i32) -> (i32, i32) {
    %c0_i32 = arith.constant 0 : i32
    %c0_i32_0 = arith.constant 0 : i32
    %c0_i32_1 = arith.constant 0 : i32
    return %c0_i32, %c0_i32_0 : i32, i32
  }
  func.func @transform_9(%arg0: i32) -> (i32, i32) {
    %c0_i32 = arith.constant 0 : i32
    %c0_i32_0 = arith.constant 0 : i32
    %c0_i32_1 = arith.constant 0 : i32
    return %c0_i32, %c0_i32_0 : i32, i32
  }
}

</mosaic_0001>

<bundles_post_ra>
// kernel: cnn_model_forward.1
= control target key start
LH: loop header
LB: loop body
LE: loop exit
PB: predicated region body
PF: predicated region fallthrough
CT: control target
= control target key end

     0   :  { %s6788_s0 = inlined_call_operand.hbm [shape: f32[8,512], index: 0, kind: input, shape index: {}]   ;;  %s6789_s1 = inlined_call_operand.hbm [shape: s8[512,2048], index: 1, kind: input, shape index: {}]   ;;  %s6790_s2 = inlined_call_operand.hbm [shape: s8[2048,1024], index: 2, kind: input, shape index: {}]   ;;  %s6791_s3 = inlined_call_operand.hbm [shape: s8[1024,512], index: 3, kind: input, shape index: {}]   ;;  %s6792_s4 = inlined_call_operand.hbm [shape: s8[512,256], index: 4, kind: input, shape index: {}]   ;;  %s6793_s5 = inlined_call_operand.hbm [shape: f32[1,256], index: 5, kind: input, shape index: {}]   ;;  %s6794_s6 = inlined_call_operand.hbm [shape: f32[1,3840], index: 6, kind: input, shape index: {}]   ;;  %s6795_s7 = inlined_call_operand.hbm [shape: f32[1,3840], index: 7, kind: input, shape index: {}]   ;;  %s6796_s8 = inlined_call_operand.<no memory space> [shape: f32[1,1], index: 8, kind: input, shape index: {}]   ;;  %s6797_s9 = inlined_call_operand.vmem [shape: f32[8,1], index: 9, kind: output, shape index: {}]  }
   0x1   :  { %v14_v0 = vstv %s6796_s8 }
   0x2   :  { %15 = vst [vmem:[#allocation7] sm:$0x1] %v14_v0 }
   0x3   :  { %16 = vsyncpa [#allocation9], 0 }
   0x4   :  { %17 = vsyncpa [#allocation11], 0 }
   0x5   :  { %18 = vsyncpa [#allocation14], 0  ;;  %s6252_s11 = smov [#allocation10]   ;;  %s6253_s13 = smov [#allocation8]  }
   0x6   :  { %s35_s12 = sshll.u32 %s6252_s11, 4  ;;  %s25_s14 = sshll.u32 %s6253_s13, 4  ;;  %s36_s12 = int_to_ptr.vmem [resolvable:$true] %s35_s12  ;;  %s26_s14 = int_to_ptr.vmem [resolvable:$true] %s25_s14 }
   0x7   :  { %s6062_s17 = scalar_lea.hbm %s6793_s5, 32 }
   0x8   :  { %p6063_p0 = scmp.ne.s32.totalorder %s6793_s5, %s6062_s17  ;;  %p6066_p1 = scmp.lt.u32.totalorder %s6062_s17, %s6793_s5 }
   0xa   :  { %p6068_p2 = pnand %p6066_p1, %p6063_p0 }
   0xc   :  { %6071 = shalt.err (!%p6068_p2)
}
   0xd   :  { %s6072_s21 = scalar_lea.vmem %s36_s12, 32  ;;  %p6077_p4 = scmp.lt.s32.totalorder %s36_s12, %s36_s12 }
   0xe   :  { %p6073_p3 = scmp.ne.s32.totalorder %s36_s12, %s6072_s21  ;;  %p6078_p5 = scmp.lt.s32.totalorder %s6072_s21, %s6072_s21 }
  0x10   :  { %p6079_p6 = por %p6078_p5, %p6077_p4 }
  0x12   :  { %p6080_p7 = pnand %p6079_p6, %p6073_p3 }
  0x14   :  { %6083 = shalt.err (!%p6080_p7)
}
  0x15   :  { %38 = dma.hbm_to_vmem [thread:$0]  %s6793_s5, 32, %s36_s12, [#allocation11]  }
  0x16   :  { %s6084_s26 = scalar_lea.hbm %s6788_s0, 512 }
  0x17   :  { %p6085_p8 = scmp.ne.s32.totalorder %s6788_s0, %s6084_s26  ;;  %p6088_p9 = scmp.lt.u32.totalorder %s6084_s26, %s6788_s0 }
  0x19   :  { %p6090_p10 = pnand %p6088_p9, %p6085_p8 }
  0x1b   :  { %6093 = shalt.err (!%p6090_p10)
}
  0x1c   :  { %s6094_s10 = scalar_lea.vmem %s26_s14, 512  ;;  %p6099_p12 = scmp.lt.s32.totalorder %s26_s14, %s26_s14 }
  0x1d   :  { %p6095_p11 = scmp.ne.s32.totalorder %s26_s14, %s6094_s10  ;;  %p6100_p13 = scmp.lt.s32.totalorder %s6094_s10, %s6094_s10 }
  0x1f   :  { %p6101_p0 = por %p6100_p13, %p6099_p12 }
  0x21   :  { %p6102_p1 = pnand %p6101_p0, %p6095_p11 }
  0x23   :  { %6105 = shalt.err (!%p6102_p1)
}
  0x24   :  { %28 = dma.hbm_to_vmem [thread:$0]  %s6788_s0, 512, %s26_s14, [#allocation9]  }
  0x25   :  { %s6254_s12 = smov [#allocation12]   ;;  %s6255_s15 = smov [#allocation13]  }
  0x26   :  { %s45_s13 = sshll.u32 %s6254_s12, 4  ;;  %s55_s16 = sshll.u32 %s6255_s15, 4  ;;  %s46_s13 = int_to_ptr.vmem [resolvable:$true] %s45_s13  ;;  %s56_s16 = int_to_ptr.vmem [resolvable:$true] %s55_s16 }
  0x27   :  { %s6106_s19 = scalar_lea.hbm %s6794_s6, 480 }
  0x28   :  { %p6107_p2 = scmp.ne.s32.totalorder %s6794_s6, %s6106_s19  ;;  %p6110_p3 = scmp.lt.u32.totalorder %s6106_s19, %s6794_s6 }
  0x2a   :  { %p6112_p4 = pnand %p6110_p3, %p6107_p2 }
  0x2c   :  { %6115 = shalt.err (!%p6112_p4)
}
  0x2d   :  { %s6116_s0 = scalar_lea.vmem %s46_s13, 480  ;;  %p6121_p6 = scmp.lt.s32.totalorder %s46_s13, %s46_s13 }
  0x2e   :  { %p6117_p5 = scmp.ne.s32.totalorder %s46_s13, %s6116_s0  ;;  %p6122_p7 = scmp.lt.s32.totalorder %s6116_s0, %s6116_s0 }
  0x30   :  { %p6123_p8 = por %p6122_p7, %p6121_p6 }
  0x32   :  { %p6124_p9 = pnand %p6123_p8, %p6117_p5 }
  0x34   :  { %6127 = shalt.err (!%p6124_p9)
}
  0x35   :  { %48 = dma.hbm_to_vmem [thread:$0]  %s6794_s6, 480, %s46_s13, [#allocation11]  }
  0x36   :  { %s6128_s26 = scalar_lea.hbm %s6795_s7, 480 }
  0x37   :  { %p6129_p10 = scmp.ne.s32.totalorder %s6795_s7, %s6128_s26  ;;  %p6132_p11 = scmp.lt.u32.totalorder %s6128_s26, %s6795_s7 }
  0x39   :  { %p6134_p12 = pnand %p6132_p11, %p6129_p10 }
  0x3b   :  { %6137 = shalt.err (!%p6134_p12)
}
  0x3c   :  { %s6138_s10 = scalar_lea.vmem %s56_s16, 480  ;;  %p6143_p0 = scmp.lt.s32.totalorder %s56_s16, %s56_s16 }
  0x3d   :  { %p6139_p13 = scmp.ne.s32.totalorder %s56_s16, %s6138_s10  ;;  %p6144_p1 = scmp.lt.s32.totalorder %s6138_s10, %s6138_s10 }
  0x3f   :  { %p6145_p2 = por %p6144_p1, %p6143_p0 }
  0x41   :  { %p6146_p3 = pnand %p6145_p2, %p6139_p13 }
  0x43   :  { %6149 = shalt.err (!%p6146_p3)
}
  0x44   :  { %58 = dma.hbm_to_vmem [thread:$0]  %s6795_s7, 480, %s56_s16, [#allocation14]  }
  0x45   :  { %6238 = dma.done.wait [#allocation9], 512  }
  0x46   :  { %6239 = vsyncadd [#allocation9], 4294966784 }
  0x47   :  { %6240 = dma.done.wait [#allocation11], 512  }
  0x48   :  { %6241 = vsyncadd [#allocation11], 4294966784 }
  0x49   :  { %6242 = dma.done.wait [#allocation14], 480  }
  0x4a   :  { %6243 = vsyncadd [#allocation14], 4294966816  ;;  %s6256_s11 = smov [#allocation2]   ;;  %s6257_s13 = smov [#allocation3]  }
  0x4b   :  { %s80_s12 = sshll.u32 %s6256_s11, 4  ;;  %s92_s15 = sshll.u32 %s6257_s13, 4  ;;  %s81_s12 = int_to_ptr.vmem [resolvable:$true] %s80_s12  ;;  %s93_s15 = int_to_ptr.vmem [resolvable:$true] %s92_s15 }
  0x4c   :  { %s6150_s19 = scalar_lea.hbm %s6789_s1, 32768 }
  0x4d   :  { %p6151_p4 = scmp.ne.s32.totalorder %s6789_s1, %s6150_s19  ;;  %p6154_p5 = scmp.lt.u32.totalorder %s6150_s19, %s6789_s1 }
  0x4f   :  { %p6156_p6 = pnand %p6154_p5, %p6151_p4 }
  0x51   :  { %6159 = shalt.err (!%p6156_p6)  }
  0x52   :  { %s6160_s21 = scalar_lea.vmem %s81_s12, 32768  ;;  %p6165_p8 = scmp.lt.s32.totalorder %s81_s12, %s81_s12 }
  0x53   :  { %p6161_p7 = scmp.ne.s32.totalorder %s81_s12, %s6160_s21  ;;  %p6166_p9 = scmp.lt.s32.totalorder %s6160_s21, %s6160_s21 }
  0x55   :  { %p6167_p10 = por %p6166_p9, %p6165_p8 }
  0x57   :  { %p6168_p11 = pnand %p6167_p10, %p6161_p7 }
  0x59   :  { %6171 = shalt.err (!%p6168_p11)  }
  0x5a   :  { %83 = dma.hbm_to_vmem [thread:$0]  %s6789_s1, 32768, %s81_s12, [#allocation6] }
  0x5b   :  { %s6172_s24 = scalar_lea.hbm %s6790_s2, 65536 }
  0x5c   :  { %p6173_p12 = scmp.ne.s32.totalorder %s6790_s2, %s6172_s24  ;;  %p6176_p13 = scmp.lt.u32.totalorder %s6172_s24, %s6790_s2 }
  0x5e   :  { %p6178_p0 = pnand %p6176_p13, %p6173_p12 }
  0x60   :  { %6181 = shalt.err (!%p6178_p0)  }
  0x61   :  { %s6182_s29 = scalar_lea.vmem %s93_s15, 65536  ;;  %p6187_p2 = scmp.lt.s32.totalorder %s93_s15, %s93_s15 }
  0x62   :  { %p6183_p1 = scmp.ne.s32.totalorder %s93_s15, %s6182_s29  ;;  %p6188_p3 = scmp.lt.s32.totalorder %s6182_s29, %s6182_s29 }
  0x64   :  { %p6189_p4 = por %p6188_p3, %p6187_p2 }
  0x66   :  { %p6190_p5 = pnand %p6189_p4, %p6183_p1 }
  0x68   :  { %6193 = shalt.err (!%p6190_p5)  }
  0x69   :  { %95 = dma.hbm_to_vmem [thread:$0]  %s6790_s2, 65536, %s93_s15, [#allocation6 + $0x1]  ;;  %v6385_v1 = vld [vmem:[#allocation8] sm:$0xff]  ;;  %v121_v2 = vld [vmem:[#allocation8 + $0x8] sm:$0xff]  ;;  %v6387_v3 = vld [vmem:[#allocation8 + $0x10] sm:$0xff] }
  0x6a   :  { %s6258_s10 = smov [#allocation4]   ;;  %s6259_s5 = smov [#allocation5]   ;;  %v123_v4 = vld [vmem:[#allocation8 + $0x18] sm:$0xff] }
  0x6b   :  { %s104_s6 = sshll.u32 %s6258_s10, 4  ;;  %s116_s11 = sshll.u32 %s6259_s5, 4  ;;  %s105_s6 = int_to_ptr.vmem [resolvable:$true] %s104_s6  ;;  %s117_s11 = int_to_ptr.vmem [resolvable:$true] %s116_s11 }
  0x6c   :  { %s6194_s17 = scalar_lea.hbm %s6791_s3, 16384 }
  0x6d   :  { %p6195_p6 = scmp.ne.s32.totalorder %s6791_s3, %s6194_s17  ;;  %p6198_p7 = scmp.lt.u32.totalorder %s6194_s17, %s6791_s3 }
  0x6f   :  { %p6200_p8 = pnand %p6198_p7, %p6195_p6 }
  0x71   :  { %6203 = shalt.err (!%p6200_p8)  }
  0x72   :  { %s6204_s20 = scalar_lea.vmem %s105_s6, 16384  ;;  %p6209_p10 = scmp.lt.s32.totalorder %s105_s6, %s105_s6 }
  0x73   :  { %p6205_p9 = scmp.ne.s32.totalorder %s105_s6, %s6204_s20  ;;  %p6210_p11 = scmp.lt.s32.totalorder %s6204_s20, %s6204_s20 }
  0x75   :  { %p6211_p12 = por %p6210_p11, %p6209_p10 }
  0x77   :  { %p6212_p13 = pnand %p6211_p12, %p6205_p9 }
  0x79   :  { %6215 = shalt.err (!%p6212_p13)  }
  0x7a   :  { %107 = dma.hbm_to_vmem [thread:$0]  %s6791_s3, 16384, %s105_s6, [#allocation6 + $0x2] }
  0x7b   :  { %s6216_s22 = scalar_lea.hbm %s6792_s4, 4096 }
  0x7c   :  { %p6217_p0 = scmp.ne.s32.totalorder %s6792_s4, %s6216_s22  ;;  %p6220_p1 = scmp.lt.u32.totalorder %s6216_s22, %s6792_s4 }
  0x7e   :  { %p6222_p2 = pnand %p6220_p1, %p6217_p0 }
  0x80   :  { %6225 = shalt.err (!%p6222_p2)  }
  0x81   :  { %s6226_s25 = scalar_lea.vmem %s117_s11, 4096  ;;  %p6231_p4 = scmp.lt.s32.totalorder %s117_s11, %s117_s11 }
  0x82   :  { %p6227_p3 = scmp.ne.s32.totalorder %s117_s11, %s6226_s25  ;;  %p6232_p5 = scmp.lt.s32.totalorder %s6226_s25, %s6226_s25 }
  0x84   :  { %p6233_p6 = por %p6232_p5, %p6231_p4 }
  0x86   :  { %p6234_p7 = pnand %p6233_p6, %p6227_p3 }
  0x88   :  { %6237 = shalt.err (!%p6234_p7)  }
  0x89   :  { %119 = dma.hbm_to_vmem [thread:$0]  %s6792_s4, 4096, %s117_s11, [#allocation6 + $0x3] }
  0x8a   :  { %6244 = dma.done.wait [#allocation6], 32768 }
  0x8b   :  { %6245 = vsyncadd [#allocation6], 4294934528  ;;  %v6413_v5 = vpack.c.bf16 %v121_v2, %v121_v2  ;;  %v6415_v6 = vpack.c.bf16 %v123_v4, %v123_v4  ;;  %v129_v7 = vld [vmem:[#allocation2 + $0x8] sm:$0xff]  ;;  %v128_v9 = vld [vmem:[#allocation2] sm:$0xff] }
  0x8c   :  { %v257_v8 = vld [vmem:[#allocation2 + $0x408] sm:$0xff]  ;;  %v385_v10 = vunpack.c.l.s8.bf16 %v129_v7  ;;  %v401_v11 = vunpack.c.h.s8.bf16 %v129_v7  ;;  %v256_v14 = vld [vmem:[#allocation2 + $0x400] sm:$0xff]  ;;  %v384_v15 = vunpack.c.l.s8.bf16 %v128_v9  ;;  %v400_v19 = vunpack.c.h.s8.bf16 %v128_v9 }
  0x8d   :  { %932 = vmatprep.mubr.bf16.mxu1 %v6413_v5  ;;  %973 = vmatprep.mubr.bf16.mxu0 %v6415_v6  ;;  %v641_v12 = vunpack.c.l.s8.bf16 %v257_v8  ;;  %v657_v13 = vunpack.c.h.s8.bf16 %v257_v8  ;;  %v640_v16 = vunpack.c.l.s8.bf16 %v256_v14  ;;  %v145_v17 = vld [vmem:[#allocation2 + $0x88] sm:$0xff]  ;;  %v656_v20 = vunpack.c.h.s8.bf16 %v256_v14  ;;  %v144_v23 = vld [vmem:[#allocation2 + $0x80] sm:$0xff] }
  0x8e   :  { %v273_v18 = vld [vmem:[#allocation2 + $0x488] sm:$0xff]  ;;  %900 = vmatprep.subr.bf16.mxu1 %v385_v10  ;;  %v417_v21 = vunpack.c.l.s8.bf16 %v145_v17  ;;  %v272_v24 = vld [vmem:[#allocation2 + $0x480] sm:$0xff]  ;;  %v416_v25 = vunpack.c.l.s8.bf16 %v144_v23  ;;  %v433_v27 = vunpack.c.h.s8.bf16 %v145_v17  ;;  %v432_v31 = vunpack.c.h.s8.bf16 %v144_v23 }
  0x8f   :  { %941 = vmatprep.subr.bf16.mxu0 %v641_v12  ;;  %901 = vmatpush1.bf16.msra.mxu1 %v384_v15  ;;  %v673_v22 = vunpack.c.l.s8.bf16 %v273_v18  ;;  %v672_v26 = vunpack.c.l.s8.bf16 %v272_v24  ;;  %v689_v28 = vunpack.c.h.s8.bf16 %v273_v18  ;;  %v161_v29 = vld [vmem:[#allocation2 + $0x108] sm:$0xff]  ;;  %v688_v32 = vunpack.c.h.s8.bf16 %v272_v24  ;;  %v160_v35 = vld [vmem:[#allocation2 + $0x100] sm:$0xff] }
  0x90   :  { %942 = vmatpush1.bf16.msra.mxu0 %v640_v16  ;;  %902 = vmatprep.subr.bf16.mxu1 %v401_v11  ;;  %v289_v30 = vld [vmem:[#allocation2 + $0x508] sm:$0xff]  ;;  %v449_v33 = vunpack.c.l.s8.bf16 %v161_v29  ;;  %v288_v36 = vld [vmem:[#allocation2 + $0x500] sm:$0xff]  ;;  %v448_v37 = vunpack.c.l.s8.bf16 %v160_v35  ;;  %v465_v39 = vunpack.c.h.s8.bf16 %v161_v29  ;;  %v464_v43 = vunpack.c.h.s8.bf16 %v160_v35 }
  0x91   :  { %943 = vmatprep.subr.bf16.mxu0 %v657_v13  ;;  %v705_v34 = vunpack.c.l.s8.bf16 %v289_v30  ;;  %v704_v38 = vunpack.c.l.s8.bf16 %v288_v36  ;;  %v721_v40 = vunpack.c.h.s8.bf16 %v289_v30  ;;  %v177_v41 = vld [vmem:[#allocation2 + $0x188] sm:$0xff]  ;;  %v720_v44 = vunpack.c.h.s8.bf16 %v288_v36  ;;  %v176_v47 = vld [vmem:[#allocation2 + $0x180] sm:$0xff] }
  0x92   :  { %v305_v42 = vld [vmem:[#allocation2 + $0x588] sm:$0xff]  ;;  %v481_v45 = vunpack.c.l.s8.bf16 %v177_v41  ;;  %v304_v48 = vld [vmem:[#allocation2 + $0x580] sm:$0xff]  ;;  %v480_v49 = vunpack.c.l.s8.bf16 %v176_v47  ;;  %v497_v51 = vunpack.c.h.s8.bf16 %v177_v41  ;;  %v496_v55 = vunpack.c.h.s8.bf16 %v176_v47  ;;  %v131_v41 = vld [vmem:[#allocation2 + $0x18] sm:$0xff] }
  0x93   :  { %903 = vmatpush1.bf16.msra.mxu1 %v400_v19  ;;  %v737_v46 = vunpack.c.l.s8.bf16 %v305_v42  ;;  %v736_v50 = vunpack.c.l.s8.bf16 %v304_v48  ;;  %v753_v52 = vunpack.c.h.s8.bf16 %v305_v42  ;;  %v193_v53 = vld [vmem:[#allocation2 + $0x208] sm:$0xff]  ;;  %v752_v56 = vunpack.c.h.s8.bf16 %v304_v48  ;;  %v192_v59 = vld [vmem:[#allocation2 + $0x200] sm:$0xff] }
  0x94   :  { %944 = vmatpush1.bf16.msra.mxu0 %v656_v20  ;;  %904 = vmatprep.subr.bf16.mxu1 %v417_v21  ;;  %v321_v54 = vld [vmem:[#allocation2 + $0x608] sm:$0xff]  ;;  %v513_v57 = vunpack.c.l.s8.bf16 %v193_v53  ;;  %v320_v60 = vld [vmem:[#allocation2 + $0x600] sm:$0xff]  ;;  %v512_v61 = vunpack.c.l.s8.bf16 %v192_v59  ;;  %v529_v63 = vunpack.c.h.s8.bf16 %v193_v53  ;;  %v528_v7 = vunpack.c.h.s8.bf16 %v192_v59 }
  0x95   :  { %945 = vmatprep.subr.bf16.mxu0 %v673_v22  ;;  %v769_v58 = vunpack.c.l.s8.bf16 %v321_v54  ;;  %v768_v62 = vunpack.c.l.s8.bf16 %v320_v60  ;;  %v785_v0 = vunpack.c.h.s8.bf16 %v321_v54  ;;  %v209_v2 = vld [vmem:[#allocation2 + $0x288] sm:$0xff]  ;;  %v784_v8 = vunpack.c.h.s8.bf16 %v320_v60  ;;  %v208_v11 = vld [vmem:[#allocation2 + $0x280] sm:$0xff]  ;;  %v147_v54 = vld [vmem:[#allocation2 + $0x98] sm:$0xff] }
  0x96   :  { %v337_v4 = vld [vmem:[#allocation2 + $0x688] sm:$0xff]  ;;  %v545_v9 = vunpack.c.l.s8.bf16 %v209_v2  ;;  %v336_v12 = vld [vmem:[#allocation2 + $0x680] sm:$0xff]  ;;  %v544_v13 = vunpack.c.l.s8.bf16 %v208_v11  ;;  %v561_v15 = vunpack.c.h.s8.bf16 %v209_v2  ;;  %v560_v19 = vunpack.c.h.s8.bf16 %v208_v11  ;;  %v163_v2 = vld [vmem:[#allocation2 + $0x118] sm:$0xff] }
  0x97   :  { %905 = vmatpush1.bf16.msra.mxu1 %v416_v25  ;;  %v801_v10 = vunpack.c.l.s8.bf16 %v337_v4  ;;  %v800_v14 = vunpack.c.l.s8.bf16 %v336_v12  ;;  %v817_v16 = vunpack.c.h.s8.bf16 %v337_v4  ;;  %v225_v17 = vld [vmem:[#allocation2 + $0x308] sm:$0xff]  ;;  %v816_v20 = vunpack.c.h.s8.bf16 %v336_v12  ;;  %v224_v23 = vld [vmem:[#allocation2 + $0x300] sm:$0xff] }
  0x98   :  { %946 = vmatpush1.bf16.msra.mxu0 %v672_v26  ;;  %906 = vmatprep.subr.bf16.mxu1 %v433_v27  ;;  %v353_v18 = vld [vmem:[#allocation2 + $0x708] sm:$0xff]  ;;  %v577_v21 = vunpack.c.l.s8.bf16 %v225_v17  ;;  %v352_v24 = vld [vmem:[#allocation2 + $0x700] sm:$0xff]  ;;  %v576_v25 = vunpack.c.l.s8.bf16 %v224_v23  ;;  %v593_v27 = vunpack.c.h.s8.bf16 %v225_v17  ;;  %v403_v53 = vunpack.c.h.s8.bf16 %v131_v41  ;;  %v179_v17 = vld [vmem:[#allocation2 + $0x198] sm:$0xff] }
  0x99   :  { %947 = vmatprep.subr.bf16.mxu0 %v689_v28  ;;  %v833_v22 = vunpack.c.l.s8.bf16 %v353_v18  ;;  %v832_v26 = vunpack.c.l.s8.bf16 %v352_v24  ;;  %v849_v28 = vunpack.c.h.s8.bf16 %v353_v18  ;;  %v241_v29 = vld [vmem:[#allocation2 + $0x388] sm:$0xff]  ;;  %v240_v35 = vld [vmem:[#allocation2 + $0x380] sm:$0xff] }
  0x9a   :  { %v369_v30 = vld [vmem:[#allocation2 + $0x788] sm:$0xff]  ;;  %v368_v36 = vld [vmem:[#allocation2 + $0x780] sm:$0xff] }
  0x9b   :  { %907 = vmatpush1.bf16.msra.mxu1 %v432_v31  ;;  %v592_v31 = vunpack.c.h.s8.bf16 %v224_v23  ;;  %v133_v42 = vld [vmem:[#allocation2 + $0x28] sm:$0xff]  ;;  %v132_v48 = vld [vmem:[#allocation2 + $0x20] sm:$0xff] }
  0x9c   :  { %948 = vmatpush1.bf16.msra.mxu0 %v688_v32  ;;  %908 = vmatprep.subr.bf16.mxu1 %v449_v33  ;;  %v848_v32 = vunpack.c.h.s8.bf16 %v352_v24  ;;  %v609_v33 = vunpack.c.l.s8.bf16 %v241_v29  ;;  %v389_v47 = vunpack.c.l.s8.bf16 %v133_v42  ;;  %v148_v60 = vld [vmem:[#allocation2 + $0xa0] sm:$0xff]  ;;  %v165_v4 = vld [vmem:[#allocation2 + $0x128] sm:$0xff] }
  0x9d   :  { %949 = vmatprep.subr.bf16.mxu0 %v705_v34  ;;  %v865_v34 = vunpack.c.l.s8.bf16 %v369_v30  ;;  %v453_v11 = vunpack.c.l.s8.bf16 %v165_v4  ;;  %v164_v12 = vld [vmem:[#allocation2 + $0x120] sm:$0xff]  ;;  %v181_v18 = vld [vmem:[#allocation2 + $0x1a8] sm:$0xff] }
  0x9e   :  { %v485_v23 = vunpack.c.l.s8.bf16 %v181_v18  ;;  %v180_v24 = vld [vmem:[#allocation2 + $0x1a0] sm:$0xff] }
  0x9f   :  { %909 = vmatpush1.bf16.msra.mxu1 %v448_v37  ;;  %v608_v37 = vunpack.c.l.s8.bf16 %v240_v35 }
  0xa0   :  { %950 = vmatpush1.bf16.msra.mxu0 %v704_v38  ;;  %910 = vmatprep.subr.bf16.mxu1 %v465_v39  ;;  %v864_v38 = vunpack.c.l.s8.bf16 %v368_v36  ;;  %v625_v39 = vunpack.c.h.s8.bf16 %v241_v29  ;;  %v195_v29 = vld [vmem:[#allocation2 + $0x218] sm:$0xff] }
  0xa1   :  { %951 = vmatprep.subr.bf16.mxu0 %v721_v40  ;;  %v881_v40 = vunpack.c.h.s8.bf16 %v369_v30  ;;  %v197_v30 = vld [vmem:[#allocation2 + $0x228] sm:$0xff] }
  0xa3   :  { %911 = vmatpush1.bf16.msra.mxu1 %v464_v43  ;;  %v624_v43 = vunpack.c.h.s8.bf16 %v240_v35  ;;  %v517_v35 = vunpack.c.l.s8.bf16 %v197_v30 }
  0xa4   :  { %952 = vmatpush1.bf16.msra.mxu0 %v720_v44  ;;  %912 = vmatprep.subr.bf16.mxu1 %v481_v45  ;;  %v880_v44 = vunpack.c.h.s8.bf16 %v368_v36  ;;  %v387_v45 = vunpack.c.l.s8.bf16 %v131_v41  ;;  %v196_v36 = vld [vmem:[#allocation2 + $0x220] sm:$0xff]  ;;  %v211_v41 = vld [vmem:[#allocation2 + $0x298] sm:$0xff] }
  0xa5   :  { %953 = vmatprep.subr.bf16.mxu0 %v737_v46  ;;  %v130_v46 = vld [vmem:[#allocation2 + $0x10] sm:$0xff] }
  0xa7   :  { %913 = vmatpush1.bf16.msra.mxu1 %v480_v49  ;;  %v6421_v49 = vpack.c.bf16 %v6385_v1, %v6385_v1  ;;  %v402_v1 = vunpack.c.h.s8.bf16 %v130_v46 }
  0xa8   :  { %954 = vmatpush1.bf16.msra.mxu0 %v736_v50  ;;  %914 = vmatprep.subr.bf16.mxu1 %v497_v51  ;;  %v6425_v50 = vpack.c.bf16 %v6387_v3, %v6387_v3  ;;  %v386_v51 = vunpack.c.l.s8.bf16 %v130_v46  ;;  %v419_v3 = vunpack.c.l.s8.bf16 %v147_v54  ;;  %v210_v46 = vld [vmem:[#allocation2 + $0x290] sm:$0xff] }
  0xa9   :  { %955 = vmatprep.subr.bf16.mxu0 %v753_v52  ;;  %v388_v52 = vunpack.c.l.s8.bf16 %v132_v48 }
  0xab   :  { %915 = vmatpush1.bf16.msra.mxu1 %v496_v55  ;;  %v405_v55 = vunpack.c.h.s8.bf16 %v133_v42  ;;  %v213_v42 = vld [vmem:[#allocation2 + $0x2a8] sm:$0xff] }
  0xac   :  { %956 = vmatpush1.bf16.msra.mxu0 %v752_v56  ;;  %916 = vmatprep.subr.bf16.mxu1 %v513_v57  ;;  %v149_v56 = vld [vmem:[#allocation2 + $0xa8] sm:$0xff]  ;;  %v404_v57 = vunpack.c.h.s8.bf16 %v132_v48  ;;  %v212_v48 = vld [vmem:[#allocation2 + $0x2a0] sm:$0xff] }
  0xad   :  { %957 = vmatprep.subr.bf16.mxu0 %v769_v58  ;;  %v146_v58 = vld [vmem:[#allocation2 + $0x90] sm:$0xff]  ;;  %v421_v59 = vunpack.c.l.s8.bf16 %v149_v56 }
  0xaf   :  { %917 = vmatpush1.bf16.msra.mxu1 %v512_v61  ;;  %v418_v61 = vunpack.c.l.s8.bf16 %v146_v58 }
  0xb0   :  { %958 = vmatpush1.bf16.msra.mxu0 %v768_v62  ;;  %918 = vmatprep.subr.bf16.mxu1 %v529_v63  ;;  %v420_v62 = vunpack.c.l.s8.bf16 %v148_v60  ;;  %v435_v63 = vunpack.c.h.s8.bf16 %v147_v54  ;;  %v565_v54 = vunpack.c.h.s8.bf16 %v213_v42 }
  0xb1   :  { %959 = vmatprep.subr.bf16.mxu0 %v785_v0  ;;  %v437_v0 = vunpack.c.h.s8.bf16 %v149_v56  ;;  %v229_v56 = vld [vmem:[#allocation2 + $0x328] sm:$0xff] }
  0xb3   :  { %919 = vmatpush1.bf16.msra.mxu1 %v528_v7  ;;  %v434_v7 = vunpack.c.h.s8.bf16 %v146_v58  ;;  %v226_v58 = vld [vmem:[#allocation2 + $0x310] sm:$0xff] }
  0xb4   :  { %960 = vmatpush1.bf16.msra.mxu0 %v784_v8  ;;  %920 = vmatprep.subr.bf16.mxu1 %v545_v9  ;;  %v436_v8 = vunpack.c.h.s8.bf16 %v148_v60  ;;  %v451_v9 = vunpack.c.l.s8.bf16 %v163_v2  ;;  %v228_v60 = vld [vmem:[#allocation2 + $0x320] sm:$0xff] }
  0xb5   :  { %961 = vmatprep.subr.bf16.mxu0 %v801_v10  ;;  %v162_v10 = vld [vmem:[#allocation2 + $0x110] sm:$0xff] }
  0xb7   :  { %921 = vmatpush1.bf16.msra.mxu1 %v544_v13  ;;  %v450_v13 = vunpack.c.l.s8.bf16 %v162_v10 }
  0xb8   :  { %962 = vmatpush1.bf16.msra.mxu0 %v800_v14  ;;  %922 = vmatprep.subr.bf16.mxu1 %v561_v15  ;;  %v452_v14 = vunpack.c.l.s8.bf16 %v164_v12  ;;  %v467_v15 = vunpack.c.h.s8.bf16 %v163_v2  ;;  %v243_v2 = vld [vmem:[#allocation2 + $0x398] sm:$0xff] }
  0xb9   :  { %963 = vmatprep.subr.bf16.mxu0 %v817_v16  ;;  %v469_v16 = vunpack.c.h.s8.bf16 %v165_v4  ;;  %v245_v4 = vld [vmem:[#allocation2 + $0x3a8] sm:$0xff] }
  0xbb   :  { %923 = vmatpush1.bf16.msra.mxu1 %v560_v19  ;;  %v466_v19 = vunpack.c.h.s8.bf16 %v162_v10  ;;  %v242_v10 = vld [vmem:[#allocation2 + $0x390] sm:$0xff] }
  0xbc   :  { %964 = vmatpush1.bf16.msra.mxu0 %v816_v20  ;;  %924 = vmatprep.subr.bf16.mxu1 %v577_v21  ;;  %v468_v20 = vunpack.c.h.s8.bf16 %v164_v12  ;;  %v483_v21 = vunpack.c.l.s8.bf16 %v179_v17  ;;  %v244_v12 = vld [vmem:[#allocation2 + $0x3a0] sm:$0xff] }
  0xbd   :  { %965 = vmatprep.subr.bf16.mxu0 %v833_v22  ;;  %v178_v22 = vld [vmem:[#allocation2 + $0x190] sm:$0xff] }
  0xbf   :  { %925 = vmatpush1.bf16.msra.mxu1 %v576_v25  ;;  %v482_v25 = vunpack.c.l.s8.bf16 %v178_v22 }
  0xc0   :  { %966 = vmatpush1.bf16.msra.mxu0 %v832_v26  ;;  %926 = vmatprep.subr.bf16.mxu1 %v593_v27  ;;  %v484_v26 = vunpack.c.l.s8.bf16 %v180_v24  ;;  %v499_v27 = vunpack.c.h.s8.bf16 %v179_v17  ;;  %v259_v17 = vld [vmem:[#allocation2 + $0x418] sm:$0xff] }
  0xc1   :  { %967 = vmatprep.subr.bf16.mxu0 %v849_v28  ;;  %v501_v28 = vunpack.c.h.s8.bf16 %v181_v18  ;;  %v261_v18 = vld [vmem:[#allocation2 + $0x428] sm:$0xff] }
  0xc3   :  { %927 = vmatpush1.bf16.msra.mxu1 %v592_v31  ;;  %v498_v31 = vunpack.c.h.s8.bf16 %v178_v22  ;;  %v258_v22 = vld [vmem:[#allocation2 + $0x410] sm:$0xff] }
  0xc4   :  { %968 = vmatpush1.bf16.msra.mxu0 %v848_v32  ;;  %928 = vmatprep.subr.bf16.mxu1 %v609_v33  ;;  %v500_v32 = vunpack.c.h.s8.bf16 %v180_v24  ;;  %v515_v33 = vunpack.c.l.s8.bf16 %v195_v29  ;;  %v260_v24 = vld [vmem:[#allocation2 + $0x420] sm:$0xff] }
  0xc5   :  { %969 = vmatprep.subr.bf16.mxu0 %v865_v34  ;;  %v194_v34 = vld [vmem:[#allocation2 + $0x210] sm:$0xff] }
  0xc7   :  { %929 = vmatpush1.bf16.msra.mxu1 %v608_v37  ;;  %v514_v37 = vunpack.c.l.s8.bf16 %v194_v34 }
  0xc8   :  { %970 = vmatpush1.bf16.msra.mxu0 %v864_v38  ;;  %930 = vmatprep.subr.bf16.mxu1 %v625_v39  ;;  %v516_v38 = vunpack.c.l.s8.bf16 %v196_v36  ;;  %v531_v39 = vunpack.c.h.s8.bf16 %v195_v29  ;;  %v661_v29 = vunpack.c.h.s8.bf16 %v261_v18 }
  0xc9   :  { %971 = vmatprep.subr.bf16.mxu0 %v881_v40  ;;  %v533_v40 = vunpack.c.h.s8.bf16 %v197_v30  ;;  %v277_v30 = vld [vmem:[#allocation2 + $0x4a8] sm:$0xff] }
  0xcb   :  { %931 = vmatpush1.bf16.msra.mxu1 %v624_v43  ;;  %v530_v43 = vunpack.c.h.s8.bf16 %v194_v34  ;;  %v660_v34 = vunpack.c.h.s8.bf16 %v260_v24 }
  0xcc   :  { %972 = vmatpush1.bf16.msra.mxu0 %v880_v44  ;;  %982 = vmatprep.subr.bf16.mxu1 %v387_v45  ;;  %v532_v44 = vunpack.c.h.s8.bf16 %v196_v36  ;;  %v547_v45 = vunpack.c.l.s8.bf16 %v211_v41  ;;  %v276_v36 = vld [vmem:[#allocation2 + $0x4a0] sm:$0xff] }
  0xcd   :  { %1064 = vmatprep.subr.bf16.mxu0 %v389_v47  ;;  %v549_v47 = vunpack.c.l.s8.bf16 %v213_v42  ;;  %v293_v42 = vld [vmem:[#allocation2 + $0x528] sm:$0xff] }
  0xce   :  { %933 = vmatmul.mubr.bf16.vlgmr.msra.gmra.mrb[0].mxu1 %v6421_v49 }
  0xcf   :  { %974 = vmatmul.mubr.bf16.vlgmr.msra.gmra.mrb[0].mxu0 %v6425_v50  ;;  %983 = vmatpush1.bf16.msra.mxu1 %v386_v51  ;;  %v546_v51 = vunpack.c.l.s8.bf16 %v210_v46 }
  0xd0   :  { %1065 = vmatpush1.bf16.msra.mxu0 %v388_v52  ;;  %984 = vmatprep.subr.bf16.mxu1 %v403_v53  ;;  %v548_v52 = vunpack.c.l.s8.bf16 %v212_v48  ;;  %v563_v53 = vunpack.c.h.s8.bf16 %v211_v41  ;;  %v693_v41 = vunpack.c.h.s8.bf16 %v277_v30 }
  0xd1   :  { %1014 = vmatprep.mubr.bf16.mxu1 %v6413_v5  ;;  %1066 = vmatprep.subr.bf16.mxu0 %v405_v55  ;;  %v227_v55 = vld [vmem:[#allocation2 + $0x318] sm:$0xff] }
  0xd2   :  { %1096 = vmatprep.mubr.bf16.mxu0 %v6413_v5 }
  0xd3   :  { %985 = vmatpush1.bf16.msra.mxu1 %v402_v1  ;;  %v562_v1 = vunpack.c.h.s8.bf16 %v210_v46  ;;  %v692_v46 = vunpack.c.h.s8.bf16 %v276_v36 }
  0xd4   :  { %1067 = vmatpush1.bf16.msra.mxu0 %v404_v57  ;;  %986 = vmatprep.subr.bf16.mxu1 %v419_v3  ;;  %v564_v57 = vunpack.c.h.s8.bf16 %v212_v48  ;;  %v579_v3 = vunpack.c.l.s8.bf16 %v227_v55  ;;  %v292_v48 = vld [vmem:[#allocation2 + $0x520] sm:$0xff] }
  0xd5   :  { %1068 = vmatprep.subr.bf16.mxu0 %v421_v59  ;;  %v581_v59 = vunpack.c.l.s8.bf16 %v229_v56 }
  0xd7   :  { %987 = vmatpush1.bf16.msra.mxu1 %v418_v61  ;;  %v578_v61 = vunpack.c.l.s8.bf16 %v226_v58 }
  0xd8   :  { %1069 = vmatpush1.bf16.msra.mxu0 %v420_v62  ;;  %988 = vmatprep.subr.bf16.mxu1 %v435_v63  ;;  %v580_v62 = vunpack.c.l.s8.bf16 %v228_v60  ;;  %v595_v63 = vunpack.c.h.s8.bf16 %v227_v55  ;;  %v725_v55 = vunpack.c.h.s8.bf16 %v293_v42 }
  0xd9   :  { %1070 = vmatprep.subr.bf16.mxu0 %v437_v0  ;;  %v597_v0 = vunpack.c.h.s8.bf16 %v229_v56  ;;  %v309_v56 = vld [vmem:[#allocation2 + $0x5a8] sm:$0xff] }
  0xdb   :  { %989 = vmatpush1.bf16.msra.mxu1 %v434_v7  ;;  %v594_v7 = vunpack.c.h.s8.bf16 %v226_v58  ;;  %v724_v58 = vunpack.c.h.s8.bf16 %v292_v48 }
  0xdc   :  { %1071 = vmatpush1.bf16.msra.mxu0 %v436_v8  ;;  %990 = vmatprep.subr.bf16.mxu1 %v451_v9  ;;  %v596_v8 = vunpack.c.h.s8.bf16 %v228_v60  ;;  %v611_v9 = vunpack.c.l.s8.bf16 %v243_v2  ;;  %v308_v60 = vld [vmem:[#allocation2 + $0x5a0] sm:$0xff] }
  0xdd   :  { %1072 = vmatprep.subr.bf16.mxu0 %v453_v11  ;;  %v613_v11 = vunpack.c.l.s8.bf16 %v245_v4 }
  0xdf   :  { %991 = vmatpush1.bf16.msra.mxu1 %v450_v13  ;;  %v610_v13 = vunpack.c.l.s8.bf16 %v242_v10 }
  0xe0   :  { %1073 = vmatpush1.bf16.msra.mxu0 %v452_v14  ;;  %992 = vmatprep.subr.bf16.mxu1 %v467_v15  ;;  %v612_v14 = vunpack.c.l.s8.bf16 %v244_v12  ;;  %v627_v15 = vunpack.c.h.s8.bf16 %v243_v2  ;;  %v757_v2 = vunpack.c.h.s8.bf16 %v309_v56 }
  0xe1   :  { %1074 = vmatprep.subr.bf16.mxu0 %v469_v16  ;;  %v629_v16 = vunpack.c.h.s8.bf16 %v245_v4  ;;  %v325_v4 = vld [vmem:[#allocation2 + $0x628] sm:$0xff] }
  0xe3   :  { %993 = vmatpush1.bf16.msra.mxu1 %v466_v19  ;;  %v626_v19 = vunpack.c.h.s8.bf16 %v242_v10  ;;  %v756_v10 = vunpack.c.h.s8.bf16 %v308_v60 }
  0xe4   :  { %1075 = vmatpush1.bf16.msra.mxu0 %v468_v20  ;;  %994 = vmatprep.subr.bf16.mxu1 %v483_v21  ;;  %v628_v20 = vunpack.c.h.s8.bf16 %v244_v12  ;;  %v643_v21 = vunpack.c.l.s8.bf16 %v259_v17  ;;  %v324_v12 = vld [vmem:[#allocation2 + $0x620] sm:$0xff] }
  0xe5   :  { %1076 = vmatprep.subr.bf16.mxu0 %v485_v23  ;;  %v645_v23 = vunpack.c.l.s8.bf16 %v261_v18  ;;  %v341_v18 = vld [vmem:[#allocation2 + $0x6a8] sm:$0xff] }
  0xe7   :  { %995 = vmatpush1.bf16.msra.mxu1 %v482_v25  ;;  %v642_v25 = vunpack.c.l.s8.bf16 %v258_v22 }
  0xe8   :  { %1077 = vmatpush1.bf16.msra.mxu0 %v484_v26  ;;  %996 = vmatprep.subr.bf16.mxu1 %v499_v27  ;;  %v659_v26 = vunpack.c.h.s8.bf16 %v259_v17  ;;  %v644_v27 = vunpack.c.l.s8.bf16 %v260_v24  ;;  %v789_v17 = vunpack.c.h.s8.bf16 %v325_v4  ;;  %v340_v24 = vld [vmem:[#allocation2 + $0x6a0] sm:$0xff] }
  0xe9   :  { %1078 = vmatprep.subr.bf16.mxu0 %v501_v28  ;;  %v275_v28 = vld [vmem:[#allocation2 + $0x498] sm:$0xff] }
  0xeb   :  { %997 = vmatpush1.bf16.msra.mxu1 %v498_v31  ;;  %v658_v31 = vunpack.c.h.s8.bf16 %v258_v22  ;;  %v788_v22 = vunpack.c.h.s8.bf16 %v324_v12 }
  0xec   :  { %1079 = vmatpush1.bf16.msra.mxu0 %v500_v32  ;;  %998 = vmatprep.subr.bf16.mxu1 %v515_v33  ;;  %v675_v32 = vunpack.c.l.s8.bf16 %v275_v28  ;;  %v274_v33 = vld [vmem:[#allocation2 + $0x490] sm:$0xff] }
  0xed   :  { %1080 = vmatprep.subr.bf16.mxu0 %v517_v35  ;;  %v677_v35 = vunpack.c.l.s8.bf16 %v277_v30  ;;  %v357_v30 = vld [vmem:[#allocation2 + $0x728] sm:$0xff] }
  0xef   :  { %999 = vmatpush1.bf16.msra.mxu1 %v514_v37  ;;  %v674_v37 = vunpack.c.l.s8.bf16 %v274_v33 }
  0xf0   :  { %1081 = vmatpush1.bf16.msra.mxu0 %v516_v38  ;;  %1000 = vmatprep.subr.bf16.mxu1 %v531_v39  ;;  %v691_v38 = vunpack.c.h.s8.bf16 %v275_v28  ;;  %v676_v39 = vunpack.c.l.s8.bf16 %v276_v36  ;;  %v355_v28 = vld [vmem:[#allocation2 + $0x718] sm:$0xff]  ;;  %v356_v36 = vld [vmem:[#allocation2 + $0x720] sm:$0xff] }
  0xf1   :  { %1082 = vmatprep.subr.bf16.mxu0 %v533_v40  ;;  %v291_v40 = vld [vmem:[#allocation2 + $0x518] sm:$0xff] }
  0xf3   :  { %1001 = vmatpush1.bf16.msra.mxu1 %v530_v43  ;;  %v690_v43 = vunpack.c.h.s8.bf16 %v274_v33  ;;  %v354_v33 = vld [vmem:[#allocation2 + $0x710] sm:$0xff] }
  0xf4   :  { %1083 = vmatpush1.bf16.msra.mxu0 %v532_v44  ;;  %1002 = vmatprep.subr.bf16.mxu1 %v547_v45  ;;  %v707_v44 = vunpack.c.l.s8.bf16 %v291_v40  ;;  %v290_v45 = vld [vmem:[#allocation2 + $0x510] sm:$0xff] }
  0xf5   :  { %1084 = vmatprep.subr.bf16.mxu0 %v549_v47  ;;  %v709_v47 = vunpack.c.l.s8.bf16 %v293_v42  ;;  %v373_v42 = vld [vmem:[#allocation2 + $0x7a8] sm:$0xff] }
  0xf7   :  { %1003 = vmatpush1.bf16.msra.mxu1 %v546_v51  ;;  %v706_v51 = vunpack.c.l.s8.bf16 %v290_v45 }
  0xf8   :  { %1085 = vmatpush1.bf16.msra.mxu0 %v548_v52  ;;  %1004 = vmatprep.subr.bf16.mxu1 %v563_v53  ;;  %v723_v52 = vunpack.c.h.s8.bf16 %v291_v40  ;;  %v708_v53 = vunpack.c.l.s8.bf16 %v292_v48  ;;  %v371_v40 = vld [vmem:[#allocation2 + $0x798] sm:$0xff]  ;;  %v372_v48 = vld [vmem:[#allocation2 + $0x7a0] sm:$0xff] }
  0xf9   :  { %1086 = vmatprep.subr.bf16.mxu0 %v565_v54  ;;  %v307_v54 = vld [vmem:[#allocation2 + $0x598] sm:$0xff] }
  0xfb   :  { %1005 = vmatpush1.bf16.msra.mxu1 %v562_v1  ;;  %v722_v1 = vunpack.c.h.s8.bf16 %v290_v45  ;;  %v370_v45 = vld [vmem:[#allocation2 + $0x790] sm:$0xff] }
  0xfc   :  { %1087 = vmatpush1.bf16.msra.mxu0 %v564_v57  ;;  %1006 = vmatprep.subr.bf16.mxu1 %v579_v3  ;;  %v739_v57 = vunpack.c.l.s8.bf16 %v307_v54  ;;  %v306_v3 = vld [vmem:[#allocation2 + $0x590] sm:$0xff] }
  0xfd   :  { %1088 = vmatprep.subr.bf16.mxu0 %v581_v59  ;;  %v741_v59 = vunpack.c.l.s8.bf16 %v309_v56  ;;  %v137_v56 = vld [vmem:[#allocation2 + $0x48] sm:$0xff] }
  0xff   :  { %1007 = vmatpush1.bf16.msra.mxu1 %v578_v61  ;;  %v738_v61 = vunpack.c.l.s8.bf16 %v306_v3 }
 0x100   :  { %1089 = vmatpush1.bf16.msra.mxu0 %v580_v62  ;;  %1008 = vmatprep.subr.bf16.mxu1 %v595_v63  ;;  %v755_v62 = vunpack.c.h.s8.bf16 %v307_v54  ;;  %v740_v63 = vunpack.c.l.s8.bf16 %v308_v60  ;;  %v135_v54 = vld [vmem:[#allocation2 + $0x38] sm:$0xff]  ;;  %v136_v60 = vld [vmem:[#allocation2 + $0x40] sm:$0xff] }
 0x101   :  { %1090 = vmatprep.subr.bf16.mxu0 %v597_v0  ;;  %v323_v0 = vld [vmem:[#allocation2 + $0x618] sm:$0xff] }
 0x103   :  { %1009 = vmatpush1.bf16.msra.mxu1 %v594_v7  ;;  %v754_v7 = vunpack.c.h.s8.bf16 %v306_v3  ;;  %v134_v3 = vld [vmem:[#allocation2 + $0x30] sm:$0xff] }
 0x104   :  { %1091 = vmatpush1.bf16.msra.mxu0 %v596_v8  ;;  %1010 = vmatprep.subr.bf16.mxu1 %v611_v9  ;;  %v771_v8 = vunpack.c.l.s8.bf16 %v323_v0  ;;  %v322_v9 = vld [vmem:[#allocation2 + $0x610] sm:$0xff] }
 0x105   :  { %1092 = vmatprep.subr.bf16.mxu0 %v613_v11  ;;  %v773_v11 = vunpack.c.l.s8.bf16 %v325_v4  ;;  %v153_v4 = vld [vmem:[#allocation2 + $0xc8] sm:$0xff] }
 0x107   :  { %1011 = vmatpush1.bf16.msra.mxu1 %v610_v13  ;;  %v770_v13 = vunpack.c.l.s8.bf16 %v322_v9 }
 0x108   :  { %1093 = vmatpush1.bf16.msra.mxu0 %v612_v14  ;;  %1012 = vmatprep.subr.bf16.mxu1 %v627_v15  ;;  %v787_v14 = vunpack.c.h.s8.bf16 %v323_v0  ;;  %v772_v15 = vunpack.c.l.s8.bf16 %v324_v12  ;;  %v151_v0 = vld [vmem:[#allocation2 + $0xb8] sm:$0xff]  ;;  %v152_v12 = vld [vmem:[#allocation2 + $0xc0] sm:$0xff] }
 0x109   :  { %1094 = vmatprep.subr.bf16.mxu0 %v629_v16  ;;  %v339_v16 = vld [vmem:[#allocation2 + $0x698] sm:$0xff] }
 0x10b   :  { %1013 = vmatpush1.bf16.msra.mxu1 %v626_v19  ;;  %v786_v19 = vunpack.c.h.s8.bf16 %v322_v9  ;;  %v150_v9 = vld [vmem:[#allocation2 + $0xb0] sm:$0xff] }
 0x10c   :  { %1095 = vmatpush1.bf16.msra.mxu0 %v628_v20  ;;  %1023 = vmatprep.subr.bf16.mxu1 %v643_v21  ;;  %v803_v20 = vunpack.c.l.s8.bf16 %v339_v16  ;;  %v338_v21 = vld [vmem:[#allocation2 + $0x690] sm:$0xff] }
 0x10d   :  { %1105 = vmatprep.subr.bf16.mxu0 %v645_v23  ;;  %v805_v23 = vunpack.c.l.s8.bf16 %v341_v18 }
 0x10e   :  { %1015 = vmatmul.mubr.bf16.vlgmr.msra.gmra.mrb[4].mxu1 %v6421_v49 }
 0x10f   :  { %1097 = vmatmul.mubr.bf16.vlgmr.msra.gmra.mrb[4].mxu0 %v6421_v49  ;;  %1024 = vmatpush1.bf16.msra.mxu1 %v642_v25  ;;  %v802_v25 = vunpack.c.l.s8.bf16 %v338_v21 }
 0x110   :  { %1055 = vmatprep.mubr.bf16.mxu1 %v6415_v6  ;;  %1025 = vmatprep.subr.bf16.mxu1 %v659_v26  ;;  %v819_v26 = vunpack.c.h.s8.bf16 %v339_v16  ;;  %v167_v16 = vld [vmem:[#allocation2 + $0x138] sm:$0xff] }
 0x111   :  { %1106 = vmatpush1.bf16.msra.mxu0 %v644_v27  ;;  %1137 = vmatprep.mubr.bf16.mxu0 %v6415_v6  ;;  %v804_v27 = vunpack.c.l.s8.bf16 %v340_v24 }
 0x112   :  { %1107 = vmatprep.subr.bf16.mxu0 %v661_v29  ;;  %v821_v29 = vunpack.c.h.s8.bf16 %v341_v18  ;;  %v169_v18 = vld [vmem:[#allocation2 + $0x148] sm:$0xff] }
 0x113   :  { %1026 = vmatpush1.bf16.msra.mxu1 %v658_v31  ;;  %v818_v31 = vunpack.c.h.s8.bf16 %v338_v21  ;;  %v166_v21 = vld [vmem:[#allocation2 + $0x130] sm:$0xff] }
 0x114   :  { %1027 = vmatprep.subr.bf16.mxu1 %v675_v32  ;;  %v835_v32 = vunpack.c.l.s8.bf16 %v355_v28 }
 0x115   :  { %1108 = vmatpush1.bf16.msra.mxu0 %v660_v34  ;;  %v820_v34 = vunpack.c.h.s8.bf16 %v340_v24  ;;  %v168_v24 = vld [vmem:[#allocation2 + $0x140] sm:$0xff] }
 0x116   :  { %1109 = vmatprep.subr.bf16.mxu0 %v677_v35  ;;  %v837_v35 = vunpack.c.l.s8.bf16 %v357_v30 }
 0x117   :  { %1028 = vmatpush1.bf16.msra.mxu1 %v674_v37  ;;  %v834_v37 = vunpack.c.l.s8.bf16 %v354_v33 }
 0x118   :  { %1029 = vmatprep.subr.bf16.mxu1 %v691_v38  ;;  %v851_v38 = vunpack.c.h.s8.bf16 %v355_v28  ;;  %v183_v28 = vld [vmem:[#allocation2 + $0x1b8] sm:$0xff] }
 0x119   :  { %1110 = vmatpush1.bf16.msra.mxu0 %v676_v39  ;;  %v836_v39 = vunpack.c.l.s8.bf16 %v356_v36 }
 0x11a   :  { %1111 = vmatprep.subr.bf16.mxu0 %v693_v41  ;;  %v853_v41 = vunpack.c.h.s8.bf16 %v357_v30  ;;  %v185_v30 = vld [vmem:[#allocation2 + $0x1c8] sm:$0xff] }
 0x11b   :  { %1030 = vmatpush1.bf16.msra.mxu1 %v690_v43  ;;  %v850_v43 = vunpack.c.h.s8.bf16 %v354_v33  ;;  %v182_v33 = vld [vmem:[#allocation2 + $0x1b0] sm:$0xff] }
 0x11c   :  { %1031 = vmatprep.subr.bf16.mxu1 %v707_v44  ;;  %v867_v44 = vunpack.c.l.s8.bf16 %v371_v40 }
 0x11d   :  { %1112 = vmatpush1.bf16.msra.mxu0 %v692_v46  ;;  %v852_v46 = vunpack.c.h.s8.bf16 %v356_v36  ;;  %v184_v36 = vld [vmem:[#allocation2 + $0x1c0] sm:$0xff] }
 0x11e   :  { %1113 = vmatprep.subr.bf16.mxu0 %v709_v47  ;;  %v869_v47 = vunpack.c.l.s8.bf16 %v373_v42 }
 0x11f   :  { %1032 = vmatpush1.bf16.msra.mxu1 %v706_v51  ;;  %v866_v51 = vunpack.c.l.s8.bf16 %v370_v45 }
 0x120   :  { %1033 = vmatprep.subr.bf16.mxu1 %v723_v52  ;;  %v883_v52 = vunpack.c.h.s8.bf16 %v371_v40  ;;  %v199_v40 = vld [vmem:[#allocation2 + $0x238] sm:$0xff] }
 0x121   :  { %1114 = vmatpush1.bf16.msra.mxu0 %v708_v53  ;;  %v868_v53 = vunpack.c.l.s8.bf16 %v372_v48 }
 0x122   :  { %1115 = vmatprep.subr.bf16.mxu0 %v725_v55  ;;  %v885_v55 = vunpack.c.h.s8.bf16 %v373_v42  ;;  %v201_v42 = vld [vmem:[#allocation2 + $0x248] sm:$0xff] }
 0x123   :  { %1034 = vmatpush1.bf16.msra.mxu1 %v722_v1  ;;  %v882_v1 = vunpack.c.h.s8.bf16 %v370_v45  ;;  %v198_v45 = vld [vmem:[#allocation2 + $0x230] sm:$0xff] }
 0x124   :  { %1035 = vmatprep.subr.bf16.mxu1 %v739_v57  ;;  %v391_v57 = vunpack.c.l.s8.bf16 %v135_v54 }
 0x125   :  { %1116 = vmatpush1.bf16.msra.mxu0 %v724_v58  ;;  %v884_v58 = vunpack.c.h.s8.bf16 %v372_v48  ;;  %v200_v48 = vld [vmem:[#allocation2 + $0x240] sm:$0xff] }
 0x126   :  { %1117 = vmatprep.subr.bf16.mxu0 %v741_v59  ;;  %v393_v59 = vunpack.c.l.s8.bf16 %v137_v56 }
 0x127   :  { %1036 = vmatpush1.bf16.msra.mxu1 %v738_v61  ;;  %v390_v61 = vunpack.c.l.s8.bf16 %v134_v3 }
 0x128   :  { %1037 = vmatprep.subr.bf16.mxu1 %v755_v62  ;;  %v407_v62 = vunpack.c.h.s8.bf16 %v135_v54  ;;  %v215_v54 = vld [vmem:[#allocation2 + $0x2b8] sm:$0xff] }
 0x129   :  { %1118 = vmatpush1.bf16.msra.mxu0 %v740_v63  ;;  %v392_v63 = vunpack.c.l.s8.bf16 %v136_v60 }
 0x12a   :  { %1119 = vmatprep.subr.bf16.mxu0 %v757_v2  ;;  %v409_v2 = vunpack.c.h.s8.bf16 %v137_v56  ;;  %v217_v56 = vld [vmem:[#allocation2 + $0x2c8] sm:$0xff] }
 0x12b   :  { %1038 = vmatpush1.bf16.msra.mxu1 %v754_v7  ;;  %v406_v7 = vunpack.c.h.s8.bf16 %v134_v3  ;;  %v214_v3 = vld [vmem:[#allocation2 + $0x2b0] sm:$0xff] }
 0x12c   :  { %1039 = vmatprep.subr.bf16.mxu1 %v771_v8  ;;  %v423_v8 = vunpack.c.l.s8.bf16 %v151_v0 }
 0x12d   :  { %1120 = vmatpush1.bf16.msra.mxu0 %v756_v10  ;;  %v408_v10 = vunpack.c.h.s8.bf16 %v136_v60  ;;  %v216_v60 = vld [vmem:[#allocation2 + $0x2c0] sm:$0xff] }
 0x12e   :  { %1121 = vmatprep.subr.bf16.mxu0 %v773_v11  ;;  %v425_v11 = vunpack.c.l.s8.bf16 %v153_v4 }
 0x12f   :  { %1040 = vmatpush1.bf16.msra.mxu1 %v770_v13  ;;  %v422_v13 = vunpack.c.l.s8.bf16 %v150_v9 }
 0x130   :  { %1041 = vmatprep.subr.bf16.mxu1 %v787_v14  ;;  %v439_v14 = vunpack.c.h.s8.bf16 %v151_v0  ;;  %v231_v0 = vld [vmem:[#allocation2 + $0x338] sm:$0xff] }
 0x131   :  { %1122 = vmatpush1.bf16.msra.mxu0 %v772_v15  ;;  %v424_v15 = vunpack.c.l.s8.bf16 %v152_v12 }
 0x132   :  { %1123 = vmatprep.subr.bf16.mxu0 %v789_v17  ;;  %v441_v17 = vunpack.c.h.s8.bf16 %v153_v4  ;;  %v233_v4 = vld [vmem:[#allocation2 + $0x348] sm:$0xff] }
 0x133   :  { %1042 = vmatpush1.bf16.msra.mxu1 %v786_v19  ;;  %v438_v19 = vunpack.c.h.s8.bf16 %v150_v9  ;;  %v230_v9 = vld [vmem:[#allocation2 + $0x330] sm:$0xff] }
 0x134   :  { %1043 = vmatprep.subr.bf16.mxu1 %v803_v20  ;;  %v455_v20 = vunpack.c.l.s8.bf16 %v167_v16 }
 0x135   :  { %1124 = vmatpush1.bf16.msra.mxu0 %v788_v22  ;;  %v440_v22 = vunpack.c.h.s8.bf16 %v152_v12  ;;  %v232_v12 = vld [vmem:[#allocation2 + $0x340] sm:$0xff] }
 0x136   :  { %1125 = vmatprep.subr.bf16.mxu0 %v805_v23  ;;  %v457_v23 = vunpack.c.l.s8.bf16 %v169_v18 }
 0x137   :  { %1044 = vmatpush1.bf16.msra.mxu1 %v802_v25  ;;  %v454_v25 = vunpack.c.l.s8.bf16 %v166_v21 }
 0x138   :  { %1045 = vmatprep.subr.bf16.mxu1 %v819_v26  ;;  %v471_v26 = vunpack.c.h.s8.bf16 %v167_v16  ;;  %v247_v16 = vld [vmem:[#allocation2 + $0x3b8] sm:$0xff] }
 0x139   :  { %1126 = vmatpush1.bf16.msra.mxu0 %v804_v27  ;;  %v456_v27 = vunpack.c.l.s8.bf16 %v168_v24 }
 0x13a   :  { %1127 = vmatprep.subr.bf16.mxu0 %v821_v29  ;;  %v473_v29 = vunpack.c.h.s8.bf16 %v169_v18  ;;  %v249_v18 = vld [vmem:[#allocation2 + $0x3c8] sm:$0xff] }
 0x13b   :  { %1046 = vmatpush1.bf16.msra.mxu1 %v818_v31  ;;  %v470_v31 = vunpack.c.h.s8.bf16 %v166_v21  ;;  %v246_v21 = vld [vmem:[#allocation2 + $0x3b0] sm:$0xff] }
 0x13c   :  { %1047 = vmatprep.subr.bf16.mxu1 %v835_v32  ;;  %v487_v32 = vunpack.c.l.s8.bf16 %v183_v28 }
 0x13d   :  { %1128 = vmatpush1.bf16.msra.mxu0 %v820_v34  ;;  %v472_v34 = vunpack.c.h.s8.bf16 %v168_v24  ;;  %v248_v24 = vld [vmem:[#allocation2 + $0x3c0] sm:$0xff] }
 0x13e   :  { %1129 = vmatprep.subr.bf16.mxu0 %v837_v35  ;;  %v489_v35 = vunpack.c.l.s8.bf16 %v185_v30 }
 0x13f   :  { %1048 = vmatpush1.bf16.msra.mxu1 %v834_v37  ;;  %v486_v37 = vunpack.c.l.s8.bf16 %v182_v33 }
 0x140   :  { %1049 = vmatprep.subr.bf16.mxu1 %v851_v38  ;;  %v503_v38 = vunpack.c.h.s8.bf16 %v183_v28  ;;  %v263_v28 = vld [vmem:[#allocation2 + $0x438] sm:$0xff] }
 0x141   :  { %1130 = vmatpush1.bf16.msra.mxu0 %v836_v39  ;;  %v488_v39 = vunpack.c.l.s8.bf16 %v184_v36 }
 0x142   :  { %1131 = vmatprep.subr.bf16.mxu0 %v853_v41  ;;  %v505_v41 = vunpack.c.h.s8.bf16 %v185_v30  ;;  %v265_v30 = vld [vmem:[#allocation2 + $0x448] sm:$0xff] }
 0x143   :  { %1050 = vmatpush1.bf16.msra.mxu1 %v850_v43  ;;  %v502_v43 = vunpack.c.h.s8.bf16 %v182_v33  ;;  %v262_v33 = vld [vmem:[#allocation2 + $0x430] sm:$0xff] }
 0x144   :  { %1051 = vmatprep.subr.bf16.mxu1 %v867_v44  ;;  %v519_v44 = vunpack.c.l.s8.bf16 %v199_v40 }
 0x145   :  { %1132 = vmatpush1.bf16.msra.mxu0 %v852_v46  ;;  %v504_v46 = vunpack.c.h.s8.bf16 %v184_v36  ;;  %v264_v36 = vld [vmem:[#allocation2 + $0x440] sm:$0xff] }
 0x146   :  { %1133 = vmatprep.subr.bf16.mxu0 %v869_v47  ;;  %v521_v47 = vunpack.c.l.s8.bf16 %v201_v42 }
 0x147   :  { %1052 = vmatpush1.bf16.msra.mxu1 %v866_v51  ;;  %v518_v51 = vunpack.c.l.s8.bf16 %v198_v45 }
 0x148   :  { %1053 = vmatprep.subr.bf16.mxu1 %v883_v52  ;;  %v535_v52 = vunpack.c.h.s8.bf16 %v199_v40  ;;  %v648_v40 = vunpack.c.l.s8.bf16 %v264_v36 }
 0x149   :  { %1134 = vmatpush1.bf16.msra.mxu0 %v868_v53  ;;  %v520_v53 = vunpack.c.l.s8.bf16 %v200_v48 }
 0x14a   :  { %1135 = vmatprep.subr.bf16.mxu0 %v885_v55  ;;  %v537_v55 = vunpack.c.h.s8.bf16 %v201_v42  ;;  %v662_v42 = vunpack.c.h.s8.bf16 %v262_v33 }
 0x14b   :  { %1054 = vmatpush1.bf16.msra.mxu1 %v882_v1  ;;  %v534_v1 = vunpack.c.h.s8.bf16 %v198_v45  ;;  %v278_v45 = vld [vmem:[#allocation2 + $0x4b0] sm:$0xff] }
 0x14c   :  { %1146 = vmatprep.subr.bf16.mxu1 %v391_v57  ;;  %v551_v57 = vunpack.c.l.s8.bf16 %v215_v54 }
 0x14d   :  { %1136 = vmatpush1.bf16.msra.mxu0 %v884_v58  ;;  %v536_v58 = vunpack.c.h.s8.bf16 %v200_v48  ;;  %v280_v48 = vld [vmem:[#allocation2 + $0x4c0] sm:$0xff] }
 0x14e   :  { %1228 = vmatprep.subr.bf16.mxu0 %v393_v59  ;;  %1056 = vmatmul.mubr.bf16.vlgmr.msra.gmra.mrb[4].mxu1 %v6425_v50  ;;  %v553_v59 = vunpack.c.l.s8.bf16 %v217_v56 }
 0x14f   :  { %1147 = vmatpush1.bf16.msra.mxu1 %v390_v61  ;;  %1178 = vmatprep.mubr.bf16.mxu1 %v6413_v5  ;;  %v550_v61 = vunpack.c.l.s8.bf16 %v214_v3 }
 0x150   :  { %1138 = vmatmul.mubr.bf16.vlgmr.msra.gmra.mrb[4].mxu0 %v6425_v50  ;;  %1148 = vmatprep.subr.bf16.mxu1 %v407_v62  ;;  %v567_v62 = vunpack.c.h.s8.bf16 %v215_v54  ;;  %v295_v54 = vld [vmem:[#allocation2 + $0x538] sm:$0xff] }
 0x151   :  { %1229 = vmatpush1.bf16.msra.mxu0 %v392_v63  ;;  %1260 = vmatprep.mubr.bf16.mxu0 %v6413_v5  ;;  %v552_v63 = vunpack.c.l.s8.bf16 %v216_v60 }
 0x152   :  { %1230 = vmatprep.subr.bf16.mxu0 %v409_v2  ;;  %v569_v2 = vunpack.c.h.s8.bf16 %v217_v56 }
 0x153   :  { %1149 = vmatpush1.bf16.msra.mxu1 %v406_v7  ;;  %v566_v7 = vunpack.c.h.s8.bf16 %v214_v3  ;;  %v711_v3 = vunpack.c.l.s8.bf16 %v295_v54 }
 0x154   :  { %1150 = vmatprep.subr.bf16.mxu1 %v423_v8  ;;  %v583_v8 = vunpack.c.l.s8.bf16 %v231_v0 }
 0x155   :  { %1231 = vmatpush1.bf16.msra.mxu0 %v408_v10  ;;  %v568_v10 = vunpack.c.h.s8.bf16 %v216_v60  ;;  %v696_v60 = vunpack.c.h.s8.bf16 %v280_v48 }
 0x156   :  { %1232 = vmatprep.subr.bf16.mxu0 %v425_v11  ;;  %v585_v11 = vunpack.c.l.s8.bf16 %v233_v4 }
 0x157   :  { %1151 = vmatpush1.bf16.msra.mxu1 %v422_v13  ;;  %v582_v13 = vunpack.c.l.s8.bf16 %v230_v9 }
 0x158   :  { %1152 = vmatprep.subr.bf16.mxu1 %v439_v14  ;;  %v599_v14 = vunpack.c.h.s8.bf16 %v231_v0 }
 0x159   :  { %1233 = vmatpush1.bf16.msra.mxu0 %v424_v15  ;;  %v584_v15 = vunpack.c.l.s8.bf16 %v232_v12 }
 0x15a   :  { %1234 = vmatprep.subr.bf16.mxu0 %v441_v17  ;;  %v601_v17 = vunpack.c.h.s8.bf16 %v233_v4  ;;  %v6448_v4 = vld [vmem:[#allocation12] sm:$0xff] }
 0x15b   :  { %1153 = vmatpush1.bf16.msra.mxu1 %v438_v19  ;;  %v598_v19 = vunpack.c.h.s8.bf16 %v230_v9 }
 0x15c   :  { %1154 = vmatprep.subr.bf16.mxu1 %v455_v20  ;;  %v615_v20 = vunpack.c.l.s8.bf16 %v247_v16 }
 0x15d   :  { %1235 = vmatpush1.bf16.msra.mxu0 %v440_v22  ;;  %v600_v22 = vunpack.c.h.s8.bf16 %v232_v12 }
 0x15e   :  { %1236 = vmatprep.subr.bf16.mxu0 %v457_v23  ;;  %v617_v23 = vunpack.c.l.s8.bf16 %v249_v18 }
 0x15f   :  { %1155 = vmatpush1.bf16.msra.mxu1 %v454_v25  ;;  %v614_v25 = vunpack.c.l.s8.bf16 %v246_v21 }
 0x160   :  { %1156 = vmatprep.subr.bf16.mxu1 %v471_v26  ;;  %v631_v26 = vunpack.c.h.s8.bf16 %v247_v16  ;;  %v310_v16 = vld [vmem:[#allocation2 + $0x5b0] sm:$0xff] }
 0x161   :  { %1237 = vmatpush1.bf16.msra.mxu0 %v456_v27  ;;  %v616_v27 = vunpack.c.l.s8.bf16 %v248_v24 }
 0x162   :  { %1238 = vmatprep.subr.bf16.mxu0 %v473_v29  ;;  %v633_v29 = vunpack.c.h.s8.bf16 %v249_v18 }
 0x163   :  { %1157 = vmatpush1.bf16.msra.mxu1 %v470_v31  ;;  %v630_v31 = vunpack.c.h.s8.bf16 %v246_v21 }
 0x164   :  { %1158 = vmatprep.subr.bf16.mxu1 %v487_v32  ;;  %v647_v32 = vunpack.c.l.s8.bf16 %v263_v28 }
 0x165   :  { %1239 = vmatpush1.bf16.msra.mxu0 %v472_v34  ;;  %v632_v34 = vunpack.c.h.s8.bf16 %v248_v24 }
 0x166   :  { %1240 = vmatprep.subr.bf16.mxu0 %v489_v35  ;;  %v649_v35 = vunpack.c.l.s8.bf16 %v265_v30 }
 0x167   :  { %1159 = vmatpush1.bf16.msra.mxu1 %v486_v37  ;;  %v646_v37 = vunpack.c.l.s8.bf16 %v262_v33 }
 0x168   :  { %1160 = vmatprep.subr.bf16.mxu1 %v503_v38  ;;  %v663_v38 = vunpack.c.h.s8.bf16 %v263_v28 }
 0x169   :  { %1241 = vmatpush1.bf16.msra.mxu0 %v488_v39  ;;  %v279_v39 = vld [vmem:[#allocation2 + $0x4b8] sm:$0xff] }
 0x16a   :  { %1242 = vmatprep.subr.bf16.mxu0 %v505_v41  ;;  %v665_v41 = vunpack.c.h.s8.bf16 %v265_v30  ;;  %v742_v30 = vunpack.c.l.s8.bf16 %v310_v16 }
 0x16b   :  { %1161 = vmatpush1.bf16.msra.mxu1 %v502_v43  ;;  %v281_v43 = vld [vmem:[#allocation2 + $0x4c8] sm:$0xff] }
 0x16c   :  { %1162 = vmatprep.subr.bf16.mxu1 %v519_v44  ;;  %v679_v44 = vunpack.c.l.s8.bf16 %v279_v39  ;;  %v697_v56 = vunpack.c.h.s8.bf16 %v281_v43 }
 0x16d   :  { %1243 = vmatpush1.bf16.msra.mxu0 %v504_v46  ;;  %v664_v46 = vunpack.c.h.s8.bf16 %v264_v36 }
 0x16e   :  { %1244 = vmatprep.subr.bf16.mxu0 %v521_v47  ;;  %v681_v47 = vunpack.c.l.s8.bf16 %v281_v43  ;;  %v329_v43 = vld [vmem:[#allocation2 + $0x648] sm:$0xff] }
 0x16f   :  { %1163 = vmatpush1.bf16.msra.mxu1 %v518_v51  ;;  %v678_v51 = vunpack.c.l.s8.bf16 %v278_v45 }
 0x170   :  { %1164 = vmatprep.subr.bf16.mxu1 %v535_v52  ;;  %v695_v52 = vunpack.c.h.s8.bf16 %v279_v39 }
 0x171   :  { %1245 = vmatpush1.bf16.msra.mxu0 %v520_v53  ;;  %v1562_v53 = vlaneseq }
 0x172   :  { %1246 = vmatprep.subr.bf16.mxu0 %v537_v55  ;;  %v680_v55 = vunpack.c.l.s8.bf16 %v280_v48 }
 0x173   :  { %1165 = vmatpush1.bf16.msra.mxu1 %v534_v1  ;;  %v694_v1 = vunpack.c.h.s8.bf16 %v278_v45 }
 0x174   :  { %1166 = vmatprep.subr.bf16.mxu1 %v551_v57  ;;  %v297_v57 = vld [vmem:[#allocation2 + $0x548] sm:$0xff] }
 0x175   :  { %1247 = vmatpush1.bf16.msra.mxu0 %v536_v58  ;;  %v294_v58 = vld [vmem:[#allocation2 + $0x530] sm:$0xff] }
 0x176   :  { %1248 = vmatprep.subr.bf16.mxu0 %v553_v59  ;;  %v6443_v59 = vshrl.u32 %v1562_v53, 7  ;;  %v726_v12 = vunpack.c.h.s8.bf16 %v294_v58  ;;  %v328_v53 = vld [vmem:[#allocation2 + $0x640] sm:$0xff] }
 0x177   :  { %1167 = vmatpush1.bf16.msra.mxu1 %v550_v61  ;;  %v713_v61 = vunpack.c.l.s8.bf16 %v297_v57 }
 0x178   :  { %1168 = vmatprep.subr.bf16.mxu1 %v567_v62  ;;  %v296_v62 = vld [vmem:[#allocation2 + $0x540] sm:$0xff]  ;;  %v6446_v0 = vsub.s32 0, %v6443_v59 }
 0x179   :  { %1249 = vmatpush1.bf16.msra.mxu0 %v552_v63  ;;  %v710_v63 = vunpack.c.l.s8.bf16 %v294_v58  ;;  %v712_v9 = vunpack.c.l.s8.bf16 %v296_v62 }
 0x17a   :  { %1250 = vmatprep.subr.bf16.mxu0 %v569_v2  ;;  %v727_v2 = vunpack.c.h.s8.bf16 %v295_v54 }
 0x17b   :  { %1169 = vmatpush1.bf16.msra.mxu1 %v566_v7  ;;  %v6451_v7 = vsub.s32 1, %v6443_v59 }
 0x17c   :  { %1170 = vmatprep.subr.bf16.mxu1 %v583_v8  ;;  %v311_v8 = vld [vmem:[#allocation2 + $0x5b8] sm:$0xff] }
 0x17d   :  { %1251 = vmatpush1.bf16.msra.mxu0 %v568_v10  ;;  %v729_v10 = vunpack.c.h.s8.bf16 %v297_v57  ;;  %v776_v57 = vunpack.c.l.s8.bf16 %v328_v53 }
 0x17e   :  { %1252 = vmatprep.subr.bf16.mxu0 %v585_v11  ;;  %v6453_v11 = vld [vmem:[#allocation13] sm:$0xff] }
 0x17f   :  { %1171 = vmatpush1.bf16.msra.mxu1 %v582_v13  ;;  %v313_v13 = vld [vmem:[#allocation2 + $0x5c8] sm:$0xff]  ;;  %v1667_v28 = vrot.slane %v6453_v11, %v6451_v7 }
 0x180   :  { %1172 = vmatprep.subr.bf16.mxu1 %v599_v14  ;;  %v1565_v14 = vrot.slane %v6448_v4, %v6446_v0 }
 0x181   :  { %1253 = vmatpush1.bf16.msra.mxu0 %v584_v15  ;;  %v743_v15 = vunpack.c.l.s8.bf16 %v311_v8 }
 0x182   :  { %1254 = vmatprep.subr.bf16.mxu0 %v601_v17 }
 0x183   :  { %1173 = vmatpush1.bf16.msra.mxu1 %v598_v19  ;;  %v1569_v19 = vrot.slane %v6448_v4, %v6451_v7 }
 0x184   :  { %1174 = vmatprep.subr.bf16.mxu1 %v615_v20  ;;  %v728_v20 = vunpack.c.h.s8.bf16 %v296_v62  ;;  %v342_v62 = vld [vmem:[#allocation2 + $0x6b0] sm:$0xff] }
 0x185   :  { %1255 = vmatpush1.bf16.msra.mxu0 %v600_v22  ;;  %v1663_v22 = vrot.slane %v6453_v11, %v6446_v0 }
 0x186   :  { %1256 = vmatprep.subr.bf16.mxu0 %v617_v23 }
 0x187   :  { %1175 = vmatpush1.bf16.msra.mxu1 %v614_v25  ;;  %v745_v25 = vunpack.c.l.s8.bf16 %v313_v13 }
 0x188   :  { %1176 = vmatprep.subr.bf16.mxu1 %v631_v26  ;;  %v312_v26 = vld [vmem:[#allocation2 + $0x5c0] sm:$0xff] }
 0x189   :  { %1257 = vmatpush1.bf16.msra.mxu0 %v616_v27  ;;  %v760_v48 = vunpack.c.h.s8.bf16 %v312_v26 }
 0x18a   :  { %1258 = vmatprep.subr.bf16.mxu0 %v633_v29 }
 0x18b   :  { %1177 = vmatpush1.bf16.msra.mxu1 %v630_v31 }
 0x18c   :  { %1187 = vmatprep.subr.bf16.mxu1 %v647_v32 }
 0x18d   :  { %1259 = vmatpush1.bf16.msra.mxu0 %v632_v34  ;;  %v759_v34 = vunpack.c.h.s8.bf16 %v311_v8  ;;  %v344_v8 = vld [vmem:[#allocation2 + $0x6c0] sm:$0xff] }
 0x18e   :  { %1269 = vmatprep.subr.bf16.mxu0 %v649_v35  ;;  %1179 = vmatmul.mubr.bf16.vlgmr.msra.gmra.mrb[8].mxu1 %v6421_v49 }
 0x18f   :  { %1188 = vmatpush1.bf16.msra.mxu1 %v646_v37  ;;  %1219 = vmatprep.mubr.bf16.mxu1 %v6415_v6  ;;  %v327_v37 = vld [vmem:[#allocation2 + $0x638] sm:$0xff] }
 0x190   :  { %1189 = vmatprep.subr.bf16.mxu1 %v663_v38  ;;  %1261 = vmatmul.mubr.bf16.vlgmr.msra.gmra.mrb[8].mxu0 %v6421_v49  ;;  %v744_v38 = vunpack.c.l.s8.bf16 %v312_v26  ;;  %v775_v45 = vunpack.c.l.s8.bf16 %v327_v37 }
 0x191   :  { %1270 = vmatpush1.bf16.msra.mxu0 %v648_v40  ;;  %1301 = vmatprep.mubr.bf16.mxu0 %v6415_v6  ;;  %v761_v40 = vunpack.c.h.s8.bf16 %v313_v13  ;;  %v808_v13 = vunpack.c.l.s8.bf16 %v344_v8 }
 0x192   :  { %1271 = vmatprep.subr.bf16.mxu0 %v665_v41 }
 0x193   :  { %1190 = vmatpush1.bf16.msra.mxu1 %v662_v42  ;;  %v758_v42 = vunpack.c.h.s8.bf16 %v310_v16  ;;  %v361_v16 = vld [vmem:[#allocation2 + $0x748] sm:$0xff] }
 0x194   :  { %1191 = vmatprep.subr.bf16.mxu1 %v679_v44  ;;  %v857_v26 = vunpack.c.h.s8.bf16 %v361_v16 }
 0x195   :  { %1272 = vmatpush1.bf16.msra.mxu0 %v664_v46  ;;  %v326_v46 = vld [vmem:[#allocation2 + $0x630] sm:$0xff] }
 0x196   :  { %1273 = vmatprep.subr.bf16.mxu0 %v681_v47  ;;  %v790_v58 = vunpack.c.h.s8.bf16 %v326_v46 }
 0x197   :  { %1192 = vmatpush1.bf16.msra.mxu1 %v678_v51 }
 0x198   :  { %1193 = vmatprep.subr.bf16.mxu1 %v695_v52  ;;  %v777_v52 = vunpack.c.l.s8.bf16 %v329_v43 }
 0x199   :  { %1274 = vmatpush1.bf16.msra.mxu0 %v680_v55  ;;  %v774_v55 = vunpack.c.l.s8.bf16 %v326_v46 }
 0x19a   :  { %1275 = vmatprep.subr.bf16.mxu0 %v697_v56  ;;  %v791_v56 = vunpack.c.h.s8.bf16 %v327_v37 }
 0x19b   :  { %1194 = vmatpush1.bf16.msra.mxu1 %v694_v1  ;;  %v343_v1 = vld [vmem:[#allocation2 + $0x6b8] sm:$0xff] }
 0x19c   :  { %1195 = vmatprep.subr.bf16.mxu1 %v711_v3  ;;  %v793_v3 = vunpack.c.h.s8.bf16 %v329_v43 }
 0x19d   :  { %1276 = vmatpush1.bf16.msra.mxu0 %v696_v60  ;;  %v345_v60 = vld [vmem:[#allocation2 + $0x6c8] sm:$0xff] }
 0x19e   :  { %1277 = vmatprep.subr.bf16.mxu0 %v713_v61  ;;  %v807_v61 = vunpack.c.l.s8.bf16 %v343_v1 }
 0x19f   :  { %1196 = vmatpush1.bf16.msra.mxu1 %v710_v63  ;;  %v792_v63 = vunpack.c.h.s8.bf16 %v328_v53 }
 0x1a0   :  { %1197 = vmatprep.subr.bf16.mxu1 %v727_v2  ;;  %v809_v2 = vunpack.c.l.s8.bf16 %v345_v60 }
 0x1a1   :  { %v934_v17 = vpop.f32.mrb[0].mxu1  ;;  %1278 = vmatpush1.bf16.msra.mxu0 %v712_v9  ;;  %v806_v9 = vunpack.c.l.s8.bf16 %v342_v62 }
 0x1a2   :  { %v975_v18 = vpop.f32.mrb[0].mxu0  ;;  %v936_v23 = vpop.f32.mrb[1].mxu1  ;;  %1279 = vmatprep.subr.bf16.mxu0 %v729_v10  ;;  %v823_v10 = vunpack.c.h.s8.bf16 %v343_v1 }
 0x1a3   :  { %v976_v21 = vadd.f32 %v975_v18, %v934_v17  ;;  %v977_v24 = vpop.f32.mrb[1].mxu0  ;;  %v938_v29 = vpop.f32.mrb[2].mxu1  ;;  %1198 = vmatpush1.bf16.msra.mxu1 %v726_v12  ;;  %v359_v12 = vld [vmem:[#allocation2 + $0x738] sm:$0xff]  ;;  %v358_v18 = vld [vmem:[#allocation2 + $0x730] sm:$0xff] }
 0x1a4   :  { %v978_v27 = vadd.f32 %v977_v24, %v936_v23  ;;  %v979_v31 = vpop.f32.mrb[2].mxu0  ;;  %v939_v33 = vpop.f32.mrb[3].mxu1  ;;  %1199 = vmatprep.subr.bf16.mxu1 %v743_v15  ;;  %v822_v15 = vunpack.c.h.s8.bf16 %v342_v62  ;;  %v839_v17 = vunpack.c.l.s8.bf16 %v359_v12  ;;  %v855_v23 = vunpack.c.h.s8.bf16 %v359_v12  ;;  %v375_v24 = vld [vmem:[#allocation2 + $0x7b8] sm:$0xff] }
 0x1a5   :  { %v1642_v32 = vmul.f32 %v1565_v14, %v976_v21  ;;  %v980_v35 = vpop.f32.mrb[3].mxu0  ;;  %1280 = vmatpush1.bf16.msra.mxu0 %v728_v20  ;;  %v825_v14 = vunpack.c.h.s8.bf16 %v345_v60  ;;  %v841_v20 = vunpack.c.l.s8.bf16 %v361_v16  ;;  %v360_v21 = vld [vmem:[#allocation2 + $0x740] sm:$0xff]  ;;  %v871_v29 = vunpack.c.l.s8.bf16 %v375_v24 }
 0x1a6   :  { %v1643_v36 = vmul.f32 %v1569_v19, %v978_v27  ;;  %1281 = vmatprep.subr.bf16.mxu0 %v745_v25  ;;  %v824_v19 = vunpack.c.h.s8.bf16 %v344_v8  ;;  %v840_v25 = vunpack.c.l.s8.bf16 %v360_v21  ;;  %v854_v27 = vunpack.c.h.s8.bf16 %v358_v18  ;;  %v376_v33 = vld [vmem:[#allocation2 + $0x7c0] sm:$0xff] }
 0x1a7   :  { %v1740_v39 = vadd.f32 %v1663_v22, %v1642_v32  ;;  %1200 = vmatpush1.bf16.msra.mxu1 %v742_v30  ;;  %v838_v22 = vunpack.c.l.s8.bf16 %v358_v18  ;;  %v374_v30 = vld [vmem:[#allocation2 + $0x7b0] sm:$0xff]  ;;  %v856_v31 = vunpack.c.h.s8.bf16 %v360_v21  ;;  %v887_v35 = vunpack.c.h.s8.bf16 %v375_v24  ;;  %v156_v60 = vld [vmem:[#allocation2 + $0xe0] sm:$0xff] }
 0x1a8   :  { %v1741_v41 = vadd.f32 %v1667_v28, %v1643_v36  ;;  %1201 = vmatprep.subr.bf16.mxu1 %v759_v34  ;;  %v377_v28 = vld [vmem:[#allocation2 + $0x7c8] sm:$0xff]  ;;  %v870_v34 = vunpack.c.l.s8.bf16 %v374_v30  ;;  %v139_v36 = vld [vmem:[#allocation2 + $0x58] sm:$0xff]  ;;  %v872_v37 = vunpack.c.l.s8.bf16 %v376_v33  ;;  %v888_v43 = vunpack.c.h.s8.bf16 %v376_v33  ;;  %v172_v16 = vld [vmem:[#allocation2 + $0x160] sm:$0xff] }
 0x1a9   :  { %vm1756_vm0 = vcmp.gt.f32.partialorder %v1740_v39, 0.0  ;;  %v1772_v44 = vmul.f32 0.01, %v1740_v39  ;;  %1282 = vmatpush1.bf16.msra.mxu0 %v744_v38  ;;  %v873_v32 = vunpack.c.l.s8.bf16 %v377_v28  ;;  %v889_v38 = vunpack.c.h.s8.bf16 %v377_v28  ;;  %v188_v28 = vld [vmem:[#allocation2 + $0x1e0] sm:$0xff] }
 0x1aa   :  { %vm1757_vm1 = vcmp.gt.f32.partialorder %v1741_v41, 0.0  ;;  %v1773_v47 = vmul.f32 0.01, %v1741_v41  ;;  %1283 = vmatprep.subr.bf16.mxu0 %v761_v40  ;;  %v141_v40 = vld [vmem:[#allocation2 + $0x68] sm:$0xff] }
 0x1ab   :  { %v6463_v51 = vsel %vm1756_vm0, %v1740_v39, %v1772_v44  ;;  %1202 = vmatpush1.bf16.msra.mxu1 %v758_v42  ;;  %v886_v39 = vunpack.c.h.s8.bf16 %v374_v30  ;;  %v138_v42 = vld [vmem:[#allocation2 + $0x50] sm:$0xff]  ;;  %v397_v44 = vunpack.c.l.s8.bf16 %v141_v40  ;;  %v413_v53 = vunpack.c.h.s8.bf16 %v141_v40  ;;  %v204_v40 = vld [vmem:[#allocation2 + $0x260] sm:$0xff] }
 0x1ac   :  { %v6465_v54 = vsel %vm1757_vm1, %v1741_v41, %v1773_v47  ;;  %1203 = vmatprep.subr.bf16.mxu1 %v775_v45  ;;  %v395_v41 = vunpack.c.l.s8.bf16 %v139_v36  ;;  %v140_v45 = vld [vmem:[#allocation2 + $0x60] sm:$0xff]  ;;  %v394_v46 = vunpack.c.l.s8.bf16 %v138_v42  ;;  %v411_v47 = vunpack.c.h.s8.bf16 %v139_v36 }
 0x1ad   :  { %1284 = vmatpush1.bf16.msra.mxu0 %v760_v48  ;;  %v155_v48 = vld [vmem:[#allocation2 + $0xd8] sm:$0xff] }
 0x1ae   :  { %1285 = vmatprep.subr.bf16.mxu0 %v777_v52  ;;  %v396_v52 = vunpack.c.l.s8.bf16 %v140_v45  ;;  %v427_v1 = vunpack.c.l.s8.bf16 %v155_v48  ;;  %v443_v62 = vunpack.c.h.s8.bf16 %v155_v48 }
 0x1af   :  { %1204 = vmatpush1.bf16.msra.mxu1 %v774_v55  ;;  %v410_v55 = vunpack.c.h.s8.bf16 %v138_v42 }
 0x1b0   :  { %1205 = vmatprep.subr.bf16.mxu1 %v791_v56  ;;  %v157_v56 = vld [vmem:[#allocation2 + $0xe8] sm:$0xff] }
 0x1b1   :  { %1286 = vmatpush1.bf16.msra.mxu0 %v776_v57  ;;  %v154_v57 = vld [vmem:[#allocation2 + $0xd0] sm:$0xff]  ;;  %v445_v8 = vunpack.c.h.s8.bf16 %v157_v56 }
 0x1b2   :  { %1287 = vmatprep.subr.bf16.mxu0 %v793_v3  ;;  %v412_v3 = vunpack.c.h.s8.bf16 %v140_v45 }
 0x1b3   :  { %1206 = vmatpush1.bf16.msra.mxu1 %v790_v58  ;;  %v429_v58 = vunpack.c.l.s8.bf16 %v157_v56  ;;  %v220_v56 = vld [vmem:[#allocation2 + $0x2e0] sm:$0xff] }
 0x1b4   :  { %1207 = vmatprep.subr.bf16.mxu1 %v807_v61  ;;  %v426_v61 = vunpack.c.l.s8.bf16 %v154_v57 }
 0x1b5   :  { %1288 = vmatpush1.bf16.msra.mxu0 %v792_v63  ;;  %v171_v63 = vld [vmem:[#allocation2 + $0x158] sm:$0xff] }
 0x1b6   :  { %1289 = vmatprep.subr.bf16.mxu0 %v809_v2  ;;  %v428_v2 = vunpack.c.l.s8.bf16 %v156_v60  ;;  %v459_v12 = vunpack.c.l.s8.bf16 %v171_v63  ;;  %v475_v18 = vunpack.c.h.s8.bf16 %v171_v63 }
 0x1b7   :  { %1208 = vmatpush1.bf16.msra.mxu1 %v806_v9  ;;  %v442_v9 = vunpack.c.h.s8.bf16 %v154_v57 }
 0x1b8   :  { %1209 = vmatprep.subr.bf16.mxu1 %v823_v10  ;;  %v173_v10 = vld [vmem:[#allocation2 + $0x168] sm:$0xff] }
 0x1b9   :  { %1290 = vmatpush1.bf16.msra.mxu0 %v808_v13  ;;  %v170_v13 = vld [vmem:[#allocation2 + $0x150] sm:$0xff]  ;;  %v477_v21 = vunpack.c.h.s8.bf16 %v173_v10 }
 0x1ba   :  { %1291 = vmatprep.subr.bf16.mxu0 %v825_v14  ;;  %v444_v14 = vunpack.c.h.s8.bf16 %v156_v60 }
 0x1bb   :  { %1210 = vmatpush1.bf16.msra.mxu1 %v822_v15  ;;  %v461_v15 = vunpack.c.l.s8.bf16 %v173_v10  ;;  %v236_v10 = vld [vmem:[#allocation2 + $0x360] sm:$0xff] }
 0x1bc   :  { %1211 = vmatprep.subr.bf16.mxu1 %v839_v17  ;;  %v458_v17 = vunpack.c.l.s8.bf16 %v170_v13 }
 0x1bd   :  { %1292 = vmatpush1.bf16.msra.mxu0 %v824_v19  ;;  %v187_v19 = vld [vmem:[#allocation2 + $0x1d8] sm:$0xff] }
 0x1be   :  { %1293 = vmatprep.subr.bf16.mxu0 %v841_v20  ;;  %v460_v20 = vunpack.c.l.s8.bf16 %v172_v16  ;;  %v491_v24 = vunpack.c.l.s8.bf16 %v187_v19  ;;  %v507_v30 = vunpack.c.h.s8.bf16 %v187_v19 }
 0x1bf   :  { %1212 = vmatpush1.bf16.msra.mxu1 %v838_v22  ;;  %v474_v22 = vunpack.c.h.s8.bf16 %v170_v13 }
 0x1c0   :  { %1213 = vmatprep.subr.bf16.mxu1 %v855_v23  ;;  %v189_v23 = vld [vmem:[#allocation2 + $0x1e8] sm:$0xff] }
 0x1c1   :  { %1294 = vmatpush1.bf16.msra.mxu0 %v840_v25  ;;  %v186_v25 = vld [vmem:[#allocation2 + $0x1d0] sm:$0xff]  ;;  %v509_v33 = vunpack.c.h.s8.bf16 %v189_v23 }
 0x1c2   :  { %1295 = vmatprep.subr.bf16.mxu0 %v857_v26  ;;  %v476_v26 = vunpack.c.h.s8.bf16 %v172_v16 }
 0x1c3   :  { %1214 = vmatpush1.bf16.msra.mxu1 %v854_v27  ;;  %v493_v27 = vunpack.c.l.s8.bf16 %v189_v23  ;;  %v252_v23 = vld [vmem:[#allocation2 + $0x3e0] sm:$0xff] }
 0x1c4   :  { %1215 = vmatprep.subr.bf16.mxu1 %v871_v29  ;;  %v490_v29 = vunpack.c.l.s8.bf16 %v186_v25 }
 0x1c5   :  { %1296 = vmatpush1.bf16.msra.mxu0 %v856_v31  ;;  %v203_v31 = vld [vmem:[#allocation2 + $0x258] sm:$0xff] }
 0x1c6   :  { %1297 = vmatprep.subr.bf16.mxu0 %v873_v32  ;;  %v492_v32 = vunpack.c.l.s8.bf16 %v188_v28  ;;  %v523_v36 = vunpack.c.l.s8.bf16 %v203_v31  ;;  %v539_v42 = vunpack.c.h.s8.bf16 %v203_v31 }
 0x1c7   :  { %1216 = vmatpush1.bf16.msra.mxu1 %v870_v34  ;;  %v506_v34 = vunpack.c.h.s8.bf16 %v186_v25 }
 0x1c8   :  { %1217 = vmatprep.subr.bf16.mxu1 %v887_v35  ;;  %v205_v35 = vld [vmem:[#allocation2 + $0x268] sm:$0xff] }
 0x1c9   :  { %1298 = vmatpush1.bf16.msra.mxu0 %v872_v37  ;;  %v202_v37 = vld [vmem:[#allocation2 + $0x250] sm:$0xff]  ;;  %v541_v45 = vunpack.c.h.s8.bf16 %v205_v35 }
 0x1ca   :  { %1299 = vmatprep.subr.bf16.mxu0 %v889_v38  ;;  %v508_v38 = vunpack.c.h.s8.bf16 %v188_v28 }
 0x1cb   :  { %1218 = vmatpush1.bf16.msra.mxu1 %v886_v39  ;;  %v525_v39 = vunpack.c.l.s8.bf16 %v205_v35  ;;  %v268_v35 = vld [vmem:[#allocation2 + $0x460] sm:$0xff] }
 0x1cc   :  { %1310 = vmatprep.subr.bf16.mxu1 %v395_v41  ;;  %v522_v41 = vunpack.c.l.s8.bf16 %v202_v37 }
 0x1cd   :  { %1300 = vmatpush1.bf16.msra.mxu0 %v888_v43  ;;  %v219_v43 = vld [vmem:[#allocation2 + $0x2d8] sm:$0xff] }
 0x1ce   :  { %1220 = vmatmul.mubr.bf16.vlgmr.msra.gmra.mrb[8].mxu1 %v6425_v50  ;;  %1392 = vmatprep.subr.bf16.mxu0 %v397_v44  ;;  %v524_v44 = vunpack.c.l.s8.bf16 %v204_v40  ;;  %v555_v48 = vunpack.c.l.s8.bf16 %v219_v43  ;;  %v571_v57 = vunpack.c.h.s8.bf16 %v219_v43 }
 0x1cf   :  { %1311 = vmatpush1.bf16.msra.mxu1 %v394_v46  ;;  %1342 = vmatprep.mubr.bf16.mxu1 %v6413_v5  ;;  %v538_v46 = vunpack.c.h.s8.bf16 %v202_v37 }
 0x1d0   :  { %1312 = vmatprep.subr.bf16.mxu1 %v411_v47  ;;  %1302 = vmatmul.mubr.bf16.vlgmr.msra.gmra.mrb[8].mxu0 %v6425_v50  ;;  %v221_v47 = vld [vmem:[#allocation2 + $0x2e8] sm:$0xff] }
 0x1d1   :  { %1393 = vmatpush1.bf16.msra.mxu0 %v396_v52  ;;  %1424 = vmatprep.mubr.bf16.mxu0 %v6413_v5  ;;  %v218_v52 = vld [vmem:[#allocation2 + $0x2d0] sm:$0xff]  ;;  %v573_v60 = vunpack.c.h.s8.bf16 %v221_v47 }
 0x1d2   :  { %1394 = vmatprep.subr.bf16.mxu0 %v413_v53  ;;  %v540_v53 = vunpack.c.h.s8.bf16 %v204_v40 }
 0x1d3   :  { %1313 = vmatpush1.bf16.msra.mxu1 %v410_v55  ;;  %v557_v55 = vunpack.c.l.s8.bf16 %v221_v47  ;;  %v284_v47 = vld [vmem:[#allocation2 + $0x4e0] sm:$0xff] }
 0x1d4   :  { %1314 = vmatprep.subr.bf16.mxu1 %v427_v1  ;;  %v554_v1 = vunpack.c.l.s8.bf16 %v218_v52 }
 0x1d5   :  { %1395 = vmatpush1.bf16.msra.mxu0 %v412_v3  ;;  %v235_v3 = vld [vmem:[#allocation2 + $0x358] sm:$0xff] }
 0x1d6   :  { %1396 = vmatprep.subr.bf16.mxu0 %v429_v58  ;;  %v556_v58 = vunpack.c.l.s8.bf16 %v220_v56  ;;  %v587_v63 = vunpack.c.l.s8.bf16 %v235_v3  ;;  %v603_v13 = vunpack.c.h.s8.bf16 %v235_v3 }
 0x1d7   :  { %1315 = vmatpush1.bf16.msra.mxu1 %v426_v61  ;;  %v570_v61 = vunpack.c.h.s8.bf16 %v218_v52 }
 0x1d8   :  { %1316 = vmatprep.subr.bf16.mxu1 %v443_v62  ;;  %v237_v62 = vld [vmem:[#allocation2 + $0x368] sm:$0xff] }
 0x1d9   :  { %1397 = vmatpush1.bf16.msra.mxu0 %v428_v2  ;;  %v234_v2 = vld [vmem:[#allocation2 + $0x350] sm:$0xff]  ;;  %v605_v16 = vunpack.c.h.s8.bf16 %v237_v62 }
 0x1da   :  { %1398 = vmatprep.subr.bf16.mxu0 %v445_v8  ;;  %v572_v8 = vunpack.c.h.s8.bf16 %v220_v56 }
 0x1db   :  { %1317 = vmatpush1.bf16.msra.mxu1 %v442_v9  ;;  %v589_v9 = vunpack.c.l.s8.bf16 %v237_v62 }
 0x1dc   :  { %1318 = vmatprep.subr.bf16.mxu1 %v459_v12  ;;  %v586_v12 = vunpack.c.l.s8.bf16 %v234_v2 }
 0x1dd   :  { %1399 = vmatpush1.bf16.msra.mxu0 %v444_v14  ;;  %v251_v14 = vld [vmem:[#allocation2 + $0x3d8] sm:$0xff] }
 0x1de   :  { %1400 = vmatprep.subr.bf16.mxu0 %v461_v15  ;;  %v588_v15 = vunpack.c.l.s8.bf16 %v236_v10  ;;  %v619_v19 = vunpack.c.l.s8.bf16 %v251_v14  ;;  %v635_v25 = vunpack.c.h.s8.bf16 %v251_v14 }
 0x1df   :  { %1319 = vmatpush1.bf16.msra.mxu1 %v458_v17  ;;  %v602_v17 = vunpack.c.h.s8.bf16 %v234_v2 }
 0x1e0   :  { %1320 = vmatprep.subr.bf16.mxu1 %v475_v18  ;;  %v253_v18 = vld [vmem:[#allocation2 + $0x3e8] sm:$0xff] }
 0x1e1   :  { %1401 = vmatpush1.bf16.msra.mxu0 %v460_v20  ;;  %v250_v20 = vld [vmem:[#allocation2 + $0x3d0] sm:$0xff]  ;;  %v637_v28 = vunpack.c.h.s8.bf16 %v253_v18 }
 0x1e2   :  { %1402 = vmatprep.subr.bf16.mxu0 %v477_v21  ;;  %v604_v21 = vunpack.c.h.s8.bf16 %v236_v10 }
 0x1e3   :  { %1321 = vmatpush1.bf16.msra.mxu1 %v474_v22  ;;  %v621_v22 = vunpack.c.l.s8.bf16 %v253_v18 }
 0x1e4   :  { %1322 = vmatprep.subr.bf16.mxu1 %v491_v24  ;;  %v618_v24 = vunpack.c.l.s8.bf16 %v250_v20 }
 0x1e5   :  { %1403 = vmatpush1.bf16.msra.mxu0 %v476_v26  ;;  %v267_v26 = vld [vmem:[#allocation2 + $0x458] sm:$0xff] }
 0x1e6   :  { %1404 = vmatprep.subr.bf16.mxu0 %v493_v27  ;;  %v620_v27 = vunpack.c.l.s8.bf16 %v252_v23  ;;  %v651_v31 = vunpack.c.l.s8.bf16 %v267_v26  ;;  %v667_v37 = vunpack.c.h.s8.bf16 %v267_v26 }
 0x1e7   :  { %1323 = vmatpush1.bf16.msra.mxu1 %v490_v29  ;;  %v634_v29 = vunpack.c.h.s8.bf16 %v250_v20  ;;  %v317_v20 = vld [vmem:[#allocation2 + $0x5e8] sm:$0xff] }
 0x1e8   :  { %1324 = vmatprep.subr.bf16.mxu1 %v507_v30  ;;  %v269_v30 = vld [vmem:[#allocation2 + $0x468] sm:$0xff] }
 0x1e9   :  { %1405 = vmatpush1.bf16.msra.mxu0 %v492_v32  ;;  %v266_v32 = vld [vmem:[#allocation2 + $0x450] sm:$0xff]  ;;  %v669_v40 = vunpack.c.h.s8.bf16 %v269_v30 }
 0x1ea   :  { %1406 = vmatprep.subr.bf16.mxu0 %v509_v33  ;;  %v636_v33 = vunpack.c.h.s8.bf16 %v252_v23  ;;  %v314_v23 = vld [vmem:[#allocation2 + $0x5d0] sm:$0xff] }
 0x1eb   :  { %1325 = vmatpush1.bf16.msra.mxu1 %v506_v34  ;;  %v653_v34 = vunpack.c.l.s8.bf16 %v269_v30 }
 0x1ec   :  { %1326 = vmatprep.subr.bf16.mxu1 %v523_v36  ;;  %v650_v36 = vunpack.c.l.s8.bf16 %v266_v32 }
 0x1ed   :  { %1407 = vmatpush1.bf16.msra.mxu0 %v508_v38  ;;  %v283_v38 = vld [vmem:[#allocation2 + $0x4d8] sm:$0xff] }
 0x1ee   :  { %1408 = vmatprep.subr.bf16.mxu0 %v525_v39  ;;  %v652_v39 = vunpack.c.l.s8.bf16 %v268_v35  ;;  %v683_v43 = vunpack.c.l.s8.bf16 %v283_v38  ;;  %v699_v52 = vunpack.c.h.s8.bf16 %v283_v38 }
 0x1ef   :  { %1327 = vmatpush1.bf16.msra.mxu1 %v522_v41  ;;  %v666_v41 = vunpack.c.h.s8.bf16 %v266_v32 }
 0x1f0   :  { %1328 = vmatprep.subr.bf16.mxu1 %v539_v42  ;;  %v285_v42 = vld [vmem:[#allocation2 + $0x4e8] sm:$0xff] }
 0x1f1   :  { %1409 = vmatpush1.bf16.msra.mxu0 %v524_v44  ;;  %v282_v44 = vld [vmem:[#allocation2 + $0x4d0] sm:$0xff]  ;;  %v701_v56 = vunpack.c.h.s8.bf16 %v285_v42 }
 0x1f2   :  { %1410 = vmatprep.subr.bf16.mxu0 %v541_v45  ;;  %v668_v45 = vunpack.c.h.s8.bf16 %v268_v35 }
 0x1f3   :  { %1329 = vmatpush1.bf16.msra.mxu1 %v538_v46  ;;  %v685_v46 = vunpack.c.l.s8.bf16 %v285_v42 }
 0x1f4   :  { %1330 = vmatprep.subr.bf16.mxu1 %v555_v48  ;;  %v682_v48 = vunpack.c.l.s8.bf16 %v282_v44 }
 0x1f5   :  { %1411 = vmatpush1.bf16.msra.mxu0 %v540_v53  ;;  %v299_v53 = vld [vmem:[#allocation2 + $0x558] sm:$0xff] }
 0x1f6   :  { %1412 = vmatprep.subr.bf16.mxu0 %v557_v55  ;;  %v684_v55 = vunpack.c.l.s8.bf16 %v284_v47  ;;  %v715_v3 = vunpack.c.l.s8.bf16 %v299_v53  ;;  %v731_v10 = vunpack.c.h.s8.bf16 %v299_v53 }
 0x1f7   :  { %1331 = vmatpush1.bf16.msra.mxu1 %v554_v1  ;;  %v698_v1 = vunpack.c.h.s8.bf16 %v282_v44 }
 0x1f8   :  { %1332 = vmatprep.subr.bf16.mxu1 %v571_v57  ;;  %v301_v57 = vld [vmem:[#allocation2 + $0x568] sm:$0xff] }
 0x1f9   :  { %1413 = vmatpush1.bf16.msra.mxu0 %v556_v58  ;;  %v298_v58 = vld [vmem:[#allocation2 + $0x550] sm:$0xff]  ;;  %v717_v62 = vunpack.c.l.s8.bf16 %v301_v57 }
 0x1fa   :  { %1414 = vmatprep.subr.bf16.mxu0 %v573_v60  ;;  %v700_v60 = vunpack.c.h.s8.bf16 %v284_v47  ;;  %v714_v2 = vunpack.c.l.s8.bf16 %v298_v58  ;;  %v730_v18 = vunpack.c.h.s8.bf16 %v298_v58 }
 0x1fb   :  { %1333 = vmatpush1.bf16.msra.mxu1 %v570_v61  ;;  %v6476_v61 = vsub.s32 2, %v6443_v59 }
 0x1fc   :  { %1334 = vmatprep.subr.bf16.mxu1 %v587_v63  ;;  %v300_v63 = vld [vmem:[#allocation2 + $0x560] sm:$0xff] }
 0x1fd   :  { %1415 = vmatpush1.bf16.msra.mxu0 %v572_v8  ;;  %v6479_v8 = vsub.s32 3, %v6443_v59  ;;  %v716_v14 = vunpack.c.l.s8.bf16 %v300_v63 }
 0x1fe   :  { %1416 = vmatprep.subr.bf16.mxu0 %v589_v9  ;;  %v6482_v9 = vsub.s32 4, %v6443_v59 }
 0x1ff   :  { %1335 = vmatpush1.bf16.msra.mxu1 %v586_v12  ;;  %v6485_v12 = vsub.s32 5, %v6443_v59  ;;  %v1675_v26 = vrot.slane %v6453_v11, %v6479_v8 }
 0x200   :  { %1336 = vmatprep.subr.bf16.mxu1 %v603_v13  ;;  %v315_v13 = vld [vmem:[#allocation2 + $0x5d8] sm:$0xff] }
 0x201   :  { %1417 = vmatpush1.bf16.msra.mxu0 %v588_v15  ;;  %v1573_v15 = vrot.slane %v6448_v4, %v6476_v61  ;;  %v1683_v32 = vrot.slane %v6453_v11, %v6485_v12 }
 0x202   :  { %1418 = vmatprep.subr.bf16.mxu0 %v605_v16  ;;  %v733_v16 = vunpack.c.h.s8.bf16 %v301_v57 }
 0x203   :  { %1337 = vmatpush1.bf16.msra.mxu1 %v602_v17  ;;  %v1577_v17 = vrot.slane %v6448_v4, %v6479_v8 }
 0x204   :  { %1338 = vmatprep.subr.bf16.mxu1 %v619_v19  ;;  %v1581_v19 = vrot.slane %v6448_v4, %v6482_v9 }
 0x205   :  { %1419 = vmatpush1.bf16.msra.mxu0 %v604_v21  ;;  %v1671_v21 = vrot.slane %v6453_v11, %v6476_v61 }
 0x206   :  { %1420 = vmatprep.subr.bf16.mxu0 %v621_v22  ;;  %v747_v22 = vunpack.c.l.s8.bf16 %v315_v13 }
 0x207   :  { %1339 = vmatpush1.bf16.msra.mxu1 %v618_v24  ;;  %v1585_v24 = vrot.slane %v6448_v4, %v6485_v12 }
 0x208   :  { %1340 = vmatprep.subr.bf16.mxu1 %v635_v25 }
 0x209   :  { %1421 = vmatpush1.bf16.msra.mxu0 %v620_v27  ;;  %v1679_v27 = vrot.slane %v6453_v11, %v6482_v9 }
 0x20a   :  { %1422 = vmatprep.subr.bf16.mxu0 %v637_v28  ;;  %v732_v28 = vunpack.c.h.s8.bf16 %v300_v63 }
 0x20b   :  { %1341 = vmatpush1.bf16.msra.mxu1 %v634_v29 }
 0x20c   :  { %1351 = vmatprep.subr.bf16.mxu1 %v651_v31 }
 0x20d   :  { %1423 = vmatpush1.bf16.msra.mxu0 %v636_v33  ;;  %v749_v33 = vunpack.c.l.s8.bf16 %v317_v20 }
 0x20e   :  { %1343 = vmatmul.mubr.bf16.vlgmr.msra.gmra.mrb[12].mxu1 %v6421_v49  ;;  %1433 = vmatprep.subr.bf16.mxu0 %v653_v34  ;;  %v316_v34 = vld [vmem:[#allocation2 + $0x5e0] sm:$0xff] }
 0x20f   :  { %1352 = vmatpush1.bf16.msra.mxu1 %v650_v36  ;;  %1383 = vmatprep.mubr.bf16.mxu1 %v6415_v6  ;;  %v746_v36 = vunpack.c.l.s8.bf16 %v314_v23 }
 0x210   :  { %1353 = vmatprep.subr.bf16.mxu1 %v667_v37  ;;  %1425 = vmatmul.mubr.bf16.vlgmr.msra.gmra.mrb[12].mxu0 %v6421_v49 }
 0x211   :  { %1434 = vmatpush1.bf16.msra.mxu0 %v652_v39  ;;  %1465 = vmatprep.mubr.bf16.mxu0 %v6415_v6 }
 0x212   :  { %1435 = vmatprep.subr.bf16.mxu0 %v669_v40 }
 0x213   :  { %1354 = vmatpush1.bf16.msra.mxu1 %v666_v41  ;;  %v763_v41 = vunpack.c.h.s8.bf16 %v315_v13 }
 0x214   :  { %1355 = vmatprep.subr.bf16.mxu1 %v683_v43 }
 0x215   :  { %1436 = vmatpush1.bf16.msra.mxu0 %v668_v45  ;;  %v762_v45 = vunpack.c.h.s8.bf16 %v314_v23 }
 0x216   :  { %1437 = vmatprep.subr.bf16.mxu0 %v685_v46  ;;  %v331_v46 = vld [vmem:[#allocation2 + $0x658] sm:$0xff] }
 0x217   :  { %1356 = vmatpush1.bf16.msra.mxu1 %v682_v48  ;;  %v748_v48 = vunpack.c.l.s8.bf16 %v316_v34  ;;  %v779_v58 = vunpack.c.l.s8.bf16 %v331_v46 }
 0x218   :  { %1357 = vmatprep.subr.bf16.mxu1 %v699_v52 }
 0x219   :  { %1438 = vmatpush1.bf16.msra.mxu0 %v684_v55  ;;  %v765_v55 = vunpack.c.h.s8.bf16 %v317_v20 }
 0x21a   :  { %1439 = vmatprep.subr.bf16.mxu0 %v701_v56  ;;  %v333_v56 = vld [vmem:[#allocation2 + $0x668] sm:$0xff] }
 0x21b   :  { %1358 = vmatpush1.bf16.msra.mxu1 %v698_v1  ;;  %v797_v20 = vunpack.c.h.s8.bf16 %v333_v56 }
 0x21c   :  { %1359 = vmatprep.subr.bf16.mxu1 %v715_v3 }
 0x21d   :  { %1440 = vmatpush1.bf16.msra.mxu0 %v700_v60  ;;  %v330_v60 = vld [vmem:[#allocation2 + $0x650] sm:$0xff] }
 0x21e   :  { %1441 = vmatprep.subr.bf16.mxu0 %v717_v62 }
 0x21f   :  { %1360 = vmatpush1.bf16.msra.mxu1 %v714_v2 }
 0x220   :  { %1361 = vmatprep.subr.bf16.mxu1 %v731_v10  ;;  %v764_v10 = vunpack.c.h.s8.bf16 %v316_v34  ;;  %v365_v34 = vld [vmem:[#allocation2 + $0x768] sm:$0xff] }
 0x221   :  { %v1057_v25 = vpop.f32.mrb[4].mxu1  ;;  %1442 = vmatpush1.bf16.msra.mxu0 %v716_v14  ;;  %v781_v14 = vunpack.c.l.s8.bf16 %v333_v56  ;;  %v143_v56 = vld [vmem:[#allocation2 + $0x78] sm:$0xff] }
 0x222   :  { %v1644_v29 = vmul.f32 %v1573_v15, %v1057_v25  ;;  %v1059_v30 = vpop.f32.mrb[5].mxu1  ;;  %1443 = vmatprep.subr.bf16.mxu0 %v733_v16  ;;  %v332_v15 = vld [vmem:[#allocation2 + $0x660] sm:$0xff]  ;;  %v778_v16 = vunpack.c.l.s8.bf16 %v330_v60 }
 0x223   :  { %v1139_v31 = vpop.f32.mrb[4].mxu0  ;;  %v1645_v35 = vmul.f32 %v1577_v17, %v1059_v30  ;;  %v1061_v4 = vpop.f32.mrb[6].mxu1  ;;  %1362 = vmatpush1.bf16.msra.mxu1 %v730_v18  ;;  %v795_v17 = vunpack.c.h.s8.bf16 %v331_v46  ;;  %v347_v18 = vld [vmem:[#allocation2 + $0x6d8] sm:$0xff]  ;;  %v796_v25 = vunpack.c.h.s8.bf16 %v332_v15 }
 0x224   :  { %v1646_v37 = vmul.f32 %v1581_v19, %v1139_v31  ;;  %v1141_v38 = vpop.f32.mrb[5].mxu0  ;;  %v1742_v39 = vadd.f32 %v1671_v21, %v1644_v29  ;;  %v1062_v40 = vpop.f32.mrb[7].mxu1  ;;  %1363 = vmatprep.subr.bf16.mxu1 %v747_v22  ;;  %v780_v19 = vunpack.c.l.s8.bf16 %v332_v15  ;;  %v794_v21 = vunpack.c.h.s8.bf16 %v330_v60  ;;  %v349_v22 = vld [vmem:[#allocation2 + $0x6e8] sm:$0xff]  ;;  %v363_v30 = vld [vmem:[#allocation2 + $0x758] sm:$0xff]  ;;  %v362_v4 = vld [vmem:[#allocation2 + $0x750] sm:$0xff] }
 0x225   :  { %v1647_v42 = vmul.f32 %v1585_v24, %v1141_v38  ;;  %v1143_v43 = vpop.f32.mrb[6].mxu0  ;;  %v1743_v44 = vadd.f32 %v1675_v26, %v1645_v35  ;;  %1444 = vmatpush1.bf16.msra.mxu0 %v732_v28  ;;  %v811_v23 = vunpack.c.l.s8.bf16 %v347_v18  ;;  %v346_v24 = vld [vmem:[#allocation2 + $0x6d0] sm:$0xff]  ;;  %v813_v26 = vunpack.c.l.s8.bf16 %v349_v22  ;;  %v364_v38 = vld [vmem:[#allocation2 + $0x760] sm:$0xff] }
 0x226   :  { %v1744_v47 = vadd.f32 %v1679_v27, %v1646_v37  ;;  %v1144_v11 = vpop.f32.mrb[7].mxu0  ;;  %vm1758_vm2 = vcmp.gt.f32.partialorder %v1742_v39, 0.0  ;;  %v1774_v52 = vmul.f32 0.01, %v1742_v39  ;;  %1445 = vmatprep.subr.bf16.mxu0 %v749_v33  ;;  %v348_v27 = vld [vmem:[#allocation2 + $0x6e0] sm:$0xff]  ;;  %v810_v28 = vunpack.c.l.s8.bf16 %v346_v24 }
 0x227   :  { %v1745_v53 = vadd.f32 %v1683_v32, %v1647_v42  ;;  %vm1759_vm3 = vcmp.gt.f32.partialorder %v1743_v44, 0.0  ;;  %v1775_v1 = vmul.f32 0.01, %v1743_v44  ;;  %1364 = vmatpush1.bf16.msra.mxu1 %v746_v36  ;;  %v827_v29 = vunpack.c.h.s8.bf16 %v347_v18 }
 0x228   :  { %vm1760_vm4 = vcmp.gt.f32.partialorder %v1744_v47, 0.0  ;;  %v1776_v57 = vmul.f32 0.01, %v1744_v47  ;;  %v6503_v3 = vsel %vm1758_vm2, %v1742_v39, %v1774_v52  ;;  %1365 = vmatprep.subr.bf16.mxu1 %v763_v41  ;;  %v812_v31 = vunpack.c.l.s8.bf16 %v348_v27  ;;  %v379_v41 = vld [vmem:[#allocation2 + $0x7d8] sm:$0xff]  ;;  %v380_v52 = vld [vmem:[#allocation2 + $0x7e0] sm:$0xff] }
 0x229   :  { %vm1761_vm5 = vcmp.gt.f32.partialorder %v1745_v53, 0.0  ;;  %v1777_v62 = vmul.f32 0.01, %v1745_v53  ;;  %v6505_v63 = vsel %vm1759_vm3, %v1743_v44, %v1775_v1  ;;  %1446 = vmatpush1.bf16.msra.mxu0 %v748_v48  ;;  %v829_v32 = vunpack.c.h.s8.bf16 %v349_v22  ;;  %v175_v22 = vld [vmem:[#allocation2 + $0x178] sm:$0xff] }
 0x22a   :  { %v6507_v2 = vsel %vm1760_vm4, %v1744_v47, %v1776_v57  ;;  %1447 = vmatprep.subr.bf16.mxu0 %v765_v55  ;;  %v826_v33 = vunpack.c.h.s8.bf16 %v346_v24  ;;  %v843_v35 = vunpack.c.l.s8.bf16 %v363_v30  ;;  %v828_v36 = vunpack.c.h.s8.bf16 %v348_v27  ;;  %v378_v47 = vld [vmem:[#allocation2 + $0x7d0] sm:$0xff] }
 0x22b   :  { %v6509_v13 = vsel %vm1761_vm5, %v1745_v53, %v1777_v62  ;;  %1366 = vmatpush1.bf16.msra.mxu1 %v762_v45  ;;  %v845_v37 = vunpack.c.l.s8.bf16 %v365_v34  ;;  %v842_v39 = vunpack.c.l.s8.bf16 %v362_v4  ;;  %v859_v40 = vunpack.c.h.s8.bf16 %v363_v30  ;;  %v381_v45 = vld [vmem:[#allocation2 + $0x7e8] sm:$0xff]  ;;  %v142_v62 = vld [vmem:[#allocation2 + $0x70] sm:$0xff] }
 0x22c   :  { %1367 = vmatprep.subr.bf16.mxu1 %v779_v58  ;;  %v844_v42 = vunpack.c.l.s8.bf16 %v364_v38  ;;  %v861_v43 = vunpack.c.h.s8.bf16 %v365_v34  ;;  %v858_v44 = vunpack.c.h.s8.bf16 %v362_v4  ;;  %v875_v46 = vunpack.c.l.s8.bf16 %v379_v41  ;;  %v190_v30 = vld [vmem:[#allocation2 + $0x1f0] sm:$0xff] }
 0x22d   :  { %1448 = vmatpush1.bf16.msra.mxu0 %v764_v10  ;;  %v860_v11 = vunpack.c.h.s8.bf16 %v364_v38  ;;  %v877_v48 = vunpack.c.l.s8.bf16 %v381_v45  ;;  %v874_v53 = vunpack.c.l.s8.bf16 %v378_v47  ;;  %v891_v55 = vunpack.c.h.s8.bf16 %v379_v41  ;;  %v206_v4 = vld [vmem:[#allocation2 + $0x270] sm:$0xff]  ;;  %v223_v38 = vld [vmem:[#allocation2 + $0x2f8] sm:$0xff] }
 0x22e   :  { %1449 = vmatprep.subr.bf16.mxu0 %v781_v14  ;;  %v876_v1 = vunpack.c.l.s8.bf16 %v380_v52  ;;  %v893_v57 = vunpack.c.h.s8.bf16 %v381_v45  ;;  %v890_v58 = vunpack.c.h.s8.bf16 %v378_v47  ;;  %v399_v60 = vunpack.c.l.s8.bf16 %v143_v56  ;;  %v222_v41 = vld [vmem:[#allocation2 + $0x2f0] sm:$0xff] }
 0x22f   :  { %1368 = vmatpush1.bf16.msra.mxu1 %v778_v16  ;;  %v892_v10 = vunpack.c.h.s8.bf16 %v380_v52  ;;  %v398_v14 = vunpack.c.l.s8.bf16 %v142_v62  ;;  %v415_v15 = vunpack.c.h.s8.bf16 %v143_v56  ;;  %v159_v16 = vld [vmem:[#allocation2 + $0xf8] sm:$0xff]  ;;  %v463_v24 = vunpack.c.l.s8.bf16 %v175_v22  ;;  %v238_v47 = vld [vmem:[#allocation2 + $0x370] sm:$0xff] }
 0x230   :  { %1369 = vmatprep.subr.bf16.mxu1 %v795_v17  ;;  %v414_v17 = vunpack.c.h.s8.bf16 %v142_v62  ;;  %v431_v18 = vunpack.c.l.s8.bf16 %v159_v16  ;;  %v479_v27 = vunpack.c.h.s8.bf16 %v175_v22  ;;  %v510_v34 = vunpack.c.h.s8.bf16 %v190_v30  ;;  %v255_v52 = vld [vmem:[#allocation2 + $0x3f8] sm:$0xff]  ;;  %v254_v56 = vld [vmem:[#allocation2 + $0x3f0] sm:$0xff] }
 0x231   :  { %1450 = vmatpush1.bf16.msra.mxu0 %v780_v19  ;;  %v158_v19 = vld [vmem:[#allocation2 + $0xf0] sm:$0xff]  ;;  %v574_v45 = vunpack.c.h.s8.bf16 %v222_v41  ;;  %v303_v22 = vld [vmem:[#allocation2 + $0x578] sm:$0xff] }
 0x232   :  { %1451 = vmatprep.subr.bf16.mxu0 %v797_v20  ;;  %v430_v20 = vunpack.c.l.s8.bf16 %v158_v19 }
 0x233   :  { %1370 = vmatpush1.bf16.msra.mxu1 %v794_v21  ;;  %v447_v21 = vunpack.c.h.s8.bf16 %v159_v16  ;;  %v287_v16 = vld [vmem:[#allocation2 + $0x4f8] sm:$0xff] }
 0x234   :  { %1371 = vmatprep.subr.bf16.mxu1 %v811_v23  ;;  %v446_v23 = vunpack.c.h.s8.bf16 %v158_v19  ;;  %v286_v19 = vld [vmem:[#allocation2 + $0x4f0] sm:$0xff] }
 0x235   :  { %1452 = vmatpush1.bf16.msra.mxu0 %v796_v25  ;;  %v174_v25 = vld [vmem:[#allocation2 + $0x170] sm:$0xff] }
 0x236   :  { %1453 = vmatprep.subr.bf16.mxu0 %v813_v26  ;;  %v462_v26 = vunpack.c.l.s8.bf16 %v174_v25 }
 0x237   :  { %1372 = vmatpush1.bf16.msra.mxu1 %v810_v28  ;;  %v478_v28 = vunpack.c.h.s8.bf16 %v174_v25  ;;  %v302_v25 = vld [vmem:[#allocation2 + $0x570] sm:$0xff] }
 0x238   :  { %1373 = vmatprep.subr.bf16.mxu1 %v827_v29 }
 0x239   :  { %1454 = vmatpush1.bf16.msra.mxu0 %v812_v31  ;;  %v494_v31 = vunpack.c.l.s8.bf16 %v190_v30 }
 0x23a   :  { %1455 = vmatprep.subr.bf16.mxu0 %v829_v32 }
 0x23b   :  { %1374 = vmatpush1.bf16.msra.mxu1 %v826_v33  ;;  %v207_v33 = vld [vmem:[#allocation2 + $0x278] sm:$0xff] }
 0x23c   :  { %1375 = vmatprep.subr.bf16.mxu1 %v843_v35  ;;  %v527_v35 = vunpack.c.l.s8.bf16 %v207_v33 }
 0x23d   :  { %1456 = vmatpush1.bf16.msra.mxu0 %v828_v36  ;;  %v526_v36 = vunpack.c.l.s8.bf16 %v206_v4 }
 0x23e   :  { %1457 = vmatprep.subr.bf16.mxu0 %v845_v37  ;;  %v543_v37 = vunpack.c.h.s8.bf16 %v207_v33  ;;  %v6526_v33 = vld [vmem:[#allocation13 + $0x8] sm:$0xff] }
 0x23f   :  { %1376 = vmatpush1.bf16.msra.mxu1 %v842_v39  ;;  %v542_v39 = vunpack.c.h.s8.bf16 %v206_v4  ;;  %v318_v4 = vld [vmem:[#allocation2 + $0x5f0] sm:$0xff] }
 0x240   :  { %1377 = vmatprep.subr.bf16.mxu1 %v859_v40  ;;  %v559_v40 = vunpack.c.l.s8.bf16 %v223_v38 }
 0x241   :  { %1458 = vmatpush1.bf16.msra.mxu0 %v844_v42  ;;  %v558_v42 = vunpack.c.l.s8.bf16 %v222_v41 }
 0x242   :  { %1459 = vmatprep.subr.bf16.mxu0 %v861_v43  ;;  %v575_v43 = vunpack.c.h.s8.bf16 %v223_v38 }
 0x243   :  { %1378 = vmatpush1.bf16.msra.mxu1 %v858_v44  ;;  %v239_v44 = vld [vmem:[#allocation2 + $0x378] sm:$0xff] }
 0x244   :  { %1379 = vmatprep.subr.bf16.mxu1 %v875_v46  ;;  %v591_v46 = vunpack.c.l.s8.bf16 %v239_v44 }
 0x245   :  { %1460 = vmatpush1.bf16.msra.mxu0 %v860_v11  ;;  %v590_v11 = vunpack.c.l.s8.bf16 %v238_v47 }
 0x246   :  { %1461 = vmatprep.subr.bf16.mxu0 %v877_v48  ;;  %v607_v48 = vunpack.c.h.s8.bf16 %v239_v44 }
 0x247   :  { %1380 = vmatpush1.bf16.msra.mxu1 %v874_v53  ;;  %v606_v53 = vunpack.c.h.s8.bf16 %v238_v47  ;;  %v1699_v47 = vrot.slane %v6526_v33, %v6451_v7 }
 0x248   :  { %1381 = vmatprep.subr.bf16.mxu1 %v891_v55  ;;  %v623_v55 = vunpack.c.l.s8.bf16 %v255_v52 }
 0x249   :  { %1462 = vmatpush1.bf16.msra.mxu0 %v876_v1  ;;  %v622_v1 = vunpack.c.l.s8.bf16 %v254_v56 }
 0x24a   :  { %1463 = vmatprep.subr.bf16.mxu0 %v893_v57  ;;  %v639_v57 = vunpack.c.h.s8.bf16 %v255_v52 }
 0x24b   :  { %1382 = vmatpush1.bf16.msra.mxu1 %v890_v58  ;;  %v271_v58 = vld [vmem:[#allocation2 + $0x478] sm:$0xff] }
 0x24c   :  { %1474 = vmatprep.subr.bf16.mxu1 %v399_v60  ;;  %v638_v60 = vunpack.c.h.s8.bf16 %v254_v56  ;;  %v655_v62 = vunpack.c.l.s8.bf16 %v271_v58 }
 0x24d   :  { %1464 = vmatpush1.bf16.msra.mxu0 %v892_v10  ;;  %v270_v10 = vld [vmem:[#allocation2 + $0x470] sm:$0xff] }
 0x24e   :  { %1384 = vmatmul.mubr.bf16.vlgmr.msra.gmra.mrb[12].mxu1 %v6425_v50 }
 0x24f   :  { %1475 = vmatpush1.bf16.msra.mxu1 %v398_v14  ;;  %1506 = vmatprep.mubr.bf16.mxu1 %v6413_v5  ;;  %v191_v5 = vld [vmem:[#allocation2 + $0x1f8] sm:$0xff]  ;;  %v654_v14 = vunpack.c.l.s8.bf16 %v270_v10 }
 0x250   :  { %1476 = vmatprep.subr.bf16.mxu1 %v415_v15  ;;  %1466 = vmatmul.mubr.bf16.vlgmr.msra.gmra.mrb[12].mxu0 %v6425_v50  ;;  %v495_v29 = vunpack.c.l.s8.bf16 %v191_v5  ;;  %v511_v32 = vunpack.c.h.s8.bf16 %v191_v5  ;;  %v671_v15 = vunpack.c.h.s8.bf16 %v271_v58  ;;  %v319_v5 = vld [vmem:[#allocation2 + $0x5f8] sm:$0xff] }
 0x251   :  { %v767_v52 = vunpack.c.h.s8.bf16 %v319_v5 }
 0x253   :  { %1477 = vmatpush1.bf16.msra.mxu1 %v414_v17  ;;  %v670_v17 = vunpack.c.h.s8.bf16 %v270_v10 }
 0x254   :  { %1478 = vmatprep.subr.bf16.mxu1 %v431_v18  ;;  %v687_v18 = vunpack.c.l.s8.bf16 %v287_v16 }
 0x257   :  { %1479 = vmatpush1.bf16.msra.mxu1 %v430_v20  ;;  %v686_v20 = vunpack.c.l.s8.bf16 %v286_v19 }
 0x258   :  { %1480 = vmatprep.subr.bf16.mxu1 %v447_v21  ;;  %v703_v21 = vunpack.c.h.s8.bf16 %v287_v16 }
 0x25b   :  { %1481 = vmatpush1.bf16.msra.mxu1 %v446_v23  ;;  %v702_v23 = vunpack.c.h.s8.bf16 %v286_v19  ;;  %v334_v19 = vld [vmem:[#allocation2 + $0x670] sm:$0xff] }
 0x25c   :  { %1482 = vmatprep.subr.bf16.mxu1 %v463_v24  ;;  %v719_v24 = vunpack.c.l.s8.bf16 %v303_v22 }
 0x25f   :  { %1483 = vmatpush1.bf16.msra.mxu1 %v462_v26  ;;  %v6517_v26 = vsub.s32 6, %v6443_v59 }
 0x260   :  { %1484 = vmatprep.subr.bf16.mxu1 %v479_v27  ;;  %v735_v27 = vunpack.c.h.s8.bf16 %v303_v22 }
 0x263   :  { %1485 = vmatpush1.bf16.msra.mxu1 %v478_v28  ;;  %v6522_v28 = vld [vmem:[#allocation12 + $0x8] sm:$0xff] }
 0x264   :  { %1486 = vmatprep.subr.bf16.mxu1 %v495_v29  ;;  %v6054_v29 = vld [vmem:[#allocation12] sm:$0xff] }
 0x265   :  { %v1589_v30 = vrot.slane %v6054_v29, %v6517_v26 }
 0x267   :  { %1487 = vmatpush1.bf16.msra.mxu1 %v494_v31 }
 0x268   :  { %1488 = vmatprep.subr.bf16.mxu1 %v511_v32  ;;  %v734_v32 = vunpack.c.h.s8.bf16 %v302_v25 }
 0x26b   :  { %1489 = vmatpush1.bf16.msra.mxu1 %v510_v34  ;;  %v6055_v34 = vld [vmem:[#allocation13] sm:$0xff] }
 0x26c   :  { %1490 = vmatprep.subr.bf16.mxu1 %v527_v35  ;;  %v1687_v35 = vrot.slane %v6055_v34, %v6517_v26 }
 0x26f   :  { %1491 = vmatpush1.bf16.msra.mxu1 %v526_v36  ;;  %v1597_v36 = vrot.slane %v6522_v28, %v6446_v0 }
 0x270   :  { %1492 = vmatprep.subr.bf16.mxu1 %v543_v37 }
 0x273   :  { %1493 = vmatpush1.bf16.msra.mxu1 %v542_v39  ;;  %v1601_v39 = vrot.slane %v6522_v28, %v6451_v7 }
 0x274   :  { %1494 = vmatprep.subr.bf16.mxu1 %v559_v40 }
 0x277   :  { %1495 = vmatpush1.bf16.msra.mxu1 %v558_v42  ;;  %v1695_v42 = vrot.slane %v6526_v33, %v6446_v0 }
 0x278   :  { %1496 = vmatprep.subr.bf16.mxu1 %v575_v43 }
 0x27b   :  { %1497 = vmatpush1.bf16.msra.mxu1 %v574_v45  ;;  %v750_v45 = vunpack.c.l.s8.bf16 %v318_v4 }
 0x27c   :  { %1498 = vmatprep.subr.bf16.mxu1 %v591_v46 }
 0x27f   :  { %1499 = vmatpush1.bf16.msra.mxu1 %v590_v11 }
 0x280   :  { %1500 = vmatprep.subr.bf16.mxu1 %v607_v48 }
 0x283   :  { %1501 = vmatpush1.bf16.msra.mxu1 %v606_v53 }
 0x284   :  { %1502 = vmatprep.subr.bf16.mxu1 %v623_v55 }
 0x287   :  { %1503 = vmatpush1.bf16.msra.mxu1 %v622_v1  ;;  %v335_v1 = vld [vmem:[#allocation2 + $0x678] sm:$0xff] }
 0x288   :  { %1504 = vmatprep.subr.bf16.mxu1 %v639_v57 }
 0x28b   :  { %1505 = vmatpush1.bf16.msra.mxu1 %v638_v60 }
 0x28c   :  { %1515 = vmatprep.subr.bf16.mxu1 %v655_v62 }
 0x28e   :  { %1507 = vmatmul.mubr.bf16.vlgmr.msra.gmra.mrb[16].mxu1 %v6421_v49  ;;  %v718_v49 = vunpack.c.l.s8.bf16 %v302_v25 }
 0x28f   :  { %1516 = vmatpush1.bf16.msra.mxu1 %v654_v14  ;;  %1547 = vmatprep.mubr.bf16.mxu1 %v6415_v6  ;;  %v6520_v6 = vsub.s32 7, %v6443_v59  ;;  %v751_v59 = vunpack.c.l.s8.bf16 %v319_v5  ;;  %v798_v5 = vunpack.c.h.s8.bf16 %v334_v19 }
 0x290   :  { %1517 = vmatprep.subr.bf16.mxu1 %v671_v15  ;;  %v766_v15 = vunpack.c.h.s8.bf16 %v318_v4  ;;  %v366_v4 = vld [vmem:[#allocation2 + $0x770] sm:$0xff] }
 0x291   :  { %v1593_v31 = vrot.slane %v6054_v29, %v6520_v6  ;;  %v1691_v38 = vrot.slane %v6055_v34, %v6520_v6  ;;  %v367_v34 = vld [vmem:[#allocation2 + $0x778] sm:$0xff] }
 0x293   :  { %1518 = vmatpush1.bf16.msra.mxu1 %v670_v17 }
 0x294   :  { %1519 = vmatprep.subr.bf16.mxu1 %v687_v18  ;;  %v783_v18 = vunpack.c.l.s8.bf16 %v335_v1 }
 0x297   :  { %1520 = vmatpush1.bf16.msra.mxu1 %v686_v20 }
 0x298   :  { %1521 = vmatprep.subr.bf16.mxu1 %v703_v21 }
 0x29b   :  { %1522 = vmatpush1.bf16.msra.mxu1 %v702_v23 }
 0x29c   :  { %1523 = vmatprep.subr.bf16.mxu1 %v719_v24  ;;  %v782_v24 = vunpack.c.l.s8.bf16 %v334_v19 }
 0x29f   :  { %1524 = vmatpush1.bf16.msra.mxu1 %v718_v49  ;;  %v799_v49 = vunpack.c.h.s8.bf16 %v335_v1 }
 0x2a0   :  { %1525 = vmatprep.subr.bf16.mxu1 %v735_v27  ;;  %v351_v27 = vld [vmem:[#allocation2 + $0x6f8] sm:$0xff] }
 0x2a1   :  { %v1221_v37 = vpop.f32.mrb[8].mxu1  ;;  %v815_v29 = vunpack.c.l.s8.bf16 %v351_v27 }
 0x2a2   :  { %v1648_v40 = vmul.f32 %v1589_v30, %v1221_v37  ;;  %v1223_v41 = vpop.f32.mrb[9].mxu1  ;;  %v350_v30 = vld [vmem:[#allocation2 + $0x6f0] sm:$0xff]  ;;  %v863_v37 = vunpack.c.h.s8.bf16 %v367_v34 }
 0x2a3   :  { %v1649_v43 = vmul.f32 %v1593_v31, %v1223_v41  ;;  %v1225_v44 = vpop.f32.mrb[10].mxu1  ;;  %1526 = vmatpush1.bf16.msra.mxu1 %v734_v32  ;;  %v1303_v46 = vpop.f32.mrb[8].mxu0  ;;  %v814_v31 = vunpack.c.l.s8.bf16 %v350_v30  ;;  %v831_v32 = vunpack.c.h.s8.bf16 %v351_v27  ;;  %v382_v41 = vld [vmem:[#allocation2 + $0x7f0] sm:$0xff] }
 0x2a4   :  { %v1746_v11 = vadd.f32 %v1687_v35, %v1648_v40  ;;  %v1226_v48 = vpop.f32.mrb[11].mxu1  ;;  %1527 = vmatprep.subr.bf16.mxu1 %v751_v59  ;;  %v1650_v53 = vmul.f32 %v1597_v36, %v1303_v46  ;;  %v1305_v55 = vpop.f32.mrb[9].mxu0  ;;  %v830_v35 = vunpack.c.h.s8.bf16 %v350_v30  ;;  %v847_v59 = vunpack.c.l.s8.bf16 %v367_v34 }
 0x2a5   :  { %v1747_v56 = vadd.f32 %v1691_v38, %v1649_v43  ;;  %v1651_v57 = vmul.f32 %v1601_v39, %v1305_v55  ;;  %v1307_v58 = vpop.f32.mrb[10].mxu0  ;;  %v846_v36 = vunpack.c.l.s8.bf16 %v366_v4  ;;  %v383_v38 = vld [vmem:[#allocation2 + $0x7f8] sm:$0xff]  ;;  %v862_v39 = vunpack.c.h.s8.bf16 %v366_v4 }
 0x2a6   :  { %vm1762_vm6 = vcmp.gt.f32.partialorder %v1746_v11, 0.0  ;;  %v1778_v60 = vmul.f32 0.01, %v1746_v11  ;;  %v1748_v62 = vadd.f32 %v1695_v42, %v1650_v53  ;;  %v1308_v10 = vpop.f32.mrb[11].mxu0  ;;  %v879_v40 = vunpack.c.l.s8.bf16 %v383_v38 }
 0x2a7   :  { %vm1763_vm7 = vcmp.gt.f32.partialorder %v1747_v56, 0.0  ;;  %v1779_v14 = vmul.f32 0.01, %v1747_v56  ;;  %1528 = vmatpush1.bf16.msra.mxu1 %v750_v45  ;;  %v1749_v16 = vadd.f32 %v1699_v47, %v1651_v57  ;;  %v878_v42 = vunpack.c.l.s8.bf16 %v382_v41 }
 0x2a8   :  { %v6538_v17 = vsel %vm1762_vm6, %v1746_v11, %v1778_v60  ;;  %1529 = vmatprep.subr.bf16.mxu1 %v767_v52  ;;  %vm1764_vm8 = vcmp.gt.f32.partialorder %v1748_v62, 0.0  ;;  %v1780_v20 = vmul.f32 0.01, %v1748_v62  ;;  %v895_v43 = vunpack.c.h.s8.bf16 %v383_v38 }
 0x2a9   :  { %v6540_v21 = vsel %vm1763_vm7, %v1747_v56, %v1779_v14  ;;  %vm1765_vm9 = vcmp.gt.f32.partialorder %v1749_v16, 0.0  ;;  %v1781_v22 = vmul.f32 0.01, %v1749_v16  ;;  %v894_v44 = vunpack.c.h.s8.bf16 %v382_v41 }
 0x2aa   :  { %v6542_v23 = vsel %vm1764_vm8, %v1748_v62, %v1780_v20  ;;  %v1605_v45 = vrot.slane %v6522_v28, %v6476_v61  ;;  %v1609_v46 = vrot.slane %v6522_v28, %v6479_v8  ;;  %v1703_v47 = vrot.slane %v6526_v33, %v6476_v61 }
 0x2ab   :  { %1530 = vmatpush1.bf16.msra.mxu1 %v766_v15  ;;  %v6544_v25 = vsel %vm1765_vm9, %v1749_v16, %v1781_v22  ;;  %v1613_v11 = vrot.slane %v6522_v28, %v6482_v9  ;;  %v1707_v52 = vrot.slane %v6526_v33, %v6479_v8  ;;  %v1617_v53 = vrot.slane %v6522_v28, %v6485_v12 }
 0x2ac   :  { %1531 = vmatprep.subr.bf16.mxu1 %v783_v18  ;;  %v1711_v56 = vrot.slane %v6526_v33, %v6482_v9  ;;  %v1715_v60 = vrot.slane %v6526_v33, %v6485_v12  ;;  %v1719_v4 = vrot.slane %v6526_v33, %v6517_v26 }
 0x2af   :  { %1532 = vmatpush1.bf16.msra.mxu1 %v782_v24 }
 0x2b0   :  { %1533 = vmatprep.subr.bf16.mxu1 %v799_v49 }
 0x2b3   :  { %1534 = vmatpush1.bf16.msra.mxu1 %v798_v5 }
 0x2b4   :  { %1535 = vmatprep.subr.bf16.mxu1 %v815_v29 }
 0x2b7   :  { %1536 = vmatpush1.bf16.msra.mxu1 %v814_v31 }
 0x2b8   :  { %1537 = vmatprep.subr.bf16.mxu1 %v831_v32 }
 0x2bb   :  { %1538 = vmatpush1.bf16.msra.mxu1 %v830_v35  ;;  %v1621_v35 = vrot.slane %v6522_v28, %v6517_v26 }
 0x2bc   :  { %1539 = vmatprep.subr.bf16.mxu1 %v847_v59  ;;  %v1625_v59 = vrot.slane %v6522_v28, %v6520_v6 }
 0x2bf   :  { %1540 = vmatpush1.bf16.msra.mxu1 %v846_v36 }
 0x2c0   :  { %1541 = vmatprep.subr.bf16.mxu1 %v863_v37  ;;  %v1723_v37 = vrot.slane %v6526_v33, %v6520_v6 }
 0x2c3   :  { %1542 = vmatpush1.bf16.msra.mxu1 %v862_v39 }
 0x2c4   :  { %1543 = vmatprep.subr.bf16.mxu1 %v879_v40 }
 0x2c7   :  { %1544 = vmatpush1.bf16.msra.mxu1 %v878_v42 }
 0x2c8   :  { %1545 = vmatprep.subr.bf16.mxu1 %v895_v43 }
 0x2cb   :  { %1546 = vmatpush1.bf16.msra.mxu1 %v894_v44 }
 0x2ce   :  { %1548 = vmatmul.mubr.bf16.vlgmr.msra.gmra.mrb[16].mxu1 %v6425_v50 }
 0x321   :  { %v1385_v48 = vpop.f32.mrb[12].mxu1 }
 0x322   :  { %v1652_v50 = vmul.f32 %v1605_v45, %v1385_v48  ;;  %v1387_v55 = vpop.f32.mrb[13].mxu1 }
 0x323   :  { %v1653_v1 = vmul.f32 %v1609_v46, %v1387_v55  ;;  %v1389_v57 = vpop.f32.mrb[14].mxu1  ;;  %v1467_v58 = vpop.f32.mrb[12].mxu0 }
 0x324   :  { %v1750_v62 = vadd.f32 %v1703_v47, %v1652_v50  ;;  %v1390_v10 = vpop.f32.mrb[15].mxu1  ;;  %v1654_v14 = vmul.f32 %v1613_v11, %v1467_v58  ;;  %v1469_v15 = vpop.f32.mrb[13].mxu0 }
 0x325   :  { %v1751_v16 = vadd.f32 %v1707_v52, %v1653_v1  ;;  %v1655_v18 = vmul.f32 %v1617_v53, %v1469_v15  ;;  %v1471_v19 = vpop.f32.mrb[14].mxu0 }
 0x326   :  { %vm1766_vm10 = vcmp.gt.f32.partialorder %v1750_v62, 0.0  ;;  %v1782_v20 = vmul.f32 0.01, %v1750_v62  ;;  %v1752_v22 = vadd.f32 %v1711_v56, %v1654_v14  ;;  %v1472_v24 = vpop.f32.mrb[15].mxu0 }
 0x327   :  { %vm1767_vm11 = vcmp.gt.f32.partialorder %v1751_v16, 0.0  ;;  %v1783_v49 = vmul.f32 0.01, %v1751_v16  ;;  %v1753_v27 = vadd.f32 %v1715_v60, %v1655_v18 }
 0x328   :  { %v6563_v5 = vsel %vm1766_vm10, %v1750_v62, %v1782_v20  ;;  %vm1768_vm12 = vcmp.gt.f32.partialorder %v1752_v22, 0.0  ;;  %v1784_v29 = vmul.f32 0.01, %v1752_v22 }
 0x329   :  { %v6565_v30 = vsel %vm1767_vm11, %v1751_v16, %v1783_v49  ;;  %vm1769_vm13 = vcmp.gt.f32.partialorder %v1753_v27, 0.0  ;;  %v1785_v31 = vmul.f32 0.01, %v1753_v27 }
 0x32a   :  { %v6567_v32 = vsel %vm1768_vm12, %v1752_v22, %v1784_v29 }
 0x32b   :  { %v6569_v34 = vsel %vm1769_vm13, %v1753_v27, %v1785_v31 }
 0x3a1   :  { %v1549_v36 = vpop.f32.mrb[16].mxu1 }
 0x3a2   :  { %v1656_v38 = vmul.f32 %v1621_v35, %v1549_v36  ;;  %v1551_v39 = vpop.f32.mrb[17].mxu1 }
 0x3a3   :  { %v1657_v40 = vmul.f32 %v1625_v59, %v1551_v39  ;;  %v1553_v41 = vpop.f32.mrb[18].mxu1 }
 0x3a4   :  { %v1754_v42 = vadd.f32 %v1719_v4, %v1656_v38  ;;  %v1554_v43 = vpop.f32.mrb[19].mxu1 }
 0x3a5   :  { %v1755_v44 = vadd.f32 %v1723_v37, %v1657_v40 }
 0x3a6   :  { %vm1770_vm14 = vcmp.gt.f32.partialorder %v1754_v42, 0.0  ;;  %v1786_v45 = vmul.f32 0.01, %v1754_v42 }
 0x3a7   :  { %vm1771_vm15 = vcmp.gt.f32.partialorder %v1755_v44, 0.0  ;;  %v1787_v46 = vmul.f32 0.01, %v1755_v44 }
 0x3a8   :  { %v6579_v47 = vsel %vm1770_vm14, %v1754_v42, %v1786_v45 }
 0x3a9   :  { %v6581_v28 = vsel %vm1771_vm15, %v1755_v44, %v1787_v46 }
 0x3aa   :  { %6246 = dma.done.wait [#allocation6 + $0x1], 65536 }
 0x3ab   :  { %6247 = vsyncadd [#allocation6 + $0x1], 4294901760  ;;  %v6585_v33 = vpack.c.bf16 %v6465_v54, %v6465_v54  ;;  %v1809_v11 = vld [vmem:[#allocation3 + $0x8] sm:$0xff]  ;;  %v1811_v48 = vld [vmem:[#allocation3 + $0x18] sm:$0xff] }
 0x3ac   :  { %v1808_v52 = vld [vmem:[#allocation3] sm:$0xff]  ;;  %v2321_v53 = vunpack.c.l.s8.bf16 %v1809_v11  ;;  %v2329_v50 = vunpack.c.h.s8.bf16 %v1809_v11  ;;  %v2323_v55 = vunpack.c.l.s8.bf16 %v1811_v48  ;;  %v2331_v56 = vunpack.c.h.s8.bf16 %v1811_v48  ;;  %v1810_v1 = vld [vmem:[#allocation3 + $0x10] sm:$0xff]  ;;  %v1817_v60 = vld [vmem:[#allocation3 + $0x48] sm:$0xff] }
 0x3ad   :  { %3392 = vmatprep.mubr.bf16.mxu0 %v6585_v33  ;;  %3720 = vmatprep.mubr.bf16.mxu1 %v6585_v33  ;;  %v2320_v57 = vunpack.c.l.s8.bf16 %v1808_v52  ;;  %v2322_v58 = vunpack.c.l.s8.bf16 %v1810_v1  ;;  %v1819_v62 = vld [vmem:[#allocation3 + $0x58] sm:$0xff]  ;;  %v2328_v54 = vunpack.c.h.s8.bf16 %v1808_v52  ;;  %v2330_v10 = vunpack.c.h.s8.bf16 %v1810_v1  ;;  %v1816_v16 = vld [vmem:[#allocation3 + $0x40] sm:$0xff]  ;;  %v1818_v18 = vld [vmem:[#allocation3 + $0x50] sm:$0xff] }
 0x3ae   :  { %3360 = vmatprep.subr.bf16.mxu0 %v2321_v53  ;;  %3688 = vmatprep.subr.bf16.mxu1 %v2323_v55  ;;  %v2337_v14 = vunpack.c.l.s8.bf16 %v1817_v60  ;;  %v2339_v15 = vunpack.c.l.s8.bf16 %v1819_v62  ;;  %v2336_v19 = vunpack.c.l.s8.bf16 %v1816_v16  ;;  %v2338_v20 = vunpack.c.l.s8.bf16 %v1818_v18  ;;  %v1825_v49 = vld [vmem:[#allocation3 + $0x88] sm:$0xff]  ;;  %v1827_v27 = vld [vmem:[#allocation3 + $0x98] sm:$0xff]  ;;  %v1824_v4 = vld [vmem:[#allocation3 + $0x80] sm:$0xff] }
 0x3af   :  { %3361 = vmatpush1.bf16.msra.mxu0 %v2320_v57  ;;  %3689 = vmatpush1.bf16.msra.mxu1 %v2322_v58  ;;  %v2345_v22 = vunpack.c.h.s8.bf16 %v1817_v60  ;;  %v2347_v24 = vunpack.c.h.s8.bf16 %v1819_v62  ;;  %v2344_v29 = vunpack.c.h.s8.bf16 %v1816_v16  ;;  %v2346_v31 = vunpack.c.h.s8.bf16 %v1818_v18  ;;  %v1826_v36 = vld [vmem:[#allocation3 + $0x90] sm:$0xff]  ;;  %v1833_v41 = vld [vmem:[#allocation3 + $0xc8] sm:$0xff]  ;;  %v1835_v42 = vld [vmem:[#allocation3 + $0xd8] sm:$0xff] }
 0x3b0   :  { %3362 = vmatprep.subr.bf16.mxu0 %v2329_v50  ;;  %3690 = vmatprep.subr.bf16.mxu1 %v2331_v56  ;;  %v2353_v35 = vunpack.c.l.s8.bf16 %v1825_v49  ;;  %v2355_v59 = vunpack.c.l.s8.bf16 %v1827_v27  ;;  %v2352_v37 = vunpack.c.l.s8.bf16 %v1824_v4  ;;  %v2354_v38 = vunpack.c.l.s8.bf16 %v1826_v36  ;;  %v1832_v11 = vld [vmem:[#allocation3 + $0xc0] sm:$0xff]  ;;  %v1834_v48 = vld [vmem:[#allocation3 + $0xd0] sm:$0xff]  ;;  %v1841_v56 = vld [vmem:[#allocation3 + $0x108] sm:$0xff] }
 0x3b1   :  { %v2361_v39 = vunpack.c.h.s8.bf16 %v1825_v49  ;;  %v2363_v40 = vunpack.c.h.s8.bf16 %v1827_v27  ;;  %v2360_v43 = vunpack.c.h.s8.bf16 %v1824_v4  ;;  %v2362_v44 = vunpack.c.h.s8.bf16 %v1826_v36  ;;  %v1843_v1 = vld [vmem:[#allocation3 + $0x118] sm:$0xff] }
 0x3b2   :  { %v2369_v45 = vunpack.c.l.s8.bf16 %v1833_v41  ;;  %v2371_v46 = vunpack.c.l.s8.bf16 %v1835_v42  ;;  %v2368_v52 = vunpack.c.l.s8.bf16 %v1832_v11  ;;  %v2370_v53 = vunpack.c.l.s8.bf16 %v1834_v48 }
 0x3b3   :  { %3363 = vmatpush1.bf16.msra.mxu0 %v2328_v54  ;;  %3691 = vmatpush1.bf16.msra.mxu1 %v2330_v10  ;;  %v2377_v50 = vunpack.c.h.s8.bf16 %v1833_v41  ;;  %v2379_v55 = vunpack.c.h.s8.bf16 %v1835_v42  ;;  %v2376_v57 = vunpack.c.h.s8.bf16 %v1832_v11  ;;  %v2378_v58 = vunpack.c.h.s8.bf16 %v1834_v48  ;;  %v1840_v54 = vld [vmem:[#allocation3 + $0x100] sm:$0xff]  ;;  %v1842_v10 = vld [vmem:[#allocation3 + $0x110] sm:$0xff] }
 0x3b4   :  { %3364 = vmatprep.subr.bf16.mxu0 %v2337_v14  ;;  %3692 = vmatprep.subr.bf16.mxu1 %v2339_v15  ;;  %v2385_v60 = vunpack.c.l.s8.bf16 %v1841_v56  ;;  %v2387_v62 = vunpack.c.l.s8.bf16 %v1843_v1  ;;  %v2384_v14 = vunpack.c.l.s8.bf16 %v1840_v54  ;;  %v2386_v15 = vunpack.c.l.s8.bf16 %v1842_v10 }
 0x3b5   :  { %v2393_v16 = vunpack.c.h.s8.bf16 %v1841_v56  ;;  %v2395_v18 = vunpack.c.h.s8.bf16 %v1843_v1 }
 0x3b7   :  { %3365 = vmatpush1.bf16.msra.mxu0 %v2336_v19  ;;  %3693 = vmatpush1.bf16.msra.mxu1 %v2338_v20  ;;  %v1849_v19 = vld [vmem:[#allocation3 + $0x148] sm:$0xff]  ;;  %v1851_v20 = vld [vmem:[#allocation3 + $0x158] sm:$0xff] }
 0x3b8   :  { %3366 = vmatprep.subr.bf16.mxu0 %v2345_v22  ;;  %3694 = vmatprep.subr.bf16.mxu1 %v2347_v24  ;;  %v2392_v22 = vunpack.c.h.s8.bf16 %v1840_v54  ;;  %v2394_v24 = vunpack.c.h.s8.bf16 %v1842_v10  ;;  %v2401_v49 = vunpack.c.l.s8.bf16 %v1849_v19  ;;  %v2403_v27 = vunpack.c.l.s8.bf16 %v1851_v20 }
 0x3b9   :  { %v2409_v4 = vunpack.c.h.s8.bf16 %v1849_v19  ;;  %v2411_v36 = vunpack.c.h.s8.bf16 %v1851_v20 }
 0x3bb   :  { %3367 = vmatpush1.bf16.msra.mxu0 %v2344_v29  ;;  %3695 = vmatpush1.bf16.msra.mxu1 %v2346_v31  ;;  %v1848_v29 = vld [vmem:[#allocation3 + $0x140] sm:$0xff]  ;;  %v1850_v31 = vld [vmem:[#allocation3 + $0x150] sm:$0xff] }
 0x3bc   :  { %3368 = vmatprep.subr.bf16.mxu0 %v2353_v35  ;;  %3696 = vmatprep.subr.bf16.mxu1 %v2355_v59  ;;  %v2400_v35 = vunpack.c.l.s8.bf16 %v1848_v29  ;;  %v2402_v59 = vunpack.c.l.s8.bf16 %v1850_v31 }
 0x3bf   :  { %3369 = vmatpush1.bf16.msra.mxu0 %v2352_v37  ;;  %3697 = vmatpush1.bf16.msra.mxu1 %v2354_v38  ;;  %v1857_v37 = vld [vmem:[#allocation3 + $0x188] sm:$0xff]  ;;  %v1859_v38 = vld [vmem:[#allocation3 + $0x198] sm:$0xff] }
 0x3c0   :  { %3370 = vmatprep.subr.bf16.mxu0 %v2361_v39  ;;  %3698 = vmatprep.subr.bf16.mxu1 %v2363_v40  ;;  %v2408_v39 = vunpack.c.h.s8.bf16 %v1848_v29  ;;  %v2410_v40 = vunpack.c.h.s8.bf16 %v1850_v31  ;;  %v2417_v41 = vunpack.c.l.s8.bf16 %v1857_v37  ;;  %v2419_v42 = vunpack.c.l.s8.bf16 %v1859_v38 }
 0x3c1   :  { %v2425_v11 = vunpack.c.h.s8.bf16 %v1857_v37  ;;  %v2427_v48 = vunpack.c.h.s8.bf16 %v1859_v38 }
 0x3c3   :  { %3371 = vmatpush1.bf16.msra.mxu0 %v2360_v43  ;;  %3699 = vmatpush1.bf16.msra.mxu1 %v2362_v44  ;;  %v1856_v43 = vld [vmem:[#allocation3 + $0x180] sm:$0xff]  ;;  %v1858_v44 = vld [vmem:[#allocation3 + $0x190] sm:$0xff] }
 0x3c4   :  { %3372 = vmatprep.subr.bf16.mxu0 %v2369_v45  ;;  %3700 = vmatprep.subr.bf16.mxu1 %v2371_v46  ;;  %v2416_v45 = vunpack.c.l.s8.bf16 %v1856_v43  ;;  %v2418_v46 = vunpack.c.l.s8.bf16 %v1858_v44 }
 0x3c7   :  { %3373 = vmatpush1.bf16.msra.mxu0 %v2368_v52  ;;  %3701 = vmatpush1.bf16.msra.mxu1 %v2370_v53  ;;  %v1865_v52 = vld [vmem:[#allocation3 + $0x1c8] sm:$0xff]  ;;  %v1867_v53 = vld [vmem:[#allocation3 + $0x1d8] sm:$0xff] }
 0x3c8   :  { %3374 = vmatprep.subr.bf16.mxu0 %v2377_v50  ;;  %3702 = vmatprep.subr.bf16.mxu1 %v2379_v55  ;;  %v2424_v50 = vunpack.c.h.s8.bf16 %v1856_v43  ;;  %v2426_v55 = vunpack.c.h.s8.bf16 %v1858_v44  ;;  %v2433_v56 = vunpack.c.l.s8.bf16 %v1865_v52  ;;  %v2435_v1 = vunpack.c.l.s8.bf16 %v1867_v53 }
 0x3c9   :  { %v2441_v54 = vunpack.c.h.s8.bf16 %v1865_v52  ;;  %v2443_v10 = vunpack.c.h.s8.bf16 %v1867_v53 }
 0x3cb   :  { %3375 = vmatpush1.bf16.msra.mxu0 %v2376_v57  ;;  %3703 = vmatpush1.bf16.msra.mxu1 %v2378_v58  ;;  %v1864_v57 = vld [vmem:[#allocation3 + $0x1c0] sm:$0xff]  ;;  %v1866_v58 = vld [vmem:[#allocation3 + $0x1d0] sm:$0xff] }
 0x3cc   :  { %3376 = vmatprep.subr.bf16.mxu0 %v2385_v60  ;;  %3704 = vmatprep.subr.bf16.mxu1 %v2387_v62  ;;  %v2432_v60 = vunpack.c.l.s8.bf16 %v1864_v57  ;;  %v2434_v62 = vunpack.c.l.s8.bf16 %v1866_v58 }
 0x3cf   :  { %3377 = vmatpush1.bf16.msra.mxu0 %v2384_v14  ;;  %3705 = vmatpush1.bf16.msra.mxu1 %v2386_v15  ;;  %v1873_v14 = vld [vmem:[#allocation3 + $0x208] sm:$0xff]  ;;  %v1875_v15 = vld [vmem:[#allocation3 + $0x218] sm:$0xff] }
 0x3d0   :  { %3378 = vmatprep.subr.bf16.mxu0 %v2393_v16  ;;  %3706 = vmatprep.subr.bf16.mxu1 %v2395_v18  ;;  %v2440_v16 = vunpack.c.h.s8.bf16 %v1864_v57  ;;  %v2442_v18 = vunpack.c.h.s8.bf16 %v1866_v58  ;;  %v2449_v19 = vunpack.c.l.s8.bf16 %v1873_v14  ;;  %v2451_v20 = vunpack.c.l.s8.bf16 %v1875_v15 }
 0x3d1   :  { %v2457_v31 = vunpack.c.h.s8.bf16 %v1873_v14 }
 0x3d3   :  { %3379 = vmatpush1.bf16.msra.mxu0 %v2392_v22  ;;  %3707 = vmatpush1.bf16.msra.mxu1 %v2394_v24  ;;  %v1872_v22 = vld [vmem:[#allocation3 + $0x200] sm:$0xff]  ;;  %v1874_v24 = vld [vmem:[#allocation3 + $0x210] sm:$0xff] }
 0x3d4   :  { %3380 = vmatprep.subr.bf16.mxu0 %v2401_v49  ;;  %3708 = vmatprep.subr.bf16.mxu1 %v2403_v27  ;;  %v6591_v49 = vpack.c.bf16 %v6463_v51, %v6463_v51  ;;  %v2448_v27 = vunpack.c.l.s8.bf16 %v1872_v22  ;;  %v2450_v29 = vunpack.c.l.s8.bf16 %v1874_v24  ;;  %v2456_v51 = vunpack.c.h.s8.bf16 %v1872_v22 }
 0x3d5   :  { %v2458_v37 = vunpack.c.h.s8.bf16 %v1874_v24 }
 0x3d7   :  { %3381 = vmatpush1.bf16.msra.mxu0 %v2400_v35  ;;  %3709 = vmatpush1.bf16.msra.mxu1 %v2402_v59  ;;  %v2459_v35 = vunpack.c.h.s8.bf16 %v1875_v15  ;;  %v1881_v59 = vld [vmem:[#allocation3 + $0x248] sm:$0xff] }
 0x3d8   :  { %3382 = vmatprep.subr.bf16.mxu0 %v2409_v4  ;;  %3710 = vmatprep.subr.bf16.mxu1 %v2411_v36  ;;  %v1883_v4 = vld [vmem:[#allocation3 + $0x258] sm:$0xff]  ;;  %v6595_v36 = vpack.c.bf16 %v6505_v63, %v6505_v63  ;;  %v2465_v38 = vunpack.c.l.s8.bf16 %v1881_v59  ;;  %v2473_v43 = vunpack.c.h.s8.bf16 %v1881_v59 }
 0x3d9   :  { %v2475_v44 = vunpack.c.h.s8.bf16 %v1883_v4 }
 0x3db   :  { %3383 = vmatpush1.bf16.msra.mxu0 %v2408_v39  ;;  %3711 = vmatpush1.bf16.msra.mxu1 %v2410_v40  ;;  %v2467_v39 = vunpack.c.l.s8.bf16 %v1883_v4  ;;  %v1880_v40 = vld [vmem:[#allocation3 + $0x240] sm:$0xff] }
 0x3dc   :  { %3384 = vmatprep.subr.bf16.mxu0 %v2417_v41  ;;  %3712 = vmatprep.subr.bf16.mxu1 %v2419_v42  ;;  %v1882_v41 = vld [vmem:[#allocation3 + $0x250] sm:$0xff]  ;;  %v2464_v63 = vunpack.c.l.s8.bf16 %v1880_v40 }
 0x3dd   :  { %v2466_v42 = vunpack.c.l.s8.bf16 %v1882_v41 }
 0x3df   :  { %3385 = vmatpush1.bf16.msra.mxu0 %v2416_v45  ;;  %3713 = vmatpush1.bf16.msra.mxu1 %v2418_v46  ;;  %v1889_v45 = vld [vmem:[#allocation3 + $0x288] sm:$0xff]  ;;  %v1891_v46 = vld [vmem:[#allocation3 + $0x298] sm:$0xff] }
 0x3e0   :  { %3386 = vmatprep.subr.bf16.mxu0 %v2425_v11  ;;  %3714 = vmatprep.subr.bf16.mxu1 %v2427_v48  ;;  %v2472_v11 = vunpack.c.h.s8.bf16 %v1880_v40  ;;  %v2474_v48 = vunpack.c.h.s8.bf16 %v1882_v41  ;;  %v2481_v52 = vunpack.c.l.s8.bf16 %v1889_v45  ;;  %v2483_v53 = vunpack.c.l.s8.bf16 %v1891_v46 }
 0x3e1   :  { %v2489_v57 = vunpack.c.h.s8.bf16 %v1889_v45  ;;  %v2491_v58 = vunpack.c.h.s8.bf16 %v1891_v46 }
 0x3e3   :  { %3387 = vmatpush1.bf16.msra.mxu0 %v2424_v50  ;;  %3715 = vmatpush1.bf16.msra.mxu1 %v2426_v55  ;;  %v1888_v50 = vld [vmem:[#allocation3 + $0x280] sm:$0xff]  ;;  %v1890_v55 = vld [vmem:[#allocation3 + $0x290] sm:$0xff] }
 0x3e4   :  { %3388 = vmatprep.subr.bf16.mxu0 %v2433_v56  ;;  %3716 = vmatprep.subr.bf16.mxu1 %v2435_v1  ;;  %v2480_v56 = vunpack.c.l.s8.bf16 %v1888_v50  ;;  %v2482_v1 = vunpack.c.l.s8.bf16 %v1890_v55 }
 0x3e7   :  { %3389 = vmatpush1.bf16.msra.mxu0 %v2432_v60  ;;  %3717 = vmatpush1.bf16.msra.mxu1 %v2434_v62  ;;  %v1897_v60 = vld [vmem:[#allocation3 + $0x2c8] sm:$0xff]  ;;  %v1899_v62 = vld [vmem:[#allocation3 + $0x2d8] sm:$0xff] }
 0x3e8   :  { %3390 = vmatprep.subr.bf16.mxu0 %v2441_v54  ;;  %3718 = vmatprep.subr.bf16.mxu1 %v2443_v10  ;;  %v2488_v54 = vunpack.c.h.s8.bf16 %v1888_v50  ;;  %v2490_v10 = vunpack.c.h.s8.bf16 %v1890_v55  ;;  %v2497_v14 = vunpack.c.l.s8.bf16 %v1897_v60  ;;  %v2499_v15 = vunpack.c.l.s8.bf16 %v1899_v62 }
 0x3e9   :  { %v2505_v22 = vunpack.c.h.s8.bf16 %v1897_v60  ;;  %v2507_v24 = vunpack.c.h.s8.bf16 %v1899_v62 }
 0x3eb   :  { %3391 = vmatpush1.bf16.msra.mxu0 %v2440_v16  ;;  %3719 = vmatpush1.bf16.msra.mxu1 %v2442_v18  ;;  %v1896_v16 = vld [vmem:[#allocation3 + $0x2c0] sm:$0xff]  ;;  %v1898_v18 = vld [vmem:[#allocation3 + $0x2d0] sm:$0xff] }
 0x3ec   :  { %3401 = vmatprep.subr.bf16.mxu0 %v2449_v19  ;;  %3729 = vmatprep.subr.bf16.mxu1 %v2451_v20  ;;  %v2496_v19 = vunpack.c.l.s8.bf16 %v1896_v16  ;;  %v2498_v20 = vunpack.c.l.s8.bf16 %v1898_v18 }
 0x3ee   :  { %3393 = vmatmul.mubr.bf16.vlgmr.msra.gmra.mrb[16].mxu0 %v6591_v49  ;;  %3721 = vmatmul.mubr.bf16.vlgmr.msra.gmra.mrb[20].mxu1 %v6591_v49 }
 0x3ef   :  { %3402 = vmatpush1.bf16.msra.mxu0 %v2448_v27  ;;  %3730 = vmatpush1.bf16.msra.mxu1 %v2450_v29  ;;  %v1905_v27 = vld [vmem:[#allocation3 + $0x308] sm:$0xff]  ;;  %v1907_v29 = vld [vmem:[#allocation3 + $0x318] sm:$0xff] }
 0x3f0   :  { %3403 = vmatprep.subr.bf16.mxu0 %v2457_v31  ;;  %3731 = vmatprep.subr.bf16.mxu1 %v2459_v35  ;;  %v2504_v31 = vunpack.c.h.s8.bf16 %v1896_v16  ;;  %v2506_v35 = vunpack.c.h.s8.bf16 %v1898_v18  ;;  %v2513_v59 = vunpack.c.l.s8.bf16 %v1905_v27  ;;  %v2515_v4 = vunpack.c.l.s8.bf16 %v1907_v29 }
 0x3f1   :  { %3433 = vmatprep.mubr.bf16.mxu0 %v6595_v36  ;;  %3761 = vmatprep.mubr.bf16.mxu1 %v6595_v36  ;;  %v2521_v40 = vunpack.c.h.s8.bf16 %v1905_v27  ;;  %v2523_v41 = vunpack.c.h.s8.bf16 %v1907_v29 }
 0x3f3   :  { %3404 = vmatpush1.bf16.msra.mxu0 %v2456_v51  ;;  %3732 = vmatpush1.bf16.msra.mxu1 %v2458_v37  ;;  %v1904_v51 = vld [vmem:[#allocation3 + $0x300] sm:$0xff]  ;;  %v1906_v37 = vld [vmem:[#allocation3 + $0x310] sm:$0xff] }
 0x3f4   :  { %3405 = vmatprep.subr.bf16.mxu0 %v2465_v38  ;;  %3733 = vmatprep.subr.bf16.mxu1 %v2467_v39  ;;  %v2512_v38 = vunpack.c.l.s8.bf16 %v1904_v51  ;;  %v2514_v39 = vunpack.c.l.s8.bf16 %v1906_v37 }
 0x3f7   :  { %3406 = vmatpush1.bf16.msra.mxu0 %v2464_v63  ;;  %3734 = vmatpush1.bf16.msra.mxu1 %v2466_v42  ;;  %v1913_v63 = vld [vmem:[#allocation3 + $0x348] sm:$0xff]  ;;  %v1915_v42 = vld [vmem:[#allocation3 + $0x358] sm:$0xff] }
 0x3f8   :  { %3407 = vmatprep.subr.bf16.mxu0 %v2473_v43  ;;  %3735 = vmatprep.subr.bf16.mxu1 %v2475_v44  ;;  %v2520_v43 = vunpack.c.h.s8.bf16 %v1904_v51  ;;  %v2522_v44 = vunpack.c.h.s8.bf16 %v1906_v37  ;;  %v2529_v45 = vunpack.c.l.s8.bf16 %v1913_v63  ;;  %v2531_v46 = vunpack.c.l.s8.bf16 %v1915_v42 }
 0x3f9   :  { %v2537_v50 = vunpack.c.h.s8.bf16 %v1913_v63  ;;  %v2539_v55 = vunpack.c.h.s8.bf16 %v1915_v42 }
 0x3fb   :  { %3408 = vmatpush1.bf16.msra.mxu0 %v2472_v11  ;;  %3736 = vmatpush1.bf16.msra.mxu1 %v2474_v48  ;;  %v1912_v11 = vld [vmem:[#allocation3 + $0x340] sm:$0xff]  ;;  %v1914_v48 = vld [vmem:[#allocation3 + $0x350] sm:$0xff] }
 0x3fc   :  { %3409 = vmatprep.subr.bf16.mxu0 %v2481_v52  ;;  %3737 = vmatprep.subr.bf16.mxu1 %v2483_v53  ;;  %v2528_v52 = vunpack.c.l.s8.bf16 %v1912_v11  ;;  %v2530_v53 = vunpack.c.l.s8.bf16 %v1914_v48 }
 0x3ff   :  { %3410 = vmatpush1.bf16.msra.mxu0 %v2480_v56  ;;  %3738 = vmatpush1.bf16.msra.mxu1 %v2482_v1  ;;  %v1921_v56 = vld [vmem:[#allocation3 + $0x388] sm:$0xff]  ;;  %v1923_v1 = vld [vmem:[#allocation3 + $0x398] sm:$0xff] }
 0x400   :  { %3411 = vmatprep.subr.bf16.mxu0 %v2489_v57  ;;  %3739 = vmatprep.subr.bf16.mxu1 %v2491_v58  ;;  %v2536_v57 = vunpack.c.h.s8.bf16 %v1912_v11  ;;  %v2538_v58 = vunpack.c.h.s8.bf16 %v1914_v48  ;;  %v2545_v60 = vunpack.c.l.s8.bf16 %v1921_v56  ;;  %v2547_v62 = vunpack.c.l.s8.bf16 %v1923_v1 }
 0x401   :  { %v2553_v16 = vunpack.c.h.s8.bf16 %v1921_v56  ;;  %v2555_v18 = vunpack.c.h.s8.bf16 %v1923_v1 }
 0x403   :  { %3412 = vmatpush1.bf16.msra.mxu0 %v2488_v54  ;;  %3740 = vmatpush1.bf16.msra.mxu1 %v2490_v10  ;;  %v1920_v54 = vld [vmem:[#allocation3 + $0x380] sm:$0xff]  ;;  %v1922_v10 = vld [vmem:[#allocation3 + $0x390] sm:$0xff] }
 0x404   :  { %3413 = vmatprep.subr.bf16.mxu0 %v2497_v14  ;;  %3741 = vmatprep.subr.bf16.mxu1 %v2499_v15  ;;  %v2544_v14 = vunpack.c.l.s8.bf16 %v1920_v54  ;;  %v2546_v15 = vunpack.c.l.s8.bf16 %v1922_v10 }
 0x407   :  { %3414 = vmatpush1.bf16.msra.mxu0 %v2496_v19  ;;  %3742 = vmatpush1.bf16.msra.mxu1 %v2498_v20  ;;  %v1929_v19 = vld [vmem:[#allocation3 + $0x3c8] sm:$0xff]  ;;  %v1931_v20 = vld [vmem:[#allocation3 + $0x3d8] sm:$0xff] }
 0x408   :  { %3415 = vmatprep.subr.bf16.mxu0 %v2505_v22  ;;  %3743 = vmatprep.subr.bf16.mxu1 %v2507_v24  ;;  %v2552_v22 = vunpack.c.h.s8.bf16 %v1920_v54  ;;  %v2554_v24 = vunpack.c.h.s8.bf16 %v1922_v10  ;;  %v2561_v27 = vunpack.c.l.s8.bf16 %v1929_v19  ;;  %v2563_v29 = vunpack.c.l.s8.bf16 %v1931_v20 }
 0x409   :  { %v2569_v51 = vunpack.c.h.s8.bf16 %v1929_v19  ;;  %v2571_v37 = vunpack.c.h.s8.bf16 %v1931_v20 }
 0x40b   :  { %3416 = vmatpush1.bf16.msra.mxu0 %v2504_v31  ;;  %3744 = vmatpush1.bf16.msra.mxu1 %v2506_v35  ;;  %v1928_v31 = vld [vmem:[#allocation3 + $0x3c0] sm:$0xff]  ;;  %v1930_v35 = vld [vmem:[#allocation3 + $0x3d0] sm:$0xff] }
 0x40c   :  { %3417 = vmatprep.subr.bf16.mxu0 %v2513_v59  ;;  %3745 = vmatprep.subr.bf16.mxu1 %v2515_v4  ;;  %v2560_v59 = vunpack.c.l.s8.bf16 %v1928_v31  ;;  %v2562_v4 = vunpack.c.l.s8.bf16 %v1930_v35 }
 0x40f   :  { %3418 = vmatpush1.bf16.msra.mxu0 %v2512_v38  ;;  %3746 = vmatpush1.bf16.msra.mxu1 %v2514_v39  ;;  %v1937_v38 = vld [vmem:[#allocation3 + $0x408] sm:$0xff]  ;;  %v1939_v39 = vld [vmem:[#allocation3 + $0x418] sm:$0xff] }
 0x410   :  { %3419 = vmatprep.subr.bf16.mxu0 %v2521_v40  ;;  %3747 = vmatprep.subr.bf16.mxu1 %v2523_v41  ;;  %v2568_v40 = vunpack.c.h.s8.bf16 %v1928_v31  ;;  %v2570_v41 = vunpack.c.h.s8.bf16 %v1930_v35  ;;  %v2577_v63 = vunpack.c.l.s8.bf16 %v1937_v38  ;;  %v2579_v42 = vunpack.c.l.s8.bf16 %v1939_v39 }
 0x411   :  { %v2585_v48 = vunpack.c.h.s8.bf16 %v1937_v38 }
 0x413   :  { %3420 = vmatpush1.bf16.msra.mxu0 %v2520_v43  ;;  %3748 = vmatpush1.bf16.msra.mxu1 %v2522_v44  ;;  %v1936_v43 = vld [vmem:[#allocation3 + $0x400] sm:$0xff]  ;;  %v1938_v44 = vld [vmem:[#allocation3 + $0x410] sm:$0xff] }
 0x414   :  { %3421 = vmatprep.subr.bf16.mxu0 %v2529_v45  ;;  %3749 = vmatprep.subr.bf16.mxu1 %v2531_v46  ;;  %v6603_v45 = vpack.c.bf16 %v6503_v3, %v6503_v3  ;;  %v2576_v46 = vunpack.c.l.s8.bf16 %v1936_v43  ;;  %v2578_v11 = vunpack.c.l.s8.bf16 %v1938_v44  ;;  %v2584_v3 = vunpack.c.h.s8.bf16 %v1936_v43 }
 0x415   :  { %v2586_v56 = vunpack.c.h.s8.bf16 %v1938_v44 }
 0x417   :  { %3422 = vmatpush1.bf16.msra.mxu0 %v2528_v52  ;;  %3750 = vmatpush1.bf16.msra.mxu1 %v2530_v53  ;;  %v2587_v52 = vunpack.c.h.s8.bf16 %v1939_v39  ;;  %v1945_v53 = vld [vmem:[#allocation3 + $0x448] sm:$0xff] }
 0x418   :  { %3423 = vmatprep.subr.bf16.mxu0 %v2537_v50  ;;  %3751 = vmatprep.subr.bf16.mxu1 %v2539_v55  ;;  %v1947_v50 = vld [vmem:[#allocation3 + $0x458] sm:$0xff]  ;;  %v6607_v55 = vpack.c.bf16 %v6509_v13, %v6509_v13  ;;  %v2593_v1 = vunpack.c.l.s8.bf16 %v1945_v53  ;;  %v2601_v54 = vunpack.c.h.s8.bf16 %v1945_v53 }
 0x419   :  { %v2603_v10 = vunpack.c.h.s8.bf16 %v1947_v50 }
 0x41b   :  { %3424 = vmatpush1.bf16.msra.mxu0 %v2536_v57  ;;  %3752 = vmatpush1.bf16.msra.mxu1 %v2538_v58  ;;  %v2595_v57 = vunpack.c.l.s8.bf16 %v1947_v50  ;;  %v1944_v58 = vld [vmem:[#allocation3 + $0x440] sm:$0xff] }
 0x41c   :  { %3425 = vmatprep.subr.bf16.mxu0 %v2545_v60  ;;  %3753 = vmatprep.subr.bf16.mxu1 %v2547_v62  ;;  %v1946_v60 = vld [vmem:[#allocation3 + $0x450] sm:$0xff]  ;;  %v2592_v13 = vunpack.c.l.s8.bf16 %v1944_v58 }
 0x41d   :  { %v2594_v62 = vunpack.c.l.s8.bf16 %v1946_v60 }
 0x41f   :  { %3426 = vmatpush1.bf16.msra.mxu0 %v2544_v14  ;;  %3754 = vmatpush1.bf16.msra.mxu1 %v2546_v15  ;;  %v1953_v14 = vld [vmem:[#allocation3 + $0x488] sm:$0xff]  ;;  %v1955_v15 = vld [vmem:[#allocation3 + $0x498] sm:$0xff] }
 0x420   :  { %3427 = vmatprep.subr.bf16.mxu0 %v2553_v16  ;;  %3755 = vmatprep.subr.bf16.mxu1 %v2555_v18  ;;  %v2600_v16 = vunpack.c.h.s8.bf16 %v1944_v58  ;;  %v2602_v18 = vunpack.c.h.s8.bf16 %v1946_v60  ;;  %v2609_v19 = vunpack.c.l.s8.bf16 %v1953_v14  ;;  %v2611_v20 = vunpack.c.l.s8.bf16 %v1955_v15 }
 0x421   :  { %v2617_v31 = vunpack.c.h.s8.bf16 %v1953_v14  ;;  %v2619_v35 = vunpack.c.h.s8.bf16 %v1955_v15 }
 0x423   :  { %3428 = vmatpush1.bf16.msra.mxu0 %v2552_v22  ;;  %3756 = vmatpush1.bf16.msra.mxu1 %v2554_v24  ;;  %v1952_v22 = vld [vmem:[#allocation3 + $0x480] sm:$0xff]  ;;  %v1954_v24 = vld [vmem:[#allocation3 + $0x490] sm:$0xff] }
 0x424   :  { %3429 = vmatprep.subr.bf16.mxu0 %v2561_v27  ;;  %3757 = vmatprep.subr.bf16.mxu1 %v2563_v29  ;;  %v2608_v27 = vunpack.c.l.s8.bf16 %v1952_v22  ;;  %v2610_v29 = vunpack.c.l.s8.bf16 %v1954_v24 }
 0x427   :  { %3430 = vmatpush1.bf16.msra.mxu0 %v2560_v59  ;;  %3758 = vmatpush1.bf16.msra.mxu1 %v2562_v4  ;;  %v1961_v59 = vld [vmem:[#allocation3 + $0x4c8] sm:$0xff]  ;;  %v1963_v4 = vld [vmem:[#allocation3 + $0x4d8] sm:$0xff] }
 0x428   :  { %3431 = vmatprep.subr.bf16.mxu0 %v2569_v51  ;;  %3759 = vmatprep.subr.bf16.mxu1 %v2571_v37  ;;  %v2616_v51 = vunpack.c.h.s8.bf16 %v1952_v22  ;;  %v2618_v37 = vunpack.c.h.s8.bf16 %v1954_v24  ;;  %v2625_v38 = vunpack.c.l.s8.bf16 %v1961_v59  ;;  %v2627_v39 = vunpack.c.l.s8.bf16 %v1963_v4 }
 0x429   :  { %v2633_v43 = vunpack.c.h.s8.bf16 %v1961_v59  ;;  %v2635_v44 = vunpack.c.h.s8.bf16 %v1963_v4 }
 0x42b   :  { %3432 = vmatpush1.bf16.msra.mxu0 %v2568_v40  ;;  %3760 = vmatpush1.bf16.msra.mxu1 %v2570_v41  ;;  %v1960_v40 = vld [vmem:[#allocation3 + $0x4c0] sm:$0xff]  ;;  %v1962_v41 = vld [vmem:[#allocation3 + $0x4d0] sm:$0xff] }
 0x42c   :  { %3442 = vmatprep.subr.bf16.mxu0 %v2577_v63  ;;  %3770 = vmatprep.subr.bf16.mxu1 %v2579_v42  ;;  %v2624_v63 = vunpack.c.l.s8.bf16 %v1960_v40  ;;  %v2626_v42 = vunpack.c.l.s8.bf16 %v1962_v41 }
 0x42e   :  { %3434 = vmatmul.mubr.bf16.vlgmr.msra.gmra.mrb[16].mxu0 %v6603_v45  ;;  %3762 = vmatmul.mubr.bf16.vlgmr.msra.gmra.mrb[20].mxu1 %v6603_v45 }
 0x42f   :  { %3443 = vmatpush1.bf16.msra.mxu0 %v2576_v46  ;;  %3771 = vmatpush1.bf16.msra.mxu1 %v2578_v11  ;;  %v1969_v46 = vld [vmem:[#allocation3 + $0x508] sm:$0xff]  ;;  %v1971_v11 = vld [vmem:[#allocation3 + $0x518] sm:$0xff] }
 0x430   :  { %3444 = vmatprep.subr.bf16.mxu0 %v2585_v48  ;;  %3772 = vmatprep.subr.bf16.mxu1 %v2587_v52  ;;  %v2632_v48 = vunpack.c.h.s8.bf16 %v1960_v40  ;;  %v2634_v52 = vunpack.c.h.s8.bf16 %v1962_v41  ;;  %v2641_v53 = vunpack.c.l.s8.bf16 %v1969_v46  ;;  %v2643_v50 = vunpack.c.l.s8.bf16 %v1971_v11 }
 0x431   :  { %3474 = vmatprep.mubr.bf16.mxu0 %v6607_v55  ;;  %3802 = vmatprep.mubr.bf16.mxu1 %v6607_v55  ;;  %v2649_v58 = vunpack.c.h.s8.bf16 %v1969_v46  ;;  %v2651_v60 = vunpack.c.h.s8.bf16 %v1971_v11 }
 0x433   :  { %3445 = vmatpush1.bf16.msra.mxu0 %v2584_v3  ;;  %3773 = vmatpush1.bf16.msra.mxu1 %v2586_v56  ;;  %v1968_v3 = vld [vmem:[#allocation3 + $0x500] sm:$0xff]  ;;  %v1970_v56 = vld [vmem:[#allocation3 + $0x510] sm:$0xff] }
 0x434   :  { %3446 = vmatprep.subr.bf16.mxu0 %v2593_v1  ;;  %3774 = vmatprep.subr.bf16.mxu1 %v2595_v57  ;;  %v2640_v1 = vunpack.c.l.s8.bf16 %v1968_v3  ;;  %v2642_v57 = vunpack.c.l.s8.bf16 %v1970_v56 }
 0x437   :  { %3447 = vmatpush1.bf16.msra.mxu0 %v2592_v13  ;;  %3775 = vmatpush1.bf16.msra.mxu1 %v2594_v62  ;;  %v1977_v13 = vld [vmem:[#allocation3 + $0x548] sm:$0xff]  ;;  %v1979_v62 = vld [vmem:[#allocation3 + $0x558] sm:$0xff] }
 0x438   :  { %3448 = vmatprep.subr.bf16.mxu0 %v2601_v54  ;;  %3776 = vmatprep.subr.bf16.mxu1 %v2603_v10  ;;  %v2648_v54 = vunpack.c.h.s8.bf16 %v1968_v3  ;;  %v2650_v10 = vunpack.c.h.s8.bf16 %v1970_v56  ;;  %v2657_v14 = vunpack.c.l.s8.bf16 %v1977_v13  ;;  %v2659_v15 = vunpack.c.l.s8.bf16 %v1979_v62 }
 0x439   :  { %v2665_v22 = vunpack.c.h.s8.bf16 %v1977_v13  ;;  %v2667_v24 = vunpack.c.h.s8.bf16 %v1979_v62 }
 0x43b   :  { %3449 = vmatpush1.bf16.msra.mxu0 %v2600_v16  ;;  %3777 = vmatpush1.bf16.msra.mxu1 %v2602_v18  ;;  %v1976_v16 = vld [vmem:[#allocation3 + $0x540] sm:$0xff]  ;;  %v1978_v18 = vld [vmem:[#allocation3 + $0x550] sm:$0xff] }
 0x43c   :  { %3450 = vmatprep.subr.bf16.mxu0 %v2609_v19  ;;  %3778 = vmatprep.subr.bf16.mxu1 %v2611_v20  ;;  %v2656_v19 = vunpack.c.l.s8.bf16 %v1976_v16  ;;  %v2658_v20 = vunpack.c.l.s8.bf16 %v1978_v18 }
 0x43f   :  { %3451 = vmatpush1.bf16.msra.mxu0 %v2608_v27  ;;  %3779 = vmatpush1.bf16.msra.mxu1 %v2610_v29  ;;  %v1985_v27 = vld [vmem:[#allocation3 + $0x588] sm:$0xff]  ;;  %v1987_v29 = vld [vmem:[#allocation3 + $0x598] sm:$0xff] }
 0x440   :  { %3452 = vmatprep.subr.bf16.mxu0 %v2617_v31  ;;  %3780 = vmatprep.subr.bf16.mxu1 %v2619_v35  ;;  %v2664_v31 = vunpack.c.h.s8.bf16 %v1976_v16  ;;  %v2666_v35 = vunpack.c.h.s8.bf16 %v1978_v18  ;;  %v2673_v59 = vunpack.c.l.s8.bf16 %v1985_v27  ;;  %v2675_v4 = vunpack.c.l.s8.bf16 %v1987_v29 }
 0x441   :  { %v2681_v40 = vunpack.c.h.s8.bf16 %v1985_v27  ;;  %v2683_v41 = vunpack.c.h.s8.bf16 %v1987_v29 }
 0x443   :  { %3453 = vmatpush1.bf16.msra.mxu0 %v2616_v51  ;;  %3781 = vmatpush1.bf16.msra.mxu1 %v2618_v37  ;;  %v1984_v51 = vld [vmem:[#allocation3 + $0x580] sm:$0xff]  ;;  %v1986_v37 = vld [vmem:[#allocation3 + $0x590] sm:$0xff] }
 0x444   :  { %3454 = vmatprep.subr.bf16.mxu0 %v2625_v38  ;;  %3782 = vmatprep.subr.bf16.mxu1 %v2627_v39  ;;  %v2672_v38 = vunpack.c.l.s8.bf16 %v1984_v51  ;;  %v2674_v39 = vunpack.c.l.s8.bf16 %v1986_v37 }
 0x447   :  { %3455 = vmatpush1.bf16.msra.mxu0 %v2624_v63  ;;  %3783 = vmatpush1.bf16.msra.mxu1 %v2626_v42  ;;  %v1993_v63 = vld [vmem:[#allocation3 + $0x5c8] sm:$0xff]  ;;  %v1995_v42 = vld [vmem:[#allocation3 + $0x5d8] sm:$0xff] }
 0x448   :  { %3456 = vmatprep.subr.bf16.mxu0 %v2633_v43  ;;  %3784 = vmatprep.subr.bf16.mxu1 %v2635_v44  ;;  %v2680_v43 = vunpack.c.h.s8.bf16 %v1984_v51  ;;  %v2682_v44 = vunpack.c.h.s8.bf16 %v1986_v37  ;;  %v2689_v46 = vunpack.c.l.s8.bf16 %v1993_v63  ;;  %v2691_v11 = vunpack.c.l.s8.bf16 %v1995_v42 }
 0x449   :  { %v2697_v3 = vunpack.c.h.s8.bf16 %v1993_v63  ;;  %v2699_v56 = vunpack.c.h.s8.bf16 %v1995_v42 }
 0x44b   :  { %3457 = vmatpush1.bf16.msra.mxu0 %v2632_v48  ;;  %3785 = vmatpush1.bf16.msra.mxu1 %v2634_v52  ;;  %v1992_v48 = vld [vmem:[#allocation3 + $0x5c0] sm:$0xff]  ;;  %v1994_v52 = vld [vmem:[#allocation3 + $0x5d0] sm:$0xff] }
 0x44c   :  { %3458 = vmatprep.subr.bf16.mxu0 %v2641_v53  ;;  %3786 = vmatprep.subr.bf16.mxu1 %v2643_v50  ;;  %v2688_v53 = vunpack.c.l.s8.bf16 %v1992_v48  ;;  %v2690_v50 = vunpack.c.l.s8.bf16 %v1994_v52 }
 0x44f   :  { %3459 = vmatpush1.bf16.msra.mxu0 %v2640_v1  ;;  %3787 = vmatpush1.bf16.msra.mxu1 %v2642_v57  ;;  %v2001_v1 = vld [vmem:[#allocation3 + $0x608] sm:$0xff]  ;;  %v2003_v57 = vld [vmem:[#allocation3 + $0x618] sm:$0xff] }
 0x450   :  { %3460 = vmatprep.subr.bf16.mxu0 %v2649_v58  ;;  %3788 = vmatprep.subr.bf16.mxu1 %v2651_v60  ;;  %v2696_v58 = vunpack.c.h.s8.bf16 %v1992_v48  ;;  %v2698_v60 = vunpack.c.h.s8.bf16 %v1994_v52  ;;  %v2705_v13 = vunpack.c.l.s8.bf16 %v2001_v1  ;;  %v2707_v62 = vunpack.c.l.s8.bf16 %v2003_v57 }
 0x451   :  { %v2713_v18 = vunpack.c.h.s8.bf16 %v2001_v1 }
 0x453   :  { %3461 = vmatpush1.bf16.msra.mxu0 %v2648_v54  ;;  %3789 = vmatpush1.bf16.msra.mxu1 %v2650_v10  ;;  %v2000_v54 = vld [vmem:[#allocation3 + $0x600] sm:$0xff]  ;;  %v2002_v10 = vld [vmem:[#allocation3 + $0x610] sm:$0xff] }
 0x454   :  { %3462 = vmatprep.subr.bf16.mxu0 %v2657_v14  ;;  %3790 = vmatprep.subr.bf16.mxu1 %v2659_v15  ;;  %v6615_v14 = vpack.c.bf16 %v6507_v2, %v6507_v2  ;;  %v2704_v15 = vunpack.c.l.s8.bf16 %v2000_v54  ;;  %v2706_v16 = vunpack.c.l.s8.bf16 %v2002_v10  ;;  %v2712_v2 = vunpack.c.h.s8.bf16 %v2000_v54 }
 0x455   :  { %v2714_v27 = vunpack.c.h.s8.bf16 %v2002_v10 }
 0x457   :  { %3463 = vmatpush1.bf16.msra.mxu0 %v2656_v19  ;;  %3791 = vmatpush1.bf16.msra.mxu1 %v2658_v20  ;;  %v2715_v19 = vunpack.c.h.s8.bf16 %v2003_v57  ;;  %v2009_v20 = vld [vmem:[#allocation3 + $0x648] sm:$0xff] }
 0x458   :  { %3464 = vmatprep.subr.bf16.mxu0 %v2665_v22  ;;  %3792 = vmatprep.subr.bf16.mxu1 %v2667_v24  ;;  %v2011_v22 = vld [vmem:[#allocation3 + $0x658] sm:$0xff]  ;;  %v6619_v24 = vpack.c.bf16 %v6540_v21, %v6540_v21  ;;  %v2721_v29 = vunpack.c.l.s8.bf16 %v2009_v20  ;;  %v2729_v51 = vunpack.c.h.s8.bf16 %v2009_v20 }
 0x459   :  { %v2731_v37 = vunpack.c.h.s8.bf16 %v2011_v22 }
 0x45b   :  { %3465 = vmatpush1.bf16.msra.mxu0 %v2664_v31  ;;  %3793 = vmatpush1.bf16.msra.mxu1 %v2666_v35  ;;  %v2723_v31 = vunpack.c.l.s8.bf16 %v2011_v22  ;;  %v2008_v35 = vld [vmem:[#allocation3 + $0x640] sm:$0xff] }
 0x45c   :  { %3466 = vmatprep.subr.bf16.mxu0 %v2673_v59  ;;  %3794 = vmatprep.subr.bf16.mxu1 %v2675_v4  ;;  %v2010_v59 = vld [vmem:[#allocation3 + $0x650] sm:$0xff]  ;;  %v2720_v21 = vunpack.c.l.s8.bf16 %v2008_v35 }
 0x45d   :  { %v2722_v4 = vunpack.c.l.s8.bf16 %v2010_v59 }
 0x45f   :  { %3467 = vmatpush1.bf16.msra.mxu0 %v2672_v38  ;;  %3795 = vmatpush1.bf16.msra.mxu1 %v2674_v39  ;;  %v2017_v38 = vld [vmem:[#allocation3 + $0x688] sm:$0xff]  ;;  %v2019_v39 = vld [vmem:[#allocation3 + $0x698] sm:$0xff] }
 0x460   :  { %3468 = vmatprep.subr.bf16.mxu0 %v2681_v40  ;;  %3796 = vmatprep.subr.bf16.mxu1 %v2683_v41  ;;  %v2728_v40 = vunpack.c.h.s8.bf16 %v2008_v35  ;;  %v2730_v41 = vunpack.c.h.s8.bf16 %v2010_v59  ;;  %v2737_v63 = vunpack.c.l.s8.bf16 %v2017_v38  ;;  %v2739_v42 = vunpack.c.l.s8.bf16 %v2019_v39 }
 0x461   :  { %v2745_v48 = vunpack.c.h.s8.bf16 %v2017_v38  ;;  %v2747_v52 = vunpack.c.h.s8.bf16 %v2019_v39 }
 0x463   :  { %3469 = vmatpush1.bf16.msra.mxu0 %v2680_v43  ;;  %3797 = vmatpush1.bf16.msra.mxu1 %v2682_v44  ;;  %v2016_v43 = vld [vmem:[#allocation3 + $0x680] sm:$0xff]  ;;  %v2018_v44 = vld [vmem:[#allocation3 + $0x690] sm:$0xff] }
 0x464   :  { %3470 = vmatprep.subr.bf16.mxu0 %v2689_v46  ;;  %3798 = vmatprep.subr.bf16.mxu1 %v2691_v11  ;;  %v2736_v46 = vunpack.c.l.s8.bf16 %v2016_v43  ;;  %v2738_v11 = vunpack.c.l.s8.bf16 %v2018_v44 }
 0x467   :  { %3471 = vmatpush1.bf16.msra.mxu0 %v2688_v53  ;;  %3799 = vmatpush1.bf16.msra.mxu1 %v2690_v50  ;;  %v2025_v53 = vld [vmem:[#allocation3 + $0x6c8] sm:$0xff]  ;;  %v2027_v50 = vld [vmem:[#allocation3 + $0x6d8] sm:$0xff] }
 0x468   :  { %3472 = vmatprep.subr.bf16.mxu0 %v2697_v3  ;;  %3800 = vmatprep.subr.bf16.mxu1 %v2699_v56  ;;  %v2744_v3 = vunpack.c.h.s8.bf16 %v2016_v43  ;;  %v2746_v56 = vunpack.c.h.s8.bf16 %v2018_v44  ;;  %v2753_v1 = vunpack.c.l.s8.bf16 %v2025_v53  ;;  %v2755_v57 = vunpack.c.l.s8.bf16 %v2027_v50 }
 0x469   :  { %v2761_v54 = vunpack.c.h.s8.bf16 %v2025_v53  ;;  %v2763_v10 = vunpack.c.h.s8.bf16 %v2027_v50 }
 0x46b   :  { %3473 = vmatpush1.bf16.msra.mxu0 %v2696_v58  ;;  %3801 = vmatpush1.bf16.msra.mxu1 %v2698_v60  ;;  %v2024_v58 = vld [vmem:[#allocation3 + $0x6c0] sm:$0xff]  ;;  %v2026_v60 = vld [vmem:[#allocation3 + $0x6d0] sm:$0xff] }
 0x46c   :  { %3483 = vmatprep.subr.bf16.mxu0 %v2705_v13  ;;  %3811 = vmatprep.subr.bf16.mxu1 %v2707_v62  ;;  %v2752_v13 = vunpack.c.l.s8.bf16 %v2024_v58  ;;  %v2754_v62 = vunpack.c.l.s8.bf16 %v2026_v60 }
 0x46e   :  { %3475 = vmatmul.mubr.bf16.vlgmr.msra.gmra.mrb[16].mxu0 %v6615_v14  ;;  %3803 = vmatmul.mubr.bf16.vlgmr.msra.gmra.mrb[20].mxu1 %v6615_v14 }
 0x46f   :  { %3484 = vmatpush1.bf16.msra.mxu0 %v2704_v15  ;;  %3812 = vmatpush1.bf16.msra.mxu1 %v2706_v16  ;;  %v2033_v15 = vld [vmem:[#allocation3 + $0x708] sm:$0xff]  ;;  %v2035_v16 = vld [vmem:[#allocation3 + $0x718] sm:$0xff] }
 0x470   :  { %3485 = vmatprep.subr.bf16.mxu0 %v2713_v18  ;;  %3813 = vmatprep.subr.bf16.mxu1 %v2715_v19  ;;  %v2760_v18 = vunpack.c.h.s8.bf16 %v2024_v58  ;;  %v2762_v19 = vunpack.c.h.s8.bf16 %v2026_v60  ;;  %v2769_v20 = vunpack.c.l.s8.bf16 %v2033_v15  ;;  %v2771_v22 = vunpack.c.l.s8.bf16 %v2035_v16 }
 0x471   :  { %3515 = vmatprep.mubr.bf16.mxu0 %v6619_v24  ;;  %3843 = vmatprep.mubr.bf16.mxu1 %v6619_v24  ;;  %v2777_v35 = vunpack.c.h.s8.bf16 %v2033_v15  ;;  %v2779_v59 = vunpack.c.h.s8.bf16 %v2035_v16 }
 0x473   :  { %3486 = vmatpush1.bf16.msra.mxu0 %v2712_v2  ;;  %3814 = vmatpush1.bf16.msra.mxu1 %v2714_v27  ;;  %v2032_v2 = vld [vmem:[#allocation3 + $0x700] sm:$0xff]  ;;  %v2034_v27 = vld [vmem:[#allocation3 + $0x710] sm:$0xff] }
 0x474   :  { %3487 = vmatprep.subr.bf16.mxu0 %v2721_v29  ;;  %3815 = vmatprep.subr.bf16.mxu1 %v2723_v31  ;;  %v2768_v29 = vunpack.c.l.s8.bf16 %v2032_v2  ;;  %v2770_v31 = vunpack.c.l.s8.bf16 %v2034_v27 }
 0x477   :  { %3488 = vmatpush1.bf16.msra.mxu0 %v2720_v21  ;;  %3816 = vmatpush1.bf16.msra.mxu1 %v2722_v4  ;;  %v2041_v21 = vld [vmem:[#allocation3 + $0x748] sm:$0xff]  ;;  %v2043_v4 = vld [vmem:[#allocation3 + $0x758] sm:$0xff] }
 0x478   :  { %3489 = vmatprep.subr.bf16.mxu0 %v2729_v51  ;;  %3817 = vmatprep.subr.bf16.mxu1 %v2731_v37  ;;  %v2776_v51 = vunpack.c.h.s8.bf16 %v2032_v2  ;;  %v2778_v37 = vunpack.c.h.s8.bf16 %v2034_v27  ;;  %v2785_v38 = vunpack.c.l.s8.bf16 %v2041_v21  ;;  %v2787_v39 = vunpack.c.l.s8.bf16 %v2043_v4 }
 0x479   :  { %v2793_v43 = vunpack.c.h.s8.bf16 %v2041_v21  ;;  %v2795_v44 = vunpack.c.h.s8.bf16 %v2043_v4 }
 0x47b   :  { %3490 = vmatpush1.bf16.msra.mxu0 %v2728_v40  ;;  %3818 = vmatpush1.bf16.msra.mxu1 %v2730_v41  ;;  %v2040_v40 = vld [vmem:[#allocation3 + $0x740] sm:$0xff]  ;;  %v2042_v41 = vld [vmem:[#allocation3 + $0x750] sm:$0xff] }
 0x47c   :  { %3491 = vmatprep.subr.bf16.mxu0 %v2737_v63  ;;  %3819 = vmatprep.subr.bf16.mxu1 %v2739_v42  ;;  %v2784_v63 = vunpack.c.l.s8.bf16 %v2040_v40  ;;  %v2786_v42 = vunpack.c.l.s8.bf16 %v2042_v41 }
 0x47f   :  { %3492 = vmatpush1.bf16.msra.mxu0 %v2736_v46  ;;  %3820 = vmatpush1.bf16.msra.mxu1 %v2738_v11  ;;  %v2049_v46 = vld [vmem:[#allocation3 + $0x788] sm:$0xff]  ;;  %v2051_v11 = vld [vmem:[#allocation3 + $0x798] sm:$0xff] }
 0x480   :  { %3493 = vmatprep.subr.bf16.mxu0 %v2745_v48  ;;  %3821 = vmatprep.subr.bf16.mxu1 %v2747_v52  ;;  %v2792_v48 = vunpack.c.h.s8.bf16 %v2040_v40  ;;  %v2794_v52 = vunpack.c.h.s8.bf16 %v2042_v41  ;;  %v2801_v53 = vunpack.c.l.s8.bf16 %v2049_v46  ;;  %v2803_v50 = vunpack.c.l.s8.bf16 %v2051_v11 }
 0x481   :  { %v2809_v58 = vunpack.c.h.s8.bf16 %v2049_v46  ;;  %v2811_v60 = vunpack.c.h.s8.bf16 %v2051_v11 }
 0x483   :  { %3494 = vmatpush1.bf16.msra.mxu0 %v2744_v3  ;;  %3822 = vmatpush1.bf16.msra.mxu1 %v2746_v56  ;;  %v2048_v3 = vld [vmem:[#allocation3 + $0x780] sm:$0xff]  ;;  %v2050_v56 = vld [vmem:[#allocation3 + $0x790] sm:$0xff] }
 0x484   :  { %3495 = vmatprep.subr.bf16.mxu0 %v2753_v1  ;;  %3823 = vmatprep.subr.bf16.mxu1 %v2755_v57  ;;  %v2800_v1 = vunpack.c.l.s8.bf16 %v2048_v3  ;;  %v2802_v57 = vunpack.c.l.s8.bf16 %v2050_v56 }
 0x487   :  { %3496 = vmatpush1.bf16.msra.mxu0 %v2752_v13  ;;  %3824 = vmatpush1.bf16.msra.mxu1 %v2754_v62  ;;  %v2057_v13 = vld [vmem:[#allocation3 + $0x7c8] sm:$0xff]  ;;  %v2059_v62 = vld [vmem:[#allocation3 + $0x7d8] sm:$0xff] }
 0x488   :  { %3497 = vmatprep.subr.bf16.mxu0 %v2761_v54  ;;  %3825 = vmatprep.subr.bf16.mxu1 %v2763_v10  ;;  %v2808_v54 = vunpack.c.h.s8.bf16 %v2048_v3  ;;  %v2810_v10 = vunpack.c.h.s8.bf16 %v2050_v56  ;;  %v2817_v15 = vunpack.c.l.s8.bf16 %v2057_v13  ;;  %v2819_v16 = vunpack.c.l.s8.bf16 %v2059_v62 }
 0x489   :  { %v2825_v2 = vunpack.c.h.s8.bf16 %v2057_v13  ;;  %v2827_v27 = vunpack.c.h.s8.bf16 %v2059_v62 }
 0x48b   :  { %3498 = vmatpush1.bf16.msra.mxu0 %v2760_v18  ;;  %3826 = vmatpush1.bf16.msra.mxu1 %v2762_v19  ;;  %v2056_v18 = vld [vmem:[#allocation3 + $0x7c0] sm:$0xff]  ;;  %v2058_v19 = vld [vmem:[#allocation3 + $0x7d0] sm:$0xff] }
 0x48c   :  { %3499 = vmatprep.subr.bf16.mxu0 %v2769_v20  ;;  %3827 = vmatprep.subr.bf16.mxu1 %v2771_v22  ;;  %v2816_v20 = vunpack.c.l.s8.bf16 %v2056_v18  ;;  %v2818_v22 = vunpack.c.l.s8.bf16 %v2058_v19 }
 0x48f   :  { %3500 = vmatpush1.bf16.msra.mxu0 %v2768_v29  ;;  %3828 = vmatpush1.bf16.msra.mxu1 %v2770_v31  ;;  %v2065_v29 = vld [vmem:[#allocation3 + $0x808] sm:$0xff]  ;;  %v2067_v31 = vld [vmem:[#allocation3 + $0x818] sm:$0xff] }
 0x490   :  { %3501 = vmatprep.subr.bf16.mxu0 %v2777_v35  ;;  %3829 = vmatprep.subr.bf16.mxu1 %v2779_v59  ;;  %v2824_v35 = vunpack.c.h.s8.bf16 %v2056_v18  ;;  %v2826_v59 = vunpack.c.h.s8.bf16 %v2058_v19  ;;  %v2833_v21 = vunpack.c.l.s8.bf16 %v2065_v29  ;;  %v2835_v4 = vunpack.c.l.s8.bf16 %v2067_v31 }
 0x491   :  { %v2841_v41 = vunpack.c.h.s8.bf16 %v2065_v29 }
 0x493   :  { %3502 = vmatpush1.bf16.msra.mxu0 %v2776_v51  ;;  %3830 = vmatpush1.bf16.msra.mxu1 %v2778_v37  ;;  %v2064_v51 = vld [vmem:[#allocation3 + $0x800] sm:$0xff]  ;;  %v2066_v37 = vld [vmem:[#allocation3 + $0x810] sm:$0xff] }
 0x494   :  { %3503 = vmatprep.subr.bf16.mxu0 %v2785_v38  ;;  %3831 = vmatprep.subr.bf16.mxu1 %v2787_v39  ;;  %v6627_v38 = vpack.c.bf16 %v6538_v17, %v6538_v17  ;;  %v2832_v39 = vunpack.c.l.s8.bf16 %v2064_v51  ;;  %v2834_v40 = vunpack.c.l.s8.bf16 %v2066_v37  ;;  %v2840_v17 = vunpack.c.h.s8.bf16 %v2064_v51 }
 0x495   :  { %v2842_v46 = vunpack.c.h.s8.bf16 %v2066_v37 }
 0x497   :  { %3504 = vmatpush1.bf16.msra.mxu0 %v2784_v63  ;;  %3832 = vmatpush1.bf16.msra.mxu1 %v2786_v42  ;;  %v2843_v63 = vunpack.c.h.s8.bf16 %v2067_v31  ;;  %v2073_v42 = vld [vmem:[#allocation3 + $0x848] sm:$0xff] }
 0x498   :  { %3505 = vmatprep.subr.bf16.mxu0 %v2793_v43  ;;  %3833 = vmatprep.subr.bf16.mxu1 %v2795_v44  ;;  %v2075_v43 = vld [vmem:[#allocation3 + $0x858] sm:$0xff]  ;;  %v6631_v44 = vpack.c.bf16 %v6544_v25, %v6544_v25  ;;  %v2849_v11 = vunpack.c.l.s8.bf16 %v2073_v42  ;;  %v2857_v3 = vunpack.c.h.s8.bf16 %v2073_v42 }
 0x499   :  { %v2859_v56 = vunpack.c.h.s8.bf16 %v2075_v43 }
 0x49b   :  { %3506 = vmatpush1.bf16.msra.mxu0 %v2792_v48  ;;  %3834 = vmatpush1.bf16.msra.mxu1 %v2794_v52  ;;  %v2851_v48 = vunpack.c.l.s8.bf16 %v2075_v43  ;;  %v2072_v52 = vld [vmem:[#allocation3 + $0x840] sm:$0xff] }
 0x49c   :  { %3507 = vmatprep.subr.bf16.mxu0 %v2801_v53  ;;  %3835 = vmatprep.subr.bf16.mxu1 %v2803_v50  ;;  %v2074_v53 = vld [vmem:[#allocation3 + $0x850] sm:$0xff]  ;;  %v2848_v25 = vunpack.c.l.s8.bf16 %v2072_v52 }
 0x49d   :  { %v2850_v50 = vunpack.c.l.s8.bf16 %v2074_v53 }
 0x49f   :  { %3508 = vmatpush1.bf16.msra.mxu0 %v2800_v1  ;;  %3836 = vmatpush1.bf16.msra.mxu1 %v2802_v57  ;;  %v2081_v1 = vld [vmem:[#allocation3 + $0x888] sm:$0xff]  ;;  %v2083_v57 = vld [vmem:[#allocation3 + $0x898] sm:$0xff] }
 0x4a0   :  { %3509 = vmatprep.subr.bf16.mxu0 %v2809_v58  ;;  %3837 = vmatprep.subr.bf16.mxu1 %v2811_v60  ;;  %v2856_v58 = vunpack.c.h.s8.bf16 %v2072_v52  ;;  %v2858_v60 = vunpack.c.h.s8.bf16 %v2074_v53  ;;  %v2865_v13 = vunpack.c.l.s8.bf16 %v2081_v1  ;;  %v2867_v62 = vunpack.c.l.s8.bf16 %v2083_v57 }
 0x4a1   :  { %v2873_v18 = vunpack.c.h.s8.bf16 %v2081_v1  ;;  %v2875_v19 = vunpack.c.h.s8.bf16 %v2083_v57 }
 0x4a3   :  { %3510 = vmatpush1.bf16.msra.mxu0 %v2808_v54  ;;  %3838 = vmatpush1.bf16.msra.mxu1 %v2810_v10  ;;  %v2080_v54 = vld [vmem:[#allocation3 + $0x880] sm:$0xff]  ;;  %v2082_v10 = vld [vmem:[#allocation3 + $0x890] sm:$0xff] }
 0x4a4   :  { %3511 = vmatprep.subr.bf16.mxu0 %v2817_v15  ;;  %3839 = vmatprep.subr.bf16.mxu1 %v2819_v16  ;;  %v2864_v15 = vunpack.c.l.s8.bf16 %v2080_v54  ;;  %v2866_v16 = vunpack.c.l.s8.bf16 %v2082_v10 }
 0x4a7   :  { %3512 = vmatpush1.bf16.msra.mxu0 %v2816_v20  ;;  %3840 = vmatpush1.bf16.msra.mxu1 %v2818_v22  ;;  %v2089_v20 = vld [vmem:[#allocation3 + $0x8c8] sm:$0xff]  ;;  %v2091_v22 = vld [vmem:[#allocation3 + $0x8d8] sm:$0xff] }
 0x4a8   :  { %3513 = vmatprep.subr.bf16.mxu0 %v2825_v2  ;;  %3841 = vmatprep.subr.bf16.mxu1 %v2827_v27  ;;  %v2872_v2 = vunpack.c.h.s8.bf16 %v2080_v54  ;;  %v2874_v27 = vunpack.c.h.s8.bf16 %v2082_v10  ;;  %v2881_v29 = vunpack.c.l.s8.bf16 %v2089_v20  ;;  %v2883_v31 = vunpack.c.l.s8.bf16 %v2091_v22 }
 0x4a9   :  { %v2889_v51 = vunpack.c.h.s8.bf16 %v2089_v20  ;;  %v2891_v37 = vunpack.c.h.s8.bf16 %v2091_v22 }
 0x4ab   :  { %3514 = vmatpush1.bf16.msra.mxu0 %v2824_v35  ;;  %3842 = vmatpush1.bf16.msra.mxu1 %v2826_v59  ;;  %v2088_v35 = vld [vmem:[#allocation3 + $0x8c0] sm:$0xff]  ;;  %v2090_v59 = vld [vmem:[#allocation3 + $0x8d0] sm:$0xff] }
 0x4ac   :  { %3524 = vmatprep.subr.bf16.mxu0 %v2833_v21  ;;  %3852 = vmatprep.subr.bf16.mxu1 %v2835_v4  ;;  %v2880_v21 = vunpack.c.l.s8.bf16 %v2088_v35  ;;  %v2882_v4 = vunpack.c.l.s8.bf16 %v2090_v59 }
 0x4ae   :  { %3516 = vmatmul.mubr.bf16.vlgmr.msra.gmra.mrb[16].mxu0 %v6627_v38  ;;  %3844 = vmatmul.mubr.bf16.vlgmr.msra.gmra.mrb[20].mxu1 %v6627_v38 }
 0x4af   :  { %3525 = vmatpush1.bf16.msra.mxu0 %v2832_v39  ;;  %3853 = vmatpush1.bf16.msra.mxu1 %v2834_v40  ;;  %v2097_v39 = vld [vmem:[#allocation3 + $0x908] sm:$0xff]  ;;  %v2099_v40 = vld [vmem:[#allocation3 + $0x918] sm:$0xff] }
 0x4b0   :  { %3526 = vmatprep.subr.bf16.mxu0 %v2841_v41  ;;  %3854 = vmatprep.subr.bf16.mxu1 %v2843_v63  ;;  %v2888_v41 = vunpack.c.h.s8.bf16 %v2088_v35  ;;  %v2890_v63 = vunpack.c.h.s8.bf16 %v2090_v59  ;;  %v2897_v42 = vunpack.c.l.s8.bf16 %v2097_v39  ;;  %v2899_v43 = vunpack.c.l.s8.bf16 %v2099_v40 }
 0x4b1   :  { %3556 = vmatprep.mubr.bf16.mxu0 %v6631_v44  ;;  %3884 = vmatprep.mubr.bf16.mxu1 %v6631_v44  ;;  %v2905_v52 = vunpack.c.h.s8.bf16 %v2097_v39  ;;  %v2907_v53 = vunpack.c.h.s8.bf16 %v2099_v40 }
 0x4b3   :  { %3527 = vmatpush1.bf16.msra.mxu0 %v2840_v17  ;;  %3855 = vmatpush1.bf16.msra.mxu1 %v2842_v46  ;;  %v2096_v17 = vld [vmem:[#allocation3 + $0x900] sm:$0xff]  ;;  %v2098_v46 = vld [vmem:[#allocation3 + $0x910] sm:$0xff] }
 0x4b4   :  { %3528 = vmatprep.subr.bf16.mxu0 %v2849_v11  ;;  %3856 = vmatprep.subr.bf16.mxu1 %v2851_v48  ;;  %v2896_v11 = vunpack.c.l.s8.bf16 %v2096_v17  ;;  %v2898_v48 = vunpack.c.l.s8.bf16 %v2098_v46 }
 0x4b7   :  { %3529 = vmatpush1.bf16.msra.mxu0 %v2848_v25  ;;  %3857 = vmatpush1.bf16.msra.mxu1 %v2850_v50  ;;  %v2105_v25 = vld [vmem:[#allocation3 + $0x948] sm:$0xff]  ;;  %v2107_v50 = vld [vmem:[#allocation3 + $0x958] sm:$0xff] }
 0x4b8   :  { %3530 = vmatprep.subr.bf16.mxu0 %v2857_v3  ;;  %3858 = vmatprep.subr.bf16.mxu1 %v2859_v56  ;;  %v2904_v3 = vunpack.c.h.s8.bf16 %v2096_v17  ;;  %v2906_v56 = vunpack.c.h.s8.bf16 %v2098_v46  ;;  %v2913_v1 = vunpack.c.l.s8.bf16 %v2105_v25  ;;  %v2915_v57 = vunpack.c.l.s8.bf16 %v2107_v50 }
 0x4b9   :  { %v2921_v54 = vunpack.c.h.s8.bf16 %v2105_v25  ;;  %v2923_v10 = vunpack.c.h.s8.bf16 %v2107_v50 }
 0x4bb   :  { %3531 = vmatpush1.bf16.msra.mxu0 %v2856_v58  ;;  %3859 = vmatpush1.bf16.msra.mxu1 %v2858_v60  ;;  %v2104_v58 = vld [vmem:[#allocation3 + $0x940] sm:$0xff]  ;;  %v2106_v60 = vld [vmem:[#allocation3 + $0x950] sm:$0xff] }
 0x4bc   :  { %3532 = vmatprep.subr.bf16.mxu0 %v2865_v13  ;;  %3860 = vmatprep.subr.bf16.mxu1 %v2867_v62  ;;  %v2912_v13 = vunpack.c.l.s8.bf16 %v2104_v58  ;;  %v2914_v62 = vunpack.c.l.s8.bf16 %v2106_v60 }
 0x4bf   :  { %3533 = vmatpush1.bf16.msra.mxu0 %v2864_v15  ;;  %3861 = vmatpush1.bf16.msra.mxu1 %v2866_v16  ;;  %v2113_v15 = vld [vmem:[#allocation3 + $0x988] sm:$0xff]  ;;  %v2115_v16 = vld [vmem:[#allocation3 + $0x998] sm:$0xff] }
 0x4c0   :  { %3534 = vmatprep.subr.bf16.mxu0 %v2873_v18  ;;  %3862 = vmatprep.subr.bf16.mxu1 %v2875_v19  ;;  %v2920_v18 = vunpack.c.h.s8.bf16 %v2104_v58  ;;  %v2922_v19 = vunpack.c.h.s8.bf16 %v2106_v60  ;;  %v2929_v20 = vunpack.c.l.s8.bf16 %v2113_v15  ;;  %v2931_v22 = vunpack.c.l.s8.bf16 %v2115_v16 }
 0x4c1   :  { %v2937_v35 = vunpack.c.h.s8.bf16 %v2113_v15  ;;  %v2939_v59 = vunpack.c.h.s8.bf16 %v2115_v16 }
 0x4c3   :  { %3535 = vmatpush1.bf16.msra.mxu0 %v2872_v2  ;;  %3863 = vmatpush1.bf16.msra.mxu1 %v2874_v27  ;;  %v2112_v2 = vld [vmem:[#allocation3 + $0x980] sm:$0xff]  ;;  %v2114_v27 = vld [vmem:[#allocation3 + $0x990] sm:$0xff] }
 0x4c4   :  { %3536 = vmatprep.subr.bf16.mxu0 %v2881_v29  ;;  %3864 = vmatprep.subr.bf16.mxu1 %v2883_v31  ;;  %v2928_v29 = vunpack.c.l.s8.bf16 %v2112_v2  ;;  %v2930_v31 = vunpack.c.l.s8.bf16 %v2114_v27 }
 0x4c7   :  { %3537 = vmatpush1.bf16.msra.mxu0 %v2880_v21  ;;  %3865 = vmatpush1.bf16.msra.mxu1 %v2882_v4  ;;  %v2121_v21 = vld [vmem:[#allocation3 + $0x9c8] sm:$0xff]  ;;  %v2123_v4 = vld [vmem:[#allocation3 + $0x9d8] sm:$0xff] }
 0x4c8   :  { %3538 = vmatprep.subr.bf16.mxu0 %v2889_v51  ;;  %3866 = vmatprep.subr.bf16.mxu1 %v2891_v37  ;;  %v2936_v51 = vunpack.c.h.s8.bf16 %v2112_v2  ;;  %v2938_v37 = vunpack.c.h.s8.bf16 %v2114_v27  ;;  %v2945_v39 = vunpack.c.l.s8.bf16 %v2121_v21  ;;  %v2947_v40 = vunpack.c.l.s8.bf16 %v2123_v4 }
 0x4c9   :  { %v2953_v17 = vunpack.c.h.s8.bf16 %v2121_v21  ;;  %v2955_v46 = vunpack.c.h.s8.bf16 %v2123_v4 }
 0x4cb   :  { %3539 = vmatpush1.bf16.msra.mxu0 %v2888_v41  ;;  %3867 = vmatpush1.bf16.msra.mxu1 %v2890_v63  ;;  %v2120_v41 = vld [vmem:[#allocation3 + $0x9c0] sm:$0xff]  ;;  %v2122_v63 = vld [vmem:[#allocation3 + $0x9d0] sm:$0xff] }
 0x4cc   :  { %3540 = vmatprep.subr.bf16.mxu0 %v2897_v42  ;;  %3868 = vmatprep.subr.bf16.mxu1 %v2899_v43  ;;  %v2944_v42 = vunpack.c.l.s8.bf16 %v2120_v41  ;;  %v2946_v43 = vunpack.c.l.s8.bf16 %v2122_v63 }
 0x4cf   :  { %3541 = vmatpush1.bf16.msra.mxu0 %v2896_v11  ;;  %3869 = vmatpush1.bf16.msra.mxu1 %v2898_v48  ;;  %v2129_v11 = vld [vmem:[#allocation3 + $0xa08] sm:$0xff]  ;;  %v2131_v48 = vld [vmem:[#allocation3 + $0xa18] sm:$0xff] }
 0x4d0   :  { %3542 = vmatprep.subr.bf16.mxu0 %v2905_v52  ;;  %3870 = vmatprep.subr.bf16.mxu1 %v2907_v53  ;;  %v2952_v52 = vunpack.c.h.s8.bf16 %v2120_v41  ;;  %v2954_v53 = vunpack.c.h.s8.bf16 %v2122_v63  ;;  %v2961_v25 = vunpack.c.l.s8.bf16 %v2129_v11  ;;  %v2963_v50 = vunpack.c.l.s8.bf16 %v2131_v48 }
 0x4d1   :  { %v2969_v60 = vunpack.c.h.s8.bf16 %v2129_v11 }
 0x4d3   :  { %3543 = vmatpush1.bf16.msra.mxu0 %v2904_v3  ;;  %3871 = vmatpush1.bf16.msra.mxu1 %v2906_v56  ;;  %v2128_v3 = vld [vmem:[#allocation3 + $0xa00] sm:$0xff]  ;;  %v2130_v56 = vld [vmem:[#allocation3 + $0xa10] sm:$0xff] }
 0x4d4   :  { %3544 = vmatprep.subr.bf16.mxu0 %v2913_v1  ;;  %3872 = vmatprep.subr.bf16.mxu1 %v2915_v57  ;;  %v6639_v1 = vpack.c.bf16 %v6542_v23, %v6542_v23  ;;  %v2960_v57 = vunpack.c.l.s8.bf16 %v2128_v3  ;;  %v2962_v58 = vunpack.c.l.s8.bf16 %v2130_v56  ;;  %v2968_v23 = vunpack.c.h.s8.bf16 %v2128_v3 }
 0x4d5   :  { %v2970_v15 = vunpack.c.h.s8.bf16 %v2130_v56 }
 0x4d7   :  { %3545 = vmatpush1.bf16.msra.mxu0 %v2912_v13  ;;  %3873 = vmatpush1.bf16.msra.mxu1 %v2914_v62  ;;  %v2971_v13 = vunpack.c.h.s8.bf16 %v2131_v48  ;;  %v2137_v62 = vld [vmem:[#allocation3 + $0xa48] sm:$0xff] }
 0x4d8   :  { %3546 = vmatprep.subr.bf16.mxu0 %v2921_v54  ;;  %3874 = vmatprep.subr.bf16.mxu1 %v2923_v10  ;;  %v2139_v54 = vld [vmem:[#allocation3 + $0xa58] sm:$0xff]  ;;  %v6643_v10 = vpack.c.bf16 %v6565_v30, %v6565_v30  ;;  %v2977_v16 = vunpack.c.l.s8.bf16 %v2137_v62  ;;  %v2985_v2 = vunpack.c.h.s8.bf16 %v2137_v62 }
 0x4d9   :  { %v2987_v27 = vunpack.c.h.s8.bf16 %v2139_v54 }
 0x4db   :  { %3547 = vmatpush1.bf16.msra.mxu0 %v2920_v18  ;;  %3875 = vmatpush1.bf16.msra.mxu1 %v2922_v19  ;;  %v2979_v18 = vunpack.c.l.s8.bf16 %v2139_v54  ;;  %v2136_v19 = vld [vmem:[#allocation3 + $0xa40] sm:$0xff] }
 0x4dc   :  { %3548 = vmatprep.subr.bf16.mxu0 %v2929_v20  ;;  %3876 = vmatprep.subr.bf16.mxu1 %v2931_v22  ;;  %v2138_v20 = vld [vmem:[#allocation3 + $0xa50] sm:$0xff]  ;;  %v2976_v30 = vunpack.c.l.s8.bf16 %v2136_v19 }
 0x4dd   :  { %v2978_v22 = vunpack.c.l.s8.bf16 %v2138_v20 }
 0x4df   :  { %3549 = vmatpush1.bf16.msra.mxu0 %v2928_v29  ;;  %3877 = vmatpush1.bf16.msra.mxu1 %v2930_v31  ;;  %v2145_v29 = vld [vmem:[#allocation3 + $0xa88] sm:$0xff]  ;;  %v2147_v31 = vld [vmem:[#allocation3 + $0xa98] sm:$0xff] }
 0x4e0   :  { %3550 = vmatprep.subr.bf16.mxu0 %v2937_v35  ;;  %3878 = vmatprep.subr.bf16.mxu1 %v2939_v59  ;;  %v2984_v35 = vunpack.c.h.s8.bf16 %v2136_v19  ;;  %v2986_v59 = vunpack.c.h.s8.bf16 %v2138_v20  ;;  %v2993_v21 = vunpack.c.l.s8.bf16 %v2145_v29  ;;  %v2995_v4 = vunpack.c.l.s8.bf16 %v2147_v31 }
 0x4e1   :  { %v3001_v41 = vunpack.c.h.s8.bf16 %v2145_v29  ;;  %v3003_v63 = vunpack.c.h.s8.bf16 %v2147_v31 }
 0x4e3   :  { %3551 = vmatpush1.bf16.msra.mxu0 %v2936_v51  ;;  %3879 = vmatpush1.bf16.msra.mxu1 %v2938_v37  ;;  %v2144_v51 = vld [vmem:[#allocation3 + $0xa80] sm:$0xff]  ;;  %v2146_v37 = vld [vmem:[#allocation3 + $0xa90] sm:$0xff] }
 0x4e4   :  { %3552 = vmatprep.subr.bf16.mxu0 %v2945_v39  ;;  %3880 = vmatprep.subr.bf16.mxu1 %v2947_v40  ;;  %v2992_v39 = vunpack.c.l.s8.bf16 %v2144_v51  ;;  %v2994_v40 = vunpack.c.l.s8.bf16 %v2146_v37 }
 0x4e7   :  { %3553 = vmatpush1.bf16.msra.mxu0 %v2944_v42  ;;  %3881 = vmatpush1.bf16.msra.mxu1 %v2946_v43  ;;  %v2153_v42 = vld [vmem:[#allocation3 + $0xac8] sm:$0xff]  ;;  %v2155_v43 = vld [vmem:[#allocation3 + $0xad8] sm:$0xff] }
 0x4e8   :  { %3554 = vmatprep.subr.bf16.mxu0 %v2953_v17  ;;  %3882 = vmatprep.subr.bf16.mxu1 %v2955_v46  ;;  %v3000_v17 = vunpack.c.h.s8.bf16 %v2144_v51  ;;  %v3002_v46 = vunpack.c.h.s8.bf16 %v2146_v37  ;;  %v3009_v11 = vunpack.c.l.s8.bf16 %v2153_v42  ;;  %v3011_v48 = vunpack.c.l.s8.bf16 %v2155_v43 }
 0x4e9   :  { %v3017_v3 = vunpack.c.h.s8.bf16 %v2153_v42  ;;  %v3019_v56 = vunpack.c.h.s8.bf16 %v2155_v43 }
 0x4eb   :  { %3555 = vmatpush1.bf16.msra.mxu0 %v2952_v52  ;;  %3883 = vmatpush1.bf16.msra.mxu1 %v2954_v53  ;;  %v2152_v52 = vld [vmem:[#allocation3 + $0xac0] sm:$0xff]  ;;  %v2154_v53 = vld [vmem:[#allocation3 + $0xad0] sm:$0xff] }
 0x4ec   :  { %3565 = vmatprep.subr.bf16.mxu0 %v2961_v25  ;;  %3893 = vmatprep.subr.bf16.mxu1 %v2963_v50  ;;  %v3008_v25 = vunpack.c.l.s8.bf16 %v2152_v52  ;;  %v3010_v50 = vunpack.c.l.s8.bf16 %v2154_v53 }
 0x4ee   :  { %3557 = vmatmul.mubr.bf16.vlgmr.msra.gmra.mrb[16].mxu0 %v6639_v1  ;;  %3885 = vmatmul.mubr.bf16.vlgmr.msra.gmra.mrb[20].mxu1 %v6639_v1 }
 0x4ef   :  { %3566 = vmatpush1.bf16.msra.mxu0 %v2960_v57  ;;  %3894 = vmatpush1.bf16.msra.mxu1 %v2962_v58  ;;  %v2161_v57 = vld [vmem:[#allocation3 + $0xb08] sm:$0xff]  ;;  %v2163_v58 = vld [vmem:[#allocation3 + $0xb18] sm:$0xff] }
 0x4f0   :  { %3567 = vmatprep.subr.bf16.mxu0 %v2969_v60  ;;  %3895 = vmatprep.subr.bf16.mxu1 %v2971_v13  ;;  %v3016_v60 = vunpack.c.h.s8.bf16 %v2152_v52  ;;  %v3018_v13 = vunpack.c.h.s8.bf16 %v2154_v53  ;;  %v3025_v62 = vunpack.c.l.s8.bf16 %v2161_v57  ;;  %v3027_v54 = vunpack.c.l.s8.bf16 %v2163_v58 }
 0x4f1   :  { %3597 = vmatprep.mubr.bf16.mxu0 %v6643_v10  ;;  %3925 = vmatprep.mubr.bf16.mxu1 %v6643_v10  ;;  %v3033_v19 = vunpack.c.h.s8.bf16 %v2161_v57  ;;  %v3035_v20 = vunpack.c.h.s8.bf16 %v2163_v58 }
 0x4f3   :  { %3568 = vmatpush1.bf16.msra.mxu0 %v2968_v23  ;;  %3896 = vmatpush1.bf16.msra.mxu1 %v2970_v15  ;;  %v2160_v23 = vld [vmem:[#allocation3 + $0xb00] sm:$0xff]  ;;  %v2162_v15 = vld [vmem:[#allocation3 + $0xb10] sm:$0xff] }
 0x4f4   :  { %3569 = vmatprep.subr.bf16.mxu0 %v2977_v16  ;;  %3897 = vmatprep.subr.bf16.mxu1 %v2979_v18  ;;  %v3024_v16 = vunpack.c.l.s8.bf16 %v2160_v23  ;;  %v3026_v18 = vunpack.c.l.s8.bf16 %v2162_v15 }
 0x4f7   :  { %3570 = vmatpush1.bf16.msra.mxu0 %v2976_v30  ;;  %3898 = vmatpush1.bf16.msra.mxu1 %v2978_v22  ;;  %v2169_v30 = vld [vmem:[#allocation3 + $0xb48] sm:$0xff]  ;;  %v2171_v22 = vld [vmem:[#allocation3 + $0xb58] sm:$0xff] }
 0x4f8   :  { %3571 = vmatprep.subr.bf16.mxu0 %v2985_v2  ;;  %3899 = vmatprep.subr.bf16.mxu1 %v2987_v27  ;;  %v3032_v2 = vunpack.c.h.s8.bf16 %v2160_v23  ;;  %v3034_v27 = vunpack.c.h.s8.bf16 %v2162_v15  ;;  %v3041_v29 = vunpack.c.l.s8.bf16 %v2169_v30  ;;  %v3043_v31 = vunpack.c.l.s8.bf16 %v2171_v22 }
 0x4f9   :  { %v3049_v51 = vunpack.c.h.s8.bf16 %v2169_v30  ;;  %v3051_v37 = vunpack.c.h.s8.bf16 %v2171_v22 }
 0x4fb   :  { %3572 = vmatpush1.bf16.msra.mxu0 %v2984_v35  ;;  %3900 = vmatpush1.bf16.msra.mxu1 %v2986_v59  ;;  %v2168_v35 = vld [vmem:[#allocation3 + $0xb40] sm:$0xff]  ;;  %v2170_v59 = vld [vmem:[#allocation3 + $0xb50] sm:$0xff] }
 0x4fc   :  { %3573 = vmatprep.subr.bf16.mxu0 %v2993_v21  ;;  %3901 = vmatprep.subr.bf16.mxu1 %v2995_v4  ;;  %v3040_v21 = vunpack.c.l.s8.bf16 %v2168_v35  ;;  %v3042_v4 = vunpack.c.l.s8.bf16 %v2170_v59 }
 0x4ff   :  { %3574 = vmatpush1.bf16.msra.mxu0 %v2992_v39  ;;  %3902 = vmatpush1.bf16.msra.mxu1 %v2994_v40  ;;  %v2177_v39 = vld [vmem:[#allocation3 + $0xb88] sm:$0xff]  ;;  %v2179_v40 = vld [vmem:[#allocation3 + $0xb98] sm:$0xff] }
 0x500   :  { %3575 = vmatprep.subr.bf16.mxu0 %v3001_v41  ;;  %3903 = vmatprep.subr.bf16.mxu1 %v3003_v63  ;;  %v3048_v41 = vunpack.c.h.s8.bf16 %v2168_v35  ;;  %v3050_v63 = vunpack.c.h.s8.bf16 %v2170_v59  ;;  %v3057_v42 = vunpack.c.l.s8.bf16 %v2177_v39  ;;  %v3059_v43 = vunpack.c.l.s8.bf16 %v2179_v40 }
 0x501   :  { %v3065_v52 = vunpack.c.h.s8.bf16 %v2177_v39  ;;  %v3067_v53 = vunpack.c.h.s8.bf16 %v2179_v40 }
 0x503   :  { %3576 = vmatpush1.bf16.msra.mxu0 %v3000_v17  ;;  %3904 = vmatpush1.bf16.msra.mxu1 %v3002_v46  ;;  %v2176_v17 = vld [vmem:[#allocation3 + $0xb80] sm:$0xff]  ;;  %v2178_v46 = vld [vmem:[#allocation3 + $0xb90] sm:$0xff] }
 0x504   :  { %3577 = vmatprep.subr.bf16.mxu0 %v3009_v11  ;;  %3905 = vmatprep.subr.bf16.mxu1 %v3011_v48  ;;  %v3056_v11 = vunpack.c.l.s8.bf16 %v2176_v17  ;;  %v3058_v48 = vunpack.c.l.s8.bf16 %v2178_v46 }
 0x507   :  { %3578 = vmatpush1.bf16.msra.mxu0 %v3008_v25  ;;  %3906 = vmatpush1.bf16.msra.mxu1 %v3010_v50  ;;  %v2185_v25 = vld [vmem:[#allocation3 + $0xbc8] sm:$0xff]  ;;  %v2187_v50 = vld [vmem:[#allocation3 + $0xbd8] sm:$0xff] }
 0x508   :  { %3579 = vmatprep.subr.bf16.mxu0 %v3017_v3  ;;  %3907 = vmatprep.subr.bf16.mxu1 %v3019_v56  ;;  %v3064_v3 = vunpack.c.h.s8.bf16 %v2176_v17  ;;  %v3066_v56 = vunpack.c.h.s8.bf16 %v2178_v46  ;;  %v3073_v57 = vunpack.c.l.s8.bf16 %v2185_v25  ;;  %v3075_v58 = vunpack.c.l.s8.bf16 %v2187_v50 }
 0x509   :  { %v3081_v23 = vunpack.c.h.s8.bf16 %v2185_v25  ;;  %v3083_v15 = vunpack.c.h.s8.bf16 %v2187_v50 }
 0x50b   :  { %3580 = vmatpush1.bf16.msra.mxu0 %v3016_v60  ;;  %3908 = vmatpush1.bf16.msra.mxu1 %v3018_v13  ;;  %v2184_v60 = vld [vmem:[#allocation3 + $0xbc0] sm:$0xff]  ;;  %v2186_v13 = vld [vmem:[#allocation3 + $0xbd0] sm:$0xff] }
 0x50c   :  { %3581 = vmatprep.subr.bf16.mxu0 %v3025_v62  ;;  %3909 = vmatprep.subr.bf16.mxu1 %v3027_v54  ;;  %v3072_v62 = vunpack.c.l.s8.bf16 %v2184_v60  ;;  %v3074_v54 = vunpack.c.l.s8.bf16 %v2186_v13 }
 0x50f   :  { %3582 = vmatpush1.bf16.msra.mxu0 %v3024_v16  ;;  %3910 = vmatpush1.bf16.msra.mxu1 %v3026_v18  ;;  %v2193_v16 = vld [vmem:[#allocation3 + $0xc08] sm:$0xff]  ;;  %v2195_v18 = vld [vmem:[#allocation3 + $0xc18] sm:$0xff] }
 0x510   :  { %3583 = vmatprep.subr.bf16.mxu0 %v3033_v19  ;;  %3911 = vmatprep.subr.bf16.mxu1 %v3035_v20  ;;  %v3080_v19 = vunpack.c.h.s8.bf16 %v2184_v60  ;;  %v3082_v20 = vunpack.c.h.s8.bf16 %v2186_v13  ;;  %v3089_v30 = vunpack.c.l.s8.bf16 %v2193_v16  ;;  %v3091_v22 = vunpack.c.l.s8.bf16 %v2195_v18 }
 0x511   :  { %v3097_v59 = vunpack.c.h.s8.bf16 %v2193_v16 }
 0x513   :  { %3584 = vmatpush1.bf16.msra.mxu0 %v3032_v2  ;;  %3912 = vmatpush1.bf16.msra.mxu1 %v3034_v27  ;;  %v2192_v2 = vld [vmem:[#allocation3 + $0xc00] sm:$0xff]  ;;  %v2194_v27 = vld [vmem:[#allocation3 + $0xc10] sm:$0xff] }
 0x514   :  { %3585 = vmatprep.subr.bf16.mxu0 %v3041_v29  ;;  %3913 = vmatprep.subr.bf16.mxu1 %v3043_v31  ;;  %v6651_v29 = vpack.c.bf16 %v6563_v5, %v6563_v5  ;;  %v3088_v31 = vunpack.c.l.s8.bf16 %v2192_v2  ;;  %v3090_v35 = vunpack.c.l.s8.bf16 %v2194_v27  ;;  %v3096_v5 = vunpack.c.h.s8.bf16 %v2192_v2 }
 0x515   :  { %v3098_v39 = vunpack.c.h.s8.bf16 %v2194_v27 }
 0x517   :  { %3586 = vmatpush1.bf16.msra.mxu0 %v3040_v21  ;;  %3914 = vmatpush1.bf16.msra.mxu1 %v3042_v4  ;;  %v3099_v21 = vunpack.c.h.s8.bf16 %v2195_v18  ;;  %v2201_v4 = vld [vmem:[#allocation3 + $0xc48] sm:$0xff] }
 0x518   :  { %3587 = vmatprep.subr.bf16.mxu0 %v3049_v51  ;;  %3915 = vmatprep.subr.bf16.mxu1 %v3051_v37  ;;  %v2203_v51 = vld [vmem:[#allocation3 + $0xc58] sm:$0xff]  ;;  %v6655_v37 = vpack.c.bf16 %v6569_v34, %v6569_v34  ;;  %v3105_v40 = vunpack.c.l.s8.bf16 %v2201_v4  ;;  %v3113_v17 = vunpack.c.h.s8.bf16 %v2201_v4 }
 0x519   :  { %v3115_v46 = vunpack.c.h.s8.bf16 %v2203_v51 }
 0x51b   :  { %3588 = vmatpush1.bf16.msra.mxu0 %v3048_v41  ;;  %3916 = vmatpush1.bf16.msra.mxu1 %v3050_v63  ;;  %v3107_v41 = vunpack.c.l.s8.bf16 %v2203_v51  ;;  %v2200_v63 = vld [vmem:[#allocation3 + $0xc40] sm:$0xff] }
 0x51c   :  { %3589 = vmatprep.subr.bf16.mxu0 %v3057_v42  ;;  %3917 = vmatprep.subr.bf16.mxu1 %v3059_v43  ;;  %v2202_v42 = vld [vmem:[#allocation3 + $0xc50] sm:$0xff]  ;;  %v3104_v34 = vunpack.c.l.s8.bf16 %v2200_v63 }
 0x51d   :  { %v3106_v43 = vunpack.c.l.s8.bf16 %v2202_v42 }
 0x51f   :  { %3590 = vmatpush1.bf16.msra.mxu0 %v3056_v11  ;;  %3918 = vmatpush1.bf16.msra.mxu1 %v3058_v48  ;;  %v2209_v11 = vld [vmem:[#allocation3 + $0xc88] sm:$0xff]  ;;  %v2211_v48 = vld [vmem:[#allocation3 + $0xc98] sm:$0xff] }
 0x520   :  { %3591 = vmatprep.subr.bf16.mxu0 %v3065_v52  ;;  %3919 = vmatprep.subr.bf16.mxu1 %v3067_v53  ;;  %v3112_v52 = vunpack.c.h.s8.bf16 %v2200_v63  ;;  %v3114_v53 = vunpack.c.h.s8.bf16 %v2202_v42  ;;  %v3121_v25 = vunpack.c.l.s8.bf16 %v2209_v11  ;;  %v3123_v50 = vunpack.c.l.s8.bf16 %v2211_v48 }
 0x521   :  { %v3129_v60 = vunpack.c.h.s8.bf16 %v2209_v11  ;;  %v3131_v13 = vunpack.c.h.s8.bf16 %v2211_v48 }
 0x523   :  { %3592 = vmatpush1.bf16.msra.mxu0 %v3064_v3  ;;  %3920 = vmatpush1.bf16.msra.mxu1 %v3066_v56  ;;  %v2208_v3 = vld [vmem:[#allocation3 + $0xc80] sm:$0xff]  ;;  %v2210_v56 = vld [vmem:[#allocation3 + $0xc90] sm:$0xff] }
 0x524   :  { %3593 = vmatprep.subr.bf16.mxu0 %v3073_v57  ;;  %3921 = vmatprep.subr.bf16.mxu1 %v3075_v58  ;;  %v3120_v57 = vunpack.c.l.s8.bf16 %v2208_v3  ;;  %v3122_v58 = vunpack.c.l.s8.bf16 %v2210_v56 }
 0x527   :  { %3594 = vmatpush1.bf16.msra.mxu0 %v3072_v62  ;;  %3922 = vmatpush1.bf16.msra.mxu1 %v3074_v54  ;;  %v2217_v62 = vld [vmem:[#allocation3 + $0xcc8] sm:$0xff]  ;;  %v2219_v54 = vld [vmem:[#allocation3 + $0xcd8] sm:$0xff] }
 0x528   :  { %3595 = vmatprep.subr.bf16.mxu0 %v3081_v23  ;;  %3923 = vmatprep.subr.bf16.mxu1 %v3083_v15  ;;  %v3128_v23 = vunpack.c.h.s8.bf16 %v2208_v3  ;;  %v3130_v15 = vunpack.c.h.s8.bf16 %v2210_v56  ;;  %v3137_v16 = vunpack.c.l.s8.bf16 %v2217_v62  ;;  %v3139_v18 = vunpack.c.l.s8.bf16 %v2219_v54 }
 0x529   :  { %v3145_v2 = vunpack.c.h.s8.bf16 %v2217_v62  ;;  %v3147_v27 = vunpack.c.h.s8.bf16 %v2219_v54 }
 0x52b   :  { %3596 = vmatpush1.bf16.msra.mxu0 %v3080_v19  ;;  %3924 = vmatpush1.bf16.msra.mxu1 %v3082_v20  ;;  %v2216_v19 = vld [vmem:[#allocation3 + $0xcc0] sm:$0xff]  ;;  %v2218_v20 = vld [vmem:[#allocation3 + $0xcd0] sm:$0xff] }
 0x52c   :  { %3606 = vmatprep.subr.bf16.mxu0 %v3089_v30  ;;  %3934 = vmatprep.subr.bf16.mxu1 %v3091_v22  ;;  %v3136_v30 = vunpack.c.l.s8.bf16 %v2216_v19  ;;  %v3138_v22 = vunpack.c.l.s8.bf16 %v2218_v20 }
 0x52e   :  { %3598 = vmatmul.mubr.bf16.vlgmr.msra.gmra.mrb[16].mxu0 %v6651_v29  ;;  %3926 = vmatmul.mubr.bf16.vlgmr.msra.gmra.mrb[20].mxu1 %v6651_v29 }
 0x52f   :  { %3607 = vmatpush1.bf16.msra.mxu0 %v3088_v31  ;;  %3935 = vmatpush1.bf16.msra.mxu1 %v3090_v35  ;;  %v2225_v31 = vld [vmem:[#allocation3 + $0xd08] sm:$0xff]  ;;  %v2227_v35 = vld [vmem:[#allocation3 + $0xd18] sm:$0xff] }
 0x530   :  { %3608 = vmatprep.subr.bf16.mxu0 %v3097_v59  ;;  %3936 = vmatprep.subr.bf16.mxu1 %v3099_v21  ;;  %v3144_v59 = vunpack.c.h.s8.bf16 %v2216_v19  ;;  %v3146_v21 = vunpack.c.h.s8.bf16 %v2218_v20  ;;  %v3153_v4 = vunpack.c.l.s8.bf16 %v2225_v31  ;;  %v3155_v51 = vunpack.c.l.s8.bf16 %v2227_v35 }
 0x531   :  { %3638 = vmatprep.mubr.bf16.mxu0 %v6655_v37  ;;  %3966 = vmatprep.mubr.bf16.mxu1 %v6655_v37  ;;  %v3161_v63 = vunpack.c.h.s8.bf16 %v2225_v31  ;;  %v3163_v42 = vunpack.c.h.s8.bf16 %v2227_v35 }
 0x533   :  { %3609 = vmatpush1.bf16.msra.mxu0 %v3096_v5  ;;  %3937 = vmatpush1.bf16.msra.mxu1 %v3098_v39  ;;  %v2224_v5 = vld [vmem:[#allocation3 + $0xd00] sm:$0xff]  ;;  %v2226_v39 = vld [vmem:[#allocation3 + $0xd10] sm:$0xff] }
 0x534   :  { %3610 = vmatprep.subr.bf16.mxu0 %v3105_v40  ;;  %3938 = vmatprep.subr.bf16.mxu1 %v3107_v41  ;;  %v3152_v40 = vunpack.c.l.s8.bf16 %v2224_v5  ;;  %v3154_v41 = vunpack.c.l.s8.bf16 %v2226_v39 }
 0x537   :  { %3611 = vmatpush1.bf16.msra.mxu0 %v3104_v34  ;;  %3939 = vmatpush1.bf16.msra.mxu1 %v3106_v43  ;;  %v2233_v34 = vld [vmem:[#allocation3 + $0xd48] sm:$0xff]  ;;  %v2235_v43 = vld [vmem:[#allocation3 + $0xd58] sm:$0xff] }
 0x538   :  { %3612 = vmatprep.subr.bf16.mxu0 %v3113_v17  ;;  %3940 = vmatprep.subr.bf16.mxu1 %v3115_v46  ;;  %v3160_v17 = vunpack.c.h.s8.bf16 %v2224_v5  ;;  %v3162_v46 = vunpack.c.h.s8.bf16 %v2226_v39  ;;  %v3169_v11 = vunpack.c.l.s8.bf16 %v2233_v34  ;;  %v3171_v48 = vunpack.c.l.s8.bf16 %v2235_v43 }
 0x539   :  { %v3177_v3 = vunpack.c.h.s8.bf16 %v2233_v34  ;;  %v3179_v56 = vunpack.c.h.s8.bf16 %v2235_v43 }
 0x53b   :  { %3613 = vmatpush1.bf16.msra.mxu0 %v3112_v52  ;;  %3941 = vmatpush1.bf16.msra.mxu1 %v3114_v53  ;;  %v2232_v52 = vld [vmem:[#allocation3 + $0xd40] sm:$0xff]  ;;  %v2234_v53 = vld [vmem:[#allocation3 + $0xd50] sm:$0xff] }
 0x53c   :  { %3614 = vmatprep.subr.bf16.mxu0 %v3121_v25  ;;  %3942 = vmatprep.subr.bf16.mxu1 %v3123_v50  ;;  %v3168_v25 = vunpack.c.l.s8.bf16 %v2232_v52  ;;  %v3170_v50 = vunpack.c.l.s8.bf16 %v2234_v53 }
 0x53f   :  { %3615 = vmatpush1.bf16.msra.mxu0 %v3120_v57  ;;  %3943 = vmatpush1.bf16.msra.mxu1 %v3122_v58  ;;  %v2241_v57 = vld [vmem:[#allocation3 + $0xd88] sm:$0xff]  ;;  %v2243_v58 = vld [vmem:[#allocation3 + $0xd98] sm:$0xff] }
 0x540   :  { %3616 = vmatprep.subr.bf16.mxu0 %v3129_v60  ;;  %3944 = vmatprep.subr.bf16.mxu1 %v3131_v13  ;;  %v3176_v60 = vunpack.c.h.s8.bf16 %v2232_v52  ;;  %v3178_v13 = vunpack.c.h.s8.bf16 %v2234_v53  ;;  %v3185_v62 = vunpack.c.l.s8.bf16 %v2241_v57  ;;  %v3187_v54 = vunpack.c.l.s8.bf16 %v2243_v58 }
 0x541   :  { %v3193_v19 = vunpack.c.h.s8.bf16 %v2241_v57  ;;  %v3195_v20 = vunpack.c.h.s8.bf16 %v2243_v58 }
 0x543   :  { %3617 = vmatpush1.bf16.msra.mxu0 %v3128_v23  ;;  %3945 = vmatpush1.bf16.msra.mxu1 %v3130_v15  ;;  %v2240_v23 = vld [vmem:[#allocation3 + $0xd80] sm:$0xff]  ;;  %v2242_v15 = vld [vmem:[#allocation3 + $0xd90] sm:$0xff] }
 0x544   :  { %3618 = vmatprep.subr.bf16.mxu0 %v3137_v16  ;;  %3946 = vmatprep.subr.bf16.mxu1 %v3139_v18  ;;  %v3184_v16 = vunpack.c.l.s8.bf16 %v2240_v23  ;;  %v3186_v18 = vunpack.c.l.s8.bf16 %v2242_v15 }
 0x547   :  { %3619 = vmatpush1.bf16.msra.mxu0 %v3136_v30  ;;  %3947 = vmatpush1.bf16.msra.mxu1 %v3138_v22  ;;  %v2249_v30 = vld [vmem:[#allocation3 + $0xdc8] sm:$0xff]  ;;  %v2251_v22 = vld [vmem:[#allocation3 + $0xdd8] sm:$0xff] }
 0x548   :  { %3620 = vmatprep.subr.bf16.mxu0 %v3145_v2  ;;  %3948 = vmatprep.subr.bf16.mxu1 %v3147_v27  ;;  %v3192_v2 = vunpack.c.h.s8.bf16 %v2240_v23  ;;  %v3194_v27 = vunpack.c.h.s8.bf16 %v2242_v15  ;;  %v3201_v31 = vunpack.c.l.s8.bf16 %v2249_v30  ;;  %v3203_v35 = vunpack.c.l.s8.bf16 %v2251_v22 }
 0x549   :  { %v3209_v5 = vunpack.c.h.s8.bf16 %v2249_v30  ;;  %v3211_v39 = vunpack.c.h.s8.bf16 %v2251_v22 }
 0x54b   :  { %3621 = vmatpush1.bf16.msra.mxu0 %v3144_v59  ;;  %3949 = vmatpush1.bf16.msra.mxu1 %v3146_v21  ;;  %v2248_v59 = vld [vmem:[#allocation3 + $0xdc0] sm:$0xff]  ;;  %v2250_v21 = vld [vmem:[#allocation3 + $0xdd0] sm:$0xff] }
 0x54c   :  { %3622 = vmatprep.subr.bf16.mxu0 %v3153_v4  ;;  %3950 = vmatprep.subr.bf16.mxu1 %v3155_v51  ;;  %v3200_v4 = vunpack.c.l.s8.bf16 %v2248_v59  ;;  %v3202_v51 = vunpack.c.l.s8.bf16 %v2250_v21 }
 0x54f   :  { %3623 = vmatpush1.bf16.msra.mxu0 %v3152_v40  ;;  %3951 = vmatpush1.bf16.msra.mxu1 %v3154_v41  ;;  %v2257_v40 = vld [vmem:[#allocation3 + $0xe08] sm:$0xff]  ;;  %v2259_v41 = vld [vmem:[#allocation3 + $0xe18] sm:$0xff] }
 0x550   :  { %3624 = vmatprep.subr.bf16.mxu0 %v3161_v63  ;;  %3952 = vmatprep.subr.bf16.mxu1 %v3163_v42  ;;  %v3208_v63 = vunpack.c.h.s8.bf16 %v2248_v59  ;;  %v3210_v42 = vunpack.c.h.s8.bf16 %v2250_v21  ;;  %v3217_v34 = vunpack.c.l.s8.bf16 %v2257_v40  ;;  %v3219_v43 = vunpack.c.l.s8.bf16 %v2259_v41 }
 0x551   :  { %v3225_v53 = vunpack.c.h.s8.bf16 %v2257_v40 }
 0x553   :  { %3625 = vmatpush1.bf16.msra.mxu0 %v3160_v17  ;;  %3953 = vmatpush1.bf16.msra.mxu1 %v3162_v46  ;;  %v2256_v17 = vld [vmem:[#allocation3 + $0xe00] sm:$0xff]  ;;  %v2258_v46 = vld [vmem:[#allocation3 + $0xe10] sm:$0xff] }
 0x554   :  { %3626 = vmatprep.subr.bf16.mxu0 %v3169_v11  ;;  %3954 = vmatprep.subr.bf16.mxu1 %v3171_v48  ;;  %v6663_v11 = vpack.c.bf16 %v6567_v32, %v6567_v32  ;;  %v3216_v48 = vunpack.c.l.s8.bf16 %v2256_v17  ;;  %v3218_v52 = vunpack.c.l.s8.bf16 %v2258_v46  ;;  %v3224_v32 = vunpack.c.h.s8.bf16 %v2256_v17 }
 0x555   :  { %v3226_v57 = vunpack.c.h.s8.bf16 %v2258_v46 }
 0x557   :  { %3627 = vmatpush1.bf16.msra.mxu0 %v3168_v25  ;;  %3955 = vmatpush1.bf16.msra.mxu1 %v3170_v50  ;;  %v3227_v25 = vunpack.c.h.s8.bf16 %v2259_v41  ;;  %v2265_v50 = vld [vmem:[#allocation3 + $0xe48] sm:$0xff] }
 0x558   :  { %3628 = vmatprep.subr.bf16.mxu0 %v3177_v3  ;;  %3956 = vmatprep.subr.bf16.mxu1 %v3179_v56  ;;  %v2267_v3 = vld [vmem:[#allocation3 + $0xe58] sm:$0xff]  ;;  %v6667_v56 = vpack.c.bf16 %v6581_v28, %v6581_v28  ;;  %v3233_v58 = vunpack.c.l.s8.bf16 %v2265_v50  ;;  %v3241_v23 = vunpack.c.h.s8.bf16 %v2265_v50 }
 0x559   :  { %v3243_v15 = vunpack.c.h.s8.bf16 %v2267_v3 }
 0x55b   :  { %3629 = vmatpush1.bf16.msra.mxu0 %v3176_v60  ;;  %3957 = vmatpush1.bf16.msra.mxu1 %v3178_v13  ;;  %v3235_v60 = vunpack.c.l.s8.bf16 %v2267_v3  ;;  %v2264_v13 = vld [vmem:[#allocation3 + $0xe40] sm:$0xff] }
 0x55c   :  { %3630 = vmatprep.subr.bf16.mxu0 %v3185_v62  ;;  %3958 = vmatprep.subr.bf16.mxu1 %v3187_v54  ;;  %v2266_v62 = vld [vmem:[#allocation3 + $0xe50] sm:$0xff]  ;;  %v3232_v28 = vunpack.c.l.s8.bf16 %v2264_v13 }
 0x55d   :  { %v3234_v54 = vunpack.c.l.s8.bf16 %v2266_v62 }
 0x55f   :  { %3631 = vmatpush1.bf16.msra.mxu0 %v3184_v16  ;;  %3959 = vmatpush1.bf16.msra.mxu1 %v3186_v18  ;;  %v2273_v16 = vld [vmem:[#allocation3 + $0xe88] sm:$0xff]  ;;  %v2275_v18 = vld [vmem:[#allocation3 + $0xe98] sm:$0xff] }
 0x560   :  { %3632 = vmatprep.subr.bf16.mxu0 %v3193_v19  ;;  %3960 = vmatprep.subr.bf16.mxu1 %v3195_v20  ;;  %v3240_v19 = vunpack.c.h.s8.bf16 %v2264_v13  ;;  %v3242_v20 = vunpack.c.h.s8.bf16 %v2266_v62  ;;  %v3249_v30 = vunpack.c.l.s8.bf16 %v2273_v16  ;;  %v3251_v22 = vunpack.c.l.s8.bf16 %v2275_v18 }
 0x561   :  { %v3257_v59 = vunpack.c.h.s8.bf16 %v2273_v16  ;;  %v3259_v21 = vunpack.c.h.s8.bf16 %v2275_v18 }
 0x563   :  { %3633 = vmatpush1.bf16.msra.mxu0 %v3192_v2  ;;  %3961 = vmatpush1.bf16.msra.mxu1 %v3194_v27  ;;  %v2272_v2 = vld [vmem:[#allocation3 + $0xe80] sm:$0xff]  ;;  %v2274_v27 = vld [vmem:[#allocation3 + $0xe90] sm:$0xff] }
 0x564   :  { %3634 = vmatprep.subr.bf16.mxu0 %v3201_v31  ;;  %3962 = vmatprep.subr.bf16.mxu1 %v3203_v35  ;;  %v3248_v31 = vunpack.c.l.s8.bf16 %v2272_v2  ;;  %v3250_v35 = vunpack.c.l.s8.bf16 %v2274_v27 }
 0x567   :  { %3635 = vmatpush1.bf16.msra.mxu0 %v3200_v4  ;;  %3963 = vmatpush1.bf16.msra.mxu1 %v3202_v51  ;;  %v2281_v4 = vld [vmem:[#allocation3 + $0xec8] sm:$0xff]  ;;  %v2283_v51 = vld [vmem:[#allocation3 + $0xed8] sm:$0xff] }
 0x568   :  { %3636 = vmatprep.subr.bf16.mxu0 %v3209_v5  ;;  %3964 = vmatprep.subr.bf16.mxu1 %v3211_v39  ;;  %v3256_v5 = vunpack.c.h.s8.bf16 %v2272_v2  ;;  %v3258_v39 = vunpack.c.h.s8.bf16 %v2274_v27  ;;  %v3265_v40 = vunpack.c.l.s8.bf16 %v2281_v4  ;;  %v3267_v41 = vunpack.c.l.s8.bf16 %v2283_v51 }
 0x569   :  { %v3273_v17 = vunpack.c.h.s8.bf16 %v2281_v4  ;;  %v3275_v46 = vunpack.c.h.s8.bf16 %v2283_v51 }
 0x56b   :  { %3637 = vmatpush1.bf16.msra.mxu0 %v3208_v63  ;;  %3965 = vmatpush1.bf16.msra.mxu1 %v3210_v42  ;;  %v2280_v63 = vld [vmem:[#allocation3 + $0xec0] sm:$0xff]  ;;  %v2282_v42 = vld [vmem:[#allocation3 + $0xed0] sm:$0xff] }
 0x56c   :  { %3647 = vmatprep.subr.bf16.mxu0 %v3217_v34  ;;  %3975 = vmatprep.subr.bf16.mxu1 %v3219_v43  ;;  %v3264_v34 = vunpack.c.l.s8.bf16 %v2280_v63  ;;  %v3266_v43 = vunpack.c.l.s8.bf16 %v2282_v42 }
 0x56e   :  { %3639 = vmatmul.mubr.bf16.vlgmr.msra.gmra.mrb[16].mxu0 %v6663_v11  ;;  %3967 = vmatmul.mubr.bf16.vlgmr.msra.gmra.mrb[20].mxu1 %v6663_v11 }
 0x56f   :  { %3648 = vmatpush1.bf16.msra.mxu0 %v3216_v48  ;;  %3976 = vmatpush1.bf16.msra.mxu1 %v3218_v52  ;;  %v2289_v48 = vld [vmem:[#allocation3 + $0xf08] sm:$0xff]  ;;  %v2291_v52 = vld [vmem:[#allocation3 + $0xf18] sm:$0xff] }
 0x570   :  { %3649 = vmatprep.subr.bf16.mxu0 %v3225_v53  ;;  %3977 = vmatprep.subr.bf16.mxu1 %v3227_v25  ;;  %v3272_v53 = vunpack.c.h.s8.bf16 %v2280_v63  ;;  %v3274_v25 = vunpack.c.h.s8.bf16 %v2282_v42  ;;  %v3281_v50 = vunpack.c.l.s8.bf16 %v2289_v48  ;;  %v3283_v3 = vunpack.c.l.s8.bf16 %v2291_v52 }
 0x571   :  { %3679 = vmatprep.mubr.bf16.mxu0 %v6667_v56  ;;  %4007 = vmatprep.mubr.bf16.mxu1 %v6667_v56  ;;  %v3289_v13 = vunpack.c.h.s8.bf16 %v2289_v48  ;;  %v3291_v62 = vunpack.c.h.s8.bf16 %v2291_v52 }
 0x573   :  { %3650 = vmatpush1.bf16.msra.mxu0 %v3224_v32  ;;  %3978 = vmatpush1.bf16.msra.mxu1 %v3226_v57  ;;  %v2288_v32 = vld [vmem:[#allocation3 + $0xf00] sm:$0xff]  ;;  %v2290_v57 = vld [vmem:[#allocation3 + $0xf10] sm:$0xff] }
 0x574   :  { %3651 = vmatprep.subr.bf16.mxu0 %v3233_v58  ;;  %3979 = vmatprep.subr.bf16.mxu1 %v3235_v60  ;;  %v3280_v58 = vunpack.c.l.s8.bf16 %v2288_v32  ;;  %v3282_v60 = vunpack.c.l.s8.bf16 %v2290_v57 }
 0x577   :  { %3652 = vmatpush1.bf16.msra.mxu0 %v3232_v28  ;;  %3980 = vmatpush1.bf16.msra.mxu1 %v3234_v54  ;;  %v2297_v28 = vld [vmem:[#allocation3 + $0xf48] sm:$0xff]  ;;  %v2299_v54 = vld [vmem:[#allocation3 + $0xf58] sm:$0xff] }
 0x578   :  { %3653 = vmatprep.subr.bf16.mxu0 %v3241_v23  ;;  %3981 = vmatprep.subr.bf16.mxu1 %v3243_v15  ;;  %v3288_v23 = vunpack.c.h.s8.bf16 %v2288_v32  ;;  %v3290_v15 = vunpack.c.h.s8.bf16 %v2290_v57  ;;  %v3297_v16 = vunpack.c.l.s8.bf16 %v2297_v28  ;;  %v3299_v18 = vunpack.c.l.s8.bf16 %v2299_v54 }
 0x579   :  { %v3305_v2 = vunpack.c.h.s8.bf16 %v2297_v28  ;;  %v3307_v27 = vunpack.c.h.s8.bf16 %v2299_v54 }
 0x57b   :  { %3654 = vmatpush1.bf16.msra.mxu0 %v3240_v19  ;;  %3982 = vmatpush1.bf16.msra.mxu1 %v3242_v20  ;;  %v2296_v19 = vld [vmem:[#allocation3 + $0xf40] sm:$0xff]  ;;  %v2298_v20 = vld [vmem:[#allocation3 + $0xf50] sm:$0xff] }
 0x57c   :  { %3655 = vmatprep.subr.bf16.mxu0 %v3249_v30  ;;  %3983 = vmatprep.subr.bf16.mxu1 %v3251_v22  ;;  %v3296_v30 = vunpack.c.l.s8.bf16 %v2296_v19  ;;  %v3298_v22 = vunpack.c.l.s8.bf16 %v2298_v20 }
 0x57f   :  { %3656 = vmatpush1.bf16.msra.mxu0 %v3248_v31  ;;  %3984 = vmatpush1.bf16.msra.mxu1 %v3250_v35  ;;  %v2305_v31 = vld [vmem:[#allocation3 + $0xf88] sm:$0xff]  ;;  %v2307_v35 = vld [vmem:[#allocation3 + $0xf98] sm:$0xff] }
 0x580   :  { %3657 = vmatprep.subr.bf16.mxu0 %v3257_v59  ;;  %3985 = vmatprep.subr.bf16.mxu1 %v3259_v21  ;;  %v3304_v59 = vunpack.c.h.s8.bf16 %v2296_v19  ;;  %v3306_v21 = vunpack.c.h.s8.bf16 %v2298_v20  ;;  %v3313_v4 = vunpack.c.l.s8.bf16 %v2305_v31  ;;  %v3315_v51 = vunpack.c.l.s8.bf16 %v2307_v35 }
 0x581   :  { %v3321_v63 = vunpack.c.h.s8.bf16 %v2305_v31  ;;  %v3323_v42 = vunpack.c.h.s8.bf16 %v2307_v35 }
 0x583   :  { %3658 = vmatpush1.bf16.msra.mxu0 %v3256_v5  ;;  %3986 = vmatpush1.bf16.msra.mxu1 %v3258_v39  ;;  %v2304_v5 = vld [vmem:[#allocation3 + $0xf80] sm:$0xff]  ;;  %v2306_v39 = vld [vmem:[#allocation3 + $0xf90] sm:$0xff] }
 0x584   :  { %3659 = vmatprep.subr.bf16.mxu0 %v3265_v40  ;;  %3987 = vmatprep.subr.bf16.mxu1 %v3267_v41  ;;  %v3312_v40 = vunpack.c.l.s8.bf16 %v2304_v5  ;;  %v3314_v41 = vunpack.c.l.s8.bf16 %v2306_v39 }
 0x587   :  { %3660 = vmatpush1.bf16.msra.mxu0 %v3264_v34  ;;  %3988 = vmatpush1.bf16.msra.mxu1 %v3266_v43  ;;  %v2313_v34 = vld [vmem:[#allocation3 + $0xfc8] sm:$0xff]  ;;  %v2315_v43 = vld [vmem:[#allocation3 + $0xfd8] sm:$0xff] }
 0x588   :  { %3661 = vmatprep.subr.bf16.mxu0 %v3273_v17  ;;  %3989 = vmatprep.subr.bf16.mxu1 %v3275_v46  ;;  %v3320_v17 = vunpack.c.h.s8.bf16 %v2304_v5  ;;  %v3322_v46 = vunpack.c.h.s8.bf16 %v2306_v39  ;;  %v3329_v48 = vunpack.c.l.s8.bf16 %v2313_v34  ;;  %v3331_v52 = vunpack.c.l.s8.bf16 %v2315_v43 }
 0x589   :  { %v3337_v32 = vunpack.c.h.s8.bf16 %v2313_v34  ;;  %v3339_v57 = vunpack.c.h.s8.bf16 %v2315_v43 }
 0x58b   :  { %3662 = vmatpush1.bf16.msra.mxu0 %v3272_v53  ;;  %3990 = vmatpush1.bf16.msra.mxu1 %v3274_v25  ;;  %v2312_v53 = vld [vmem:[#allocation3 + $0xfc0] sm:$0xff]  ;;  %v2314_v25 = vld [vmem:[#allocation3 + $0xfd0] sm:$0xff] }
 0x58c   :  { %3663 = vmatprep.subr.bf16.mxu0 %v3281_v50  ;;  %3991 = vmatprep.subr.bf16.mxu1 %v3283_v3  ;;  %v3328_v50 = vunpack.c.l.s8.bf16 %v2312_v53  ;;  %v3330_v3 = vunpack.c.l.s8.bf16 %v2314_v25 }
 0x58f   :  { %3664 = vmatpush1.bf16.msra.mxu0 %v3280_v58  ;;  %3992 = vmatpush1.bf16.msra.mxu1 %v3282_v60  ;;  %v1813_v58 = vld [vmem:[#allocation3 + $0x28] sm:$0xff]  ;;  %v1815_v60 = vld [vmem:[#allocation3 + $0x38] sm:$0xff] }
 0x590   :  { %3665 = vmatprep.subr.bf16.mxu0 %v3289_v13  ;;  %3993 = vmatprep.subr.bf16.mxu1 %v3291_v62  ;;  %v3336_v13 = vunpack.c.h.s8.bf16 %v2312_v53  ;;  %v3338_v62 = vunpack.c.h.s8.bf16 %v2314_v25  ;;  %v2325_v28 = vunpack.c.l.s8.bf16 %v1813_v58  ;;  %v2327_v54 = vunpack.c.l.s8.bf16 %v1815_v60  ;;  %v1837_v25 = vld [vmem:[#allocation3 + $0xe8] sm:$0xff] }
 0x591   :  { %v2333_v20 = vunpack.c.h.s8.bf16 %v1813_v58 }
 0x593   :  { %3666 = vmatpush1.bf16.msra.mxu0 %v3288_v23  ;;  %3994 = vmatpush1.bf16.msra.mxu1 %v3290_v15  ;;  %v1812_v23 = vld [vmem:[#allocation3 + $0x20] sm:$0xff]  ;;  %v1814_v15 = vld [vmem:[#allocation3 + $0x30] sm:$0xff] }
 0x594   :  { %3667 = vmatprep.subr.bf16.mxu0 %v3297_v16  ;;  %3995 = vmatprep.subr.bf16.mxu1 %v3299_v18  ;;  %v6675_v16 = vpack.c.bf16 %v6579_v47, %v6579_v47  ;;  %v2324_v18 = vunpack.c.l.s8.bf16 %v1812_v23  ;;  %v2326_v19 = vunpack.c.l.s8.bf16 %v1814_v15  ;;  %v2334_v31 = vunpack.c.h.s8.bf16 %v1814_v15  ;;  %v1845_v15 = vld [vmem:[#allocation3 + $0x128] sm:$0xff] }
 0x597   :  { %3668 = vmatpush1.bf16.msra.mxu0 %v3296_v30  ;;  %3996 = vmatpush1.bf16.msra.mxu1 %v3298_v22  ;;  %v2335_v30 = vunpack.c.h.s8.bf16 %v1815_v60  ;;  %v1821_v22 = vld [vmem:[#allocation3 + $0x68] sm:$0xff]  ;;  %v1836_v60 = vld [vmem:[#allocation3 + $0xe0] sm:$0xff] }
 0x598   :  { %3669 = vmatprep.subr.bf16.mxu0 %v3305_v2  ;;  %3997 = vmatprep.subr.bf16.mxu1 %v3307_v27  ;;  %v1823_v2 = vld [vmem:[#allocation3 + $0x78] sm:$0xff]  ;;  %v2332_v27 = vunpack.c.h.s8.bf16 %v1812_v23  ;;  %v2341_v47 = vunpack.c.l.s8.bf16 %v1821_v22  ;;  %v2349_v5 = vunpack.c.h.s8.bf16 %v1821_v22 }
 0x599   :  { %v2343_v35 = vunpack.c.l.s8.bf16 %v1823_v2  ;;  %v2351_v39 = vunpack.c.h.s8.bf16 %v1823_v2  ;;  %v1844_v2 = vld [vmem:[#allocation3 + $0x120] sm:$0xff] }
 0x59b   :  { %3670 = vmatpush1.bf16.msra.mxu0 %v3304_v59  ;;  %3998 = vmatpush1.bf16.msra.mxu1 %v3306_v21  ;;  %v1820_v59 = vld [vmem:[#allocation3 + $0x60] sm:$0xff]  ;;  %v1822_v21 = vld [vmem:[#allocation3 + $0x70] sm:$0xff] }
 0x59c   :  { %3671 = vmatprep.subr.bf16.mxu0 %v3313_v4  ;;  %3999 = vmatprep.subr.bf16.mxu1 %v3315_v51  ;;  %v2340_v4 = vunpack.c.l.s8.bf16 %v1820_v59  ;;  %v2342_v51 = vunpack.c.l.s8.bf16 %v1822_v21 }
 0x59f   :  { %3672 = vmatpush1.bf16.msra.mxu0 %v3312_v40  ;;  %4000 = vmatpush1.bf16.msra.mxu1 %v3314_v41  ;;  %v1829_v40 = vld [vmem:[#allocation3 + $0xa8] sm:$0xff]  ;;  %v1831_v41 = vld [vmem:[#allocation3 + $0xb8] sm:$0xff] }
 0x5a0   :  { %3673 = vmatprep.subr.bf16.mxu0 %v3321_v63  ;;  %4001 = vmatprep.subr.bf16.mxu1 %v3323_v42  ;;  %v2348_v63 = vunpack.c.h.s8.bf16 %v1820_v59  ;;  %v2350_v42 = vunpack.c.h.s8.bf16 %v1822_v21  ;;  %v2357_v34 = vunpack.c.l.s8.bf16 %v1829_v40  ;;  %v2359_v43 = vunpack.c.l.s8.bf16 %v1831_v41  ;;  %v1853_v21 = vld [vmem:[#allocation3 + $0x168] sm:$0xff] }
 0x5a1   :  { %v2367_v53 = vunpack.c.h.s8.bf16 %v1831_v41  ;;  %v1852_v41 = vld [vmem:[#allocation3 + $0x160] sm:$0xff] }
 0x5a3   :  { %3674 = vmatpush1.bf16.msra.mxu0 %v3320_v17  ;;  %4002 = vmatpush1.bf16.msra.mxu1 %v3322_v46  ;;  %v1828_v17 = vld [vmem:[#allocation3 + $0xa0] sm:$0xff] }
 0x5a4   :  { %3675 = vmatprep.subr.bf16.mxu0 %v3329_v48  ;;  %4003 = vmatprep.subr.bf16.mxu1 %v3331_v52  ;;  %v2356_v46 = vunpack.c.l.s8.bf16 %v1828_v17  ;;  %v2365_v52 = vunpack.c.h.s8.bf16 %v1829_v40 }
 0x5a7   :  { %3676 = vmatpush1.bf16.msra.mxu0 %v3328_v50  ;;  %4004 = vmatpush1.bf16.msra.mxu1 %v3330_v3  ;;  %v1839_v50 = vld [vmem:[#allocation3 + $0xf8] sm:$0xff]  ;;  %v2364_v3 = vunpack.c.h.s8.bf16 %v1828_v17 }
 0x5a8   :  { %3677 = vmatprep.subr.bf16.mxu0 %v3337_v32  ;;  %4005 = vmatprep.subr.bf16.mxu1 %v3339_v57  ;;  %v2373_v57 = vunpack.c.l.s8.bf16 %v1837_v25  ;;  %v2375_v58 = vunpack.c.l.s8.bf16 %v1839_v50  ;;  %v2383_v23 = vunpack.c.h.s8.bf16 %v1839_v50  ;;  %v1860_v50 = vld [vmem:[#allocation3 + $0x1a0] sm:$0xff] }
 0x5ab   :  { %3678 = vmatpush1.bf16.msra.mxu0 %v3336_v13  ;;  %4006 = vmatpush1.bf16.msra.mxu1 %v3338_v62  ;;  %v1838_v13 = vld [vmem:[#allocation3 + $0xf0] sm:$0xff]  ;;  %v2372_v62 = vunpack.c.l.s8.bf16 %v1836_v60 }
 0x5ac   :  { %4016 = vmatprep.subr.bf16.mxu0 %v2325_v28  ;;  %4344 = vmatprep.subr.bf16.mxu1 %v2327_v54  ;;  %v2374_v28 = vunpack.c.l.s8.bf16 %v1838_v13  ;;  %v2381_v54 = vunpack.c.h.s8.bf16 %v1837_v25 }
 0x5ae   :  { %3680 = vmatmul.mubr.bf16.vlgmr.msra.gmra.mrb[16].mxu0 %v6675_v16  ;;  %4008 = vmatmul.mubr.bf16.vlgmr.msra.gmra.mrb[20].mxu1 %v6675_v16 }
 0x5af   :  { %4017 = vmatpush1.bf16.msra.mxu0 %v2324_v18  ;;  %4345 = vmatpush1.bf16.msra.mxu1 %v2326_v19  ;;  %v1847_v18 = vld [vmem:[#allocation3 + $0x138] sm:$0xff]  ;;  %v2380_v19 = vunpack.c.h.s8.bf16 %v1836_v60 }
 0x5b0   :  { %4018 = vmatprep.subr.bf16.mxu0 %v2333_v20  ;;  %4346 = vmatprep.subr.bf16.mxu1 %v2335_v30  ;;  %v2382_v20 = vunpack.c.h.s8.bf16 %v1838_v13  ;;  %v2389_v30 = vunpack.c.l.s8.bf16 %v1845_v15  ;;  %v2391_v22 = vunpack.c.l.s8.bf16 %v1847_v18  ;;  %v2399_v59 = vunpack.c.h.s8.bf16 %v1847_v18  ;;  %v1869_v13 = vld [vmem:[#allocation3 + $0x1e8] sm:$0xff]  ;;  %v1868_v18 = vld [vmem:[#allocation3 + $0x1e0] sm:$0xff] }
 0x5b1   :  { %4048 = vmatprep.mubr.bf16.mxu0 %v6585_v33  ;;  %4376 = vmatprep.mubr.bf16.mxu1 %v6585_v33  ;;  %v1830_v33 = vld [vmem:[#allocation3 + $0xb0] sm:$0xff] }
 0x5b2   :  { %v2358_v48 = vunpack.c.l.s8.bf16 %v1830_v33  ;;  %v2366_v32 = vunpack.c.h.s8.bf16 %v1830_v33  ;;  %v1861_v33 = vld [vmem:[#allocation3 + $0x1a8] sm:$0xff] }
 0x5b3   :  { %4019 = vmatpush1.bf16.msra.mxu0 %v2332_v27  ;;  %4347 = vmatpush1.bf16.msra.mxu1 %v2334_v31  ;;  %v1846_v27 = vld [vmem:[#allocation3 + $0x130] sm:$0xff]  ;;  %v2388_v31 = vunpack.c.l.s8.bf16 %v1844_v2 }
 0x5b4   :  { %4020 = vmatprep.subr.bf16.mxu0 %v2341_v47  ;;  %4348 = vmatprep.subr.bf16.mxu1 %v2343_v35  ;;  %v2390_v47 = vunpack.c.l.s8.bf16 %v1846_v27  ;;  %v2397_v35 = vunpack.c.h.s8.bf16 %v1845_v15 }
 0x5b7   :  { %4021 = vmatpush1.bf16.msra.mxu0 %v2340_v4  ;;  %4349 = vmatpush1.bf16.msra.mxu1 %v2342_v51  ;;  %v1855_v4 = vld [vmem:[#allocation3 + $0x178] sm:$0xff]  ;;  %v2396_v51 = vunpack.c.h.s8.bf16 %v1844_v2 }
 0x5b8   :  { %4022 = vmatprep.subr.bf16.mxu0 %v2349_v5  ;;  %4350 = vmatprep.subr.bf16.mxu1 %v2351_v39  ;;  %v2398_v5 = vunpack.c.h.s8.bf16 %v1846_v27  ;;  %v2405_v39 = vunpack.c.l.s8.bf16 %v1853_v21  ;;  %v2407_v40 = vunpack.c.l.s8.bf16 %v1855_v4  ;;  %v2415_v17 = vunpack.c.h.s8.bf16 %v1855_v4  ;;  %v1877_v27 = vld [vmem:[#allocation3 + $0x228] sm:$0xff]  ;;  %v1876_v4 = vld [vmem:[#allocation3 + $0x220] sm:$0xff] }
 0x5bb   :  { %4023 = vmatpush1.bf16.msra.mxu0 %v2348_v63  ;;  %4351 = vmatpush1.bf16.msra.mxu1 %v2350_v42  ;;  %v1854_v63 = vld [vmem:[#allocation3 + $0x170] sm:$0xff]  ;;  %v2404_v42 = vunpack.c.l.s8.bf16 %v1852_v41 }
 0x5bc   :  { %4024 = vmatprep.subr.bf16.mxu0 %v2357_v34  ;;  %4352 = vmatprep.subr.bf16.mxu1 %v2359_v43  ;;  %v2406_v34 = vunpack.c.l.s8.bf16 %v1854_v63  ;;  %v2413_v43 = vunpack.c.h.s8.bf16 %v1853_v21 }
 0x5bf   :  { %4025 = vmatpush1.bf16.msra.mxu0 %v2356_v46  ;;  %4353 = vmatpush1.bf16.msra.mxu1 %v2358_v48  ;;  %v1863_v46 = vld [vmem:[#allocation3 + $0x1b8] sm:$0xff]  ;;  %v2412_v48 = vunpack.c.h.s8.bf16 %v1852_v41 }
 0x5c0   :  { %4026 = vmatprep.subr.bf16.mxu0 %v2365_v52  ;;  %4354 = vmatprep.subr.bf16.mxu1 %v2367_v53  ;;  %v2414_v52 = vunpack.c.h.s8.bf16 %v1854_v63  ;;  %v2421_v53 = vunpack.c.l.s8.bf16 %v1861_v33  ;;  %v2423_v25 = vunpack.c.l.s8.bf16 %v1863_v46  ;;  %v2431_v60 = vunpack.c.h.s8.bf16 %v1863_v46  ;;  %v1885_v63 = vld [vmem:[#allocation3 + $0x268] sm:$0xff]  ;;  %v1884_v46 = vld [vmem:[#allocation3 + $0x260] sm:$0xff] }
 0x5c3   :  { %4027 = vmatpush1.bf16.msra.mxu0 %v2364_v3  ;;  %4355 = vmatpush1.bf16.msra.mxu1 %v2366_v32  ;;  %v1862_v3 = vld [vmem:[#allocation3 + $0x1b0] sm:$0xff]  ;;  %v2420_v32 = vunpack.c.l.s8.bf16 %v1860_v50 }
 0x5c4   :  { %4028 = vmatprep.subr.bf16.mxu0 %v2373_v57  ;;  %4356 = vmatprep.subr.bf16.mxu1 %v2375_v58  ;;  %v2422_v57 = vunpack.c.l.s8.bf16 %v1862_v3  ;;  %v2429_v58 = vunpack.c.h.s8.bf16 %v1861_v33 }
 0x5c7   :  { %4029 = vmatpush1.bf16.msra.mxu0 %v2372_v62  ;;  %4357 = vmatpush1.bf16.msra.mxu1 %v2374_v28  ;;  %v1871_v62 = vld [vmem:[#allocation3 + $0x1f8] sm:$0xff]  ;;  %v2428_v28 = vunpack.c.h.s8.bf16 %v1860_v50  ;;  %v1893_v50 = vld [vmem:[#allocation3 + $0x2a8] sm:$0xff] }
 0x5c8   :  { %4030 = vmatprep.subr.bf16.mxu0 %v2381_v54  ;;  %4358 = vmatprep.subr.bf16.mxu1 %v2383_v23  ;;  %v2430_v54 = vunpack.c.h.s8.bf16 %v1862_v3  ;;  %v2437_v23 = vunpack.c.l.s8.bf16 %v1869_v13  ;;  %v2439_v15 = vunpack.c.l.s8.bf16 %v1871_v62  ;;  %v2447_v2 = vunpack.c.h.s8.bf16 %v1871_v62  ;;  %v1895_v3 = vld [vmem:[#allocation3 + $0x2b8] sm:$0xff] }
 0x5cb   :  { %4031 = vmatpush1.bf16.msra.mxu0 %v2380_v19  ;;  %4359 = vmatpush1.bf16.msra.mxu1 %v2382_v20  ;;  %v1870_v19 = vld [vmem:[#allocation3 + $0x1f0] sm:$0xff]  ;;  %v2436_v20 = vunpack.c.l.s8.bf16 %v1868_v18 }
 0x5cc   :  { %4032 = vmatprep.subr.bf16.mxu0 %v2389_v30  ;;  %4360 = vmatprep.subr.bf16.mxu1 %v2391_v22  ;;  %v2438_v30 = vunpack.c.l.s8.bf16 %v1870_v19  ;;  %v2445_v22 = vunpack.c.h.s8.bf16 %v1869_v13  ;;  %v1892_v13 = vld [vmem:[#allocation3 + $0x2a0] sm:$0xff] }
 0x5cd   :  { %v2484_v62 = vunpack.c.l.s8.bf16 %v1892_v13 }
 0x5cf   :  { %4033 = vmatpush1.bf16.msra.mxu0 %v2388_v31  ;;  %4361 = vmatpush1.bf16.msra.mxu1 %v2390_v47  ;;  %v1879_v31 = vld [vmem:[#allocation3 + $0x238] sm:$0xff]  ;;  %v2444_v47 = vunpack.c.h.s8.bf16 %v1868_v18 }
 0x5d0   :  { %4034 = vmatprep.subr.bf16.mxu0 %v2397_v35  ;;  %4362 = vmatprep.subr.bf16.mxu1 %v2399_v59  ;;  %v2446_v35 = vunpack.c.h.s8.bf16 %v1870_v19  ;;  %v2453_v59 = vunpack.c.l.s8.bf16 %v1877_v27  ;;  %v2455_v21 = vunpack.c.l.s8.bf16 %v1879_v31  ;;  %v2463_v41 = vunpack.c.h.s8.bf16 %v1879_v31  ;;  %v1903_v18 = vld [vmem:[#allocation3 + $0x2f8] sm:$0xff] }
 0x5d1   :  { %v2492_v19 = vunpack.c.h.s8.bf16 %v1892_v13  ;;  %v1927_v13 = vld [vmem:[#allocation3 + $0x3b8] sm:$0xff] }
 0x5d3   :  { %4035 = vmatpush1.bf16.msra.mxu0 %v2396_v51  ;;  %4363 = vmatpush1.bf16.msra.mxu1 %v2398_v5  ;;  %v1878_v51 = vld [vmem:[#allocation3 + $0x230] sm:$0xff]  ;;  %v2452_v5 = vunpack.c.l.s8.bf16 %v1876_v4 }
 0x5d4   :  { %4036 = vmatprep.subr.bf16.mxu0 %v2405_v39  ;;  %4364 = vmatprep.subr.bf16.mxu1 %v2407_v40  ;;  %v2454_v39 = vunpack.c.l.s8.bf16 %v1878_v51  ;;  %v2461_v40 = vunpack.c.h.s8.bf16 %v1877_v27  ;;  %v1902_v27 = vld [vmem:[#allocation3 + $0x2f0] sm:$0xff] }
 0x5d7   :  { %4037 = vmatpush1.bf16.msra.mxu0 %v2404_v42  ;;  %4365 = vmatpush1.bf16.msra.mxu1 %v2406_v34  ;;  %v1887_v42 = vld [vmem:[#allocation3 + $0x278] sm:$0xff]  ;;  %v2460_v34 = vunpack.c.h.s8.bf16 %v1876_v4 }
 0x5d8   :  { %4038 = vmatprep.subr.bf16.mxu0 %v2413_v43  ;;  %4366 = vmatprep.subr.bf16.mxu1 %v2415_v17  ;;  %v2462_v43 = vunpack.c.h.s8.bf16 %v1878_v51  ;;  %v2469_v17 = vunpack.c.l.s8.bf16 %v1885_v63  ;;  %v2471_v33 = vunpack.c.l.s8.bf16 %v1887_v42  ;;  %v1911_v4 = vld [vmem:[#allocation3 + $0x338] sm:$0xff] }
 0x5db   :  { %4039 = vmatpush1.bf16.msra.mxu0 %v2412_v48  ;;  %4367 = vmatpush1.bf16.msra.mxu1 %v2414_v52  ;;  %v1886_v48 = vld [vmem:[#allocation3 + $0x270] sm:$0xff]  ;;  %v2468_v52 = vunpack.c.l.s8.bf16 %v1884_v46 }
 0x5dc   :  { %4040 = vmatprep.subr.bf16.mxu0 %v2421_v53  ;;  %4368 = vmatprep.subr.bf16.mxu1 %v2423_v25  ;;  %v2470_v53 = vunpack.c.l.s8.bf16 %v1886_v48  ;;  %v2479_v25 = vunpack.c.h.s8.bf16 %v1887_v42 }
 0x5df   :  { %4041 = vmatpush1.bf16.msra.mxu0 %v2420_v32  ;;  %4369 = vmatpush1.bf16.msra.mxu1 %v2422_v57  ;;  %v2476_v32 = vunpack.c.h.s8.bf16 %v1884_v46  ;;  %v2478_v57 = vunpack.c.h.s8.bf16 %v1886_v48  ;;  %v1919_v46 = vld [vmem:[#allocation3 + $0x378] sm:$0xff] }
 0x5e0   :  { %4042 = vmatprep.subr.bf16.mxu0 %v2429_v58  ;;  %4370 = vmatprep.subr.bf16.mxu1 %v2431_v60  ;;  %v2485_v58 = vunpack.c.l.s8.bf16 %v1893_v50  ;;  %v2487_v60 = vunpack.c.l.s8.bf16 %v1895_v3 }
 0x5e3   :  { %4043 = vmatpush1.bf16.msra.mxu0 %v2428_v28  ;;  %4371 = vmatpush1.bf16.msra.mxu1 %v2430_v54  ;;  %v2493_v54 = vunpack.c.h.s8.bf16 %v1893_v50  ;;  %v1918_v50 = vld [vmem:[#allocation3 + $0x370] sm:$0xff] }
 0x5e4   :  { %4044 = vmatprep.subr.bf16.mxu0 %v2437_v23  ;;  %4372 = vmatprep.subr.bf16.mxu1 %v2439_v15  ;;  %v2495_v23 = vunpack.c.h.s8.bf16 %v1895_v3  ;;  %v1901_v15 = vld [vmem:[#allocation3 + $0x2e8] sm:$0xff] }
 0x5e7   :  { %4045 = vmatpush1.bf16.msra.mxu0 %v2436_v20  ;;  %4373 = vmatpush1.bf16.msra.mxu1 %v2438_v30  ;;  %v2501_v30 = vunpack.c.l.s8.bf16 %v1901_v15 }
 0x5e8   :  { %4046 = vmatprep.subr.bf16.mxu0 %v2445_v22  ;;  %4374 = vmatprep.subr.bf16.mxu1 %v2447_v2  ;;  %v2503_v22 = vunpack.c.l.s8.bf16 %v1903_v18  ;;  %v1900_v2 = vld [vmem:[#allocation3 + $0x2e0] sm:$0xff] }
 0x5e9   :  { %v2500_v31 = vunpack.c.l.s8.bf16 %v1900_v2  ;;  %v2508_v51 = vunpack.c.h.s8.bf16 %v1900_v2  ;;  %v1935_v2 = vld [vmem:[#allocation3 + $0x3f8] sm:$0xff] }
 0x5eb   :  { %4047 = vmatpush1.bf16.msra.mxu0 %v2444_v47  ;;  %4375 = vmatpush1.bf16.msra.mxu1 %v2446_v35  ;;  %v2502_v47 = vunpack.c.l.s8.bf16 %v1902_v27  ;;  %v2509_v35 = vunpack.c.h.s8.bf16 %v1901_v15  ;;  %v1926_v15 = vld [vmem:[#allocation3 + $0x3b0] sm:$0xff] }
 0x5ec   :  { %4057 = vmatprep.subr.bf16.mxu0 %v2453_v59  ;;  %4385 = vmatprep.subr.bf16.mxu1 %v2455_v21  ;;  %v2511_v59 = vunpack.c.h.s8.bf16 %v1903_v18  ;;  %v1909_v21 = vld [vmem:[#allocation3 + $0x328] sm:$0xff] }
 0x5ee   :  { %4049 = vmatmul.mubr.bf16.vlgmr.msra.gmra.mrb[20].mxu0 %v6591_v49  ;;  %4377 = vmatmul.mubr.bf16.vlgmr.msra.gmra.mrb[24].mxu1 %v6591_v49  ;;  %v2477_v49 = vunpack.c.h.s8.bf16 %v1885_v63  ;;  %v1910_v63 = vld [vmem:[#allocation3 + $0x330] sm:$0xff] }
 0x5ef   :  { %4058 = vmatpush1.bf16.msra.mxu0 %v2452_v5  ;;  %4386 = vmatpush1.bf16.msra.mxu1 %v2454_v39  ;;  %v2510_v5 = vunpack.c.h.s8.bf16 %v1902_v27  ;;  %v2517_v39 = vunpack.c.l.s8.bf16 %v1909_v21 }
 0x5f0   :  { %4059 = vmatprep.subr.bf16.mxu0 %v2461_v40  ;;  %4387 = vmatprep.subr.bf16.mxu1 %v2463_v41  ;;  %v2519_v40 = vunpack.c.l.s8.bf16 %v1911_v4  ;;  %v1908_v41 = vld [vmem:[#allocation3 + $0x320] sm:$0xff] }
 0x5f1   :  { %4089 = vmatprep.mubr.bf16.mxu0 %v6595_v36  ;;  %4417 = vmatprep.mubr.bf16.mxu1 %v6595_v36  ;;  %v1894_v36 = vld [vmem:[#allocation3 + $0x2b0] sm:$0xff]  ;;  %v2516_v42 = vunpack.c.l.s8.bf16 %v1908_v41  ;;  %v2524_v48 = vunpack.c.h.s8.bf16 %v1908_v41  ;;  %v1943_v41 = vld [vmem:[#allocation3 + $0x438] sm:$0xff] }
 0x5f2   :  { %v2486_v28 = vunpack.c.l.s8.bf16 %v1894_v36  ;;  %v2494_v20 = vunpack.c.h.s8.bf16 %v1894_v36 }
 0x5f3   :  { %4060 = vmatpush1.bf16.msra.mxu0 %v2460_v34  ;;  %4388 = vmatpush1.bf16.msra.mxu1 %v2462_v43  ;;  %v2518_v34 = vunpack.c.l.s8.bf16 %v1910_v63  ;;  %v2525_v43 = vunpack.c.h.s8.bf16 %v1909_v21  ;;  %v1934_v21 = vld [vmem:[#allocation3 + $0x3f0] sm:$0xff] }
 0x5f4   :  { %4061 = vmatprep.subr.bf16.mxu0 %v2469_v17  ;;  %4389 = vmatprep.subr.bf16.mxu1 %v2471_v33  ;;  %v2527_v17 = vunpack.c.h.s8.bf16 %v1911_v4  ;;  %v1917_v33 = vld [vmem:[#allocation3 + $0x368] sm:$0xff] }
 0x5f7   :  { %4062 = vmatpush1.bf16.msra.mxu0 %v2468_v52  ;;  %4390 = vmatpush1.bf16.msra.mxu1 %v2470_v53  ;;  %v2526_v52 = vunpack.c.h.s8.bf16 %v1910_v63  ;;  %v2533_v53 = vunpack.c.l.s8.bf16 %v1917_v33 }
 0x5f8   :  { %4063 = vmatprep.subr.bf16.mxu0 %v2477_v49  ;;  %4391 = vmatprep.subr.bf16.mxu1 %v2479_v25  ;;  %v2535_v49 = vunpack.c.l.s8.bf16 %v1919_v46  ;;  %v1916_v25 = vld [vmem:[#allocation3 + $0x360] sm:$0xff] }
 0x5f9   :  { %v2532_v3 = vunpack.c.l.s8.bf16 %v1916_v25  ;;  %v2540_v36 = vunpack.c.h.s8.bf16 %v1916_v25  ;;  %v1951_v25 = vld [vmem:[#allocation3 + $0x478] sm:$0xff] }
 0x5fb   :  { %4064 = vmatpush1.bf16.msra.mxu0 %v2476_v32  ;;  %4392 = vmatpush1.bf16.msra.mxu1 %v2478_v57  ;;  %v2534_v32 = vunpack.c.l.s8.bf16 %v1918_v50  ;;  %v2541_v57 = vunpack.c.h.s8.bf16 %v1917_v33  ;;  %v1942_v33 = vld [vmem:[#allocation3 + $0x430] sm:$0xff] }
 0x5fc   :  { %4065 = vmatprep.subr.bf16.mxu0 %v2485_v58  ;;  %4393 = vmatprep.subr.bf16.mxu1 %v2487_v60  ;;  %v2543_v58 = vunpack.c.h.s8.bf16 %v1919_v46  ;;  %v1925_v60 = vld [vmem:[#allocation3 + $0x3a8] sm:$0xff] }
 0x5ff   :  { %4066 = vmatpush1.bf16.msra.mxu0 %v2484_v62  ;;  %4394 = vmatpush1.bf16.msra.mxu1 %v2486_v28  ;;  %v2542_v62 = vunpack.c.h.s8.bf16 %v1918_v50  ;;  %v2549_v28 = vunpack.c.l.s8.bf16 %v1925_v60 }
 0x600   :  { %4067 = vmatprep.subr.bf16.mxu0 %v2493_v54  ;;  %4395 = vmatprep.subr.bf16.mxu1 %v2495_v23  ;;  %v2551_v54 = vunpack.c.l.s8.bf16 %v1927_v13  ;;  %v1924_v23 = vld [vmem:[#allocation3 + $0x3a0] sm:$0xff] }
 0x601   :  { %v2548_v18 = vunpack.c.l.s8.bf16 %v1924_v23  ;;  %v2556_v27 = vunpack.c.h.s8.bf16 %v1924_v23 }
 0x603   :  { %4068 = vmatpush1.bf16.msra.mxu0 %v2492_v19  ;;  %4396 = vmatpush1.bf16.msra.mxu1 %v2494_v20  ;;  %v2550_v19 = vunpack.c.l.s8.bf16 %v1926_v15  ;;  %v2557_v20 = vunpack.c.h.s8.bf16 %v1925_v60  ;;  %v1950_v60 = vld [vmem:[#allocation3 + $0x470] sm:$0xff] }
 0x604   :  { %4069 = vmatprep.subr.bf16.mxu0 %v2501_v30  ;;  %4397 = vmatprep.subr.bf16.mxu1 %v2503_v22  ;;  %v2559_v30 = vunpack.c.h.s8.bf16 %v1927_v13  ;;  %v1933_v22 = vld [vmem:[#allocation3 + $0x3e8] sm:$0xff] }
 0x607   :  { %4070 = vmatpush1.bf16.msra.mxu0 %v2500_v31  ;;  %4398 = vmatpush1.bf16.msra.mxu1 %v2502_v47  ;;  %v2558_v31 = vunpack.c.h.s8.bf16 %v1926_v15  ;;  %v2565_v47 = vunpack.c.l.s8.bf16 %v1933_v22  ;;  %v2606_v15 = vunpack.c.h.s8.bf16 %v1950_v60 }
 0x608   :  { %4071 = vmatprep.subr.bf16.mxu0 %v2509_v35  ;;  %4399 = vmatprep.subr.bf16.mxu1 %v2511_v59  ;;  %v2567_v35 = vunpack.c.l.s8.bf16 %v1935_v2  ;;  %v1932_v59 = vld [vmem:[#allocation3 + $0x3e0] sm:$0xff] }
 0x609   :  { %v2564_v4 = vunpack.c.l.s8.bf16 %v1932_v59  ;;  %v2572_v63 = vunpack.c.h.s8.bf16 %v1932_v59 }
 0x60b   :  { %4072 = vmatpush1.bf16.msra.mxu0 %v2508_v51  ;;  %4400 = vmatpush1.bf16.msra.mxu1 %v2510_v5  ;;  %v2566_v51 = vunpack.c.l.s8.bf16 %v1934_v21  ;;  %v2573_v5 = vunpack.c.h.s8.bf16 %v1933_v22 }
 0x60c   :  { %4073 = vmatprep.subr.bf16.mxu0 %v2517_v39  ;;  %4401 = vmatprep.subr.bf16.mxu1 %v2519_v40  ;;  %v2575_v39 = vunpack.c.h.s8.bf16 %v1935_v2  ;;  %v1941_v40 = vld [vmem:[#allocation3 + $0x428] sm:$0xff] }
 0x60f   :  { %4074 = vmatpush1.bf16.msra.mxu0 %v2516_v42  ;;  %4402 = vmatpush1.bf16.msra.mxu1 %v2518_v34  ;;  %v2574_v42 = vunpack.c.h.s8.bf16 %v1934_v21  ;;  %v2581_v34 = vunpack.c.l.s8.bf16 %v1941_v40 }
 0x610   :  { %4075 = vmatprep.subr.bf16.mxu0 %v2525_v43  ;;  %4403 = vmatprep.subr.bf16.mxu1 %v2527_v17  ;;  %v2583_v43 = vunpack.c.l.s8.bf16 %v1943_v41  ;;  %v1940_v17 = vld [vmem:[#allocation3 + $0x420] sm:$0xff] }
 0x611   :  { %v2580_v46 = vunpack.c.l.s8.bf16 %v1940_v17  ;;  %v2588_v50 = vunpack.c.h.s8.bf16 %v1940_v17 }
 0x613   :  { %4076 = vmatpush1.bf16.msra.mxu0 %v2524_v48  ;;  %4404 = vmatpush1.bf16.msra.mxu1 %v2526_v52  ;;  %v2582_v48 = vunpack.c.l.s8.bf16 %v1942_v33  ;;  %v2589_v52 = vunpack.c.h.s8.bf16 %v1941_v40 }
 0x614   :  { %4077 = vmatprep.subr.bf16.mxu0 %v2533_v53  ;;  %4405 = vmatprep.subr.bf16.mxu1 %v2535_v49  ;;  %v2591_v53 = vunpack.c.h.s8.bf16 %v1943_v41  ;;  %v1949_v49 = vld [vmem:[#allocation3 + $0x468] sm:$0xff] }
 0x617   :  { %4078 = vmatpush1.bf16.msra.mxu0 %v2532_v3  ;;  %4406 = vmatpush1.bf16.msra.mxu1 %v2534_v32  ;;  %v2590_v3 = vunpack.c.h.s8.bf16 %v1942_v33  ;;  %v2597_v32 = vunpack.c.l.s8.bf16 %v1949_v49 }
 0x618   :  { %4079 = vmatprep.subr.bf16.mxu0 %v2541_v57  ;;  %4407 = vmatprep.subr.bf16.mxu1 %v2543_v58  ;;  %v2599_v57 = vunpack.c.l.s8.bf16 %v1951_v25  ;;  %v1948_v58 = vld [vmem:[#allocation3 + $0x460] sm:$0xff] }
 0x619   :  { %v2596_v13 = vunpack.c.l.s8.bf16 %v1948_v58  ;;  %v2604_v23 = vunpack.c.h.s8.bf16 %v1948_v58 }
 0x61b   :  { %4080 = vmatpush1.bf16.msra.mxu0 %v2540_v36  ;;  %4408 = vmatpush1.bf16.msra.mxu1 %v2542_v62  ;;  %v2598_v36 = vunpack.c.l.s8.bf16 %v1950_v60  ;;  %v2607_v62 = vunpack.c.h.s8.bf16 %v1951_v25 }
 0x61c   :  { %4081 = vmatprep.subr.bf16.mxu0 %v2549_v28  ;;  %4409 = vmatprep.subr.bf16.mxu1 %v2551_v54  ;;  %v1957_v28 = vld [vmem:[#allocation3 + $0x4a8] sm:$0xff]  ;;  %v1959_v54 = vld [vmem:[#allocation3 + $0x4b8] sm:$0xff] }
 0x61d   :  { %v2621_v2 = vunpack.c.h.s8.bf16 %v1957_v28 }
 0x61f   :  { %4082 = vmatpush1.bf16.msra.mxu0 %v2548_v18  ;;  %4410 = vmatpush1.bf16.msra.mxu1 %v2550_v19  ;;  %v2613_v18 = vunpack.c.l.s8.bf16 %v1957_v28  ;;  %v2615_v19 = vunpack.c.l.s8.bf16 %v1959_v54 }
 0x620   :  { %4083 = vmatprep.subr.bf16.mxu0 %v2557_v20  ;;  %4411 = vmatprep.subr.bf16.mxu1 %v2559_v30  ;;  %v1956_v20 = vld [vmem:[#allocation3 + $0x4a0] sm:$0xff] }
 0x621   :  { %v2612_v30 = vunpack.c.l.s8.bf16 %v1956_v20 }
 0x623   :  { %4084 = vmatpush1.bf16.msra.mxu0 %v2556_v27  ;;  %4412 = vmatpush1.bf16.msra.mxu1 %v2558_v31  ;;  %v2623_v27 = vunpack.c.h.s8.bf16 %v1959_v54  ;;  %v1965_v31 = vld [vmem:[#allocation3 + $0x4e8] sm:$0xff] }
 0x624   :  { %4085 = vmatprep.subr.bf16.mxu0 %v2565_v47  ;;  %4413 = vmatprep.subr.bf16.mxu1 %v2567_v35  ;;  %v1967_v47 = vld [vmem:[#allocation3 + $0x4f8] sm:$0xff]  ;;  %v2620_v35 = vunpack.c.h.s8.bf16 %v1956_v20  ;;  %v2629_v21 = vunpack.c.l.s8.bf16 %v1965_v31  ;;  %v2637_v41 = vunpack.c.h.s8.bf16 %v1965_v31 }
 0x627   :  { %4086 = vmatpush1.bf16.msra.mxu0 %v2564_v4  ;;  %4414 = vmatpush1.bf16.msra.mxu1 %v2566_v51  ;;  %v2631_v4 = vunpack.c.l.s8.bf16 %v1967_v47  ;;  %v1964_v51 = vld [vmem:[#allocation3 + $0x4e0] sm:$0xff] }
 0x628   :  { %4087 = vmatprep.subr.bf16.mxu0 %v2573_v5  ;;  %4415 = vmatprep.subr.bf16.mxu1 %v2575_v39  ;;  %v1966_v5 = vld [vmem:[#allocation3 + $0x4f0] sm:$0xff]  ;;  %v2628_v39 = vunpack.c.l.s8.bf16 %v1964_v51 }
 0x629   :  { %v2630_v40 = vunpack.c.l.s8.bf16 %v1966_v5  ;;  %v2638_v17 = vunpack.c.h.s8.bf16 %v1966_v5 }
 0x62b   :  { %4088 = vmatpush1.bf16.msra.mxu0 %v2572_v63  ;;  %4416 = vmatpush1.bf16.msra.mxu1 %v2574_v42  ;;  %v2639_v63 = vunpack.c.h.s8.bf16 %v1967_v47  ;;  %v1973_v42 = vld [vmem:[#allocation3 + $0x528] sm:$0xff] }
 0x62c   :  { %4098 = vmatprep.subr.bf16.mxu0 %v2581_v34  ;;  %4426 = vmatprep.subr.bf16.mxu1 %v2583_v43  ;;  %v1975_v34 = vld [vmem:[#allocation3 + $0x538] sm:$0xff]  ;;  %v2636_v43 = vunpack.c.h.s8.bf16 %v1964_v51  ;;  %v2645_v33 = vunpack.c.l.s8.bf16 %v1973_v42  ;;  %v2653_v25 = vunpack.c.h.s8.bf16 %v1973_v42 }
 0x62e   :  { %4090 = vmatmul.mubr.bf16.vlgmr.msra.gmra.mrb[20].mxu0 %v6603_v45  ;;  %4418 = vmatmul.mubr.bf16.vlgmr.msra.gmra.mrb[24].mxu1 %v6603_v45  ;;  %v2605_v45 = vunpack.c.h.s8.bf16 %v1949_v49 }
 0x62f   :  { %4099 = vmatpush1.bf16.msra.mxu0 %v2580_v46  ;;  %4427 = vmatpush1.bf16.msra.mxu1 %v2582_v48  ;;  %v2647_v46 = vunpack.c.l.s8.bf16 %v1975_v34  ;;  %v1972_v48 = vld [vmem:[#allocation3 + $0x520] sm:$0xff] }
 0x630   :  { %4100 = vmatprep.subr.bf16.mxu0 %v2589_v52  ;;  %4428 = vmatprep.subr.bf16.mxu1 %v2591_v53  ;;  %v1974_v52 = vld [vmem:[#allocation3 + $0x530] sm:$0xff]  ;;  %v2644_v53 = vunpack.c.l.s8.bf16 %v1972_v48 }
 0x631   :  { %4130 = vmatprep.mubr.bf16.mxu0 %v6607_v55  ;;  %4458 = vmatprep.mubr.bf16.mxu1 %v6607_v55  ;;  %v1958_v55 = vld [vmem:[#allocation3 + $0x4b0] sm:$0xff]  ;;  %v2646_v49 = vunpack.c.l.s8.bf16 %v1974_v52  ;;  %v2654_v58 = vunpack.c.h.s8.bf16 %v1974_v52 }
 0x632   :  { %v2614_v22 = vunpack.c.l.s8.bf16 %v1958_v55  ;;  %v2622_v59 = vunpack.c.h.s8.bf16 %v1958_v55 }
 0x633   :  { %4101 = vmatpush1.bf16.msra.mxu0 %v2588_v50  ;;  %4429 = vmatpush1.bf16.msra.mxu1 %v2590_v3  ;;  %v2655_v50 = vunpack.c.h.s8.bf16 %v1975_v34  ;;  %v1981_v3 = vld [vmem:[#allocation3 + $0x568] sm:$0xff] }
 0x634   :  { %4102 = vmatprep.subr.bf16.mxu0 %v2597_v32  ;;  %4430 = vmatprep.subr.bf16.mxu1 %v2599_v57  ;;  %v1983_v32 = vld [vmem:[#allocation3 + $0x578] sm:$0xff]  ;;  %v2652_v57 = vunpack.c.h.s8.bf16 %v1972_v48  ;;  %v2661_v60 = vunpack.c.l.s8.bf16 %v1981_v3  ;;  %v2669_v54 = vunpack.c.h.s8.bf16 %v1981_v3 }
 0x637   :  { %4103 = vmatpush1.bf16.msra.mxu0 %v2596_v13  ;;  %4431 = vmatpush1.bf16.msra.mxu1 %v2598_v36  ;;  %v2663_v13 = vunpack.c.l.s8.bf16 %v1983_v32  ;;  %v1980_v36 = vld [vmem:[#allocation3 + $0x560] sm:$0xff] }
 0x638   :  { %4104 = vmatprep.subr.bf16.mxu0 %v2605_v45  ;;  %4432 = vmatprep.subr.bf16.mxu1 %v2607_v62  ;;  %v1982_v45 = vld [vmem:[#allocation3 + $0x570] sm:$0xff]  ;;  %v2660_v62 = vunpack.c.l.s8.bf16 %v1980_v36 }
 0x639   :  { %v2662_v28 = vunpack.c.l.s8.bf16 %v1982_v45  ;;  %v2670_v20 = vunpack.c.h.s8.bf16 %v1982_v45 }
 0x63b   :  { %4105 = vmatpush1.bf16.msra.mxu0 %v2604_v23  ;;  %4433 = vmatpush1.bf16.msra.mxu1 %v2606_v15  ;;  %v2671_v23 = vunpack.c.h.s8.bf16 %v1983_v32  ;;  %v1989_v15 = vld [vmem:[#allocation3 + $0x5a8] sm:$0xff] }
 0x63c   :  { %4106 = vmatprep.subr.bf16.mxu0 %v2613_v18  ;;  %4434 = vmatprep.subr.bf16.mxu1 %v2615_v19  ;;  %v1991_v18 = vld [vmem:[#allocation3 + $0x5b8] sm:$0xff]  ;;  %v2668_v19 = vunpack.c.h.s8.bf16 %v1980_v36  ;;  %v2677_v55 = vunpack.c.l.s8.bf16 %v1989_v15  ;;  %v2685_v47 = vunpack.c.h.s8.bf16 %v1989_v15 }
 0x63f   :  { %4107 = vmatpush1.bf16.msra.mxu0 %v2612_v30  ;;  %4435 = vmatpush1.bf16.msra.mxu1 %v2614_v22  ;;  %v2679_v30 = vunpack.c.l.s8.bf16 %v1991_v18  ;;  %v1988_v22 = vld [vmem:[#allocation3 + $0x5a0] sm:$0xff] }
 0x640   :  { %4108 = vmatprep.subr.bf16.mxu0 %v2621_v2  ;;  %4436 = vmatprep.subr.bf16.mxu1 %v2623_v27  ;;  %v1990_v2 = vld [vmem:[#allocation3 + $0x5b0] sm:$0xff]  ;;  %v2676_v27 = vunpack.c.l.s8.bf16 %v1988_v22 }
 0x641   :  { %v2678_v31 = vunpack.c.l.s8.bf16 %v1990_v2  ;;  %v2686_v51 = vunpack.c.h.s8.bf16 %v1990_v2 }
 0x643   :  { %4109 = vmatpush1.bf16.msra.mxu0 %v2620_v35  ;;  %4437 = vmatpush1.bf16.msra.mxu1 %v2622_v59  ;;  %v2687_v35 = vunpack.c.h.s8.bf16 %v1991_v18  ;;  %v1997_v59 = vld [vmem:[#allocation3 + $0x5e8] sm:$0xff] }
 0x644   :  { %4110 = vmatprep.subr.bf16.mxu0 %v2629_v21  ;;  %4438 = vmatprep.subr.bf16.mxu1 %v2631_v4  ;;  %v1999_v21 = vld [vmem:[#allocation3 + $0x5f8] sm:$0xff]  ;;  %v2684_v4 = vunpack.c.h.s8.bf16 %v1988_v22  ;;  %v2693_v5 = vunpack.c.l.s8.bf16 %v1997_v59  ;;  %v2701_v34 = vunpack.c.h.s8.bf16 %v1997_v59 }
 0x647   :  { %4111 = vmatpush1.bf16.msra.mxu0 %v2628_v39  ;;  %4439 = vmatpush1.bf16.msra.mxu1 %v2630_v40  ;;  %v2695_v39 = vunpack.c.l.s8.bf16 %v1999_v21  ;;  %v1996_v40 = vld [vmem:[#allocation3 + $0x5e0] sm:$0xff] }
 0x648   :  { %4112 = vmatprep.subr.bf16.mxu0 %v2637_v41  ;;  %4440 = vmatprep.subr.bf16.mxu1 %v2639_v63  ;;  %v1998_v41 = vld [vmem:[#allocation3 + $0x5f0] sm:$0xff]  ;;  %v2692_v63 = vunpack.c.l.s8.bf16 %v1996_v40 }
 0x649   :  { %v2694_v42 = vunpack.c.l.s8.bf16 %v1998_v41  ;;  %v2702_v48 = vunpack.c.h.s8.bf16 %v1998_v41 }
 0x64b   :  { %4113 = vmatpush1.bf16.msra.mxu0 %v2636_v43  ;;  %4441 = vmatpush1.bf16.msra.mxu1 %v2638_v17  ;;  %v2703_v43 = vunpack.c.h.s8.bf16 %v1999_v21  ;;  %v2005_v17 = vld [vmem:[#allocation3 + $0x628] sm:$0xff] }
 0x64c   :  { %4114 = vmatprep.subr.bf16.mxu0 %v2645_v33  ;;  %4442 = vmatprep.subr.bf16.mxu1 %v2647_v46  ;;  %v2007_v33 = vld [vmem:[#allocation3 + $0x638] sm:$0xff]  ;;  %v2700_v46 = vunpack.c.h.s8.bf16 %v1996_v40  ;;  %v2709_v52 = vunpack.c.l.s8.bf16 %v2005_v17  ;;  %v2717_v32 = vunpack.c.h.s8.bf16 %v2005_v17 }
 0x64f   :  { %4115 = vmatpush1.bf16.msra.mxu0 %v2644_v53  ;;  %4443 = vmatpush1.bf16.msra.mxu1 %v2646_v49  ;;  %v2711_v53 = vunpack.c.l.s8.bf16 %v2007_v33  ;;  %v2004_v49 = vld [vmem:[#allocation3 + $0x620] sm:$0xff] }
 0x650   :  { %4116 = vmatprep.subr.bf16.mxu0 %v2653_v25  ;;  %4444 = vmatprep.subr.bf16.mxu1 %v2655_v50  ;;  %v2006_v25 = vld [vmem:[#allocation3 + $0x630] sm:$0xff]  ;;  %v2708_v50 = vunpack.c.l.s8.bf16 %v2004_v49 }
 0x651   :  { %v2710_v3 = vunpack.c.l.s8.bf16 %v2006_v25  ;;  %v2718_v36 = vunpack.c.h.s8.bf16 %v2006_v25 }
 0x653   :  { %4117 = vmatpush1.bf16.msra.mxu0 %v2652_v57  ;;  %4445 = vmatpush1.bf16.msra.mxu1 %v2654_v58  ;;  %v2719_v57 = vunpack.c.h.s8.bf16 %v2007_v33  ;;  %v2013_v58 = vld [vmem:[#allocation3 + $0x668] sm:$0xff] }
 0x654   :  { %4118 = vmatprep.subr.bf16.mxu0 %v2661_v60  ;;  %4446 = vmatprep.subr.bf16.mxu1 %v2663_v13  ;;  %v2015_v60 = vld [vmem:[#allocation3 + $0x678] sm:$0xff]  ;;  %v2716_v13 = vunpack.c.h.s8.bf16 %v2004_v49  ;;  %v2725_v45 = vunpack.c.l.s8.bf16 %v2013_v58 }
 0x655   :  { %v2735_v18 = vunpack.c.h.s8.bf16 %v2015_v60 }
 0x657   :  { %4119 = vmatpush1.bf16.msra.mxu0 %v2660_v62  ;;  %4447 = vmatpush1.bf16.msra.mxu1 %v2662_v28  ;;  %v2727_v62 = vunpack.c.l.s8.bf16 %v2015_v60  ;;  %v2012_v28 = vld [vmem:[#allocation3 + $0x660] sm:$0xff] }
 0x658   :  { %4120 = vmatprep.subr.bf16.mxu0 %v2669_v54  ;;  %4448 = vmatprep.subr.bf16.mxu1 %v2671_v23  ;;  %v2014_v54 = vld [vmem:[#allocation3 + $0x670] sm:$0xff]  ;;  %v2724_v23 = vunpack.c.l.s8.bf16 %v2012_v28 }
 0x659   :  { %v2726_v15 = vunpack.c.l.s8.bf16 %v2014_v54 }
 0x65b   :  { %4121 = vmatpush1.bf16.msra.mxu0 %v2668_v19  ;;  %4449 = vmatpush1.bf16.msra.mxu1 %v2670_v20  ;;  %v2021_v19 = vld [vmem:[#allocation3 + $0x6a8] sm:$0xff]  ;;  %v2023_v20 = vld [vmem:[#allocation3 + $0x6b8] sm:$0xff] }
 0x65c   :  { %4122 = vmatprep.subr.bf16.mxu0 %v2677_v55  ;;  %4450 = vmatprep.subr.bf16.mxu1 %v2679_v30  ;;  %v2732_v55 = vunpack.c.h.s8.bf16 %v2012_v28  ;;  %v2734_v30 = vunpack.c.h.s8.bf16 %v2014_v54  ;;  %v2741_v22 = vunpack.c.l.s8.bf16 %v2021_v19  ;;  %v2743_v2 = vunpack.c.l.s8.bf16 %v2023_v20 }
 0x65d   :  { %v2749_v59 = vunpack.c.h.s8.bf16 %v2021_v19  ;;  %v2751_v21 = vunpack.c.h.s8.bf16 %v2023_v20 }
 0x65f   :  { %4123 = vmatpush1.bf16.msra.mxu0 %v2676_v27  ;;  %4451 = vmatpush1.bf16.msra.mxu1 %v2678_v31  ;;  %v2020_v27 = vld [vmem:[#allocation3 + $0x6a0] sm:$0xff] }
 0x660   :  { %4124 = vmatprep.subr.bf16.mxu0 %v2685_v47  ;;  %4452 = vmatprep.subr.bf16.mxu1 %v2687_v35  ;;  %v2740_v31 = vunpack.c.l.s8.bf16 %v2020_v27  ;;  %v4672_v35 = vld [vmem:[#allocation12 + $0x10] sm:$0xff] }
 0x661   :  { %v4686_v40 = vrot.slane %v4672_v35, %v6476_v61  ;;  %v4682_v41 = vrot.slane %v4672_v35, %v6451_v7 }
 0x663   :  { %4125 = vmatpush1.bf16.msra.mxu0 %v2684_v4  ;;  %4453 = vmatpush1.bf16.msra.mxu1 %v2686_v51  ;;  %v4673_v4 = vld [vmem:[#allocation13 + $0x10] sm:$0xff]  ;;  %v2029_v51 = vld [vmem:[#allocation3 + $0x6e8] sm:$0xff] }
 0x664   :  { %4126 = vmatprep.subr.bf16.mxu0 %v2693_v5  ;;  %4454 = vmatprep.subr.bf16.mxu1 %v2695_v39  ;;  %v2031_v5 = vld [vmem:[#allocation3 + $0x6f8] sm:$0xff]  ;;  %v4678_v39 = vrot.slane %v4672_v35, %v6446_v0  ;;  %v4735_v17 = vrot.slane %v4673_v4, %v6476_v61  ;;  %v2757_v33 = vunpack.c.l.s8.bf16 %v2029_v51  ;;  %v4731_v25 = vrot.slane %v4673_v4, %v6451_v7 }
 0x665   :  { %v2767_v19 = vunpack.c.h.s8.bf16 %v2031_v5 }
 0x667   :  { %4127 = vmatpush1.bf16.msra.mxu0 %v2692_v63  ;;  %4455 = vmatpush1.bf16.msra.mxu1 %v2694_v42  ;;  %v4690_v63 = vrot.slane %v4672_v35, %v6479_v8  ;;  %v2748_v42 = vunpack.c.h.s8.bf16 %v2020_v27  ;;  %v2039_v27 = vld [vmem:[#allocation3 + $0x738] sm:$0xff] }
 0x668   :  { %4128 = vmatprep.subr.bf16.mxu0 %v2701_v34  ;;  %4456 = vmatprep.subr.bf16.mxu1 %v2703_v43  ;;  %v4727_v43 = vrot.slane %v4673_v4, %v6446_v0 }
 0x66b   :  { %4129 = vmatpush1.bf16.msra.mxu0 %v2700_v46  ;;  %4457 = vmatpush1.bf16.msra.mxu1 %v2702_v48  ;;  %v2759_v46 = vunpack.c.l.s8.bf16 %v2031_v5  ;;  %v2028_v48 = vld [vmem:[#allocation3 + $0x6e0] sm:$0xff] }
 0x66c   :  { %4139 = vmatprep.subr.bf16.mxu0 %v2709_v52  ;;  %4467 = vmatprep.subr.bf16.mxu1 %v2711_v53  ;;  %v2030_v52 = vld [vmem:[#allocation3 + $0x6f0] sm:$0xff]  ;;  %v2036_v5 = vld [vmem:[#allocation3 + $0x720] sm:$0xff] }
 0x66d   :  { %v2758_v28 = vunpack.c.l.s8.bf16 %v2030_v52 }
 0x66e   :  { %4131 = vmatmul.mubr.bf16.vlgmr.msra.gmra.mrb[20].mxu0 %v6615_v14  ;;  %4459 = vmatmul.mubr.bf16.vlgmr.msra.gmra.mrb[24].mxu1 %v6615_v14  ;;  %v2733_v14 = vunpack.c.h.s8.bf16 %v2013_v58 }
 0x66f   :  { %4140 = vmatpush1.bf16.msra.mxu0 %v2708_v50  ;;  %4468 = vmatpush1.bf16.msra.mxu1 %v2710_v3  ;;  %v4739_v50 = vrot.slane %v4673_v4, %v6479_v8 }
 0x670   :  { %4141 = vmatprep.subr.bf16.mxu0 %v2717_v32  ;;  %4469 = vmatprep.subr.bf16.mxu1 %v2719_v57 }
 0x671   :  { %4171 = vmatprep.mubr.bf16.mxu0 %v6619_v24  ;;  %4499 = vmatprep.mubr.bf16.mxu1 %v6619_v24  ;;  %v2022_v24 = vld [vmem:[#allocation3 + $0x6b0] sm:$0xff] }
 0x672   :  { %v2742_v47 = vunpack.c.l.s8.bf16 %v2022_v24  ;;  %v2750_v34 = vunpack.c.h.s8.bf16 %v2022_v24 }
 0x673   :  { %4142 = vmatpush1.bf16.msra.mxu0 %v2716_v13  ;;  %4470 = vmatpush1.bf16.msra.mxu1 %v2718_v36 }
 0x674   :  { %4143 = vmatprep.subr.bf16.mxu0 %v2725_v45  ;;  %4471 = vmatprep.subr.bf16.mxu1 %v2727_v62  ;;  %v2756_v62 = vunpack.c.l.s8.bf16 %v2028_v48 }
 0x677   :  { %4144 = vmatpush1.bf16.msra.mxu0 %v2724_v23  ;;  %4472 = vmatpush1.bf16.msra.mxu1 %v2726_v15 }
 0x678   :  { %4145 = vmatprep.subr.bf16.mxu0 %v2733_v14  ;;  %4473 = vmatprep.subr.bf16.mxu1 %v2735_v18  ;;  %v2765_v18 = vunpack.c.h.s8.bf16 %v2029_v51  ;;  %v2775_v51 = vunpack.c.l.s8.bf16 %v2039_v27 }
 0x67b   :  { %4146 = vmatpush1.bf16.msra.mxu0 %v2732_v55  ;;  %4474 = vmatpush1.bf16.msra.mxu1 %v2734_v30  ;;  %v2764_v30 = vunpack.c.h.s8.bf16 %v2028_v48 }
 0x67c   :  { %4147 = vmatprep.subr.bf16.mxu0 %v2741_v22  ;;  %4475 = vmatprep.subr.bf16.mxu1 %v2743_v2  ;;  %v2766_v22 = vunpack.c.h.s8.bf16 %v2030_v52  ;;  %v2037_v2 = vld [vmem:[#allocation3 + $0x728] sm:$0xff] }
 0x67d   :  { %v2773_v4 = vunpack.c.l.s8.bf16 %v2037_v2 }
 0x67f   :  { %4148 = vmatpush1.bf16.msra.mxu0 %v2740_v31  ;;  %4476 = vmatpush1.bf16.msra.mxu1 %v2742_v47 }
 0x680   :  { %4149 = vmatprep.subr.bf16.mxu0 %v2749_v59  ;;  %4477 = vmatprep.subr.bf16.mxu1 %v2751_v21 }
 0x681   :  { %v3681_v53 = vpop.f32.mrb[16].mxu0  ;;  %v4009_v49 = vpop.f32.mrb[20].mxu1 }
 0x682   :  { %v4715_v3 = vmul.f32 %v4678_v39, %v3681_v53  ;;  %v4717_v32 = vmul.f32 %v4686_v40, %v4009_v49  ;;  %v3683_v57 = vpop.f32.mrb[17].mxu0  ;;  %v4011_v58 = vpop.f32.mrb[21].mxu1  ;;  %v2038_v39 = vld [vmem:[#allocation3 + $0x730] sm:$0xff]  ;;  %v2044_v49 = vld [vmem:[#allocation3 + $0x760] sm:$0xff] }
 0x683   :  { %v4716_v60 = vmul.f32 %v4682_v41, %v3683_v57  ;;  %v4718_v13 = vmul.f32 %v4690_v63, %v4011_v58  ;;  %v3685_v36 = vpop.f32.mrb[18].mxu0  ;;  %v4013_v45 = vpop.f32.mrb[22].mxu1  ;;  %4150 = vmatpush1.bf16.msra.mxu0 %v2748_v42  ;;  %4478 = vmatpush1.bf16.msra.mxu1 %v2750_v34  ;;  %v2772_v63 = vunpack.c.l.s8.bf16 %v2036_v5  ;;  %v2774_v42 = vunpack.c.l.s8.bf16 %v2038_v39  ;;  %v2053_v58 = vld [vmem:[#allocation3 + $0x7a8] sm:$0xff] }
 0x684   :  { %v4764_v54 = vadd.f32 %v4727_v43, %v4715_v3  ;;  %v4766_v23 = vadd.f32 %v4735_v17, %v4717_v32  ;;  %v3686_v15 = vpop.f32.mrb[19].mxu0  ;;  %v4014_v14 = vpop.f32.mrb[23].mxu1  ;;  %4151 = vmatprep.subr.bf16.mxu0 %v2757_v33  ;;  %4479 = vmatprep.subr.bf16.mxu1 %v2759_v46  ;;  %v2781_v34 = vunpack.c.h.s8.bf16 %v2037_v2  ;;  %v2783_v43 = vunpack.c.h.s8.bf16 %v2039_v27  ;;  %v2045_v17 = vld [vmem:[#allocation3 + $0x768] sm:$0xff]  ;;  %v2047_v33 = vld [vmem:[#allocation3 + $0x778] sm:$0xff]  ;;  %v2060_v27 = vld [vmem:[#allocation3 + $0x7e0] sm:$0xff] }
 0x685   :  { %v4765_v20 = vadd.f32 %v4731_v25, %v4716_v60  ;;  %v4767_v55 = vadd.f32 %v4739_v50, %v4718_v13  ;;  %v2780_v46 = vunpack.c.h.s8.bf16 %v2036_v5  ;;  %v2782_v48 = vunpack.c.h.s8.bf16 %v2038_v39  ;;  %v2046_v25 = vld [vmem:[#allocation3 + $0x770] sm:$0xff]  ;;  %v2055_v60 = vld [vmem:[#allocation3 + $0x7b8] sm:$0xff] }
 0x686   :  { %vm4772_vm0 = vcmp.gt.f32.partialorder %v4764_v54, 0.0  ;;  %v4780_v24 = vmul.f32 0.01, %v4764_v54  ;;  %vm4774_vm1 = vcmp.gt.f32.partialorder %v4766_v23, 0.0  ;;  %v4782_v31 = vmul.f32 0.01, %v4766_v23 }
 0x687   :  { %vm4773_vm2 = vcmp.gt.f32.partialorder %v4765_v20, 0.0  ;;  %v4781_v47 = vmul.f32 0.01, %v4765_v20  ;;  %vm4775_vm3 = vcmp.gt.f32.partialorder %v4767_v55, 0.0  ;;  %v4783_v35 = vmul.f32 0.01, %v4767_v55  ;;  %4152 = vmatpush1.bf16.msra.mxu0 %v2756_v62  ;;  %4480 = vmatpush1.bf16.msra.mxu1 %v2758_v28 }
 0x688   :  { %v6701_v59 = vsel %vm4772_vm0, %v4764_v54, %v4780_v24  ;;  %v6703_v21 = vsel %vm4774_vm1, %v4766_v23, %v4782_v31  ;;  %4153 = vmatprep.subr.bf16.mxu0 %v2765_v18  ;;  %4481 = vmatprep.subr.bf16.mxu1 %v2767_v19  ;;  %v2789_v52 = vunpack.c.l.s8.bf16 %v2045_v17  ;;  %v2791_v53 = vunpack.c.l.s8.bf16 %v2047_v33  ;;  %v2052_v28 = vld [vmem:[#allocation3 + $0x7a0] sm:$0xff]  ;;  %v2054_v54 = vld [vmem:[#allocation3 + $0x7b0] sm:$0xff]  ;;  %v2061_v19 = vld [vmem:[#allocation3 + $0x7e8] sm:$0xff] }
 0x689   :  { %v6705_v40 = vsel %vm4773_vm2, %v4765_v20, %v4781_v47  ;;  %v6707_v41 = vsel %vm4775_vm3, %v4767_v55, %v4783_v35  ;;  %v2788_v50 = vunpack.c.l.s8.bf16 %v2044_v49  ;;  %v2790_v3 = vunpack.c.l.s8.bf16 %v2046_v25  ;;  %v2063_v20 = vld [vmem:[#allocation3 + $0x7f8] sm:$0xff]  ;;  %v2062_v24 = vld [vmem:[#allocation3 + $0x7f0] sm:$0xff] }
 0x68a   :  { %v2797_v32 = vunpack.c.h.s8.bf16 %v2045_v17  ;;  %v2799_v57 = vunpack.c.h.s8.bf16 %v2047_v33  ;;  %v2796_v13 = vunpack.c.h.s8.bf16 %v2044_v49  ;;  %v2798_v36 = vunpack.c.h.s8.bf16 %v2046_v25  ;;  %v2071_v5 = vld [vmem:[#allocation3 + $0x838] sm:$0xff]  ;;  %v2070_v17 = vld [vmem:[#allocation3 + $0x830] sm:$0xff] }
 0x68b   :  { %4154 = vmatpush1.bf16.msra.mxu0 %v2764_v30  ;;  %4482 = vmatpush1.bf16.msra.mxu1 %v2766_v22  ;;  %v2805_v45 = vunpack.c.l.s8.bf16 %v2053_v58  ;;  %v2807_v62 = vunpack.c.l.s8.bf16 %v2055_v60  ;;  %v2804_v23 = vunpack.c.l.s8.bf16 %v2052_v28  ;;  %v2806_v15 = vunpack.c.l.s8.bf16 %v2054_v54  ;;  %v2079_v49 = vld [vmem:[#allocation3 + $0x878] sm:$0xff] }
 0x68c   :  { %4155 = vmatprep.subr.bf16.mxu0 %v2773_v4  ;;  %4483 = vmatprep.subr.bf16.mxu1 %v2775_v51  ;;  %v2813_v14 = vunpack.c.h.s8.bf16 %v2053_v58  ;;  %v2815_v18 = vunpack.c.h.s8.bf16 %v2055_v60  ;;  %v2812_v55 = vunpack.c.h.s8.bf16 %v2052_v28  ;;  %v2814_v30 = vunpack.c.h.s8.bf16 %v2054_v54  ;;  %v2069_v51 = vld [vmem:[#allocation3 + $0x828] sm:$0xff]  ;;  %v2078_v58 = vld [vmem:[#allocation3 + $0x870] sm:$0xff] }
 0x68d   :  { %v2821_v22 = vunpack.c.l.s8.bf16 %v2061_v19  ;;  %v2823_v2 = vunpack.c.l.s8.bf16 %v2063_v20  ;;  %v2820_v31 = vunpack.c.l.s8.bf16 %v2060_v27  ;;  %v2822_v47 = vunpack.c.l.s8.bf16 %v2062_v24 }
 0x68e   :  { %v2829_v35 = vunpack.c.h.s8.bf16 %v2061_v19  ;;  %v2831_v4 = vunpack.c.h.s8.bf16 %v2063_v20  ;;  %v2828_v39 = vunpack.c.h.s8.bf16 %v2060_v27  ;;  %v2862_v54 = vunpack.c.h.s8.bf16 %v2078_v58 }
 0x68f   :  { %4156 = vmatpush1.bf16.msra.mxu0 %v2772_v63  ;;  %4484 = vmatpush1.bf16.msra.mxu1 %v2774_v42  ;;  %v2830_v63 = vunpack.c.h.s8.bf16 %v2062_v24  ;;  %v2837_v42 = vunpack.c.l.s8.bf16 %v2069_v51 }
 0x690   :  { %4157 = vmatprep.subr.bf16.mxu0 %v2781_v34  ;;  %4485 = vmatprep.subr.bf16.mxu1 %v2783_v43  ;;  %v2839_v34 = vunpack.c.l.s8.bf16 %v2071_v5  ;;  %v2068_v43 = vld [vmem:[#allocation3 + $0x820] sm:$0xff] }
 0x691   :  { %v2836_v33 = vunpack.c.l.s8.bf16 %v2068_v43  ;;  %v2844_v25 = vunpack.c.h.s8.bf16 %v2068_v43 }
 0x693   :  { %4158 = vmatpush1.bf16.msra.mxu0 %v2780_v46  ;;  %4486 = vmatpush1.bf16.msra.mxu1 %v2782_v48  ;;  %v2838_v46 = vunpack.c.l.s8.bf16 %v2070_v17  ;;  %v2845_v48 = vunpack.c.h.s8.bf16 %v2069_v51 }
 0x694   :  { %4159 = vmatprep.subr.bf16.mxu0 %v2789_v52  ;;  %4487 = vmatprep.subr.bf16.mxu1 %v2791_v53  ;;  %v2847_v52 = vunpack.c.h.s8.bf16 %v2071_v5  ;;  %v2077_v53 = vld [vmem:[#allocation3 + $0x868] sm:$0xff] }
 0x697   :  { %4160 = vmatpush1.bf16.msra.mxu0 %v2788_v50  ;;  %4488 = vmatpush1.bf16.msra.mxu1 %v2790_v3  ;;  %v2846_v50 = vunpack.c.h.s8.bf16 %v2070_v17  ;;  %v2853_v3 = vunpack.c.l.s8.bf16 %v2077_v53 }
 0x698   :  { %4161 = vmatprep.subr.bf16.mxu0 %v2797_v32  ;;  %4489 = vmatprep.subr.bf16.mxu1 %v2799_v57  ;;  %v2855_v32 = vunpack.c.l.s8.bf16 %v2079_v49  ;;  %v2076_v57 = vld [vmem:[#allocation3 + $0x860] sm:$0xff] }
 0x699   :  { %v2852_v60 = vunpack.c.l.s8.bf16 %v2076_v57  ;;  %v2860_v28 = vunpack.c.h.s8.bf16 %v2076_v57 }
 0x69b   :  { %4162 = vmatpush1.bf16.msra.mxu0 %v2796_v13  ;;  %4490 = vmatpush1.bf16.msra.mxu1 %v2798_v36  ;;  %v2854_v13 = vunpack.c.l.s8.bf16 %v2078_v58  ;;  %v2863_v36 = vunpack.c.h.s8.bf16 %v2079_v49 }
 0x69c   :  { %4163 = vmatprep.subr.bf16.mxu0 %v2805_v45  ;;  %4491 = vmatprep.subr.bf16.mxu1 %v2807_v62  ;;  %v2085_v45 = vld [vmem:[#allocation3 + $0x8a8] sm:$0xff]  ;;  %v2087_v62 = vld [vmem:[#allocation3 + $0x8b8] sm:$0xff] }
 0x69d   :  { %v2877_v20 = vunpack.c.h.s8.bf16 %v2085_v45 }
 0x69f   :  { %4164 = vmatpush1.bf16.msra.mxu0 %v2804_v23  ;;  %4492 = vmatpush1.bf16.msra.mxu1 %v2806_v15  ;;  %v2869_v23 = vunpack.c.l.s8.bf16 %v2085_v45  ;;  %v2871_v15 = vunpack.c.l.s8.bf16 %v2087_v62 }
 0x6a0   :  { %4165 = vmatprep.subr.bf16.mxu0 %v2813_v14  ;;  %4493 = vmatprep.subr.bf16.mxu1 %v2815_v18  ;;  %v2084_v14 = vld [vmem:[#allocation3 + $0x8a0] sm:$0xff] }
 0x6a1   :  { %v2868_v18 = vunpack.c.l.s8.bf16 %v2084_v14 }
 0x6a3   :  { %4166 = vmatpush1.bf16.msra.mxu0 %v2812_v55  ;;  %4494 = vmatpush1.bf16.msra.mxu1 %v2814_v30  ;;  %v2879_v55 = vunpack.c.h.s8.bf16 %v2087_v62  ;;  %v2093_v30 = vld [vmem:[#allocation3 + $0x8e8] sm:$0xff] }
 0x6a4   :  { %4167 = vmatprep.subr.bf16.mxu0 %v2821_v22  ;;  %4495 = vmatprep.subr.bf16.mxu1 %v2823_v2  ;;  %v2095_v22 = vld [vmem:[#allocation3 + $0x8f8] sm:$0xff]  ;;  %v2876_v2 = vunpack.c.h.s8.bf16 %v2084_v14  ;;  %v2885_v24 = vunpack.c.l.s8.bf16 %v2093_v30  ;;  %v2893_v5 = vunpack.c.h.s8.bf16 %v2093_v30 }
 0x6a7   :  { %4168 = vmatpush1.bf16.msra.mxu0 %v2820_v31  ;;  %4496 = vmatpush1.bf16.msra.mxu1 %v2822_v47  ;;  %v2887_v31 = vunpack.c.l.s8.bf16 %v2095_v22  ;;  %v2092_v47 = vld [vmem:[#allocation3 + $0x8e0] sm:$0xff] }
 0x6a8   :  { %4169 = vmatprep.subr.bf16.mxu0 %v2829_v35  ;;  %4497 = vmatprep.subr.bf16.mxu1 %v2831_v4  ;;  %v2094_v35 = vld [vmem:[#allocation3 + $0x8f0] sm:$0xff]  ;;  %v2884_v4 = vunpack.c.l.s8.bf16 %v2092_v47 }
 0x6a9   :  { %v2886_v51 = vunpack.c.l.s8.bf16 %v2094_v35  ;;  %v2894_v43 = vunpack.c.h.s8.bf16 %v2094_v35 }
 0x6ab   :  { %4170 = vmatpush1.bf16.msra.mxu0 %v2828_v39  ;;  %4498 = vmatpush1.bf16.msra.mxu1 %v2830_v63  ;;  %v2895_v39 = vunpack.c.h.s8.bf16 %v2095_v22  ;;  %v2101_v63 = vld [vmem:[#allocation3 + $0x928] sm:$0xff] }
 0x6ac   :  { %4180 = vmatprep.subr.bf16.mxu0 %v2837_v42  ;;  %4508 = vmatprep.subr.bf16.mxu1 %v2839_v34  ;;  %v2103_v42 = vld [vmem:[#allocation3 + $0x938] sm:$0xff]  ;;  %v2892_v34 = vunpack.c.h.s8.bf16 %v2092_v47  ;;  %v2901_v17 = vunpack.c.l.s8.bf16 %v2101_v63  ;;  %v2909_v49 = vunpack.c.h.s8.bf16 %v2101_v63 }
 0x6ae   :  { %4172 = vmatmul.mubr.bf16.vlgmr.msra.gmra.mrb[20].mxu0 %v6627_v38  ;;  %4500 = vmatmul.mubr.bf16.vlgmr.msra.gmra.mrb[24].mxu1 %v6627_v38  ;;  %v2861_v38 = vunpack.c.h.s8.bf16 %v2077_v53 }
 0x6af   :  { %4181 = vmatpush1.bf16.msra.mxu0 %v2836_v33  ;;  %4509 = vmatpush1.bf16.msra.mxu1 %v2838_v46  ;;  %v2903_v33 = vunpack.c.l.s8.bf16 %v2103_v42  ;;  %v2100_v46 = vld [vmem:[#allocation3 + $0x920] sm:$0xff] }
 0x6b0   :  { %4182 = vmatprep.subr.bf16.mxu0 %v2845_v48  ;;  %4510 = vmatprep.subr.bf16.mxu1 %v2847_v52  ;;  %v2102_v48 = vld [vmem:[#allocation3 + $0x930] sm:$0xff]  ;;  %v2900_v52 = vunpack.c.l.s8.bf16 %v2100_v46 }
 0x6b1   :  { %4212 = vmatprep.mubr.bf16.mxu0 %v6631_v44  ;;  %4540 = vmatprep.mubr.bf16.mxu1 %v6631_v44  ;;  %v2086_v44 = vld [vmem:[#allocation3 + $0x8b0] sm:$0xff]  ;;  %v2902_v53 = vunpack.c.l.s8.bf16 %v2102_v48  ;;  %v2910_v57 = vunpack.c.h.s8.bf16 %v2102_v48 }
 0x6b2   :  { %v2870_v19 = vunpack.c.l.s8.bf16 %v2086_v44  ;;  %v2878_v27 = vunpack.c.h.s8.bf16 %v2086_v44 }
 0x6b3   :  { %4183 = vmatpush1.bf16.msra.mxu0 %v2844_v25  ;;  %4511 = vmatpush1.bf16.msra.mxu1 %v2846_v50  ;;  %v2911_v25 = vunpack.c.h.s8.bf16 %v2103_v42  ;;  %v2109_v50 = vld [vmem:[#allocation3 + $0x968] sm:$0xff] }
 0x6b4   :  { %4184 = vmatprep.subr.bf16.mxu0 %v2853_v3  ;;  %4512 = vmatprep.subr.bf16.mxu1 %v2855_v32  ;;  %v2111_v3 = vld [vmem:[#allocation3 + $0x978] sm:$0xff]  ;;  %v2908_v32 = vunpack.c.h.s8.bf16 %v2100_v46  ;;  %v2917_v58 = vunpack.c.l.s8.bf16 %v2109_v50  ;;  %v2925_v62 = vunpack.c.h.s8.bf16 %v2109_v50 }
 0x6b7   :  { %4185 = vmatpush1.bf16.msra.mxu0 %v2852_v60  ;;  %4513 = vmatpush1.bf16.msra.mxu1 %v2854_v13  ;;  %v2919_v60 = vunpack.c.l.s8.bf16 %v2111_v3  ;;  %v2108_v13 = vld [vmem:[#allocation3 + $0x960] sm:$0xff] }
 0x6b8   :  { %4186 = vmatprep.subr.bf16.mxu0 %v2861_v38  ;;  %4514 = vmatprep.subr.bf16.mxu1 %v2863_v36  ;;  %v2110_v38 = vld [vmem:[#allocation3 + $0x970] sm:$0xff]  ;;  %v2916_v36 = vunpack.c.l.s8.bf16 %v2108_v13 }
 0x6b9   :  { %v2918_v45 = vunpack.c.l.s8.bf16 %v2110_v38  ;;  %v2926_v14 = vunpack.c.h.s8.bf16 %v2110_v38 }
 0x6bb   :  { %4187 = vmatpush1.bf16.msra.mxu0 %v2860_v28  ;;  %4515 = vmatpush1.bf16.msra.mxu1 %v2862_v54  ;;  %v2927_v28 = vunpack.c.h.s8.bf16 %v2111_v3  ;;  %v2117_v54 = vld [vmem:[#allocation3 + $0x9a8] sm:$0xff] }
 0x6bc   :  { %4188 = vmatprep.subr.bf16.mxu0 %v2869_v23  ;;  %4516 = vmatprep.subr.bf16.mxu1 %v2871_v15  ;;  %v2119_v23 = vld [vmem:[#allocation3 + $0x9b8] sm:$0xff]  ;;  %v2924_v15 = vunpack.c.h.s8.bf16 %v2108_v13  ;;  %v2933_v44 = vunpack.c.l.s8.bf16 %v2117_v54  ;;  %v2941_v22 = vunpack.c.h.s8.bf16 %v2117_v54 }
 0x6bf   :  { %4189 = vmatpush1.bf16.msra.mxu0 %v2868_v18  ;;  %4517 = vmatpush1.bf16.msra.mxu1 %v2870_v19  ;;  %v2935_v18 = vunpack.c.l.s8.bf16 %v2119_v23  ;;  %v2116_v19 = vld [vmem:[#allocation3 + $0x9a0] sm:$0xff] }
 0x6c0   :  { %4190 = vmatprep.subr.bf16.mxu0 %v2877_v20  ;;  %4518 = vmatprep.subr.bf16.mxu1 %v2879_v55  ;;  %v2118_v20 = vld [vmem:[#allocation3 + $0x9b0] sm:$0xff]  ;;  %v2932_v55 = vunpack.c.l.s8.bf16 %v2116_v19 }
 0x6c1   :  { %v2934_v30 = vunpack.c.l.s8.bf16 %v2118_v20  ;;  %v2942_v47 = vunpack.c.h.s8.bf16 %v2118_v20 }
 0x6c3   :  { %4191 = vmatpush1.bf16.msra.mxu0 %v2876_v2  ;;  %4519 = vmatpush1.bf16.msra.mxu1 %v2878_v27  ;;  %v2943_v2 = vunpack.c.h.s8.bf16 %v2119_v23  ;;  %v2125_v27 = vld [vmem:[#allocation3 + $0x9e8] sm:$0xff] }
 0x6c4   :  { %4192 = vmatprep.subr.bf16.mxu0 %v2885_v24  ;;  %4520 = vmatprep.subr.bf16.mxu1 %v2887_v31  ;;  %v2127_v24 = vld [vmem:[#allocation3 + $0x9f8] sm:$0xff]  ;;  %v2940_v31 = vunpack.c.h.s8.bf16 %v2116_v19  ;;  %v2949_v35 = vunpack.c.l.s8.bf16 %v2125_v27  ;;  %v2957_v42 = vunpack.c.h.s8.bf16 %v2125_v27 }
 0x6c7   :  { %4193 = vmatpush1.bf16.msra.mxu0 %v2884_v4  ;;  %4521 = vmatpush1.bf16.msra.mxu1 %v2886_v51  ;;  %v2951_v4 = vunpack.c.l.s8.bf16 %v2127_v24  ;;  %v2124_v51 = vld [vmem:[#allocation3 + $0x9e0] sm:$0xff] }
 0x6c8   :  { %4194 = vmatprep.subr.bf16.mxu0 %v2893_v5  ;;  %4522 = vmatprep.subr.bf16.mxu1 %v2895_v39  ;;  %v2126_v5 = vld [vmem:[#allocation3 + $0x9f0] sm:$0xff]  ;;  %v2948_v39 = vunpack.c.l.s8.bf16 %v2124_v51 }
 0x6c9   :  { %v2950_v63 = vunpack.c.l.s8.bf16 %v2126_v5  ;;  %v2958_v46 = vunpack.c.h.s8.bf16 %v2126_v5  ;;  %v2156_v5 = vld [vmem:[#allocation3 + $0xae0] sm:$0xff] }
 0x6cb   :  { %4195 = vmatpush1.bf16.msra.mxu0 %v2892_v34  ;;  %4523 = vmatpush1.bf16.msra.mxu1 %v2894_v43  ;;  %v2959_v34 = vunpack.c.h.s8.bf16 %v2127_v24  ;;  %v2133_v43 = vld [vmem:[#allocation3 + $0xa28] sm:$0xff] }
 0x6cc   :  { %4196 = vmatprep.subr.bf16.mxu0 %v2901_v17  ;;  %4524 = vmatprep.subr.bf16.mxu1 %v2903_v33  ;;  %v2135_v17 = vld [vmem:[#allocation3 + $0xa38] sm:$0xff]  ;;  %v2956_v33 = vunpack.c.h.s8.bf16 %v2124_v51  ;;  %v2965_v48 = vunpack.c.l.s8.bf16 %v2133_v43  ;;  %v2973_v3 = vunpack.c.h.s8.bf16 %v2133_v43  ;;  %v2157_v24 = vld [vmem:[#allocation3 + $0xae8] sm:$0xff] }
 0x6cf   :  { %4197 = vmatpush1.bf16.msra.mxu0 %v2900_v52  ;;  %4525 = vmatpush1.bf16.msra.mxu1 %v2902_v53  ;;  %v2967_v52 = vunpack.c.l.s8.bf16 %v2135_v17  ;;  %v2132_v53 = vld [vmem:[#allocation3 + $0xa20] sm:$0xff] }
 0x6d0   :  { %4198 = vmatprep.subr.bf16.mxu0 %v2909_v49  ;;  %4526 = vmatprep.subr.bf16.mxu1 %v2911_v25  ;;  %v2134_v49 = vld [vmem:[#allocation3 + $0xa30] sm:$0xff]  ;;  %v2964_v25 = vunpack.c.l.s8.bf16 %v2132_v53 }
 0x6d1   :  { %v2966_v50 = vunpack.c.l.s8.bf16 %v2134_v49  ;;  %v2974_v13 = vunpack.c.h.s8.bf16 %v2134_v49  ;;  %v2164_v49 = vld [vmem:[#allocation3 + $0xb20] sm:$0xff] }
 0x6d3   :  { %4199 = vmatpush1.bf16.msra.mxu0 %v2908_v32  ;;  %4527 = vmatpush1.bf16.msra.mxu1 %v2910_v57  ;;  %v2975_v32 = vunpack.c.h.s8.bf16 %v2135_v17  ;;  %v2141_v57 = vld [vmem:[#allocation3 + $0xa68] sm:$0xff] }
 0x6d4   :  { %4200 = vmatprep.subr.bf16.mxu0 %v2917_v58  ;;  %4528 = vmatprep.subr.bf16.mxu1 %v2919_v60  ;;  %v2143_v58 = vld [vmem:[#allocation3 + $0xa78] sm:$0xff]  ;;  %v2972_v60 = vunpack.c.h.s8.bf16 %v2132_v53  ;;  %v2981_v38 = vunpack.c.l.s8.bf16 %v2141_v57  ;;  %v2165_v17 = vld [vmem:[#allocation3 + $0xb28] sm:$0xff] }
 0x6d5   :  { %v2991_v23 = vunpack.c.h.s8.bf16 %v2143_v58 }
 0x6d7   :  { %4201 = vmatpush1.bf16.msra.mxu0 %v2916_v36  ;;  %4529 = vmatpush1.bf16.msra.mxu1 %v2918_v45  ;;  %v2983_v36 = vunpack.c.l.s8.bf16 %v2143_v58  ;;  %v2140_v45 = vld [vmem:[#allocation3 + $0xa60] sm:$0xff]  ;;  %v2173_v58 = vld [vmem:[#allocation3 + $0xb68] sm:$0xff] }
 0x6d8   :  { %4202 = vmatprep.subr.bf16.mxu0 %v2925_v62  ;;  %4530 = vmatprep.subr.bf16.mxu1 %v2927_v28  ;;  %v2142_v62 = vld [vmem:[#allocation3 + $0xa70] sm:$0xff]  ;;  %v2980_v28 = vunpack.c.l.s8.bf16 %v2140_v45 }
 0x6d9   :  { %v2982_v54 = vunpack.c.l.s8.bf16 %v2142_v62 }
 0x6db   :  { %4203 = vmatpush1.bf16.msra.mxu0 %v2924_v15  ;;  %4531 = vmatpush1.bf16.msra.mxu1 %v2926_v14  ;;  %v2149_v15 = vld [vmem:[#allocation3 + $0xaa8] sm:$0xff]  ;;  %v2151_v14 = vld [vmem:[#allocation3 + $0xab8] sm:$0xff] }
 0x6dc   :  { %4204 = vmatprep.subr.bf16.mxu0 %v2933_v44  ;;  %4532 = vmatprep.subr.bf16.mxu1 %v2935_v18  ;;  %v2988_v44 = vunpack.c.h.s8.bf16 %v2140_v45  ;;  %v2990_v18 = vunpack.c.h.s8.bf16 %v2142_v62  ;;  %v2997_v19 = vunpack.c.l.s8.bf16 %v2149_v15  ;;  %v2999_v20 = vunpack.c.l.s8.bf16 %v2151_v14  ;;  %v2172_v62 = vld [vmem:[#allocation3 + $0xb60] sm:$0xff] }
 0x6dd   :  { %v3007_v27 = vunpack.c.h.s8.bf16 %v2151_v14  ;;  %v2181_v14 = vld [vmem:[#allocation3 + $0xba8] sm:$0xff] }
 0x6df   :  { %4205 = vmatpush1.bf16.msra.mxu0 %v2932_v55  ;;  %4533 = vmatpush1.bf16.msra.mxu1 %v2934_v30  ;;  %v2148_v55 = vld [vmem:[#allocation3 + $0xaa0] sm:$0xff] }
 0x6e0   :  { %4206 = vmatprep.subr.bf16.mxu0 %v2941_v22  ;;  %4534 = vmatprep.subr.bf16.mxu1 %v2943_v2  ;;  %v2996_v30 = vunpack.c.l.s8.bf16 %v2148_v55  ;;  %v3005_v2 = vunpack.c.h.s8.bf16 %v2149_v15 }
 0x6e3   :  { %4207 = vmatpush1.bf16.msra.mxu0 %v2940_v31  ;;  %4535 = vmatpush1.bf16.msra.mxu1 %v2942_v47  ;;  %v2159_v31 = vld [vmem:[#allocation3 + $0xaf8] sm:$0xff]  ;;  %v3004_v47 = vunpack.c.h.s8.bf16 %v2148_v55 }
 0x6e4   :  { %4208 = vmatprep.subr.bf16.mxu0 %v2949_v35  ;;  %4536 = vmatprep.subr.bf16.mxu1 %v2951_v4  ;;  %v3013_v4 = vunpack.c.l.s8.bf16 %v2157_v24  ;;  %v3015_v51 = vunpack.c.l.s8.bf16 %v2159_v31  ;;  %v3023_v43 = vunpack.c.h.s8.bf16 %v2159_v31  ;;  %v2189_v31 = vld [vmem:[#allocation3 + $0xbe8] sm:$0xff] }
 0x6e7   :  { %4209 = vmatpush1.bf16.msra.mxu0 %v2948_v39  ;;  %4537 = vmatpush1.bf16.msra.mxu1 %v2950_v63  ;;  %v2158_v39 = vld [vmem:[#allocation3 + $0xaf0] sm:$0xff]  ;;  %v3012_v63 = vunpack.c.l.s8.bf16 %v2156_v5 }
 0x6e8   :  { %4210 = vmatprep.subr.bf16.mxu0 %v2957_v42  ;;  %4538 = vmatprep.subr.bf16.mxu1 %v2959_v34  ;;  %v3014_v42 = vunpack.c.l.s8.bf16 %v2158_v39  ;;  %v3021_v34 = vunpack.c.h.s8.bf16 %v2157_v24 }
 0x6eb   :  { %4211 = vmatpush1.bf16.msra.mxu0 %v2956_v33  ;;  %4539 = vmatpush1.bf16.msra.mxu1 %v2958_v46  ;;  %v2167_v33 = vld [vmem:[#allocation3 + $0xb38] sm:$0xff]  ;;  %v3020_v46 = vunpack.c.h.s8.bf16 %v2156_v5 }
 0x6ec   :  { %4221 = vmatprep.subr.bf16.mxu0 %v2965_v48  ;;  %4549 = vmatprep.subr.bf16.mxu1 %v2967_v52  ;;  %v3022_v48 = vunpack.c.h.s8.bf16 %v2158_v39  ;;  %v3029_v52 = vunpack.c.l.s8.bf16 %v2165_v17  ;;  %v3031_v53 = vunpack.c.l.s8.bf16 %v2167_v33  ;;  %v2188_v39 = vld [vmem:[#allocation3 + $0xbe0] sm:$0xff] }
 0x6ee   :  { %4213 = vmatmul.mubr.bf16.vlgmr.msra.gmra.mrb[20].mxu0 %v6639_v1  ;;  %4541 = vmatmul.mubr.bf16.vlgmr.msra.gmra.mrb[24].mxu1 %v6639_v1  ;;  %v2989_v1 = vunpack.c.h.s8.bf16 %v2141_v57  ;;  %v3039_v57 = vunpack.c.h.s8.bf16 %v2167_v33  ;;  %v2197_v33 = vld [vmem:[#allocation3 + $0xc28] sm:$0xff] }
 0x6ef   :  { %4222 = vmatpush1.bf16.msra.mxu0 %v2964_v25  ;;  %4550 = vmatpush1.bf16.msra.mxu1 %v2966_v50  ;;  %v2166_v25 = vld [vmem:[#allocation3 + $0xb30] sm:$0xff]  ;;  %v3028_v50 = vunpack.c.l.s8.bf16 %v2164_v49 }
 0x6f0   :  { %4223 = vmatprep.subr.bf16.mxu0 %v2973_v3  ;;  %4551 = vmatprep.subr.bf16.mxu1 %v2975_v32  ;;  %v3030_v3 = vunpack.c.l.s8.bf16 %v2166_v25  ;;  %v3037_v32 = vunpack.c.h.s8.bf16 %v2165_v17 }
 0x6f1   :  { %4253 = vmatprep.mubr.bf16.mxu0 %v6643_v10  ;;  %4581 = vmatprep.mubr.bf16.mxu1 %v6643_v10  ;;  %v2150_v10 = vld [vmem:[#allocation3 + $0xab0] sm:$0xff] }
 0x6f2   :  { %v2998_v22 = vunpack.c.l.s8.bf16 %v2150_v10  ;;  %v3006_v35 = vunpack.c.h.s8.bf16 %v2150_v10  ;;  %v2180_v10 = vld [vmem:[#allocation3 + $0xba0] sm:$0xff] }
 0x6f3   :  { %4224 = vmatpush1.bf16.msra.mxu0 %v2972_v60  ;;  %4552 = vmatpush1.bf16.msra.mxu1 %v2974_v13  ;;  %v2175_v60 = vld [vmem:[#allocation3 + $0xb78] sm:$0xff]  ;;  %v3036_v13 = vunpack.c.h.s8.bf16 %v2164_v49 }
 0x6f4   :  { %4225 = vmatprep.subr.bf16.mxu0 %v2981_v38  ;;  %4553 = vmatprep.subr.bf16.mxu1 %v2983_v36  ;;  %v3038_v38 = vunpack.c.h.s8.bf16 %v2166_v25  ;;  %v3045_v36 = vunpack.c.l.s8.bf16 %v2173_v58  ;;  %v3047_v45 = vunpack.c.l.s8.bf16 %v2175_v60  ;;  %v3055_v15 = vunpack.c.h.s8.bf16 %v2175_v60  ;;  %v2196_v25 = vld [vmem:[#allocation3 + $0xc20] sm:$0xff]  ;;  %v2205_v60 = vld [vmem:[#allocation3 + $0xc68] sm:$0xff] }
 0x6f7   :  { %4226 = vmatpush1.bf16.msra.mxu0 %v2980_v28  ;;  %4554 = vmatpush1.bf16.msra.mxu1 %v2982_v54  ;;  %v2174_v28 = vld [vmem:[#allocation3 + $0xb70] sm:$0xff]  ;;  %v3044_v54 = vunpack.c.l.s8.bf16 %v2172_v62 }
 0x6f8   :  { %4227 = vmatprep.subr.bf16.mxu0 %v2989_v1  ;;  %4555 = vmatprep.subr.bf16.mxu1 %v2991_v23  ;;  %v3046_v1 = vunpack.c.l.s8.bf16 %v2174_v28  ;;  %v3053_v23 = vunpack.c.h.s8.bf16 %v2173_v58 }
 0x6fb   :  { %4228 = vmatpush1.bf16.msra.mxu0 %v2988_v44  ;;  %4556 = vmatpush1.bf16.msra.mxu1 %v2990_v18  ;;  %v2183_v44 = vld [vmem:[#allocation3 + $0xbb8] sm:$0xff]  ;;  %v3052_v18 = vunpack.c.h.s8.bf16 %v2172_v62 }
 0x6fc   :  { %4229 = vmatprep.subr.bf16.mxu0 %v2997_v19  ;;  %4557 = vmatprep.subr.bf16.mxu1 %v2999_v20  ;;  %v3054_v19 = vunpack.c.h.s8.bf16 %v2174_v28  ;;  %v3061_v20 = vunpack.c.l.s8.bf16 %v2181_v14  ;;  %v3063_v55 = vunpack.c.l.s8.bf16 %v2183_v44  ;;  %v3071_v24 = vunpack.c.h.s8.bf16 %v2183_v44  ;;  %v2204_v28 = vld [vmem:[#allocation3 + $0xc60] sm:$0xff]  ;;  %v2215_v44 = vld [vmem:[#allocation3 + $0xcb8] sm:$0xff] }
 0x6ff   :  { %4230 = vmatpush1.bf16.msra.mxu0 %v2996_v30  ;;  %4558 = vmatpush1.bf16.msra.mxu1 %v2998_v22  ;;  %v2182_v30 = vld [vmem:[#allocation3 + $0xbb0] sm:$0xff]  ;;  %v3060_v22 = vunpack.c.l.s8.bf16 %v2180_v10 }
 0x700   :  { %4231 = vmatprep.subr.bf16.mxu0 %v3005_v2  ;;  %4559 = vmatprep.subr.bf16.mxu1 %v3007_v27  ;;  %v3062_v2 = vunpack.c.l.s8.bf16 %v2182_v30  ;;  %v3069_v27 = vunpack.c.h.s8.bf16 %v2181_v14  ;;  %v2213_v14 = vld [vmem:[#allocation3 + $0xca8] sm:$0xff] }
 0x703   :  { %4232 = vmatpush1.bf16.msra.mxu0 %v3004_v47  ;;  %4560 = vmatpush1.bf16.msra.mxu1 %v3006_v35  ;;  %v2191_v47 = vld [vmem:[#allocation3 + $0xbf8] sm:$0xff]  ;;  %v3068_v35 = vunpack.c.h.s8.bf16 %v2180_v10  ;;  %v2212_v10 = vld [vmem:[#allocation3 + $0xca0] sm:$0xff] }
 0x704   :  { %4233 = vmatprep.subr.bf16.mxu0 %v3013_v4  ;;  %4561 = vmatprep.subr.bf16.mxu1 %v3015_v51  ;;  %v3070_v4 = vunpack.c.h.s8.bf16 %v2182_v30  ;;  %v3077_v51 = vunpack.c.l.s8.bf16 %v2189_v31  ;;  %v3079_v5 = vunpack.c.l.s8.bf16 %v2191_v47  ;;  %v3087_v17 = vunpack.c.h.s8.bf16 %v2191_v47 }
 0x705   :  { %v3124_v30 = vunpack.c.l.s8.bf16 %v2212_v10  ;;  %v3132_v47 = vunpack.c.h.s8.bf16 %v2212_v10  ;;  %v2246_v10 = vld [vmem:[#allocation3 + $0xdb0] sm:$0xff] }
 0x707   :  { %4234 = vmatpush1.bf16.msra.mxu0 %v3012_v63  ;;  %4562 = vmatpush1.bf16.msra.mxu1 %v3014_v42  ;;  %v2190_v63 = vld [vmem:[#allocation3 + $0xbf0] sm:$0xff]  ;;  %v3076_v42 = vunpack.c.l.s8.bf16 %v2188_v39 }
 0x708   :  { %4235 = vmatprep.subr.bf16.mxu0 %v3021_v34  ;;  %4563 = vmatprep.subr.bf16.mxu1 %v3023_v43  ;;  %v3078_v34 = vunpack.c.l.s8.bf16 %v2190_v63  ;;  %v3085_v43 = vunpack.c.h.s8.bf16 %v2189_v31  ;;  %v2223_v31 = vld [vmem:[#allocation3 + $0xcf8] sm:$0xff] }
 0x70b   :  { %4236 = vmatpush1.bf16.msra.mxu0 %v3020_v46  ;;  %4564 = vmatpush1.bf16.msra.mxu1 %v3022_v48  ;;  %v2199_v46 = vld [vmem:[#allocation3 + $0xc38] sm:$0xff]  ;;  %v3084_v48 = vunpack.c.h.s8.bf16 %v2188_v39  ;;  %v2222_v39 = vld [vmem:[#allocation3 + $0xcf0] sm:$0xff] }
 0x70c   :  { %4237 = vmatprep.subr.bf16.mxu0 %v3029_v52  ;;  %4565 = vmatprep.subr.bf16.mxu1 %v3031_v53  ;;  %v3086_v52 = vunpack.c.h.s8.bf16 %v2190_v63  ;;  %v3093_v53 = vunpack.c.l.s8.bf16 %v2197_v33  ;;  %v3095_v49 = vunpack.c.l.s8.bf16 %v2199_v46  ;;  %v3103_v58 = vunpack.c.h.s8.bf16 %v2199_v46 }
 0x70f   :  { %4238 = vmatpush1.bf16.msra.mxu0 %v3028_v50  ;;  %4566 = vmatpush1.bf16.msra.mxu1 %v3030_v3  ;;  %v2198_v50 = vld [vmem:[#allocation3 + $0xc30] sm:$0xff]  ;;  %v3092_v3 = vunpack.c.l.s8.bf16 %v2196_v25 }
 0x710   :  { %4239 = vmatprep.subr.bf16.mxu0 %v3037_v32  ;;  %4567 = vmatprep.subr.bf16.mxu1 %v3039_v57  ;;  %v3094_v32 = vunpack.c.l.s8.bf16 %v2198_v50  ;;  %v3101_v57 = vunpack.c.h.s8.bf16 %v2197_v33  ;;  %v2231_v33 = vld [vmem:[#allocation3 + $0xd38] sm:$0xff] }
 0x713   :  { %4240 = vmatpush1.bf16.msra.mxu0 %v3036_v13  ;;  %4568 = vmatpush1.bf16.msra.mxu1 %v3038_v38  ;;  %v2207_v13 = vld [vmem:[#allocation3 + $0xc78] sm:$0xff]  ;;  %v3100_v38 = vunpack.c.h.s8.bf16 %v2196_v25  ;;  %v2230_v25 = vld [vmem:[#allocation3 + $0xd30] sm:$0xff] }
 0x714   :  { %4241 = vmatprep.subr.bf16.mxu0 %v3045_v36  ;;  %4569 = vmatprep.subr.bf16.mxu1 %v3047_v45  ;;  %v3102_v36 = vunpack.c.h.s8.bf16 %v2198_v50  ;;  %v3109_v45 = vunpack.c.l.s8.bf16 %v2205_v60  ;;  %v3111_v62 = vunpack.c.l.s8.bf16 %v2207_v13 }
 0x717   :  { %4242 = vmatpush1.bf16.msra.mxu0 %v3044_v54  ;;  %4570 = vmatpush1.bf16.msra.mxu1 %v3046_v1  ;;  %v2206_v54 = vld [vmem:[#allocation3 + $0xc70] sm:$0xff]  ;;  %v3108_v1 = vunpack.c.l.s8.bf16 %v2204_v28 }
 0x718   :  { %4243 = vmatprep.subr.bf16.mxu0 %v3053_v23  ;;  %4571 = vmatprep.subr.bf16.mxu1 %v3055_v15  ;;  %v3110_v23 = vunpack.c.l.s8.bf16 %v2206_v54  ;;  %v3119_v15 = vunpack.c.h.s8.bf16 %v2207_v13 }
 0x71b   :  { %4244 = vmatpush1.bf16.msra.mxu0 %v3052_v18  ;;  %4572 = vmatpush1.bf16.msra.mxu1 %v3054_v19  ;;  %v3116_v18 = vunpack.c.h.s8.bf16 %v2204_v28  ;;  %v3118_v19 = vunpack.c.h.s8.bf16 %v2206_v54  ;;  %v2238_v28 = vld [vmem:[#allocation3 + $0xd70] sm:$0xff] }
 0x71c   :  { %4245 = vmatprep.subr.bf16.mxu0 %v3061_v20  ;;  %4573 = vmatprep.subr.bf16.mxu1 %v3063_v55  ;;  %v3125_v20 = vunpack.c.l.s8.bf16 %v2213_v14  ;;  %v3127_v55 = vunpack.c.l.s8.bf16 %v2215_v44 }
 0x71f   :  { %4246 = vmatpush1.bf16.msra.mxu0 %v3060_v22  ;;  %4574 = vmatpush1.bf16.msra.mxu1 %v3062_v2  ;;  %v3133_v2 = vunpack.c.h.s8.bf16 %v2213_v14  ;;  %v2247_v14 = vld [vmem:[#allocation3 + $0xdb8] sm:$0xff] }
 0x720   :  { %4247 = vmatprep.subr.bf16.mxu0 %v3069_v27  ;;  %4575 = vmatprep.subr.bf16.mxu1 %v3071_v24  ;;  %v3135_v27 = vunpack.c.h.s8.bf16 %v2215_v44  ;;  %v2221_v24 = vld [vmem:[#allocation3 + $0xce8] sm:$0xff] }
 0x723   :  { %4248 = vmatpush1.bf16.msra.mxu0 %v3068_v35  ;;  %4576 = vmatpush1.bf16.msra.mxu1 %v3070_v4  ;;  %v3141_v4 = vunpack.c.l.s8.bf16 %v2221_v24 }
 0x724   :  { %4249 = vmatprep.subr.bf16.mxu0 %v3077_v51  ;;  %4577 = vmatprep.subr.bf16.mxu1 %v3079_v5  ;;  %v3143_v51 = vunpack.c.l.s8.bf16 %v2223_v31  ;;  %v2220_v5 = vld [vmem:[#allocation3 + $0xce0] sm:$0xff] }
 0x725   :  { %v3140_v63 = vunpack.c.l.s8.bf16 %v2220_v5  ;;  %v3148_v46 = vunpack.c.h.s8.bf16 %v2220_v5  ;;  %v2254_v5 = vld [vmem:[#allocation3 + $0xdf0] sm:$0xff] }
 0x727   :  { %4250 = vmatpush1.bf16.msra.mxu0 %v3076_v42  ;;  %4578 = vmatpush1.bf16.msra.mxu1 %v3078_v34  ;;  %v3142_v42 = vunpack.c.l.s8.bf16 %v2222_v39  ;;  %v3149_v34 = vunpack.c.h.s8.bf16 %v2221_v24  ;;  %v2255_v24 = vld [vmem:[#allocation3 + $0xdf8] sm:$0xff] }
 0x728   :  { %4251 = vmatprep.subr.bf16.mxu0 %v3085_v43  ;;  %4579 = vmatprep.subr.bf16.mxu1 %v3087_v17  ;;  %v3151_v43 = vunpack.c.h.s8.bf16 %v2223_v31  ;;  %v2229_v17 = vld [vmem:[#allocation3 + $0xd28] sm:$0xff] }
 0x72b   :  { %4252 = vmatpush1.bf16.msra.mxu0 %v3084_v48  ;;  %4580 = vmatpush1.bf16.msra.mxu1 %v3086_v52  ;;  %v3150_v48 = vunpack.c.h.s8.bf16 %v2222_v39  ;;  %v3157_v52 = vunpack.c.l.s8.bf16 %v2229_v17 }
 0x72c   :  { %4262 = vmatprep.subr.bf16.mxu0 %v3093_v53  ;;  %4590 = vmatprep.subr.bf16.mxu1 %v3095_v49  ;;  %v3159_v53 = vunpack.c.l.s8.bf16 %v2231_v33  ;;  %v2228_v49 = vld [vmem:[#allocation3 + $0xd20] sm:$0xff] }
 0x72d   :  { %v3156_v50 = vunpack.c.l.s8.bf16 %v2228_v49  ;;  %v3164_v13 = vunpack.c.h.s8.bf16 %v2228_v49  ;;  %v2262_v49 = vld [vmem:[#allocation3 + $0xe30] sm:$0xff] }
 0x72e   :  { %4254 = vmatmul.mubr.bf16.vlgmr.msra.gmra.mrb[20].mxu0 %v6651_v29  ;;  %4582 = vmatmul.mubr.bf16.vlgmr.msra.gmra.mrb[24].mxu1 %v6651_v29  ;;  %v3117_v29 = vunpack.c.h.s8.bf16 %v2205_v60  ;;  %v2239_v60 = vld [vmem:[#allocation3 + $0xd78] sm:$0xff] }
 0x72f   :  { %4263 = vmatpush1.bf16.msra.mxu0 %v3092_v3  ;;  %4591 = vmatpush1.bf16.msra.mxu1 %v3094_v32  ;;  %v3158_v3 = vunpack.c.l.s8.bf16 %v2230_v25  ;;  %v3165_v32 = vunpack.c.h.s8.bf16 %v2229_v17  ;;  %v2263_v17 = vld [vmem:[#allocation3 + $0xe38] sm:$0xff] }
 0x730   :  { %4264 = vmatprep.subr.bf16.mxu0 %v3101_v57  ;;  %4592 = vmatprep.subr.bf16.mxu1 %v3103_v58  ;;  %v3167_v57 = vunpack.c.h.s8.bf16 %v2231_v33  ;;  %v2237_v58 = vld [vmem:[#allocation3 + $0xd68] sm:$0xff] }
 0x731   :  { %4294 = vmatprep.mubr.bf16.mxu0 %v6655_v37  ;;  %4622 = vmatprep.mubr.bf16.mxu1 %v6655_v37  ;;  %v2214_v37 = vld [vmem:[#allocation3 + $0xcb0] sm:$0xff] }
 0x732   :  { %v3126_v22 = vunpack.c.l.s8.bf16 %v2214_v37  ;;  %v3134_v35 = vunpack.c.h.s8.bf16 %v2214_v37 }
 0x733   :  { %4265 = vmatpush1.bf16.msra.mxu0 %v3100_v38  ;;  %4593 = vmatpush1.bf16.msra.mxu1 %v3102_v36  ;;  %v3166_v38 = vunpack.c.h.s8.bf16 %v2230_v25  ;;  %v3173_v36 = vunpack.c.l.s8.bf16 %v2237_v58 }
 0x734   :  { %4266 = vmatprep.subr.bf16.mxu0 %v3109_v45  ;;  %4594 = vmatprep.subr.bf16.mxu1 %v3111_v62  ;;  %v3175_v45 = vunpack.c.l.s8.bf16 %v2239_v60  ;;  %v2236_v62 = vld [vmem:[#allocation3 + $0xd60] sm:$0xff] }
 0x735   :  { %v3172_v54 = vunpack.c.l.s8.bf16 %v2236_v62  ;;  %v3180_v44 = vunpack.c.h.s8.bf16 %v2236_v62  ;;  %v2270_v62 = vld [vmem:[#allocation3 + $0xe70] sm:$0xff] }
 0x737   :  { %4267 = vmatpush1.bf16.msra.mxu0 %v3108_v1  ;;  %4595 = vmatpush1.bf16.msra.mxu1 %v3110_v23  ;;  %v3174_v1 = vunpack.c.l.s8.bf16 %v2238_v28  ;;  %v3181_v23 = vunpack.c.h.s8.bf16 %v2237_v58  ;;  %v2271_v58 = vld [vmem:[#allocation3 + $0xe78] sm:$0xff] }
 0x738   :  { %4268 = vmatprep.subr.bf16.mxu0 %v3117_v29  ;;  %4596 = vmatprep.subr.bf16.mxu1 %v3119_v15  ;;  %v3183_v29 = vunpack.c.h.s8.bf16 %v2239_v60  ;;  %v2245_v15 = vld [vmem:[#allocation3 + $0xda8] sm:$0xff] }
 0x73b   :  { %4269 = vmatpush1.bf16.msra.mxu0 %v3116_v18  ;;  %4597 = vmatpush1.bf16.msra.mxu1 %v3118_v19  ;;  %v3182_v18 = vunpack.c.h.s8.bf16 %v2238_v28  ;;  %v3189_v19 = vunpack.c.l.s8.bf16 %v2245_v15 }
 0x73c   :  { %4270 = vmatprep.subr.bf16.mxu0 %v3125_v20  ;;  %4598 = vmatprep.subr.bf16.mxu1 %v3127_v55  ;;  %v3191_v20 = vunpack.c.l.s8.bf16 %v2247_v14  ;;  %v2244_v55 = vld [vmem:[#allocation3 + $0xda0] sm:$0xff] }
 0x73d   :  { %v3188_v37 = vunpack.c.l.s8.bf16 %v2244_v55  ;;  %v3196_v31 = vunpack.c.h.s8.bf16 %v2244_v55 }
 0x73f   :  { %4271 = vmatpush1.bf16.msra.mxu0 %v3124_v30  ;;  %4599 = vmatpush1.bf16.msra.mxu1 %v3126_v22  ;;  %v3190_v30 = vunpack.c.l.s8.bf16 %v2246_v10  ;;  %v3197_v22 = vunpack.c.h.s8.bf16 %v2245_v15 }
 0x740   :  { %4272 = vmatprep.subr.bf16.mxu0 %v3133_v2  ;;  %4600 = vmatprep.subr.bf16.mxu1 %v3135_v27  ;;  %v3199_v2 = vunpack.c.h.s8.bf16 %v2247_v14  ;;  %v2253_v27 = vld [vmem:[#allocation3 + $0xde8] sm:$0xff]  ;;  %v3246_v14 = vunpack.c.h.s8.bf16 %v2270_v62 }
 0x743   :  { %4273 = vmatpush1.bf16.msra.mxu0 %v3132_v47  ;;  %4601 = vmatpush1.bf16.msra.mxu1 %v3134_v35  ;;  %v3198_v47 = vunpack.c.h.s8.bf16 %v2246_v10  ;;  %v3205_v35 = vunpack.c.l.s8.bf16 %v2253_v27 }
 0x744   :  { %4274 = vmatprep.subr.bf16.mxu0 %v3141_v4  ;;  %4602 = vmatprep.subr.bf16.mxu1 %v3143_v51  ;;  %v3207_v4 = vunpack.c.l.s8.bf16 %v2255_v24  ;;  %v2252_v51 = vld [vmem:[#allocation3 + $0xde0] sm:$0xff] }
 0x745   :  { %v3204_v39 = vunpack.c.l.s8.bf16 %v2252_v51  ;;  %v3212_v33 = vunpack.c.h.s8.bf16 %v2252_v51 }
 0x747   :  { %4275 = vmatpush1.bf16.msra.mxu0 %v3140_v63  ;;  %4603 = vmatpush1.bf16.msra.mxu1 %v3142_v42  ;;  %v3206_v63 = vunpack.c.l.s8.bf16 %v2254_v5  ;;  %v3213_v42 = vunpack.c.h.s8.bf16 %v2253_v27 }
 0x748   :  { %4276 = vmatprep.subr.bf16.mxu0 %v3149_v34  ;;  %4604 = vmatprep.subr.bf16.mxu1 %v3151_v43  ;;  %v3215_v34 = vunpack.c.h.s8.bf16 %v2255_v24  ;;  %v2261_v43 = vld [vmem:[#allocation3 + $0xe28] sm:$0xff] }
 0x74b   :  { %4277 = vmatpush1.bf16.msra.mxu0 %v3148_v46  ;;  %4605 = vmatpush1.bf16.msra.mxu1 %v3150_v48  ;;  %v3214_v46 = vunpack.c.h.s8.bf16 %v2254_v5  ;;  %v3221_v48 = vunpack.c.l.s8.bf16 %v2261_v43 }
 0x74c   :  { %4278 = vmatprep.subr.bf16.mxu0 %v3157_v52  ;;  %4606 = vmatprep.subr.bf16.mxu1 %v3159_v53  ;;  %v3223_v52 = vunpack.c.l.s8.bf16 %v2263_v17  ;;  %v2260_v53 = vld [vmem:[#allocation3 + $0xe20] sm:$0xff] }
 0x74d   :  { %v3220_v25 = vunpack.c.l.s8.bf16 %v2260_v53  ;;  %v3228_v60 = vunpack.c.h.s8.bf16 %v2260_v53 }
 0x74f   :  { %4279 = vmatpush1.bf16.msra.mxu0 %v3156_v50  ;;  %4607 = vmatpush1.bf16.msra.mxu1 %v3158_v3  ;;  %v3222_v50 = vunpack.c.l.s8.bf16 %v2262_v49  ;;  %v3229_v3 = vunpack.c.h.s8.bf16 %v2261_v43 }
 0x750   :  { %4280 = vmatprep.subr.bf16.mxu0 %v3165_v32  ;;  %4608 = vmatprep.subr.bf16.mxu1 %v3167_v57  ;;  %v3231_v32 = vunpack.c.h.s8.bf16 %v2263_v17  ;;  %v2269_v57 = vld [vmem:[#allocation3 + $0xe68] sm:$0xff] }
 0x753   :  { %4281 = vmatpush1.bf16.msra.mxu0 %v3164_v13  ;;  %4609 = vmatpush1.bf16.msra.mxu1 %v3166_v38  ;;  %v3230_v13 = vunpack.c.h.s8.bf16 %v2262_v49  ;;  %v3237_v38 = vunpack.c.l.s8.bf16 %v2269_v57 }
 0x754   :  { %4282 = vmatprep.subr.bf16.mxu0 %v3173_v36  ;;  %4610 = vmatprep.subr.bf16.mxu1 %v3175_v45  ;;  %v3239_v36 = vunpack.c.l.s8.bf16 %v2271_v58  ;;  %v2268_v45 = vld [vmem:[#allocation3 + $0xe60] sm:$0xff] }
 0x755   :  { %v3236_v28 = vunpack.c.l.s8.bf16 %v2268_v45  ;;  %v3244_v15 = vunpack.c.h.s8.bf16 %v2268_v45 }
 0x757   :  { %4283 = vmatpush1.bf16.msra.mxu0 %v3172_v54  ;;  %4611 = vmatpush1.bf16.msra.mxu1 %v3174_v1  ;;  %v3238_v54 = vunpack.c.l.s8.bf16 %v2270_v62  ;;  %v3247_v1 = vunpack.c.h.s8.bf16 %v2271_v58 }
 0x758   :  { %4284 = vmatprep.subr.bf16.mxu0 %v3181_v23  ;;  %4612 = vmatprep.subr.bf16.mxu1 %v3183_v29  ;;  %v2277_v23 = vld [vmem:[#allocation3 + $0xea8] sm:$0xff]  ;;  %v2279_v29 = vld [vmem:[#allocation3 + $0xeb8] sm:$0xff] }
 0x759   :  { %v3261_v10 = vunpack.c.h.s8.bf16 %v2277_v23 }
 0x75b   :  { %4285 = vmatpush1.bf16.msra.mxu0 %v3180_v44  ;;  %4613 = vmatpush1.bf16.msra.mxu1 %v3182_v18  ;;  %v3253_v44 = vunpack.c.l.s8.bf16 %v2277_v23  ;;  %v3255_v18 = vunpack.c.l.s8.bf16 %v2279_v29 }
 0x75c   :  { %4286 = vmatprep.subr.bf16.mxu0 %v3189_v19  ;;  %4614 = vmatprep.subr.bf16.mxu1 %v3191_v20  ;;  %v2276_v19 = vld [vmem:[#allocation3 + $0xea0] sm:$0xff] }
 0x75d   :  { %v3252_v20 = vunpack.c.l.s8.bf16 %v2276_v19 }
 0x75f   :  { %4287 = vmatpush1.bf16.msra.mxu0 %v3188_v37  ;;  %4615 = vmatpush1.bf16.msra.mxu1 %v3190_v30  ;;  %v3263_v37 = vunpack.c.h.s8.bf16 %v2279_v29  ;;  %v2285_v30 = vld [vmem:[#allocation3 + $0xee8] sm:$0xff] }
 0x760   :  { %4288 = vmatprep.subr.bf16.mxu0 %v3197_v22  ;;  %4616 = vmatprep.subr.bf16.mxu1 %v3199_v2  ;;  %v2287_v22 = vld [vmem:[#allocation3 + $0xef8] sm:$0xff]  ;;  %v3260_v2 = vunpack.c.h.s8.bf16 %v2276_v19  ;;  %v3269_v24 = vunpack.c.l.s8.bf16 %v2285_v30  ;;  %v3277_v5 = vunpack.c.h.s8.bf16 %v2285_v30 }
 0x763   :  { %4289 = vmatpush1.bf16.msra.mxu0 %v3196_v31  ;;  %4617 = vmatpush1.bf16.msra.mxu1 %v3198_v47  ;;  %v3271_v31 = vunpack.c.l.s8.bf16 %v2287_v22  ;;  %v2284_v47 = vld [vmem:[#allocation3 + $0xee0] sm:$0xff] }
 0x764   :  { %4290 = vmatprep.subr.bf16.mxu0 %v3205_v35  ;;  %4618 = vmatprep.subr.bf16.mxu1 %v3207_v4  ;;  %v2286_v35 = vld [vmem:[#allocation3 + $0xef0] sm:$0xff]  ;;  %v3268_v4 = vunpack.c.l.s8.bf16 %v2284_v47 }
 0x765   :  { %v3270_v51 = vunpack.c.l.s8.bf16 %v2286_v35  ;;  %v3278_v43 = vunpack.c.h.s8.bf16 %v2286_v35 }
 0x767   :  { %4291 = vmatpush1.bf16.msra.mxu0 %v3204_v39  ;;  %4619 = vmatpush1.bf16.msra.mxu1 %v3206_v63  ;;  %v3279_v39 = vunpack.c.h.s8.bf16 %v2287_v22  ;;  %v2293_v63 = vld [vmem:[#allocation3 + $0xf28] sm:$0xff] }
 0x768   :  { %4292 = vmatprep.subr.bf16.mxu0 %v3213_v42  ;;  %4620 = vmatprep.subr.bf16.mxu1 %v3215_v34  ;;  %v2295_v42 = vld [vmem:[#allocation3 + $0xf38] sm:$0xff]  ;;  %v3276_v34 = vunpack.c.h.s8.bf16 %v2284_v47  ;;  %v3285_v17 = vunpack.c.l.s8.bf16 %v2293_v63  ;;  %v3293_v49 = vunpack.c.h.s8.bf16 %v2293_v63 }
 0x76b   :  { %4293 = vmatpush1.bf16.msra.mxu0 %v3212_v33  ;;  %4621 = vmatpush1.bf16.msra.mxu1 %v3214_v46  ;;  %v3287_v33 = vunpack.c.l.s8.bf16 %v2295_v42  ;;  %v2292_v46 = vld [vmem:[#allocation3 + $0xf20] sm:$0xff] }
 0x76c   :  { %4303 = vmatprep.subr.bf16.mxu0 %v3221_v48  ;;  %4631 = vmatprep.subr.bf16.mxu1 %v3223_v52  ;;  %v2294_v48 = vld [vmem:[#allocation3 + $0xf30] sm:$0xff]  ;;  %v3284_v52 = vunpack.c.l.s8.bf16 %v2292_v46 }
 0x76d   :  { %v3286_v53 = vunpack.c.l.s8.bf16 %v2294_v48 }
 0x76e   :  { %4295 = vmatmul.mubr.bf16.vlgmr.msra.gmra.mrb[20].mxu0 %v6663_v11  ;;  %4623 = vmatmul.mubr.bf16.vlgmr.msra.gmra.mrb[24].mxu1 %v6663_v11  ;;  %v3245_v11 = vunpack.c.h.s8.bf16 %v2269_v57  ;;  %v3294_v57 = vunpack.c.h.s8.bf16 %v2294_v48 }
 0x76f   :  { %4304 = vmatpush1.bf16.msra.mxu0 %v3220_v25  ;;  %4632 = vmatpush1.bf16.msra.mxu1 %v3222_v50  ;;  %v3295_v25 = vunpack.c.h.s8.bf16 %v2295_v42  ;;  %v2301_v50 = vld [vmem:[#allocation3 + $0xf68] sm:$0xff] }
 0x770   :  { %4305 = vmatprep.subr.bf16.mxu0 %v3229_v3  ;;  %4633 = vmatprep.subr.bf16.mxu1 %v3231_v32  ;;  %v2303_v3 = vld [vmem:[#allocation3 + $0xf78] sm:$0xff]  ;;  %v3292_v32 = vunpack.c.h.s8.bf16 %v2292_v46  ;;  %v3301_v58 = vunpack.c.l.s8.bf16 %v2301_v50  ;;  %v3309_v62 = vunpack.c.h.s8.bf16 %v2301_v50 }
 0x771   :  { %4335 = vmatprep.mubr.bf16.mxu0 %v6667_v56  ;;  %4663 = vmatprep.mubr.bf16.mxu1 %v6667_v56  ;;  %v2278_v56 = vld [vmem:[#allocation3 + $0xeb0] sm:$0xff] }
 0x772   :  { %v3254_v55 = vunpack.c.l.s8.bf16 %v2278_v56  ;;  %v3262_v27 = vunpack.c.h.s8.bf16 %v2278_v56 }
 0x773   :  { %4306 = vmatpush1.bf16.msra.mxu0 %v3228_v60  ;;  %4634 = vmatpush1.bf16.msra.mxu1 %v3230_v13  ;;  %v3303_v60 = vunpack.c.l.s8.bf16 %v2303_v3  ;;  %v2300_v13 = vld [vmem:[#allocation3 + $0xf60] sm:$0xff] }
 0x774   :  { %4307 = vmatprep.subr.bf16.mxu0 %v3237_v38  ;;  %4635 = vmatprep.subr.bf16.mxu1 %v3239_v36  ;;  %v2302_v38 = vld [vmem:[#allocation3 + $0xf70] sm:$0xff]  ;;  %v3300_v36 = vunpack.c.l.s8.bf16 %v2300_v13 }
 0x775   :  { %v3302_v45 = vunpack.c.l.s8.bf16 %v2302_v38  ;;  %v3310_v23 = vunpack.c.h.s8.bf16 %v2302_v38 }
 0x777   :  { %4308 = vmatpush1.bf16.msra.mxu0 %v3236_v28  ;;  %4636 = vmatpush1.bf16.msra.mxu1 %v3238_v54  ;;  %v3311_v28 = vunpack.c.h.s8.bf16 %v2303_v3  ;;  %v2309_v54 = vld [vmem:[#allocation3 + $0xfa8] sm:$0xff] }
 0x778   :  { %4309 = vmatprep.subr.bf16.mxu0 %v3245_v11  ;;  %4637 = vmatprep.subr.bf16.mxu1 %v3247_v1  ;;  %v2311_v11 = vld [vmem:[#allocation3 + $0xfb8] sm:$0xff]  ;;  %v3308_v1 = vunpack.c.h.s8.bf16 %v2300_v13  ;;  %v3317_v29 = vunpack.c.l.s8.bf16 %v2309_v54  ;;  %v3325_v56 = vunpack.c.h.s8.bf16 %v2309_v54 }
 0x77b   :  { %4310 = vmatpush1.bf16.msra.mxu0 %v3244_v15  ;;  %4638 = vmatpush1.bf16.msra.mxu1 %v3246_v14  ;;  %v3319_v15 = vunpack.c.l.s8.bf16 %v2311_v11  ;;  %v2308_v14 = vld [vmem:[#allocation3 + $0xfa0] sm:$0xff] }
 0x77c   :  { %4311 = vmatprep.subr.bf16.mxu0 %v3253_v44  ;;  %4639 = vmatprep.subr.bf16.mxu1 %v3255_v18  ;;  %v2310_v44 = vld [vmem:[#allocation3 + $0xfb0] sm:$0xff]  ;;  %v3316_v18 = vunpack.c.l.s8.bf16 %v2308_v14 }
 0x77d   :  { %v3318_v19 = vunpack.c.l.s8.bf16 %v2310_v44  ;;  %v3326_v30 = vunpack.c.h.s8.bf16 %v2310_v44 }
 0x77f   :  { %4312 = vmatpush1.bf16.msra.mxu0 %v3252_v20  ;;  %4640 = vmatpush1.bf16.msra.mxu1 %v3254_v55  ;;  %v3327_v20 = vunpack.c.h.s8.bf16 %v2311_v11  ;;  %v2317_v55 = vld [vmem:[#allocation3 + $0xfe8] sm:$0xff] }
 0x780   :  { %4313 = vmatprep.subr.bf16.mxu0 %v3261_v10  ;;  %4641 = vmatprep.subr.bf16.mxu1 %v3263_v37  ;;  %v2319_v10 = vld [vmem:[#allocation3 + $0xff8] sm:$0xff]  ;;  %v3324_v37 = vunpack.c.h.s8.bf16 %v2308_v14  ;;  %v3333_v22 = vunpack.c.l.s8.bf16 %v2317_v55  ;;  %v3341_v35 = vunpack.c.h.s8.bf16 %v2317_v55 }
 0x783   :  { %4314 = vmatpush1.bf16.msra.mxu0 %v3260_v2  ;;  %4642 = vmatpush1.bf16.msra.mxu1 %v3262_v27  ;;  %v3335_v2 = vunpack.c.l.s8.bf16 %v2319_v10  ;;  %v2316_v27 = vld [vmem:[#allocation3 + $0xfe0] sm:$0xff] }
 0x784   :  { %4315 = vmatprep.subr.bf16.mxu0 %v3269_v24  ;;  %4643 = vmatprep.subr.bf16.mxu1 %v3271_v31  ;;  %v2318_v24 = vld [vmem:[#allocation3 + $0xff0] sm:$0xff]  ;;  %v3332_v31 = vunpack.c.l.s8.bf16 %v2316_v27 }
 0x785   :  { %v3334_v47 = vunpack.c.l.s8.bf16 %v2318_v24 }
 0x787   :  { %4316 = vmatpush1.bf16.msra.mxu0 %v3268_v4  ;;  %4644 = vmatpush1.bf16.msra.mxu1 %v3270_v51  ;;  %v3343_v4 = vunpack.c.h.s8.bf16 %v2319_v10  ;;  %v3340_v51 = vunpack.c.h.s8.bf16 %v2316_v27 }
 0x788   :  { %4317 = vmatprep.subr.bf16.mxu0 %v3277_v5  ;;  %4645 = vmatprep.subr.bf16.mxu1 %v3279_v39  ;;  %v3342_v5 = vunpack.c.h.s8.bf16 %v2318_v24  ;;  %v6056_v39 = vld [vmem:[#allocation12 + $0x10] sm:$0xff] }
 0x789   :  { %v4694_v63 = vrot.slane %v6056_v39, %v6482_v9  ;;  %v4702_v42 = vrot.slane %v6056_v39, %v6517_v26 }
 0x78b   :  { %4318 = vmatpush1.bf16.msra.mxu0 %v3276_v34  ;;  %4646 = vmatpush1.bf16.msra.mxu1 %v3278_v43  ;;  %v4698_v34 = vrot.slane %v6056_v39, %v6485_v12  ;;  %v4706_v43 = vrot.slane %v6056_v39, %v6520_v6 }
 0x78c   :  { %4319 = vmatprep.subr.bf16.mxu0 %v3285_v17  ;;  %4647 = vmatprep.subr.bf16.mxu1 %v3287_v33  ;;  %v6057_v17 = vld [vmem:[#allocation13 + $0x10] sm:$0xff] }
 0x78d   :  { %v4743_v33 = vrot.slane %v6057_v17, %v6482_v9  ;;  %v4751_v46 = vrot.slane %v6057_v17, %v6517_v26 }
 0x78f   :  { %4320 = vmatpush1.bf16.msra.mxu0 %v3284_v52  ;;  %4648 = vmatpush1.bf16.msra.mxu1 %v3286_v53  ;;  %v4747_v53 = vrot.slane %v6057_v17, %v6485_v12 }
 0x790   :  { %4321 = vmatprep.subr.bf16.mxu0 %v3293_v49  ;;  %4649 = vmatprep.subr.bf16.mxu1 %v3295_v25 }
 0x793   :  { %4322 = vmatpush1.bf16.msra.mxu0 %v3292_v32  ;;  %4650 = vmatpush1.bf16.msra.mxu1 %v3294_v57 }
 0x794   :  { %4323 = vmatprep.subr.bf16.mxu0 %v3301_v58  ;;  %4651 = vmatprep.subr.bf16.mxu1 %v3303_v60 }
 0x797   :  { %4324 = vmatpush1.bf16.msra.mxu0 %v3300_v36  ;;  %4652 = vmatpush1.bf16.msra.mxu1 %v3302_v45 }
 0x798   :  { %4325 = vmatprep.subr.bf16.mxu0 %v3309_v62  ;;  %4653 = vmatprep.subr.bf16.mxu1 %v3311_v28 }
 0x79b   :  { %4326 = vmatpush1.bf16.msra.mxu0 %v3308_v1  ;;  %4654 = vmatpush1.bf16.msra.mxu1 %v3310_v23 }
 0x79c   :  { %4327 = vmatprep.subr.bf16.mxu0 %v3317_v29  ;;  %4655 = vmatprep.subr.bf16.mxu1 %v3319_v15 }
 0x79f   :  { %4328 = vmatpush1.bf16.msra.mxu0 %v3316_v18  ;;  %4656 = vmatpush1.bf16.msra.mxu1 %v3318_v19 }
 0x7a0   :  { %4329 = vmatprep.subr.bf16.mxu0 %v3325_v56  ;;  %4657 = vmatprep.subr.bf16.mxu1 %v3327_v20 }
 0x7a3   :  { %4330 = vmatpush1.bf16.msra.mxu0 %v3324_v37  ;;  %4658 = vmatpush1.bf16.msra.mxu1 %v3326_v30 }
 0x7a4   :  { %4331 = vmatprep.subr.bf16.mxu0 %v3333_v22  ;;  %4659 = vmatprep.subr.bf16.mxu1 %v3335_v2 }
 0x7a7   :  { %4332 = vmatpush1.bf16.msra.mxu0 %v3332_v31  ;;  %4660 = vmatpush1.bf16.msra.mxu1 %v3334_v47 }
 0x7a8   :  { %4333 = vmatprep.subr.bf16.mxu0 %v3341_v35  ;;  %4661 = vmatprep.subr.bf16.mxu1 %v3343_v4 }
 0x7ab   :  { %4334 = vmatpush1.bf16.msra.mxu0 %v3340_v51  ;;  %4662 = vmatpush1.bf16.msra.mxu1 %v3342_v5 }
 0x7ae   :  { %4336 = vmatmul.mubr.bf16.vlgmr.msra.gmra.mrb[20].mxu0 %v6675_v16  ;;  %4664 = vmatmul.mubr.bf16.vlgmr.msra.gmra.mrb[24].mxu1 %v6675_v16  ;;  %v4755_v16 = vrot.slane %v6057_v17, %v6520_v6 }
 0x881   :  { %v4337_v48 = vpop.f32.mrb[20].mxu0  ;;  %v4665_v52 = vpop.f32.mrb[24].mxu1 }
 0x882   :  { %v4719_v49 = vmul.f32 %v4694_v63, %v4337_v48  ;;  %v4721_v25 = vmul.f32 %v4702_v42, %v4665_v52  ;;  %v4339_v50 = vpop.f32.mrb[21].mxu0  ;;  %v4667_v3 = vpop.f32.mrb[25].mxu1 }
 0x883   :  { %v4720_v32 = vmul.f32 %v4698_v34, %v4339_v50  ;;  %v4722_v57 = vmul.f32 %v4706_v43, %v4667_v3  ;;  %v4341_v58 = vpop.f32.mrb[22].mxu0  ;;  %v4669_v60 = vpop.f32.mrb[26].mxu1 }
 0x884   :  { %v4768_v13 = vadd.f32 %v4743_v33, %v4719_v49  ;;  %v4770_v38 = vadd.f32 %v4751_v46, %v4721_v25  ;;  %v4342_v36 = vpop.f32.mrb[23].mxu0  ;;  %v4670_v9 = vpop.f32.mrb[27].mxu1 }
 0x885   :  { %v4769_v45 = vadd.f32 %v4747_v53, %v4720_v32  ;;  %v4771_v26 = vadd.f32 %v4755_v16, %v4722_v57 }
 0x886   :  { %vm4776_vm4 = vcmp.gt.f32.partialorder %v4768_v13, 0.0  ;;  %v4784_v62 = vmul.f32 0.01, %v4768_v13  ;;  %vm4778_vm5 = vcmp.gt.f32.partialorder %v4770_v38, 0.0  ;;  %v4786_v12 = vmul.f32 0.01, %v4770_v38 }
 0x887   :  { %vm4777_vm6 = vcmp.gt.f32.partialorder %v4769_v45, 0.0  ;;  %v4785_v6 = vmul.f32 0.01, %v4769_v45  ;;  %vm4779_vm7 = vcmp.gt.f32.partialorder %v4771_v26, 0.0  ;;  %v4787_v28 = vmul.f32 0.01, %v4771_v26 }
 0x888   :  { %v6735_v54 = vsel %vm4776_vm4, %v4768_v13, %v4784_v62  ;;  %v6737_v11 = vsel %vm4778_vm5, %v4770_v38, %v4786_v12 }
 0x889   :  { %v6739_v1 = vsel %vm4777_vm6, %v4769_v45, %v4785_v6  ;;  %v6741_v23 = vsel %vm4779_vm7, %v4771_v26, %v4787_v28 }
 0x88a   :  { %6248 = dma.done.wait [#allocation6 + $0x2], 16384 }
 0x88b   :  { %6249 = vsyncadd [#allocation6 + $0x2], 4294950912  ;;  %v5185_v29 = vpack.c.bf16 %v6705_v40, %v6705_v40  ;;  %v4801_v15 = vld [vmem:[#allocation4 + $0x8] sm:$0xff]  ;;  %v4803_v14 = vld [vmem:[#allocation4 + $0x18] sm:$0xff] }
 0x88c   :  { %v4800_v44 = vld [vmem:[#allocation4] sm:$0xff]  ;;  %v4929_v18 = vunpack.c.l.s8.bf16 %v4801_v15  ;;  %v4933_v19 = vunpack.c.h.s8.bf16 %v4801_v15  ;;  %v4931_v56 = vunpack.c.l.s8.bf16 %v4803_v14  ;;  %v4935_v20 = vunpack.c.h.s8.bf16 %v4803_v14  ;;  %v4802_v55 = vld [vmem:[#allocation4 + $0x10] sm:$0xff]  ;;  %v4805_v30 = vld [vmem:[#allocation4 + $0x28] sm:$0xff] }
 0x88d   :  { %5224 = vmatprep.mubr.bf16.mxu0 %v5185_v29  ;;  %5388 = vmatprep.mubr.bf16.mxu1 %v5185_v29  ;;  %v4928_v10 = vunpack.c.l.s8.bf16 %v4800_v44  ;;  %v4930_v37 = vunpack.c.l.s8.bf16 %v4802_v55  ;;  %v4807_v22 = vld [vmem:[#allocation4 + $0x38] sm:$0xff]  ;;  %v4932_v2 = vunpack.c.h.s8.bf16 %v4800_v44  ;;  %v4934_v27 = vunpack.c.h.s8.bf16 %v4802_v55  ;;  %v4804_v31 = vld [vmem:[#allocation4 + $0x20] sm:$0xff]  ;;  %v4806_v47 = vld [vmem:[#allocation4 + $0x30] sm:$0xff] }
 0x88e   :  { %5192 = vmatprep.subr.bf16.mxu0 %v4929_v18  ;;  %5356 = vmatprep.subr.bf16.mxu1 %v4931_v56  ;;  %v4937_v40 = vunpack.c.l.s8.bf16 %v4805_v30  ;;  %v4939_v24 = vunpack.c.l.s8.bf16 %v4807_v22  ;;  %v4936_v35 = vunpack.c.l.s8.bf16 %v4804_v31  ;;  %v4938_v4 = vunpack.c.l.s8.bf16 %v4806_v47  ;;  %v4809_v39 = vld [vmem:[#allocation4 + $0x48] sm:$0xff]  ;;  %v4811_v63 = vld [vmem:[#allocation4 + $0x58] sm:$0xff]  ;;  %v4808_v33 = vld [vmem:[#allocation4 + $0x40] sm:$0xff] }
 0x88f   :  { %5193 = vmatpush1.bf16.msra.mxu0 %v4928_v10  ;;  %5357 = vmatpush1.bf16.msra.mxu1 %v4930_v37  ;;  %v4941_v51 = vunpack.c.h.s8.bf16 %v4805_v30  ;;  %v4943_v5 = vunpack.c.h.s8.bf16 %v4807_v22  ;;  %v4940_v42 = vunpack.c.h.s8.bf16 %v4804_v31  ;;  %v4942_v34 = vunpack.c.h.s8.bf16 %v4806_v47  ;;  %v4810_v46 = vld [vmem:[#allocation4 + $0x50] sm:$0xff]  ;;  %v4813_v49 = vld [vmem:[#allocation4 + $0x68] sm:$0xff]  ;;  %v4815_v25 = vld [vmem:[#allocation4 + $0x78] sm:$0xff] }
 0x890   :  { %5194 = vmatprep.subr.bf16.mxu0 %v4933_v19  ;;  %5358 = vmatprep.subr.bf16.mxu1 %v4935_v20  ;;  %v4945_v43 = vunpack.c.l.s8.bf16 %v4809_v39  ;;  %v4947_v17 = vunpack.c.l.s8.bf16 %v4811_v63  ;;  %v4944_v48 = vunpack.c.l.s8.bf16 %v4808_v33  ;;  %v4946_v52 = vunpack.c.l.s8.bf16 %v4810_v46  ;;  %v4812_v58 = vld [vmem:[#allocation4 + $0x60] sm:$0xff]  ;;  %v4814_v60 = vld [vmem:[#allocation4 + $0x70] sm:$0xff]  ;;  %v4817_v45 = vld [vmem:[#allocation4 + $0x88] sm:$0xff] }
 0x891   :  { %v4949_v53 = vunpack.c.h.s8.bf16 %v4809_v39  ;;  %v4951_v16 = vunpack.c.h.s8.bf16 %v4811_v63  ;;  %v4948_v50 = vunpack.c.h.s8.bf16 %v4808_v33  ;;  %v4950_v3 = vunpack.c.h.s8.bf16 %v4810_v46  ;;  %v4819_v26 = vld [vmem:[#allocation4 + $0x98] sm:$0xff]  ;;  %v4816_v29 = vld [vmem:[#allocation4 + $0x80] sm:$0xff]  ;;  %v4818_v15 = vld [vmem:[#allocation4 + $0x90] sm:$0xff] }
 0x892   :  { %v4953_v32 = vunpack.c.l.s8.bf16 %v4813_v49  ;;  %v4955_v57 = vunpack.c.l.s8.bf16 %v4815_v25  ;;  %v4952_v13 = vunpack.c.l.s8.bf16 %v4812_v58  ;;  %v4954_v38 = vunpack.c.l.s8.bf16 %v4814_v60  ;;  %v4821_v56 = vld [vmem:[#allocation4 + $0xa8] sm:$0xff]  ;;  %v4823_v20 = vld [vmem:[#allocation4 + $0xb8] sm:$0xff]  ;;  %v4820_v22 = vld [vmem:[#allocation4 + $0xa0] sm:$0xff] }
 0x893   :  { %5195 = vmatpush1.bf16.msra.mxu0 %v4932_v2  ;;  %5359 = vmatpush1.bf16.msra.mxu1 %v4934_v27  ;;  %v4957_v36 = vunpack.c.h.s8.bf16 %v4813_v49  ;;  %v4959_v9 = vunpack.c.h.s8.bf16 %v4815_v25  ;;  %v4956_v62 = vunpack.c.h.s8.bf16 %v4812_v58  ;;  %v4958_v12 = vunpack.c.h.s8.bf16 %v4814_v60  ;;  %v4822_v2 = vld [vmem:[#allocation4 + $0xb0] sm:$0xff]  ;;  %v4825_v47 = vld [vmem:[#allocation4 + $0xc8] sm:$0xff]  ;;  %v4824_v63 = vld [vmem:[#allocation4 + $0xc0] sm:$0xff] }
 0x894   :  { %5196 = vmatprep.subr.bf16.mxu0 %v4937_v40  ;;  %5360 = vmatprep.subr.bf16.mxu1 %v4939_v24  ;;  %v4961_v6 = vunpack.c.l.s8.bf16 %v4817_v45  ;;  %v4963_v28 = vunpack.c.l.s8.bf16 %v4819_v26  ;;  %v4960_v14 = vunpack.c.l.s8.bf16 %v4816_v29  ;;  %v4962_v44 = vunpack.c.l.s8.bf16 %v4818_v15  ;;  %v4829_v46 = vld [vmem:[#allocation4 + $0xe8] sm:$0xff]  ;;  %v4828_v25 = vld [vmem:[#allocation4 + $0xe0] sm:$0xff] }
 0x895   :  { %v4965_v18 = vunpack.c.h.s8.bf16 %v4817_v45  ;;  %v4967_v19 = vunpack.c.h.s8.bf16 %v4819_v26  ;;  %v4964_v55 = vunpack.c.h.s8.bf16 %v4816_v29  ;;  %v4966_v10 = vunpack.c.h.s8.bf16 %v4818_v15  ;;  %v4833_v60 = vld [vmem:[#allocation4 + $0x108] sm:$0xff]  ;;  %v4832_v26 = vld [vmem:[#allocation4 + $0x100] sm:$0xff] }
 0x896   :  { %v4969_v37 = vunpack.c.l.s8.bf16 %v4821_v56  ;;  %v4971_v30 = vunpack.c.l.s8.bf16 %v4823_v20  ;;  %v4968_v27 = vunpack.c.l.s8.bf16 %v4820_v22  ;;  %v4970_v40 = vunpack.c.l.s8.bf16 %v4822_v2 }
 0x897   :  { %5197 = vmatpush1.bf16.msra.mxu0 %v4936_v35  ;;  %5361 = vmatpush1.bf16.msra.mxu1 %v4938_v4  ;;  %v4973_v24 = vunpack.c.h.s8.bf16 %v4821_v56  ;;  %v4975_v31 = vunpack.c.h.s8.bf16 %v4823_v20  ;;  %v4827_v35 = vld [vmem:[#allocation4 + $0xd8] sm:$0xff]  ;;  %v4972_v4 = vunpack.c.h.s8.bf16 %v4820_v22  ;;  %v4997_v29 = vunpack.c.h.s8.bf16 %v4833_v60 }
 0x898   :  { %5198 = vmatprep.subr.bf16.mxu0 %v4941_v51  ;;  %5362 = vmatprep.subr.bf16.mxu1 %v4943_v5  ;;  %v4974_v51 = vunpack.c.h.s8.bf16 %v4822_v2  ;;  %v4977_v5 = vunpack.c.l.s8.bf16 %v4825_v47  ;;  %v4979_v39 = vunpack.c.l.s8.bf16 %v4827_v35  ;;  %v4983_v33 = vunpack.c.h.s8.bf16 %v4827_v35  ;;  %v4841_v2 = vld [vmem:[#allocation4 + $0x148] sm:$0xff]  ;;  %v4840_v35 = vld [vmem:[#allocation4 + $0x140] sm:$0xff] }
 0x89b   :  { %5199 = vmatpush1.bf16.msra.mxu0 %v4940_v42  ;;  %5363 = vmatpush1.bf16.msra.mxu1 %v4942_v34  ;;  %v4826_v42 = vld [vmem:[#allocation4 + $0xd0] sm:$0xff]  ;;  %v4976_v34 = vunpack.c.l.s8.bf16 %v4824_v63 }
 0x89c   :  { %5200 = vmatprep.subr.bf16.mxu0 %v4945_v43  ;;  %5364 = vmatprep.subr.bf16.mxu1 %v4947_v17  ;;  %v4978_v43 = vunpack.c.l.s8.bf16 %v4826_v42  ;;  %v4981_v17 = vunpack.c.h.s8.bf16 %v4825_v47 }
 0x89f   :  { %5201 = vmatpush1.bf16.msra.mxu0 %v4944_v48  ;;  %5365 = vmatpush1.bf16.msra.mxu1 %v4946_v52  ;;  %v4831_v48 = vld [vmem:[#allocation4 + $0xf8] sm:$0xff]  ;;  %v4980_v52 = vunpack.c.h.s8.bf16 %v4824_v63 }
 0x8a0   :  { %5202 = vmatprep.subr.bf16.mxu0 %v4949_v53  ;;  %5366 = vmatprep.subr.bf16.mxu1 %v4951_v16  ;;  %v4982_v53 = vunpack.c.h.s8.bf16 %v4826_v42  ;;  %v4985_v16 = vunpack.c.l.s8.bf16 %v4829_v46  ;;  %v4987_v49 = vunpack.c.l.s8.bf16 %v4831_v48  ;;  %v4991_v58 = vunpack.c.h.s8.bf16 %v4831_v48  ;;  %v4845_v42 = vld [vmem:[#allocation4 + $0x168] sm:$0xff]  ;;  %v4844_v48 = vld [vmem:[#allocation4 + $0x160] sm:$0xff] }
 0x8a3   :  { %5203 = vmatpush1.bf16.msra.mxu0 %v4948_v50  ;;  %5367 = vmatpush1.bf16.msra.mxu1 %v4950_v3  ;;  %v4830_v50 = vld [vmem:[#allocation4 + $0xf0] sm:$0xff]  ;;  %v4984_v3 = vunpack.c.l.s8.bf16 %v4828_v25 }
 0x8a4   :  { %5204 = vmatprep.subr.bf16.mxu0 %v4953_v32  ;;  %5368 = vmatprep.subr.bf16.mxu1 %v4955_v57  ;;  %v4986_v32 = vunpack.c.l.s8.bf16 %v4830_v50  ;;  %v4989_v57 = vunpack.c.h.s8.bf16 %v4829_v46 }
 0x8a7   :  { %5205 = vmatpush1.bf16.msra.mxu0 %v4952_v13  ;;  %5369 = vmatpush1.bf16.msra.mxu1 %v4954_v38  ;;  %v4835_v13 = vld [vmem:[#allocation4 + $0x118] sm:$0xff]  ;;  %v4988_v38 = vunpack.c.h.s8.bf16 %v4828_v25 }
 0x8a8   :  { %5206 = vmatprep.subr.bf16.mxu0 %v4957_v36  ;;  %5370 = vmatprep.subr.bf16.mxu1 %v4959_v9  ;;  %v4990_v36 = vunpack.c.h.s8.bf16 %v4830_v50  ;;  %v4993_v9 = vunpack.c.l.s8.bf16 %v4833_v60  ;;  %v4995_v45 = vunpack.c.l.s8.bf16 %v4835_v13  ;;  %v4999_v15 = vunpack.c.h.s8.bf16 %v4835_v13  ;;  %v4849_v50 = vld [vmem:[#allocation4 + $0x188] sm:$0xff]  ;;  %v4848_v13 = vld [vmem:[#allocation4 + $0x180] sm:$0xff] }
 0x8ab   :  { %5207 = vmatpush1.bf16.msra.mxu0 %v4956_v62  ;;  %5371 = vmatpush1.bf16.msra.mxu1 %v4958_v12  ;;  %v4834_v62 = vld [vmem:[#allocation4 + $0x110] sm:$0xff]  ;;  %v5184_v12 = vpack.c.bf16 %v6701_v59, %v6701_v59 }
 0x8ac   :  { %5208 = vmatprep.subr.bf16.mxu0 %v4961_v6  ;;  %5372 = vmatprep.subr.bf16.mxu1 %v4963_v28  ;;  %v4992_v6 = vunpack.c.l.s8.bf16 %v4832_v26  ;;  %v4994_v28 = vunpack.c.l.s8.bf16 %v4834_v62  ;;  %v4998_v56 = vunpack.c.h.s8.bf16 %v4834_v62  ;;  %v4853_v62 = vld [vmem:[#allocation4 + $0x1a8] sm:$0xff] }
 0x8af   :  { %5209 = vmatpush1.bf16.msra.mxu0 %v4960_v14  ;;  %5373 = vmatpush1.bf16.msra.mxu1 %v4962_v44  ;;  %v4837_v14 = vld [vmem:[#allocation4 + $0x128] sm:$0xff]  ;;  %v4839_v44 = vld [vmem:[#allocation4 + $0x138] sm:$0xff] }
 0x8b0   :  { %5210 = vmatprep.subr.bf16.mxu0 %v4965_v18  ;;  %5374 = vmatprep.subr.bf16.mxu1 %v4967_v19  ;;  %v5187_v18 = vpack.c.bf16 %v6707_v41, %v6707_v41  ;;  %v4996_v19 = vunpack.c.h.s8.bf16 %v4832_v26  ;;  %v5001_v59 = vunpack.c.l.s8.bf16 %v4837_v14  ;;  %v5003_v20 = vunpack.c.l.s8.bf16 %v4839_v44 }
 0x8b1   :  { %v5005_v41 = vunpack.c.h.s8.bf16 %v4837_v14  ;;  %v5007_v22 = vunpack.c.h.s8.bf16 %v4839_v44  ;;  %v4852_v14 = vld [vmem:[#allocation4 + $0x1a0] sm:$0xff]  ;;  %v4854_v44 = vld [vmem:[#allocation4 + $0x1b0] sm:$0xff] }
 0x8b3   :  { %5211 = vmatpush1.bf16.msra.mxu0 %v4964_v55  ;;  %5375 = vmatpush1.bf16.msra.mxu1 %v4966_v10  ;;  %v4836_v55 = vld [vmem:[#allocation4 + $0x120] sm:$0xff]  ;;  %v4838_v10 = vld [vmem:[#allocation4 + $0x130] sm:$0xff] }
 0x8b4   :  { %5212 = vmatprep.subr.bf16.mxu0 %v4969_v37  ;;  %5376 = vmatprep.subr.bf16.mxu1 %v4971_v30  ;;  %v5000_v37 = vunpack.c.l.s8.bf16 %v4836_v55  ;;  %v5002_v30 = vunpack.c.l.s8.bf16 %v4838_v10 }
 0x8b7   :  { %5213 = vmatpush1.bf16.msra.mxu0 %v4968_v27  ;;  %5377 = vmatpush1.bf16.msra.mxu1 %v4970_v40  ;;  %v4843_v27 = vld [vmem:[#allocation4 + $0x158] sm:$0xff]  ;;  %v5004_v40 = vunpack.c.h.s8.bf16 %v4836_v55 }
 0x8b8   :  { %5214 = vmatprep.subr.bf16.mxu0 %v4973_v24  ;;  %5378 = vmatprep.subr.bf16.mxu1 %v4975_v31  ;;  %v5006_v24 = vunpack.c.h.s8.bf16 %v4838_v10  ;;  %v5009_v31 = vunpack.c.l.s8.bf16 %v4841_v2  ;;  %v5011_v47 = vunpack.c.l.s8.bf16 %v4843_v27  ;;  %v5015_v63 = vunpack.c.h.s8.bf16 %v4843_v27  ;;  %v4859_v55 = vld [vmem:[#allocation4 + $0x1d8] sm:$0xff] }
 0x8b9   :  { %v5036_v10 = vunpack.c.h.s8.bf16 %v4852_v14 }
 0x8bb   :  { %5215 = vmatpush1.bf16.msra.mxu0 %v4972_v4  ;;  %5379 = vmatpush1.bf16.msra.mxu1 %v4974_v51  ;;  %v4842_v4 = vld [vmem:[#allocation4 + $0x150] sm:$0xff]  ;;  %v5008_v51 = vunpack.c.l.s8.bf16 %v4840_v35 }
 0x8bc   :  { %5216 = vmatprep.subr.bf16.mxu0 %v4977_v5  ;;  %5380 = vmatprep.subr.bf16.mxu1 %v4979_v39  ;;  %v5010_v5 = vunpack.c.l.s8.bf16 %v4842_v4  ;;  %v5013_v39 = vunpack.c.h.s8.bf16 %v4841_v2  ;;  %v4858_v2 = vld [vmem:[#allocation4 + $0x1d0] sm:$0xff] }
 0x8bf   :  { %5217 = vmatpush1.bf16.msra.mxu0 %v4976_v34  ;;  %5381 = vmatpush1.bf16.msra.mxu1 %v4978_v43  ;;  %v4847_v34 = vld [vmem:[#allocation4 + $0x178] sm:$0xff]  ;;  %v5012_v43 = vunpack.c.h.s8.bf16 %v4840_v35 }
 0x8c0   :  { %5218 = vmatprep.subr.bf16.mxu0 %v4981_v17  ;;  %5382 = vmatprep.subr.bf16.mxu1 %v4983_v33  ;;  %v5014_v17 = vunpack.c.h.s8.bf16 %v4842_v4  ;;  %v5017_v33 = vunpack.c.l.s8.bf16 %v4845_v42  ;;  %v5019_v46 = vunpack.c.l.s8.bf16 %v4847_v34  ;;  %v5023_v25 = vunpack.c.h.s8.bf16 %v4847_v34  ;;  %v4863_v35 = vld [vmem:[#allocation4 + $0x1f8] sm:$0xff] }
 0x8c3   :  { %5219 = vmatpush1.bf16.msra.mxu0 %v4980_v52  ;;  %5383 = vmatpush1.bf16.msra.mxu1 %v4982_v53  ;;  %v4846_v52 = vld [vmem:[#allocation4 + $0x170] sm:$0xff]  ;;  %v5016_v53 = vunpack.c.l.s8.bf16 %v4844_v48 }
 0x8c4   :  { %5220 = vmatprep.subr.bf16.mxu0 %v4985_v16  ;;  %5384 = vmatprep.subr.bf16.mxu1 %v4987_v49  ;;  %v5018_v16 = vunpack.c.l.s8.bf16 %v4846_v52  ;;  %v5021_v49 = vunpack.c.h.s8.bf16 %v4845_v42  ;;  %v4862_v42 = vld [vmem:[#allocation4 + $0x1f0] sm:$0xff] }
 0x8c7   :  { %5221 = vmatpush1.bf16.msra.mxu0 %v4984_v3  ;;  %5385 = vmatpush1.bf16.msra.mxu1 %v4986_v32  ;;  %v4851_v3 = vld [vmem:[#allocation4 + $0x198] sm:$0xff]  ;;  %v5020_v32 = vunpack.c.h.s8.bf16 %v4844_v48 }
 0x8c8   :  { %5222 = vmatprep.subr.bf16.mxu0 %v4989_v57  ;;  %5386 = vmatprep.subr.bf16.mxu1 %v4991_v58  ;;  %v5022_v57 = vunpack.c.h.s8.bf16 %v4846_v52  ;;  %v5025_v58 = vunpack.c.l.s8.bf16 %v4849_v50  ;;  %v5027_v60 = vunpack.c.l.s8.bf16 %v4851_v3  ;;  %v5031_v26 = vunpack.c.h.s8.bf16 %v4851_v3  ;;  %v4867_v48 = vld [vmem:[#allocation4 + $0x218] sm:$0xff] }
 0x8c9   :  { %v5186_v3 = vpack.c.bf16 %v6703_v21, %v6703_v21 }
 0x8cb   :  { %5223 = vmatpush1.bf16.msra.mxu0 %v4988_v38  ;;  %5387 = vmatpush1.bf16.msra.mxu1 %v4990_v36  ;;  %v4850_v38 = vld [vmem:[#allocation4 + $0x190] sm:$0xff]  ;;  %v5024_v36 = vunpack.c.l.s8.bf16 %v4848_v13 }
 0x8cc   :  { %5233 = vmatprep.subr.bf16.mxu0 %v4993_v9  ;;  %5397 = vmatprep.subr.bf16.mxu1 %v4995_v45  ;;  %v5026_v9 = vunpack.c.l.s8.bf16 %v4850_v38  ;;  %v5029_v45 = vunpack.c.h.s8.bf16 %v4849_v50  ;;  %v4866_v50 = vld [vmem:[#allocation4 + $0x210] sm:$0xff] }
 0x8ce   :  { %5225 = vmatmul.mubr.bf16.vlgmr.msra.gmra.mrb[24].mxu0 %v5184_v12  ;;  %5389 = vmatmul.mubr.bf16.vlgmr.msra.gmra.mrb[28].mxu1 %v5184_v12  ;;  %v4855_v12 = vld [vmem:[#allocation4 + $0x1b8] sm:$0xff] }
 0x8cf   :  { %5234 = vmatpush1.bf16.msra.mxu0 %v4992_v6  ;;  %5398 = vmatpush1.bf16.msra.mxu1 %v4994_v28  ;;  %v5028_v6 = vunpack.c.h.s8.bf16 %v4848_v13  ;;  %v5030_v28 = vunpack.c.h.s8.bf16 %v4850_v38  ;;  %v4869_v13 = vld [vmem:[#allocation4 + $0x228] sm:$0xff]  ;;  %v4871_v38 = vld [vmem:[#allocation4 + $0x238] sm:$0xff] }
 0x8d0   :  { %5235 = vmatprep.subr.bf16.mxu0 %v4997_v29  ;;  %5399 = vmatprep.subr.bf16.mxu1 %v4999_v15  ;;  %v5033_v29 = vunpack.c.l.s8.bf16 %v4853_v62  ;;  %v5035_v15 = vunpack.c.l.s8.bf16 %v4855_v12  ;;  %v5065_v21 = vunpack.c.l.s8.bf16 %v4869_v13 }
 0x8d1   :  { %5265 = vmatprep.mubr.bf16.mxu0 %v5187_v18  ;;  %5429 = vmatprep.mubr.bf16.mxu1 %v5187_v18  ;;  %v5032_v18 = vunpack.c.l.s8.bf16 %v4852_v14  ;;  %v4875_v14 = vld [vmem:[#allocation4 + $0x258] sm:$0xff] }
 0x8d3   :  { %5236 = vmatpush1.bf16.msra.mxu0 %v4996_v19  ;;  %5400 = vmatpush1.bf16.msra.mxu1 %v4998_v56  ;;  %v5034_v19 = vunpack.c.l.s8.bf16 %v4854_v44  ;;  %v5037_v56 = vunpack.c.h.s8.bf16 %v4853_v62  ;;  %v4868_v62 = vld [vmem:[#allocation4 + $0x220] sm:$0xff] }
 0x8d4   :  { %5237 = vmatprep.subr.bf16.mxu0 %v5001_v59  ;;  %5401 = vmatprep.subr.bf16.mxu1 %v5003_v20  ;;  %v5039_v59 = vunpack.c.h.s8.bf16 %v4855_v12  ;;  %v4857_v20 = vld [vmem:[#allocation4 + $0x1c8] sm:$0xff]  ;;  %v4870_v12 = vld [vmem:[#allocation4 + $0x230] sm:$0xff] }
 0x8d7   :  { %5238 = vmatpush1.bf16.msra.mxu0 %v5000_v37  ;;  %5402 = vmatpush1.bf16.msra.mxu1 %v5002_v30  ;;  %v5038_v37 = vunpack.c.h.s8.bf16 %v4854_v44  ;;  %v5041_v30 = vunpack.c.l.s8.bf16 %v4857_v20  ;;  %v5068_v44 = vunpack.c.h.s8.bf16 %v4868_v62 }
 0x8d8   :  { %5239 = vmatprep.subr.bf16.mxu0 %v5005_v41  ;;  %5403 = vmatprep.subr.bf16.mxu1 %v5007_v22  ;;  %v5043_v41 = vunpack.c.l.s8.bf16 %v4859_v55  ;;  %v4856_v22 = vld [vmem:[#allocation4 + $0x1c0] sm:$0xff] }
 0x8d9   :  { %v5040_v27 = vunpack.c.l.s8.bf16 %v4856_v22  ;;  %v5044_v4 = vunpack.c.h.s8.bf16 %v4856_v22  ;;  %v4879_v22 = vld [vmem:[#allocation4 + $0x278] sm:$0xff] }
 0x8db   :  { %5240 = vmatpush1.bf16.msra.mxu0 %v5004_v40  ;;  %5404 = vmatpush1.bf16.msra.mxu1 %v5006_v24  ;;  %v5042_v40 = vunpack.c.l.s8.bf16 %v4858_v2  ;;  %v5045_v24 = vunpack.c.h.s8.bf16 %v4857_v20  ;;  %v4874_v20 = vld [vmem:[#allocation4 + $0x250] sm:$0xff] }
 0x8dc   :  { %5241 = vmatprep.subr.bf16.mxu0 %v5009_v31  ;;  %5405 = vmatprep.subr.bf16.mxu1 %v5011_v47  ;;  %v5047_v31 = vunpack.c.h.s8.bf16 %v4859_v55  ;;  %v4861_v47 = vld [vmem:[#allocation4 + $0x1e8] sm:$0xff] }
 0x8df   :  { %5242 = vmatpush1.bf16.msra.mxu0 %v5008_v51  ;;  %5406 = vmatpush1.bf16.msra.mxu1 %v5010_v5  ;;  %v5046_v51 = vunpack.c.h.s8.bf16 %v4858_v2  ;;  %v5049_v5 = vunpack.c.l.s8.bf16 %v4861_v47 }
 0x8e0   :  { %5243 = vmatprep.subr.bf16.mxu0 %v5013_v39  ;;  %5407 = vmatprep.subr.bf16.mxu1 %v5015_v63  ;;  %v5051_v39 = vunpack.c.l.s8.bf16 %v4863_v35  ;;  %v4860_v63 = vld [vmem:[#allocation4 + $0x1e0] sm:$0xff] }
 0x8e1   :  { %v5048_v34 = vunpack.c.l.s8.bf16 %v4860_v63  ;;  %v5052_v52 = vunpack.c.h.s8.bf16 %v4860_v63  ;;  %v4883_v63 = vld [vmem:[#allocation4 + $0x298] sm:$0xff] }
 0x8e3   :  { %5244 = vmatpush1.bf16.msra.mxu0 %v5012_v43  ;;  %5408 = vmatpush1.bf16.msra.mxu1 %v5014_v17  ;;  %v5050_v43 = vunpack.c.l.s8.bf16 %v4862_v42  ;;  %v5053_v17 = vunpack.c.h.s8.bf16 %v4861_v47  ;;  %v4878_v47 = vld [vmem:[#allocation4 + $0x270] sm:$0xff] }
 0x8e4   :  { %5245 = vmatprep.subr.bf16.mxu0 %v5017_v33  ;;  %5409 = vmatprep.subr.bf16.mxu1 %v5019_v46  ;;  %v5055_v33 = vunpack.c.h.s8.bf16 %v4863_v35  ;;  %v4865_v46 = vld [vmem:[#allocation4 + $0x208] sm:$0xff] }
 0x8e7   :  { %5246 = vmatpush1.bf16.msra.mxu0 %v5016_v53  ;;  %5410 = vmatpush1.bf16.msra.mxu1 %v5018_v16  ;;  %v5054_v53 = vunpack.c.h.s8.bf16 %v4862_v42  ;;  %v5057_v16 = vunpack.c.l.s8.bf16 %v4865_v46 }
 0x8e8   :  { %5247 = vmatprep.subr.bf16.mxu0 %v5021_v49  ;;  %5411 = vmatprep.subr.bf16.mxu1 %v5023_v25  ;;  %v5059_v49 = vunpack.c.l.s8.bf16 %v4867_v48  ;;  %v4864_v25 = vld [vmem:[#allocation4 + $0x200] sm:$0xff] }
 0x8eb   :  { %5248 = vmatpush1.bf16.msra.mxu0 %v5020_v32  ;;  %5412 = vmatpush1.bf16.msra.mxu1 %v5022_v57  ;;  %v5056_v32 = vunpack.c.l.s8.bf16 %v4864_v25  ;;  %v5058_v57 = vunpack.c.l.s8.bf16 %v4866_v50 }
 0x8ec   :  { %5249 = vmatprep.subr.bf16.mxu0 %v5025_v58  ;;  %5413 = vmatprep.subr.bf16.mxu1 %v5027_v60  ;;  %v5061_v58 = vunpack.c.h.s8.bf16 %v4865_v46  ;;  %v5063_v60 = vunpack.c.h.s8.bf16 %v4867_v48  ;;  %v4882_v46 = vld [vmem:[#allocation4 + $0x290] sm:$0xff] }
 0x8ef   :  { %5250 = vmatpush1.bf16.msra.mxu0 %v5024_v36  ;;  %5414 = vmatpush1.bf16.msra.mxu1 %v5026_v9  ;;  %v5189_v36 = vpack.c.bf16 %v6739_v1, %v6739_v1  ;;  %v5060_v9 = vunpack.c.h.s8.bf16 %v4864_v25  ;;  %v5069_v1 = vunpack.c.h.s8.bf16 %v4869_v13  ;;  %v4887_v25 = vld [vmem:[#allocation4 + $0x2b8] sm:$0xff] }
 0x8f0   :  { %5251 = vmatprep.subr.bf16.mxu0 %v5029_v45  ;;  %5415 = vmatprep.subr.bf16.mxu1 %v5031_v26  ;;  %v5062_v45 = vunpack.c.h.s8.bf16 %v4866_v50  ;;  %v5067_v26 = vunpack.c.l.s8.bf16 %v4871_v38 }
 0x8f3   :  { %5252 = vmatpush1.bf16.msra.mxu0 %v5028_v6  ;;  %5416 = vmatpush1.bf16.msra.mxu1 %v5030_v28  ;;  %v5064_v6 = vunpack.c.l.s8.bf16 %v4868_v62  ;;  %v5066_v28 = vunpack.c.l.s8.bf16 %v4870_v12 }
 0x8f4   :  { %5253 = vmatprep.subr.bf16.mxu0 %v5033_v29  ;;  %5417 = vmatprep.subr.bf16.mxu1 %v5035_v15  ;;  %v5071_v29 = vunpack.c.h.s8.bf16 %v4871_v38  ;;  %v4873_v15 = vld [vmem:[#allocation4 + $0x248] sm:$0xff] }
 0x8f7   :  { %5254 = vmatpush1.bf16.msra.mxu0 %v5032_v18  ;;  %5418 = vmatpush1.bf16.msra.mxu1 %v5034_v19  ;;  %v5070_v18 = vunpack.c.h.s8.bf16 %v4870_v12  ;;  %v5073_v19 = vunpack.c.l.s8.bf16 %v4873_v15 }
 0x8f8   :  { %5255 = vmatprep.subr.bf16.mxu0 %v5037_v56  ;;  %5419 = vmatprep.subr.bf16.mxu1 %v5039_v59  ;;  %v5075_v56 = vunpack.c.l.s8.bf16 %v4875_v14  ;;  %v4872_v59 = vld [vmem:[#allocation4 + $0x240] sm:$0xff] }
 0x8f9   :  { %v5072_v55 = vunpack.c.l.s8.bf16 %v4872_v59  ;;  %v5076_v2 = vunpack.c.h.s8.bf16 %v4872_v59 }
 0x8fb   :  { %5256 = vmatpush1.bf16.msra.mxu0 %v5036_v10  ;;  %5420 = vmatpush1.bf16.msra.mxu1 %v5038_v37  ;;  %v5074_v10 = vunpack.c.l.s8.bf16 %v4874_v20  ;;  %v5077_v37 = vunpack.c.h.s8.bf16 %v4873_v15 }
 0x8fc   :  { %5257 = vmatprep.subr.bf16.mxu0 %v5041_v30  ;;  %5421 = vmatprep.subr.bf16.mxu1 %v5043_v41  ;;  %v5079_v30 = vunpack.c.h.s8.bf16 %v4875_v14  ;;  %v4877_v41 = vld [vmem:[#allocation4 + $0x268] sm:$0xff] }
 0x8ff   :  { %5258 = vmatpush1.bf16.msra.mxu0 %v5040_v27  ;;  %5422 = vmatpush1.bf16.msra.mxu1 %v5042_v40  ;;  %v5078_v27 = vunpack.c.h.s8.bf16 %v4874_v20  ;;  %v5081_v40 = vunpack.c.l.s8.bf16 %v4877_v41 }
 0x900   :  { %5259 = vmatprep.subr.bf16.mxu0 %v5045_v24  ;;  %5423 = vmatprep.subr.bf16.mxu1 %v5047_v31  ;;  %v5083_v24 = vunpack.c.l.s8.bf16 %v4879_v22  ;;  %v4876_v31 = vld [vmem:[#allocation4 + $0x260] sm:$0xff] }
 0x901   :  { %v5080_v35 = vunpack.c.l.s8.bf16 %v4876_v31  ;;  %v5084_v42 = vunpack.c.h.s8.bf16 %v4876_v31 }
 0x903   :  { %5260 = vmatpush1.bf16.msra.mxu0 %v5044_v4  ;;  %5424 = vmatpush1.bf16.msra.mxu1 %v5046_v51  ;;  %v5082_v4 = vunpack.c.l.s8.bf16 %v4878_v47  ;;  %v5085_v51 = vunpack.c.h.s8.bf16 %v4877_v41 }
 0x904   :  { %5261 = vmatprep.subr.bf16.mxu0 %v5049_v5  ;;  %5425 = vmatprep.subr.bf16.mxu1 %v5051_v39  ;;  %v5087_v5 = vunpack.c.h.s8.bf16 %v4879_v22  ;;  %v4881_v39 = vld [vmem:[#allocation4 + $0x288] sm:$0xff] }
 0x907   :  { %5262 = vmatpush1.bf16.msra.mxu0 %v5048_v34  ;;  %5426 = vmatpush1.bf16.msra.mxu1 %v5050_v43  ;;  %v5086_v34 = vunpack.c.h.s8.bf16 %v4878_v47  ;;  %v5089_v43 = vunpack.c.l.s8.bf16 %v4881_v39 }
 0x908   :  { %5263 = vmatprep.subr.bf16.mxu0 %v5053_v17  ;;  %5427 = vmatprep.subr.bf16.mxu1 %v5055_v33  ;;  %v5091_v17 = vunpack.c.l.s8.bf16 %v4883_v63  ;;  %v4880_v33 = vld [vmem:[#allocation4 + $0x280] sm:$0xff] }
 0x909   :  { %v5088_v48 = vunpack.c.l.s8.bf16 %v4880_v33  ;;  %v5092_v50 = vunpack.c.h.s8.bf16 %v4880_v33  ;;  %v5191_v33 = vpack.c.bf16 %v6741_v23, %v6741_v23 }
 0x90b   :  { %5264 = vmatpush1.bf16.msra.mxu0 %v5052_v52  ;;  %5428 = vmatpush1.bf16.msra.mxu1 %v5054_v53  ;;  %v5090_v52 = vunpack.c.l.s8.bf16 %v4882_v46  ;;  %v5093_v53 = vunpack.c.h.s8.bf16 %v4881_v39 }
 0x90c   :  { %5274 = vmatprep.subr.bf16.mxu0 %v5057_v16  ;;  %5438 = vmatprep.subr.bf16.mxu1 %v5059_v49  ;;  %v5095_v16 = vunpack.c.h.s8.bf16 %v4883_v63  ;;  %v4885_v49 = vld [vmem:[#allocation4 + $0x2a8] sm:$0xff] }
 0x90e   :  { %5266 = vmatmul.mubr.bf16.vlgmr.msra.gmra.mrb[24].mxu0 %v5186_v3  ;;  %5430 = vmatmul.mubr.bf16.vlgmr.msra.gmra.mrb[28].mxu1 %v5186_v3  ;;  %v5094_v3 = vunpack.c.h.s8.bf16 %v4882_v46 }
 0x90f   :  { %5275 = vmatpush1.bf16.msra.mxu0 %v5056_v32  ;;  %5439 = vmatpush1.bf16.msra.mxu1 %v5058_v57  ;;  %v5097_v32 = vunpack.c.l.s8.bf16 %v4885_v49  ;;  %v5099_v57 = vunpack.c.l.s8.bf16 %v4887_v25 }
 0x910   :  { %5276 = vmatprep.subr.bf16.mxu0 %v5061_v58  ;;  %5440 = vmatprep.subr.bf16.mxu1 %v5063_v60  ;;  %v4884_v58 = vld [vmem:[#allocation4 + $0x2a0] sm:$0xff]  ;;  %v4886_v60 = vld [vmem:[#allocation4 + $0x2b0] sm:$0xff] }
 0x911   :  { %5306 = vmatprep.mubr.bf16.mxu0 %v5189_v36  ;;  %5470 = vmatprep.mubr.bf16.mxu1 %v5189_v36  ;;  %v5096_v13 = vunpack.c.l.s8.bf16 %v4884_v58  ;;  %v5098_v38 = vunpack.c.l.s8.bf16 %v4886_v60  ;;  %v5101_v36 = vunpack.c.h.s8.bf16 %v4885_v49  ;;  %v5102_v62 = vunpack.c.h.s8.bf16 %v4886_v60 }
 0x913   :  { %5277 = vmatpush1.bf16.msra.mxu0 %v5060_v9  ;;  %5441 = vmatpush1.bf16.msra.mxu1 %v5062_v45  ;;  %v5103_v9 = vunpack.c.h.s8.bf16 %v4887_v25  ;;  %v4889_v45 = vld [vmem:[#allocation4 + $0x2c8] sm:$0xff] }
 0x914   :  { %5278 = vmatprep.subr.bf16.mxu0 %v5065_v21  ;;  %5442 = vmatprep.subr.bf16.mxu1 %v5067_v26  ;;  %v4891_v21 = vld [vmem:[#allocation4 + $0x2d8] sm:$0xff]  ;;  %v5100_v26 = vunpack.c.h.s8.bf16 %v4884_v58  ;;  %v5105_v12 = vunpack.c.l.s8.bf16 %v4889_v45  ;;  %v5109_v14 = vunpack.c.h.s8.bf16 %v4889_v45 }
 0x917   :  { %5279 = vmatpush1.bf16.msra.mxu0 %v5064_v6  ;;  %5443 = vmatpush1.bf16.msra.mxu1 %v5066_v28  ;;  %v5107_v6 = vunpack.c.l.s8.bf16 %v4891_v21  ;;  %v4888_v28 = vld [vmem:[#allocation4 + $0x2c0] sm:$0xff] }
 0x918   :  { %5280 = vmatprep.subr.bf16.mxu0 %v5069_v1  ;;  %5444 = vmatprep.subr.bf16.mxu1 %v5071_v29  ;;  %v4890_v1 = vld [vmem:[#allocation4 + $0x2d0] sm:$0xff]  ;;  %v5104_v29 = vunpack.c.l.s8.bf16 %v4888_v28 }
 0x919   :  { %v5106_v15 = vunpack.c.l.s8.bf16 %v4890_v1  ;;  %v5110_v59 = vunpack.c.h.s8.bf16 %v4890_v1 }
 0x91b   :  { %5281 = vmatpush1.bf16.msra.mxu0 %v5068_v44  ;;  %5445 = vmatpush1.bf16.msra.mxu1 %v5070_v18  ;;  %v5111_v44 = vunpack.c.h.s8.bf16 %v4891_v21  ;;  %v4893_v18 = vld [vmem:[#allocation4 + $0x2e8] sm:$0xff] }
 0x91c   :  { %5282 = vmatprep.subr.bf16.mxu0 %v5073_v19  ;;  %5446 = vmatprep.subr.bf16.mxu1 %v5075_v56  ;;  %v4895_v19 = vld [vmem:[#allocation4 + $0x2f8] sm:$0xff]  ;;  %v5108_v56 = vunpack.c.h.s8.bf16 %v4888_v28  ;;  %v5113_v20 = vunpack.c.l.s8.bf16 %v4893_v18  ;;  %v5117_v22 = vunpack.c.h.s8.bf16 %v4893_v18 }
 0x91f   :  { %5283 = vmatpush1.bf16.msra.mxu0 %v5072_v55  ;;  %5447 = vmatpush1.bf16.msra.mxu1 %v5074_v10  ;;  %v5115_v55 = vunpack.c.l.s8.bf16 %v4895_v19  ;;  %v4892_v10 = vld [vmem:[#allocation4 + $0x2e0] sm:$0xff] }
 0x920   :  { %5284 = vmatprep.subr.bf16.mxu0 %v5077_v37  ;;  %5448 = vmatprep.subr.bf16.mxu1 %v5079_v30  ;;  %v4894_v37 = vld [vmem:[#allocation4 + $0x2f0] sm:$0xff]  ;;  %v5112_v30 = vunpack.c.l.s8.bf16 %v4892_v10 }
 0x921   :  { %v5114_v41 = vunpack.c.l.s8.bf16 %v4894_v37  ;;  %v5118_v31 = vunpack.c.h.s8.bf16 %v4894_v37 }
 0x923   :  { %5285 = vmatpush1.bf16.msra.mxu0 %v5076_v2  ;;  %5449 = vmatpush1.bf16.msra.mxu1 %v5078_v27  ;;  %v5119_v2 = vunpack.c.h.s8.bf16 %v4895_v19  ;;  %v4897_v27 = vld [vmem:[#allocation4 + $0x308] sm:$0xff] }
 0x924   :  { %5286 = vmatprep.subr.bf16.mxu0 %v5081_v40  ;;  %5450 = vmatprep.subr.bf16.mxu1 %v5083_v24  ;;  %v4899_v40 = vld [vmem:[#allocation4 + $0x318] sm:$0xff]  ;;  %v5116_v24 = vunpack.c.h.s8.bf16 %v4892_v10  ;;  %v5121_v47 = vunpack.c.l.s8.bf16 %v4897_v27 }
 0x927   :  { %5287 = vmatpush1.bf16.msra.mxu0 %v5080_v35  ;;  %5451 = vmatpush1.bf16.msra.mxu1 %v5082_v4  ;;  %v5123_v35 = vunpack.c.l.s8.bf16 %v4899_v40  ;;  %v4896_v4 = vld [vmem:[#allocation4 + $0x300] sm:$0xff] }
 0x928   :  { %5288 = vmatprep.subr.bf16.mxu0 %v5085_v51  ;;  %5452 = vmatprep.subr.bf16.mxu1 %v5087_v5  ;;  %v4898_v51 = vld [vmem:[#allocation4 + $0x310] sm:$0xff]  ;;  %v5188_v5 = vpack.c.bf16 %v6735_v54, %v6735_v54  ;;  %v5120_v39 = vunpack.c.l.s8.bf16 %v4896_v4  ;;  %v5124_v46 = vunpack.c.h.s8.bf16 %v4896_v4 }
 0x929   :  { %v5122_v63 = vunpack.c.l.s8.bf16 %v4898_v51 }
 0x92b   :  { %5289 = vmatpush1.bf16.msra.mxu0 %v5084_v42  ;;  %5453 = vmatpush1.bf16.msra.mxu1 %v5086_v34  ;;  %v5125_v42 = vunpack.c.h.s8.bf16 %v4897_v27  ;;  %v5127_v34 = vunpack.c.h.s8.bf16 %v4899_v40 }
 0x92c   :  { %5290 = vmatprep.subr.bf16.mxu0 %v5089_v43  ;;  %5454 = vmatprep.subr.bf16.mxu1 %v5091_v17  ;;  %v4901_v43 = vld [vmem:[#allocation4 + $0x328] sm:$0xff]  ;;  %v4903_v17 = vld [vmem:[#allocation4 + $0x338] sm:$0xff] }
 0x92d   :  { %v5129_v54 = vunpack.c.l.s8.bf16 %v4901_v43  ;;  %v5133_v23 = vunpack.c.h.s8.bf16 %v4901_v43 }
 0x92f   :  { %5291 = vmatpush1.bf16.msra.mxu0 %v5088_v48  ;;  %5455 = vmatpush1.bf16.msra.mxu1 %v5090_v52  ;;  %v5126_v48 = vunpack.c.h.s8.bf16 %v4898_v51  ;;  %v5131_v52 = vunpack.c.l.s8.bf16 %v4903_v17 }
 0x930   :  { %5292 = vmatprep.subr.bf16.mxu0 %v5093_v53  ;;  %5456 = vmatprep.subr.bf16.mxu1 %v5095_v16  ;;  %v4900_v53 = vld [vmem:[#allocation4 + $0x320] sm:$0xff]  ;;  %v4902_v16 = vld [vmem:[#allocation4 + $0x330] sm:$0xff] }
 0x931   :  { %v5128_v49 = vunpack.c.l.s8.bf16 %v4900_v53  ;;  %v5130_v25 = vunpack.c.l.s8.bf16 %v4902_v16  ;;  %v5134_v58 = vunpack.c.h.s8.bf16 %v4902_v16  ;;  %v4920_v16 = vld [vmem:[#allocation4 + $0x3c0] sm:$0xff] }
 0x933   :  { %5293 = vmatpush1.bf16.msra.mxu0 %v5092_v50  ;;  %5457 = vmatpush1.bf16.msra.mxu1 %v5094_v3  ;;  %v5135_v50 = vunpack.c.h.s8.bf16 %v4903_v17  ;;  %v4905_v3 = vld [vmem:[#allocation4 + $0x348] sm:$0xff] }
 0x934   :  { %5294 = vmatprep.subr.bf16.mxu0 %v5097_v32  ;;  %5458 = vmatprep.subr.bf16.mxu1 %v5099_v57  ;;  %v4907_v32 = vld [vmem:[#allocation4 + $0x358] sm:$0xff]  ;;  %v5132_v57 = vunpack.c.h.s8.bf16 %v4900_v53  ;;  %v5137_v60 = vunpack.c.l.s8.bf16 %v4905_v3  ;;  %v5141_v21 = vunpack.c.h.s8.bf16 %v4905_v3 }
 0x937   :  { %5295 = vmatpush1.bf16.msra.mxu0 %v5096_v13  ;;  %5459 = vmatpush1.bf16.msra.mxu1 %v5098_v38  ;;  %v5139_v13 = vunpack.c.l.s8.bf16 %v4907_v32  ;;  %v4904_v38 = vld [vmem:[#allocation4 + $0x340] sm:$0xff] }
 0x938   :  { %5296 = vmatprep.subr.bf16.mxu0 %v5101_v36  ;;  %5460 = vmatprep.subr.bf16.mxu1 %v5103_v9  ;;  %v4906_v36 = vld [vmem:[#allocation4 + $0x350] sm:$0xff]  ;;  %v5136_v9 = vunpack.c.l.s8.bf16 %v4904_v38 }
 0x939   :  { %v5138_v45 = vunpack.c.l.s8.bf16 %v4906_v36  ;;  %v5142_v28 = vunpack.c.h.s8.bf16 %v4906_v36  ;;  %v4924_v36 = vld [vmem:[#allocation4 + $0x3e0] sm:$0xff] }
 0x93b   :  { %5297 = vmatpush1.bf16.msra.mxu0 %v5100_v26  ;;  %5461 = vmatpush1.bf16.msra.mxu1 %v5102_v62  ;;  %v5143_v26 = vunpack.c.h.s8.bf16 %v4907_v32  ;;  %v4909_v62 = vld [vmem:[#allocation4 + $0x368] sm:$0xff] }
 0x93c   :  { %5298 = vmatprep.subr.bf16.mxu0 %v5105_v12  ;;  %5462 = vmatprep.subr.bf16.mxu1 %v5107_v6  ;;  %v4911_v12 = vld [vmem:[#allocation4 + $0x378] sm:$0xff]  ;;  %v5140_v6 = vunpack.c.h.s8.bf16 %v4904_v38  ;;  %v5145_v1 = vunpack.c.l.s8.bf16 %v4909_v62  ;;  %v5149_v19 = vunpack.c.h.s8.bf16 %v4909_v62  ;;  %v4925_v32 = vld [vmem:[#allocation4 + $0x3e8] sm:$0xff] }
 0x93f   :  { %5299 = vmatpush1.bf16.msra.mxu0 %v5104_v29  ;;  %5463 = vmatpush1.bf16.msra.mxu1 %v5106_v15  ;;  %v5147_v29 = vunpack.c.l.s8.bf16 %v4911_v12  ;;  %v4908_v15 = vld [vmem:[#allocation4 + $0x360] sm:$0xff] }
 0x940   :  { %5300 = vmatprep.subr.bf16.mxu0 %v5109_v14  ;;  %5464 = vmatprep.subr.bf16.mxu1 %v5111_v44  ;;  %v4910_v14 = vld [vmem:[#allocation4 + $0x370] sm:$0xff]  ;;  %v5144_v44 = vunpack.c.l.s8.bf16 %v4908_v15 }
 0x941   :  { %v5146_v18 = vunpack.c.l.s8.bf16 %v4910_v14  ;;  %v5150_v10 = vunpack.c.h.s8.bf16 %v4910_v14 }
 0x943   :  { %5301 = vmatpush1.bf16.msra.mxu0 %v5108_v56  ;;  %5465 = vmatpush1.bf16.msra.mxu1 %v5110_v59  ;;  %v5151_v56 = vunpack.c.h.s8.bf16 %v4911_v12  ;;  %v4913_v59 = vld [vmem:[#allocation4 + $0x388] sm:$0xff]  ;;  %v5180_v12 = vunpack.c.h.s8.bf16 %v4924_v36 }
 0x944   :  { %5302 = vmatprep.subr.bf16.mxu0 %v5113_v20  ;;  %5466 = vmatprep.subr.bf16.mxu1 %v5115_v55  ;;  %v4915_v20 = vld [vmem:[#allocation4 + $0x398] sm:$0xff]  ;;  %v5148_v55 = vunpack.c.h.s8.bf16 %v4908_v15  ;;  %v5153_v37 = vunpack.c.l.s8.bf16 %v4913_v59  ;;  %v5157_v40 = vunpack.c.h.s8.bf16 %v4913_v59 }
 0x947   :  { %5303 = vmatpush1.bf16.msra.mxu0 %v5112_v30  ;;  %5467 = vmatpush1.bf16.msra.mxu1 %v5114_v41  ;;  %v5155_v30 = vunpack.c.l.s8.bf16 %v4915_v20  ;;  %v4912_v41 = vld [vmem:[#allocation4 + $0x380] sm:$0xff] }
 0x948   :  { %5304 = vmatprep.subr.bf16.mxu0 %v5117_v22  ;;  %5468 = vmatprep.subr.bf16.mxu1 %v5119_v2  ;;  %v4914_v22 = vld [vmem:[#allocation4 + $0x390] sm:$0xff]  ;;  %v5152_v2 = vunpack.c.l.s8.bf16 %v4912_v41 }
 0x949   :  { %v5154_v27 = vunpack.c.l.s8.bf16 %v4914_v22  ;;  %v5158_v4 = vunpack.c.h.s8.bf16 %v4914_v22 }
 0x94b   :  { %5305 = vmatpush1.bf16.msra.mxu0 %v5116_v24  ;;  %5469 = vmatpush1.bf16.msra.mxu1 %v5118_v31  ;;  %v5159_v24 = vunpack.c.h.s8.bf16 %v4915_v20  ;;  %v4917_v31 = vld [vmem:[#allocation4 + $0x3a8] sm:$0xff] }
 0x94c   :  { %5315 = vmatprep.subr.bf16.mxu0 %v5121_v47  ;;  %5479 = vmatprep.subr.bf16.mxu1 %v5123_v35  ;;  %v4919_v47 = vld [vmem:[#allocation4 + $0x3b8] sm:$0xff]  ;;  %v5156_v35 = vunpack.c.h.s8.bf16 %v4912_v41  ;;  %v5161_v51 = vunpack.c.l.s8.bf16 %v4917_v31  ;;  %v5165_v43 = vunpack.c.h.s8.bf16 %v4917_v31 }
 0x94d   :  { %v5167_v17 = vunpack.c.h.s8.bf16 %v4919_v47 }
 0x94e   :  { %5307 = vmatmul.mubr.bf16.vlgmr.msra.gmra.mrb[24].mxu0 %v5188_v5  ;;  %5471 = vmatmul.mubr.bf16.vlgmr.msra.gmra.mrb[28].mxu1 %v5188_v5  ;;  %v5163_v5 = vunpack.c.l.s8.bf16 %v4919_v47 }
 0x94f   :  { %5316 = vmatpush1.bf16.msra.mxu0 %v5120_v39  ;;  %5480 = vmatpush1.bf16.msra.mxu1 %v5122_v63  ;;  %v4916_v39 = vld [vmem:[#allocation4 + $0x3a0] sm:$0xff]  ;;  %v4918_v63 = vld [vmem:[#allocation4 + $0x3b0] sm:$0xff] }
 0x950   :  { %5317 = vmatprep.subr.bf16.mxu0 %v5125_v42  ;;  %5481 = vmatprep.subr.bf16.mxu1 %v5127_v34  ;;  %v5160_v42 = vunpack.c.l.s8.bf16 %v4916_v39  ;;  %v5162_v34 = vunpack.c.l.s8.bf16 %v4918_v63 }
 0x951   :  { %5347 = vmatprep.mubr.bf16.mxu0 %v5191_v33  ;;  %5511 = vmatprep.mubr.bf16.mxu1 %v5191_v33  ;;  %v4921_v33 = vld [vmem:[#allocation4 + $0x3c8] sm:$0xff] }
 0x953   :  { %5318 = vmatpush1.bf16.msra.mxu0 %v5124_v46  ;;  %5482 = vmatpush1.bf16.msra.mxu1 %v5126_v48  ;;  %v4923_v46 = vld [vmem:[#allocation4 + $0x3d8] sm:$0xff]  ;;  %v5164_v48 = vunpack.c.h.s8.bf16 %v4916_v39 }
 0x954   :  { %5319 = vmatprep.subr.bf16.mxu0 %v5129_v54  ;;  %5483 = vmatprep.subr.bf16.mxu1 %v5131_v52  ;;  %v5166_v54 = vunpack.c.h.s8.bf16 %v4918_v63  ;;  %v5169_v52 = vunpack.c.l.s8.bf16 %v4921_v33  ;;  %v5171_v53 = vunpack.c.l.s8.bf16 %v4923_v46  ;;  %v5175_v3 = vunpack.c.h.s8.bf16 %v4923_v46 }
 0x957   :  { %5320 = vmatpush1.bf16.msra.mxu0 %v5128_v49  ;;  %5484 = vmatpush1.bf16.msra.mxu1 %v5130_v25  ;;  %v4922_v49 = vld [vmem:[#allocation4 + $0x3d0] sm:$0xff]  ;;  %v5168_v25 = vunpack.c.l.s8.bf16 %v4920_v16 }
 0x958   :  { %5321 = vmatprep.subr.bf16.mxu0 %v5133_v23  ;;  %5485 = vmatprep.subr.bf16.mxu1 %v5135_v50  ;;  %v5170_v23 = vunpack.c.l.s8.bf16 %v4922_v49  ;;  %v5173_v50 = vunpack.c.h.s8.bf16 %v4921_v33 }
 0x95b   :  { %5322 = vmatpush1.bf16.msra.mxu0 %v5132_v57  ;;  %5486 = vmatpush1.bf16.msra.mxu1 %v5134_v58  ;;  %v4927_v57 = vld [vmem:[#allocation4 + $0x3f8] sm:$0xff]  ;;  %v5172_v58 = vunpack.c.h.s8.bf16 %v4920_v16 }
 0x95c   :  { %5323 = vmatprep.subr.bf16.mxu0 %v5137_v60  ;;  %5487 = vmatprep.subr.bf16.mxu1 %v5139_v13  ;;  %v5174_v60 = vunpack.c.h.s8.bf16 %v4922_v49  ;;  %v5177_v13 = vunpack.c.l.s8.bf16 %v4925_v32  ;;  %v5179_v38 = vunpack.c.l.s8.bf16 %v4927_v57  ;;  %v5183_v62 = vunpack.c.h.s8.bf16 %v4927_v57 }
 0x95f   :  { %5324 = vmatpush1.bf16.msra.mxu0 %v5136_v9  ;;  %5488 = vmatpush1.bf16.msra.mxu1 %v5138_v45  ;;  %v4926_v9 = vld [vmem:[#allocation4 + $0x3f0] sm:$0xff]  ;;  %v5176_v45 = vunpack.c.l.s8.bf16 %v4924_v36 }
 0x960   :  { %5325 = vmatprep.subr.bf16.mxu0 %v5141_v21  ;;  %5489 = vmatprep.subr.bf16.mxu1 %v5143_v26  ;;  %v5178_v21 = vunpack.c.l.s8.bf16 %v4926_v9  ;;  %v5181_v26 = vunpack.c.h.s8.bf16 %v4925_v32 }
 0x963   :  { %5326 = vmatpush1.bf16.msra.mxu0 %v5140_v6  ;;  %5490 = vmatpush1.bf16.msra.mxu1 %v5142_v28  ;;  %v5182_v6 = vunpack.c.h.s8.bf16 %v4926_v9  ;;  %v5190_v28 = vpack.c.bf16 %v6737_v11, %v6737_v11 }
 0x964   :  { %5327 = vmatprep.subr.bf16.mxu0 %v5145_v1  ;;  %5491 = vmatprep.subr.bf16.mxu1 %v5147_v29  ;;  %v5520_v1 = vld [vmem:[#allocation12 + $0x18] sm:$0xf] }
 0x965   :  { %v5521_v29 = vld [vmem:[#allocation13 + $0x18] sm:$0xf]  ;;  %v5526_v15 = vrot.slane %v5520_v1, %v6446_v0  ;;  %v5534_v14 = vrot.slane %v5520_v1, %v6476_v61 }
 0x966   :  { %v5555_v20 = vrot.slane %v5521_v29, %v6451_v7 }
 0x967   :  { %5328 = vmatpush1.bf16.msra.mxu0 %v5144_v44  ;;  %5492 = vmatpush1.bf16.msra.mxu1 %v5146_v18  ;;  %v5530_v44 = vrot.slane %v5520_v1, %v6451_v7  ;;  %v5538_v18 = vrot.slane %v5520_v1, %v6479_v8 }
 0x968   :  { %5329 = vmatprep.subr.bf16.mxu0 %v5149_v19  ;;  %5493 = vmatprep.subr.bf16.mxu1 %v5151_v56  ;;  %v5551_v19 = vrot.slane %v5521_v29, %v6446_v0  ;;  %v5559_v56 = vrot.slane %v5521_v29, %v6476_v61 }
 0x96b   :  { %5330 = vmatpush1.bf16.msra.mxu0 %v5148_v55  ;;  %5494 = vmatpush1.bf16.msra.mxu1 %v5150_v10  ;;  %v5563_v55 = vrot.slane %v5521_v29, %v6479_v8 }
 0x96c   :  { %5331 = vmatprep.subr.bf16.mxu0 %v5153_v37  ;;  %5495 = vmatprep.subr.bf16.mxu1 %v5155_v30 }
 0x96f   :  { %5332 = vmatpush1.bf16.msra.mxu0 %v5152_v2  ;;  %5496 = vmatpush1.bf16.msra.mxu1 %v5154_v27 }
 0x970   :  { %5333 = vmatprep.subr.bf16.mxu0 %v5157_v40  ;;  %5497 = vmatprep.subr.bf16.mxu1 %v5159_v24 }
 0x973   :  { %5334 = vmatpush1.bf16.msra.mxu0 %v5156_v35  ;;  %5498 = vmatpush1.bf16.msra.mxu1 %v5158_v4 }
 0x974   :  { %5335 = vmatprep.subr.bf16.mxu0 %v5161_v51  ;;  %5499 = vmatprep.subr.bf16.mxu1 %v5163_v5 }
 0x977   :  { %5336 = vmatpush1.bf16.msra.mxu0 %v5160_v42  ;;  %5500 = vmatpush1.bf16.msra.mxu1 %v5162_v34 }
 0x978   :  { %5337 = vmatprep.subr.bf16.mxu0 %v5165_v43  ;;  %5501 = vmatprep.subr.bf16.mxu1 %v5167_v17 }
 0x97b   :  { %5338 = vmatpush1.bf16.msra.mxu0 %v5164_v48  ;;  %5502 = vmatpush1.bf16.msra.mxu1 %v5166_v54 }
 0x97c   :  { %5339 = vmatprep.subr.bf16.mxu0 %v5169_v52  ;;  %5503 = vmatprep.subr.bf16.mxu1 %v5171_v53 }
 0x97f   :  { %5340 = vmatpush1.bf16.msra.mxu0 %v5168_v25  ;;  %5504 = vmatpush1.bf16.msra.mxu1 %v5170_v23 }
 0x980   :  { %5341 = vmatprep.subr.bf16.mxu0 %v5173_v50  ;;  %5505 = vmatprep.subr.bf16.mxu1 %v5175_v3 }
 0x983   :  { %5342 = vmatpush1.bf16.msra.mxu0 %v5172_v58  ;;  %5506 = vmatpush1.bf16.msra.mxu1 %v5174_v60 }
 0x984   :  { %5343 = vmatprep.subr.bf16.mxu0 %v5177_v13  ;;  %5507 = vmatprep.subr.bf16.mxu1 %v5179_v38 }
 0x987   :  { %5344 = vmatpush1.bf16.msra.mxu0 %v5176_v45  ;;  %5508 = vmatpush1.bf16.msra.mxu1 %v5178_v21 }
 0x988   :  { %5345 = vmatprep.subr.bf16.mxu0 %v5181_v26  ;;  %5509 = vmatprep.subr.bf16.mxu1 %v5183_v62 }
 0x98b   :  { %5346 = vmatpush1.bf16.msra.mxu0 %v5180_v12  ;;  %5510 = vmatpush1.bf16.msra.mxu1 %v5182_v6 }
 0x98e   :  { %5348 = vmatmul.mubr.bf16.vlgmr.msra.gmra.mrb[24].mxu0 %v5190_v28  ;;  %5512 = vmatmul.mubr.bf16.vlgmr.msra.gmra.mrb[28].mxu1 %v5190_v28 }
 0xa61   :  { %v5349_v59 = vpop.f32.mrb[24].mxu0  ;;  %v5513_v11 = vpop.f32.mrb[28].mxu1 }
 0xa62   :  { %v5543_v10 = vmul.f32 %v5526_v15, %v5349_v59  ;;  %v5545_v37 = vmul.f32 %v5534_v14, %v5513_v11  ;;  %v5351_v30 = vpop.f32.mrb[25].mxu0  ;;  %v5515_v41 = vpop.f32.mrb[29].mxu1 }
 0xa63   :  { %v5544_v22 = vmul.f32 %v5530_v44, %v5351_v30  ;;  %v5546_v2 = vmul.f32 %v5538_v18, %v5515_v41  ;;  %v5353_v27 = vpop.f32.mrb[26].mxu0  ;;  %v5517_v40 = vpop.f32.mrb[30].mxu1 }
 0xa64   :  { %v5568_v24 = vadd.f32 %v5551_v19, %v5543_v10  ;;  %v5570_v31 = vadd.f32 %v5559_v56, %v5545_v37  ;;  %v5354_v47 = vpop.f32.mrb[27].mxu0  ;;  %v5518_v35 = vpop.f32.mrb[31].mxu1 }
 0xa65   :  { %v5569_v4 = vadd.f32 %v5555_v20, %v5544_v22  ;;  %v5571_v61 = vadd.f32 %v5563_v55, %v5546_v2 }
 0xa66   :  { %vm5572_vm8 = vcmp.gt.f32.partialorder %v5568_v24, 0.0  ;;  %v5576_v51 = vmul.f32 0.01, %v5568_v24  ;;  %vm5574_vm9 = vcmp.gt.f32.partialorder %v5570_v31, 0.0  ;;  %v5578_v5 = vmul.f32 0.01, %v5570_v31 }
 0xa67   :  { %vm5573_vm10 = vcmp.gt.f32.partialorder %v5569_v4, 0.0  ;;  %v5577_v8 = vmul.f32 0.01, %v5569_v4  ;;  %vm5575_vm11 = vcmp.gt.f32.partialorder %v5571_v61, 0.0  ;;  %v5579_v39 = vmul.f32 0.01, %v5571_v61 }
 0xa68   :  { %v6767_v63 = vsel %vm5572_vm8, %v5568_v24, %v5576_v51  ;;  %v6769_v42 = vsel %vm5574_vm9, %v5570_v31, %v5578_v5 }
 0xa69   :  { %v5581_v34 = vsel %vm5573_vm10, %v5569_v4, %v5577_v8  ;;  %v6771_v43 = vsel %vm5575_vm11, %v5571_v61, %v5579_v39 }
 0xa6a   :  { %6250 = dma.done.wait [#allocation6 + $0x3], 4096 }
 0xa6b   :  { %6251 = vsyncadd [#allocation6 + $0x3], 4294963200  ;;  %v5684_v17 = vpack.c.bf16 %v5581_v34, %v5581_v34  ;;  %v5588_v33 = vld [vmem:[#allocation5 + $0x8] sm:$0xff]  ;;  %v5587_v46 = vld [vmem:[#allocation5] sm:$0xff]  ;;  %v5683_v4 = vpack.c.bf16 %v6767_v63, %v6767_v63  ;;  %v5686_v51 = vpack.c.bf16 %v6771_v43, %v6771_v43  ;;  %vm5834_vm14 = vcmask 7168  }
 0xa6c   :  { %v5620_v48 = vunpack.c.l.s8.bf16 %v5588_v33  ;;  %v5622_v54 = vunpack.c.h.s8.bf16 %v5588_v33  ;;  %v5619_v52 = vunpack.c.l.s8.bf16 %v5587_v46  ;;  %v5590_v53 = vld [vmem:[#allocation5 + $0x18] sm:$0xff]  ;;  %v5621_v16 = vunpack.c.h.s8.bf16 %v5587_v46  ;;  %v5589_v25 = vld [vmem:[#allocation5 + $0x10] sm:$0xff]  ;;  %v5592_v3 = vld [vmem:[#allocation5 + $0x28] sm:$0xff] }
 0xa6d   :  { %5719 = vmatprep.mubr.bf16.mxu0 %v5684_v17  ;;  %v5624_v49 = vunpack.c.l.s8.bf16 %v5590_v53  ;;  %v5623_v23 = vunpack.c.l.s8.bf16 %v5589_v25  ;;  %v5626_v50 = vunpack.c.h.s8.bf16 %v5590_v53  ;;  %v5625_v32 = vunpack.c.h.s8.bf16 %v5589_v25  ;;  %v5591_v58 = vld [vmem:[#allocation5 + $0x20] sm:$0xff]  ;;  %v5594_v38 = vld [vmem:[#allocation5 + $0x38] sm:$0xff]  ;;  %v5593_v45 = vld [vmem:[#allocation5 + $0x30] sm:$0xff] }
 0xa6e   :  { %5687 = vmatprep.subr.bf16.mxu0 %v5620_v48  ;;  %v5628_v57 = vunpack.c.l.s8.bf16 %v5592_v3  ;;  %v5627_v60 = vunpack.c.l.s8.bf16 %v5591_v58  ;;  %v5630_v13 = vunpack.c.h.s8.bf16 %v5592_v3  ;;  %v5629_v36 = vunpack.c.h.s8.bf16 %v5591_v58  ;;  %v5596_v62 = vld [vmem:[#allocation5 + $0x48] sm:$0xff]  ;;  %v5595_v28 = vld [vmem:[#allocation5 + $0x40] sm:$0xff]  ;;  %v5598_v15 = vld [vmem:[#allocation5 + $0x58] sm:$0xff] }
 0xa6f   :  { %5688 = vmatpush1.bf16.msra.mxu0 %v5619_v52  ;;  %v5632_v9 = vunpack.c.l.s8.bf16 %v5594_v38  ;;  %v5631_v21 = vunpack.c.l.s8.bf16 %v5593_v45  ;;  %v5634_v26 = vunpack.c.h.s8.bf16 %v5594_v38  ;;  %v5633_v12 = vunpack.c.h.s8.bf16 %v5593_v45  ;;  %v5597_v18 = vld [vmem:[#allocation5 + $0x50] sm:$0xff]  ;;  %v5600_v59 = vld [vmem:[#allocation5 + $0x68] sm:$0xff]  ;;  %v5599_v55 = vld [vmem:[#allocation5 + $0x60] sm:$0xff] }
 0xa70   :  { %5689 = vmatprep.subr.bf16.mxu0 %v5622_v54  ;;  %v5636_v6 = vunpack.c.l.s8.bf16 %v5596_v62  ;;  %v5635_v1 = vunpack.c.l.s8.bf16 %v5595_v28  ;;  %v5638_v29 = vunpack.c.h.s8.bf16 %v5596_v62  ;;  %v5637_v14 = vunpack.c.h.s8.bf16 %v5595_v28  ;;  %v5602_v30 = vld [vmem:[#allocation5 + $0x78] sm:$0xff]  ;;  %v5601_v2 = vld [vmem:[#allocation5 + $0x70] sm:$0xff]  ;;  %v5604_v24 = vld [vmem:[#allocation5 + $0x88] sm:$0xff] }
 0xa71   :  { %v5640_v44 = vunpack.c.l.s8.bf16 %v5598_v15  ;;  %v5639_v19 = vunpack.c.l.s8.bf16 %v5597_v18  ;;  %v5642_v56 = vunpack.c.h.s8.bf16 %v5598_v15  ;;  %v5641_v11 = vunpack.c.h.s8.bf16 %v5597_v18  ;;  %v5603_v35 = vld [vmem:[#allocation5 + $0x80] sm:$0xff]  ;;  %v5606_v8 = vld [vmem:[#allocation5 + $0x98] sm:$0xff]  ;;  %v5605_v17 = vld [vmem:[#allocation5 + $0x90] sm:$0xff] }
 0xa72   :  { %v5644_v20 = vunpack.c.l.s8.bf16 %v5600_v59  ;;  %v5643_v10 = vunpack.c.l.s8.bf16 %v5599_v55  ;;  %v5646_v37 = vunpack.c.h.s8.bf16 %v5600_v59  ;;  %v5645_v41 = vunpack.c.h.s8.bf16 %v5599_v55  ;;  %v5608_v63 = vld [vmem:[#allocation5 + $0xa8] sm:$0xff]  ;;  %v5607_v43 = vld [vmem:[#allocation5 + $0xa0] sm:$0xff] }
 0xa73   :  { %5690 = vmatpush1.bf16.msra.mxu0 %v5621_v16  ;;  %v5648_v22 = vunpack.c.l.s8.bf16 %v5602_v30  ;;  %v5647_v27 = vunpack.c.l.s8.bf16 %v5601_v2  ;;  %v5650_v40 = vunpack.c.h.s8.bf16 %v5602_v30  ;;  %v5649_v31 = vunpack.c.h.s8.bf16 %v5601_v2  ;;  %v5610_v16 = vld [vmem:[#allocation5 + $0xb8] sm:$0xff] }
 0xa74   :  { %5691 = vmatprep.subr.bf16.mxu0 %v5624_v49  ;;  %v5652_v47 = vunpack.c.l.s8.bf16 %v5604_v24  ;;  %v5651_v61 = vunpack.c.l.s8.bf16 %v5603_v35  ;;  %v5654_v5 = vunpack.c.h.s8.bf16 %v5604_v24  ;;  %v5653_v39 = vunpack.c.h.s8.bf16 %v5603_v35  ;;  %v5769_v55 = vld [vmem:[#allocation12 + $0x1c] sm:$0x3]  ;;  %v5803_v24 = vld [vmem:[#allocation10] sm:$0x3] }
 0xa75   :  { %v5656_v34 = vunpack.c.l.s8.bf16 %v5606_v8  ;;  %v5655_v33 = vunpack.c.l.s8.bf16 %v5605_v17  ;;  %v5658_v46 = vunpack.c.h.s8.bf16 %v5606_v8  ;;  %v5657_v48 = vunpack.c.h.s8.bf16 %v5605_v17 }
 0xa76   :  { %v5660_v54 = vunpack.c.l.s8.bf16 %v5608_v63  ;;  %v5659_v52 = vunpack.c.l.s8.bf16 %v5607_v43  ;;  %v5662_v53 = vunpack.c.h.s8.bf16 %v5608_v63  ;;  %v5661_v49 = vunpack.c.h.s8.bf16 %v5607_v43  ;;  %v5870_v63 = vld [vmem:[#allocation7] ss:$0 sm:$0xff] }
 0xa77   :  { %5692 = vmatpush1.bf16.msra.mxu0 %v5623_v23  ;;  %v5664_v25 = vunpack.c.l.s8.bf16 %v5610_v16  ;;  %v5609_v23 = vld [vmem:[#allocation5 + $0xb0] sm:$0xff]  ;;  %v5666_v3 = vunpack.c.h.s8.bf16 %v5610_v16  ;;  %v5779_v30 = vrot.slane %v5769_v55, %v6451_v7 }
 0xa78   :  { %5693 = vmatprep.subr.bf16.mxu0 %v5626_v50  ;;  %v5663_v50 = vunpack.c.l.s8.bf16 %v5609_v23 }
 0xa7b   :  { %5694 = vmatpush1.bf16.msra.mxu0 %v5625_v32  ;;  %v5612_v32 = vld [vmem:[#allocation5 + $0xc8] sm:$0xff] }
 0xa7c   :  { %5695 = vmatprep.subr.bf16.mxu0 %v5628_v57  ;;  %v5665_v57 = vunpack.c.h.s8.bf16 %v5609_v23  ;;  %v5668_v58 = vunpack.c.l.s8.bf16 %v5612_v32  ;;  %v5670_v38 = vunpack.c.h.s8.bf16 %v5612_v32 }
 0xa7f   :  { %5696 = vmatpush1.bf16.msra.mxu0 %v5627_v60  ;;  %v5611_v60 = vld [vmem:[#allocation5 + $0xc0] sm:$0xff] }
 0xa80   :  { %5697 = vmatprep.subr.bf16.mxu0 %v5630_v13  ;;  %v5667_v13 = vunpack.c.l.s8.bf16 %v5611_v60 }
 0xa83   :  { %5698 = vmatpush1.bf16.msra.mxu0 %v5629_v36  ;;  %v5614_v36 = vld [vmem:[#allocation5 + $0xd8] sm:$0xff] }
 0xa84   :  { %5699 = vmatprep.subr.bf16.mxu0 %v5632_v9  ;;  %v5669_v9 = vunpack.c.h.s8.bf16 %v5611_v60  ;;  %v5672_v45 = vunpack.c.l.s8.bf16 %v5614_v36  ;;  %v5674_v62 = vunpack.c.h.s8.bf16 %v5614_v36 }
 0xa87   :  { %5700 = vmatpush1.bf16.msra.mxu0 %v5631_v21  ;;  %v5613_v21 = vld [vmem:[#allocation5 + $0xd0] sm:$0xff] }
 0xa88   :  { %5701 = vmatprep.subr.bf16.mxu0 %v5634_v26  ;;  %v5671_v26 = vunpack.c.l.s8.bf16 %v5613_v21 }
 0xa8b   :  { %5702 = vmatpush1.bf16.msra.mxu0 %v5633_v12  ;;  %v5616_v12 = vld [vmem:[#allocation5 + $0xe8] sm:$0xff] }
 0xa8c   :  { %5703 = vmatprep.subr.bf16.mxu0 %v5636_v6  ;;  %v5673_v6 = vunpack.c.h.s8.bf16 %v5613_v21  ;;  %v5676_v28 = vunpack.c.l.s8.bf16 %v5616_v12  ;;  %v5678_v15 = vunpack.c.h.s8.bf16 %v5616_v12 }
 0xa8f   :  { %5704 = vmatpush1.bf16.msra.mxu0 %v5635_v1  ;;  %v5615_v1 = vld [vmem:[#allocation5 + $0xe0] sm:$0xff] }
 0xa90   :  { %5705 = vmatprep.subr.bf16.mxu0 %v5638_v29  ;;  %v5675_v29 = vunpack.c.l.s8.bf16 %v5615_v1 }
 0xa93   :  { %5706 = vmatpush1.bf16.msra.mxu0 %v5637_v14  ;;  %v5618_v14 = vld [vmem:[#allocation5 + $0xf8] sm:$0xff] }
 0xa94   :  { %5707 = vmatprep.subr.bf16.mxu0 %v5640_v44  ;;  %v5677_v44 = vunpack.c.h.s8.bf16 %v5615_v1  ;;  %v5680_v18 = vunpack.c.l.s8.bf16 %v5618_v14  ;;  %v5682_v59 = vunpack.c.h.s8.bf16 %v5618_v14 }
 0xa97   :  { %5708 = vmatpush1.bf16.msra.mxu0 %v5639_v19  ;;  %v5617_v19 = vld [vmem:[#allocation5 + $0xf0] sm:$0xff] }
 0xa98   :  { %5709 = vmatprep.subr.bf16.mxu0 %v5642_v56  ;;  %v5679_v56 = vunpack.c.l.s8.bf16 %v5617_v19 }
 0xa9b   :  { %5710 = vmatpush1.bf16.msra.mxu0 %v5641_v11  ;;  %v5681_v11 = vunpack.c.h.s8.bf16 %v5617_v19 }
 0xa9c   :  { %5711 = vmatprep.subr.bf16.mxu0 %v5644_v20  ;;  %v5685_v20 = vpack.c.bf16 %v6769_v42, %v6769_v42 }
 0xa9f   :  { %5712 = vmatpush1.bf16.msra.mxu0 %v5643_v10  ;;  %v5770_v10 = vld [vmem:[#allocation13 + $0x1c] sm:$0x3] }
 0xaa0   :  { %5713 = vmatprep.subr.bf16.mxu0 %v5646_v37  ;;  %v5775_v37 = vrot.slane %v5769_v55, %v6446_v0  ;;  %v5792_v2 = vrot.slane %v5770_v10, %v6451_v7 }
 0xaa3   :  { %5714 = vmatpush1.bf16.msra.mxu0 %v5645_v41  ;;  %v5788_v41 = vrot.slane %v5770_v10, %v6446_v0 }
 0xaa4   :  { %5715 = vmatprep.subr.bf16.mxu0 %v5648_v22 }
 0xaa7   :  { %5716 = vmatpush1.bf16.msra.mxu0 %v5647_v27 }
 0xaa8   :  { %5717 = vmatprep.subr.bf16.mxu0 %v5650_v40 }
 0xaab   :  { %5718 = vmatpush1.bf16.msra.mxu0 %v5649_v31 }
 0xaac   :  { %5728 = vmatprep.subr.bf16.mxu0 %v5652_v47 }
 0xaae   :  { %5720 = vmatmul.mubr.bf16.vlgmr.msra.gmra.mrb[28].mxu0 %v5683_v4 }
 0xaaf   :  { %5729 = vmatpush1.bf16.msra.mxu0 %v5651_v61  ;;  %5760 = vmatprep.mubr.bf16.mxu0 %v5686_v51  ;;  %v5808_v61 = vrot.slane %v5803_v24, %v6446_v0 }
 0xab0   :  { %5730 = vmatprep.subr.bf16.mxu0 %v5654_v5  ;;  %v5812_v5 = vrot.slane %v5803_v24, %v6451_v7 }
 0xab3   :  { %5731 = vmatpush1.bf16.msra.mxu0 %v5653_v39 }
 0xab4   :  { %5732 = vmatprep.subr.bf16.mxu0 %v5656_v34 }
 0xab7   :  { %5733 = vmatpush1.bf16.msra.mxu0 %v5655_v33 }
 0xab8   :  { %5734 = vmatprep.subr.bf16.mxu0 %v5658_v46 }
 0xabb   :  { %5735 = vmatpush1.bf16.msra.mxu0 %v5657_v48 }
 0xabc   :  { %5736 = vmatprep.subr.bf16.mxu0 %v5660_v54 }
 0xabf   :  { %5737 = vmatpush1.bf16.msra.mxu0 %v5659_v52 }
 0xac0   :  { %5738 = vmatprep.subr.bf16.mxu0 %v5662_v53 }
 0xac3   :  { %5739 = vmatpush1.bf16.msra.mxu0 %v5661_v49 }
 0xac4   :  { %5740 = vmatprep.subr.bf16.mxu0 %v5664_v25 }
 0xac7   :  { %5741 = vmatpush1.bf16.msra.mxu0 %v5663_v50 }
 0xac8   :  { %5742 = vmatprep.subr.bf16.mxu0 %v5666_v3 }
 0xacb   :  { %5743 = vmatpush1.bf16.msra.mxu0 %v5665_v57 }
 0xacc   :  { %5744 = vmatprep.subr.bf16.mxu0 %v5668_v58 }
 0xacf   :  { %5745 = vmatpush1.bf16.msra.mxu0 %v5667_v13 }
 0xad0   :  { %5746 = vmatprep.subr.bf16.mxu0 %v5670_v38 }
 0xad3   :  { %5747 = vmatpush1.bf16.msra.mxu0 %v5669_v9 }
 0xad4   :  { %5748 = vmatprep.subr.bf16.mxu0 %v5672_v45 }
 0xad7   :  { %5749 = vmatpush1.bf16.msra.mxu0 %v5671_v26 }
 0xad8   :  { %5750 = vmatprep.subr.bf16.mxu0 %v5674_v62 }
 0xadb   :  { %5751 = vmatpush1.bf16.msra.mxu0 %v5673_v6 }
 0xadc   :  { %5752 = vmatprep.subr.bf16.mxu0 %v5676_v28 }
 0xadf   :  { %5753 = vmatpush1.bf16.msra.mxu0 %v5675_v29 }
 0xae0   :  { %5754 = vmatprep.subr.bf16.mxu0 %v5678_v15 }
 0xae3   :  { %5755 = vmatpush1.bf16.msra.mxu0 %v5677_v44 }
 0xae4   :  { %5756 = vmatprep.subr.bf16.mxu0 %v5680_v18 }
 0xae7   :  { %5757 = vmatpush1.bf16.msra.mxu0 %v5679_v56 }
 0xae8   :  { %5758 = vmatprep.subr.bf16.mxu0 %v5682_v59 }
 0xaeb   :  { %5759 = vmatpush1.bf16.msra.mxu0 %v5681_v11 }
 0xaee   :  { %5761 = vmatmul.mubr.bf16.vlgmr.msra.gmra.mrb[28].mxu0 %v5685_v20 }
 0xbc1   :  { %v5762_v22 = vpop.f32.mrb[28].mxu0 }
 0xbc2   :  { %v5782_v27 = vmul.f32 %v5775_v37, %v5762_v22  ;;  %v5764_v40 = vpop.f32.mrb[29].mxu0 }
 0xbc3   :  { %v5783_v31 = vmul.f32 %v5779_v30, %v5764_v40  ;;  %v5766_v47 = vpop.f32.mrb[30].mxu0 }
 0xbc4   :  { %v5795_v35 = vadd.f32 %v5788_v41, %v5782_v27  ;;  %v5767_v42 = vpop.f32.mrb[31].mxu0 }
 0xbc5   :  { %v5796_v4 = vadd.f32 %v5792_v2, %v5783_v31 }
 0xbc6   :  { %v5799_v51 = vmul.f32 0.01, %v5795_v35  ;;  %vm5797_vm12 = vcmp.gt.f32.partialorder %v5795_v35, 0.0 }
 0xbc7   :  { %v5800_v8 = vmul.f32 0.01, %v5796_v4  ;;  %vm5798_vm13 = vcmp.gt.f32.partialorder %v5796_v4, 0.0 }
 0xbc8   :  { %v5801_v39 = vsel %vm5797_vm12, %v5795_v35, %v5799_v51 }
 0xbc9   :  { %v5802_v34 = vsel %vm5798_vm13, %v5796_v4, %v5800_v8  ;;  %v5815_v17 = vmul.f32 %v5808_v61, %v5801_v39 }
 0xbca   :  { %v5816_v33 = vmul.f32 %v5812_v5, %v5802_v34 }
 0xbcc   :  { %v5817_v46 = vadd.f32 %v5816_v33, %v5815_v17 }
 0xbce   :  { %5818 = vadd.xlane.f32.xlu0 %v5817_v46 }
 0xc5b   :  { %v5819_v48 = vpop.xlane.xlu0 %5818 }
 0xc5c   :  { %v5827_v54 = vadd.f32 %v5870_v63, %v5819_v48 }
 0xc5e   :  { %v5871_v43 = vmul.f32 -1.442695, %v5827_v54 }
 0xc60   :  { %6058 = vpow2.f32 %v5871_v43 }
 0xc6a   :  { %v6059_v52 = vpop.eup %6058 }
 0xc6b   :  { %v5831_v53 = vadd.f32 1.0, %v6059_v52 }
 0xc6d   :  { %6060 = vrcp.f32 %v5831_v53 }
 0xc77   :  { %v6061_v0 = vpop.eup %6060 }
 0xc78   :  { %5835 = vst.msk [vmem:[%s6797_s9] sm:$0xff] %vm5834_vm14, %v6061_v0 }
 0xc79   :  { %5840 = vsyncpa [#allocation9], 1 }
 0xc7a   :  { %5841 = vsyncpa [#allocation11], 1 }
 0xc7b   :  { %5842 = vsyncpa [#allocation14], 1 }
 0xc7c   :  { %5843 = vsyncmov [#allocation6] }
 0xc7f   :  { %s5844_s28 = vpop.sfrf %5843 }
 0xc80   :  { %p5872_p8 = scmp.ne.s32.totalorder %s5844_s28, 0 }
 0xc82   :  { %5848 = shalt.err (%p5872_p8)  }
 0xc83   :  { %5850 = vsyncmov [#allocation6 + $0x1] }
 0xc86   :  { %s5851_s29 = vpop.sfrf %5850 }
 0xc87   :  { %p5873_p9 = scmp.ne.s32.totalorder %s5851_s29, 0 }
 0xc89   :  { %5855 = shalt.err (%p5873_p9)  }
 0xc8a   :  { %5857 = vsyncmov [#allocation6 + $0x2] }
 0xc8d   :  { %s5858_s1 = vpop.sfrf %5857 }
 0xc8e   :  { %p5874_p10 = scmp.ne.s32.totalorder %s5858_s1, 0 }
 0xc90   :  { %5862 = shalt.err (%p5874_p10)  }
 0xc91   :  { %5864 = vsyncmov [#allocation6 + $0x3] }
 0xc94   :  { %s5865_s30 = vpop.sfrf %5864 }
 0xc95   :  { %p5875_p11 = scmp.ne.s32.totalorder %s5865_s30, 0 }
 0xc97   :  { %5869 = shalt.err (%p5875_p11)  }

</bundles_post_ra>
